<compile_context>
chip_gen: v7x
topology: tpu7x:2x2x1
jax: 0.10.0
libtpu: 0.0.40
codegen_flags: <defaults>
</compile_context>

<pallas_src>
import functools
import math

import jax
import jax.numpy as jnp
from jax.experimental import pallas as pl
from jax.experimental.pallas import tpu as pltpu


# ----------------------------------------------------------------------------
# In-kernel helpers.
# ----------------------------------------------------------------------------
def _gn_norm(x, m, mt, gamma, beta, eps, *, silu):
    """GroupNorm (+ optional SiLU) on an (N, C) f32 tile.

    Group statistics via small one-hot matmuls against a (C, G) assignment matrix
    (no channel-axis reshapes in-kernel).  Two-pass (centered) variance.
    """
    n = x.shape[0]
    cpg = x.shape[1] // m.shape[1]                                        # channels / group
    inv_cnt = 1.0 / float(n * cpg)
    mean_g = jnp.dot(jnp.sum(x, axis=0, keepdims=True), m,
                     preferred_element_type=jnp.float32) * inv_cnt        # (1, G)
    mean_c = jnp.dot(mean_g, mt, preferred_element_type=jnp.float32)      # (1, C)
    cen = x - mean_c
    var_g = jnp.dot(jnp.sum(cen * cen, axis=0, keepdims=True), m,
                    preferred_element_type=jnp.float32) * inv_cnt         # (1, G)
    var_c = jnp.dot(var_g, mt, preferred_element_type=jnp.float32)        # (1, C)
    y = cen * jax.lax.rsqrt(var_c + eps)
    y = y * gamma + beta
    if silu:
        y = y * jax.nn.sigmoid(y)
    return y


def _conv3x3(h_nc, H, W, pad_ref, w_ref, b_ref):
    """3x3 'same' conv as 9 accumulating MXU matmuls over statically shifted windows
    of a zero-padded bf16 VMEM scratch.

      h_nc    : (H*W, Cin)       f32 activation
      pad_ref : (H+2, W+2, Cin)  bf16 scratch
      w_ref   : (9, Cin, Cout)   bf16 weights, tap index = kh*3 + kw
      b_ref   : (1, Cout)

    Returns (H*W, Cout) f32.
    """
    Cin = h_nc.shape[-1]
    Cout = w_ref.shape[2]
    dt = pad_ref.dtype
    # 1-pixel zero border (thin stores, rewritten every step so the kernel stays correct
    # under any megacore split of the batch grid) + one interior store.
    pad_ref[0:1, :, :] = jnp.zeros((1, W + 2, Cin), dt)
    pad_ref[H + 1:H + 2, :, :] = jnp.zeros((1, W + 2, Cin), dt)
    pad_ref[:, 0:1, :] = jnp.zeros((H + 2, 1, Cin), dt)
    pad_ref[:, W + 1:W + 2, :] = jnp.zeros((H + 2, 1, Cin), dt)
    pad_ref[1:H + 1, 1:W + 1, :] = h_nc.reshape(H, W, Cin).astype(dt)

    acc = None
    for kh in range(3):
        for kw in range(3):
            win = pad_ref[kh:kh + H, kw:kw + W, :].reshape(H * W, Cin)    # bf16 window
            part = jnp.dot(win, w_ref[kh * 3 + kw],
                           preferred_element_type=jnp.float32)
            acc = part if acc is None else acc + part
    return acc + b_ref[...].astype(jnp.float32)


# ----------------------------------------------------------------------------
# Fused ResBlock kernel: one grid step per batch sample.
#   h   = Conv3x3(SiLU(GN1(x)))
#   h  += emb_out                          (emb MLP precomputed in the wrapper)
#   h   = Conv3x3(Dropout(SiLU(GN2(h))))   (dropout = identity in eval)
#   out = skip(x) + h                      (skip = 1x1 conv iff Cin != Cout)
# ----------------------------------------------------------------------------
def _resblock_kernel(x_ref, embv_ref,
                     g1_ref, be1_ref, m1_ref, m1t_ref, w1_ref, b1_ref,
                     g2_ref, be2_ref, m2_ref, m2t_ref, w2_ref, b2_ref,
                     *rest, H, W, eps, has_skip):
    if has_skip:
        wskip_ref, bskip_ref, o_ref, pad1_ref, pad2_ref = rest
    else:
        o_ref, pad1_ref, pad2_ref = rest

    x = x_ref[0].astype(jnp.float32)                                      # (N, Cin)

    # GN1 + SiLU -> 3x3 conv (9 accumulating matmuls over padded bf16 scratch)
    h = _gn_norm(x, m1_ref[...], m1t_ref[...],
                 g1_ref[...].astype(jnp.float32), be1_ref[...].astype(jnp.float32),
                 eps, silu=True)
    h = _conv3x3(h, H, W, pad1_ref, w1_ref, b1_ref)                       # (N, Cout) f32

    # + timestep embedding (MLP hoisted out of the kernel; broadcast over spatial)
    h = h + embv_ref[0].astype(jnp.float32)                               # (1, Cout)

    # GN2 + SiLU (dropout = identity in eval) -> 3x3 conv
    h = _gn_norm(h, m2_ref[...], m2t_ref[...],
                 g2_ref[...].astype(jnp.float32), be2_ref[...].astype(jnp.float32),
                 eps, silu=True)
    h = _conv3x3(h, H, W, pad2_ref, w2_ref, b2_ref)                       # (N, Cout)

    # skip connection (1x1 conv fused; identity when Cin == Cout)
    if has_skip:
        skip = (jnp.dot(x.astype(jnp.bfloat16), wskip_ref[...],
                        preferred_element_type=jnp.float32)
                + bskip_ref[...].astype(jnp.float32))
    else:
        skip = x
    o_ref[0] = (skip + h).astype(o_ref.dtype)


# ----------------------------------------------------------------------------
# Fused AttentionBlock kernel: one grid step per batch sample.
#   xn = GN(x); qkv = fused 1x1 projection (legacy per-head ordering regrouped in wrapper)
#   att = softmax(q k^T / sqrt(ch)) v per head (batched dot_generals, f32 softmax)
#   out = x + Proj(att)
# ----------------------------------------------------------------------------
def _attention_kernel(x_ref, g_ref, bgn_ref, m_ref, mt_ref,
                      wqkv_ref, bqkv_ref, wp_ref, bp_ref, o_ref,
                      *, num_heads, eps):
    x = x_ref[0].astype(jnp.float32)                                      # (N, C)
    N, C = x.shape
    ch = C // num_heads
    scale = 1.0 / math.sqrt(math.sqrt(ch))

    xn = _gn_norm(x, m_ref[...], mt_ref[...],
                  g_ref[...].astype(jnp.float32), bgn_ref[...].astype(jnp.float32),
                  eps, silu=False)

    # Fused q/k/v projection, channel-major result.  The activation transpose is folded
    # into the MXU (trans_b dot_general) instead of an explicit XLU transpose.
    qkv_t = (jax.lax.dot_general(
        wqkv_ref[...], xn.astype(jnp.bfloat16),
        (((1,), (1,)), ((), ())), preferred_element_type=jnp.float32)
        + bqkv_ref[...].astype(jnp.float32))                              # (3C, N)

    # sublane slices (multiples of C) -> cheap; head split is a sublane reshape
    q_t = (qkv_t[0 * C:1 * C, :] * scale).reshape(num_heads, ch, N)       # (h, ch, N)
    k_t = (qkv_t[1 * C:2 * C, :] * scale).reshape(num_heads, ch, N)
    v_t = qkv_t[2 * C:3 * C, :].reshape(num_heads, ch, N)

    qh = jnp.transpose(q_t, (0, 2, 1)).astype(jnp.bfloat16)               # (h, N, ch)
    logits = jax.lax.dot_general(                                         # (h, N, N)
        qh, k_t.astype(jnp.bfloat16),
        (((2,), (1,)), ((0,), (0,))), preferred_element_type=jnp.float32)

    # f32 softmax; normalization via EUP reciprocal (keeps the divide off the VALU).
    # TODO(synk): flash-style KV tiling with online softmax for realistic N (v7x 64 MiB VMEM).
    lmax = jnp.max(logits, axis=-1, keepdims=True)
    p = jnp.exp(logits - lmax)
    probs = p * pl.reciprocal(jnp.sum(p, axis=-1, keepdims=True), approx=True)

    att_t = jax.lax.dot_general(                                          # (h, ch, N)
        v_t.astype(jnp.bfloat16), probs.astype(jnp.bfloat16),
        (((2,), (2,)), ((0,), (0,))), preferred_element_type=jnp.float32)
    att = att_t.reshape(C, N).T.astype(jnp.bfloat16)                      # (N, C)

    out = (jax.lax.dot_general(                                           # (N, C)
        att, wp_ref[...], (((1,), (1,)), ((), ())),
        preferred_element_type=jnp.float32)
        + bp_ref[...].astype(jnp.float32))
    o_ref[0] = (x + out).astype(o_ref.dtype)


# ----------------------------------------------------------------------------
# Wrappers (parameter plumbing / layout only).
# ----------------------------------------------------------------------------
def _group_one_hot(c, groups):
    assign = jnp.arange(c) // (c // groups)
    m = jnp.eye(groups, dtype=jnp.float32)[assign]                        # (C, G)
    return m, m.T


def _const_spec(*shape):
    return pl.BlockSpec(shape, lambda b: (0,) * len(shape))


def resblock_apply(x_bnc, emb, p, groups, H, W):
    B, N, Cin = x_bnc.shape
    Cout = p["conv1_w"].shape[0]
    has_skip = Cin != Cout

    # Conv weights -> (tap, Cin, Cout) bf16 MXU operands; tap ordering = kh*3 + kw.
    w1 = jnp.transpose(p["conv1_w"], (2, 3, 1, 0)).reshape(9, Cin, Cout).astype(jnp.bfloat16)
    w2 = jnp.transpose(p["conv2_w"], (2, 3, 1, 0)).reshape(9, Cout, Cout).astype(jnp.bfloat16)
    m1, m1t = _group_one_hot(Cin, groups)
    m2, m2t = _group_one_hot(Cout, groups)

    # Timestep-embedding MLP hoisted out of the kernel (M=1 matmul, once per call, f32).
    emb_out = (jax.nn.silu(emb) @ p["emb_w"].T + p["emb_b"]).astype(jnp.float32)
    emb_out = emb_out.reshape(B, 1, Cout)

    inputs = [
        x_bnc, emb_out,
        p["gn1_g"].reshape(1, Cin), p["gn1_b"].reshape(1, Cin), m1, m1t,
        w1, p["conv1_b"].reshape(1, Cout),
        p["gn2_g"].reshape(1, Cout), p["gn2_b"].reshape(1, Cout), m2, m2t,
        w2, p["conv2_b"].reshape(1, Cout),
    ]
    in_specs = [
        pl.BlockSpec((1, N, Cin), lambda b: (b, 0, 0)),
        pl.BlockSpec((1, 1, Cout), lambda b: (b, 0, 0)),
        _const_spec(1, Cin), _const_spec(1, Cin),
        _const_spec(Cin, groups), _const_spec(groups, Cin),
        _const_spec(9, Cin, Cout), _const_spec(1, Cout),
        _const_spec(1, Cout), _const_spec(1, Cout),
        _const_spec(Cout, groups), _const_spec(groups, Cout),
        _const_spec(9, Cout, Cout), _const_spec(1, Cout),
    ]
    if has_skip:
        inputs += [jnp.transpose(p["skip_w"][:, :, 0, 0], (1, 0)).astype(jnp.bfloat16),
                   p["skip_b"].reshape(1, Cout)]
        in_specs += [_const_spec(Cin, Cout), _const_spec(1, Cout)]

    kernel = functools.partial(_resblock_kernel, H=H, W=W, eps=1e-5, has_skip=has_skip)
    return pl.pallas_call(
        kernel,
        out_shape=jax.ShapeDtypeStruct((B, N, Cout), x_bnc.dtype),
        grid=(B,),
        in_specs=in_specs,
        out_specs=pl.BlockSpec((1, N, Cout), lambda b: (b, 0, 0)),
        scratch_shapes=[pltpu.VMEM((H + 2, W + 2, Cin), jnp.bfloat16),    # padded act (conv1)
                        pltpu.VMEM((H + 2, W + 2, Cout), jnp.bfloat16)],  # padded act (conv2)
        compiler_params=pltpu.CompilerParams(
            dimension_semantics=("parallel",),
            vmem_limit_bytes=48 * 1024 * 1024),
    )(*inputs)


def attention_apply(x_bnc, p, groups, num_heads):
    B, N, C = x_bnc.shape
    ch = C // num_heads
    m, mt = _group_one_hot(C, groups)

    # Legacy qkv channel order is [q_h|k_h|v_h] interleaved per head (QKVAttentionLegacy);
    # regroup to contiguous all-q / all-k / all-v rows and fuse into one (3C, C) weight.
    w = p["qkv_w"][:, :, 0].reshape(num_heads, 3, ch, C)
    b = p["qkv_b"].reshape(num_heads, 3, ch)
    wqkv = jnp.concatenate([w[:, 0].reshape(C, C), w[:, 1].reshape(C, C),
                            w[:, 2].reshape(C, C)], axis=0).astype(jnp.bfloat16)   # (3C, C)
    bqkv = jnp.concatenate([b[:, 0].reshape(C), b[:, 1].reshape(C),
                            b[:, 2].reshape(C)], axis=0).reshape(3 * C, 1)
    wp = p["proj_w"][:, :, 0].astype(jnp.bfloat16)                        # (C_out, C_in)
    bp = p["proj_b"].reshape(1, C)

    kernel = functools.partial(_attention_kernel, num_heads=num_heads, eps=1e-5)
    return pl.pallas_call(
        kernel,
        out_shape=jax.ShapeDtypeStruct((B, N, C), x_bnc.dtype),
        grid=(B,),
        in_specs=[
            pl.BlockSpec((1, N, C), lambda b: (b, 0, 0)),
            _const_spec(1, C), _const_spec(1, C),
            _const_spec(C, groups), _const_spec(groups, C),
            _const_spec(3 * C, C), _const_spec(3 * C, 1),
            _const_spec(C, C), _const_spec(1, C),
        ],
        out_specs=pl.BlockSpec((1, N, C), lambda b: (b, 0, 0)),
        compiler_params=pltpu.CompilerParams(
            dimension_semantics=("parallel",),
            vmem_limit_bytes=48 * 1024 * 1024),
    )(x_bnc, p["gn_g"].reshape(1, C), p["gn_b"].reshape(1, C), m, mt,
      wqkv, bqkv, wp, bp)


def bottleneck_forward(x_nchw, emb, params, groups, num_heads):
    B, Cin, H, W = x_nchw.shape
    x = jnp.transpose(x_nchw, (0, 2, 3, 1)).reshape(B, H * W, Cin)        # NCHW -> (B, N, C)
    x = resblock_apply(x, emb, params["res1"], groups, H, W)
    x = attention_apply(x, params["att"], groups, num_heads)
    x = resblock_apply(x, emb, params["res2"], groups, H, W)
    Cout = x.shape[-1]
    return jnp.transpose(x.reshape(B, H, W, Cout), (0, 3, 1, 2))          # -> NCHW


# ----------------------------------------------------------------------------
# Pure-JAX f32 reference (same math, used only for the self-test).
# ----------------------------------------------------------------------------
def _ref_groupnorm(x_bnc, gamma, beta, groups, eps=1e-5):
    B, N, C = x_bnc.shape
    xg = x_bnc.reshape(B, N, groups, C // groups)
    mean = xg.mean(axis=(1, 3), keepdims=True)
    var = ((xg - mean) ** 2).mean(axis=(1, 3), keepdims=True)
    xn = ((xg - mean) / jnp.sqrt(var + eps)).reshape(B, N, C)
    return xn * gamma + beta


def _ref_conv3x3(x_bnc, w_oihw, b, H, W):
    B, N, Cin = x_bnc.shape
    x = x_bnc.reshape(B, H, W, Cin)
    w = jnp.transpose(w_oihw, (2, 3, 1, 0))                               # HWIO
    y = jax.lax.conv_general_dilated(x, w, (1, 1), "SAME",
                                     dimension_numbers=("NHWC", "HWIO", "NHWC"),
                                     precision=jax.lax.Precision.HIGHEST)
    return (y + b).reshape(B, H * W, -1)


def _ref_resblock(x, emb, p, groups, H, W):
    h = jax.nn.silu(_ref_groupnorm(x, p["gn1_g"], p["gn1_b"], groups))
    h = _ref_conv3x3(h, p["conv1_w"], p["conv1_b"], H, W)
    e = jax.nn.silu(emb) @ p["emb_w"].T + p["emb_b"]
    h = h + e[:, None, :]
    h = jax.nn.silu(_ref_groupnorm(h, p["gn2_g"], p["gn2_b"], groups))
    h = _ref_conv3x3(h, p["conv2_w"], p["conv2_b"], H, W)
    if "skip_w" in p:
        skip = x @ p["skip_w"][:, :, 0, 0].T + p["skip_b"]
    else:
        skip = x
    return skip + h


def _ref_attention(x, p, groups, num_heads):
    B, N, C = x.shape
    ch = C // num_heads
    xn = _ref_groupnorm(x, p["gn_g"], p["gn_b"], groups)
    qkv = xn @ p["qkv_w"][:, :, 0].T + p["qkv_b"]                         # (B, N, 3C) legacy
    qkv = qkv.reshape(B, N, num_heads, 3, ch)
    q, k, v = qkv[..., 0, :], qkv[..., 1, :], qkv[..., 2, :]              # (B, N, h, ch)
    scale = 1.0 / math.sqrt(math.sqrt(ch))
    logits = jnp.einsum("bnhc,bmhc->bhnm", q * scale, k * scale,
                        precision=jax.lax.Precision.HIGHEST)
    probs = jax.nn.softmax(logits, axis=-1)
    att = jnp.einsum("bhnm,bmhc->bnhc", probs, v,
                     precision=jax.lax.Precision.HIGHEST).reshape(B, N, C)
    out = att @ p["proj_w"][:, :, 0].T + p["proj_b"]
    return x + out


def _ref_bottleneck(x_nchw, emb, params, groups, num_heads, H, W):
    B, Cin = x_nchw.shape[:2]
    x = jnp.transpose(x_nchw, (0, 2, 3, 1)).reshape(B, H * W, Cin)
    x = _ref_resblock(x, emb, params["res1"], groups, H, W)
    x = _ref_attention(x, params["att"], groups, num_heads)
    x = _ref_resblock(x, emb, params["res2"], groups, H, W)
    return jnp.transpose(x.reshape(B, H, W, -1), (0, 3, 1, 2))


# ----------------------------------------------------------------------------
# Deterministic synthetic parameters (shapes follow the PyTorch layers).
# ----------------------------------------------------------------------------
def init_resblock_params(key, cin, cout, cemb, scale=0.05):
    ks = jax.random.split(key, 8)
    p = {
        "gn1_g": jnp.ones((cin,), jnp.float32),
        "gn1_b": jnp.zeros((cin,), jnp.float32),
        "conv1_w": scale * jax.random.normal(ks[0], (cout, cin, 3, 3), jnp.float32),
        "conv1_b": scale * jax.random.normal(ks[1], (cout,), jnp.float32),
        "emb_w": scale * jax.random.normal(ks[2], (cout, cemb), jnp.float32),
        "emb_b": scale * jax.random.normal(ks[3], (cout,), jnp.float32),
        "gn2_g": jnp.ones((cout,), jnp.float32),
        "gn2_b": jnp.zeros((cout,), jnp.float32),
        "conv2_w": scale * jax.random.normal(ks[4], (cout, cout, 3, 3), jnp.float32),
        "conv2_b": scale * jax.random.normal(ks[5], (cout,), jnp.float32),
    }
    if cin != cout:
        p["skip_w"] = scale * jax.random.normal(ks[6], (cout, cin, 1, 1), jnp.float32)
        p["skip_b"] = scale * jax.random.normal(ks[7], (cout,), jnp.float32)
    return p


def init_attention_params(key, c, scale=0.05):
    ks = jax.random.split(key, 4)
    return {
        "gn_g": jnp.ones((c,), jnp.float32),
        "gn_b": jnp.zeros((c,), jnp.float32),
        "qkv_w": scale * jax.random.normal(ks[0], (3 * c, c, 1), jnp.float32),
        "qkv_b": scale * jax.random.normal(ks[1], (3 * c,), jnp.float32),
        "proj_w": scale * jax.random.normal(ks[2], (c, c, 1), jnp.float32),
        "proj_b": scale * jax.random.normal(ks[3], (c,), jnp.float32),
    }


if __name__ == "__main__":
    # Small shapes consistent with BottleNeck defaults (groupnorm=32, num_heads=8).
    B, Cin, Cout, Cemb, H, W = 2, 32, 64, 128, 8, 8
    groups, num_heads = 32, 8

    key = jax.random.PRNGKey(0)
    kx, ke, k1, k2, k3 = jax.random.split(key, 5)
    x = jax.random.normal(kx, (B, Cin, H, W), jnp.float32)                # NCHW like PyTorch
    emb = jax.random.normal(ke, (B, Cemb), jnp.float32)

    params = {
        "res1": init_resblock_params(k1, Cin, Cout, Cemb),
        "att": init_attention_params(k2, Cout),
        "res2": init_resblock_params(k3, Cout, Cout, Cemb),
    }

    fwd = jax.jit(functools.partial(bottleneck_forward, groups=groups,
                                    num_heads=num_heads))
    out = jax.block_until_ready(fwd(x, emb, params))

    assert out.shape == (B, Cout, H, W), out.shape
    assert bool(jnp.all(jnp.isfinite(out)))

    # Correctness check against a pure-JAX f32 reference.  bf16 MXU operands in the
    # kernels mean ~1e-2-level agreement (not bit-exact vs f32), hence the loose bound.
    ref = _ref_bottleneck(x, emb, params, groups, num_heads, H, W)
    err = float(jnp.max(jnp.abs(out - ref)))
    assert err < 1e-1, f"max |kernel - reference| too large: {err}"

    print("KERNEL_OK")
</pallas_src>

<mosaic_0001>
module attributes {stable_mosaic.version = 11 : i64} {
  func.func @_resblock_kernel(%arg0: i32, %arg1: memref<1x64x32xf32, #tpu.memory_space<vmem>>, %arg2: memref<1x1x64xf32, #tpu.memory_space<vmem>>, %arg3: memref<1x32xf32, #tpu.memory_space<vmem>>, %arg4: memref<1x32xf32, #tpu.memory_space<vmem>>, %arg5: memref<32x32xf32, #tpu.memory_space<vmem>>, %arg6: memref<32x32xf32, #tpu.memory_space<vmem>>, %arg7: memref<9x32x64xbf16, #tpu.memory_space<vmem>>, %arg8: memref<1x64xf32, #tpu.memory_space<vmem>>, %arg9: memref<1x64xf32, #tpu.memory_space<vmem>>, %arg10: memref<1x64xf32, #tpu.memory_space<vmem>>, %arg11: memref<64x32xf32, #tpu.memory_space<vmem>>, %arg12: memref<32x64xf32, #tpu.memory_space<vmem>>, %arg13: memref<9x64x64xbf16, #tpu.memory_space<vmem>>, %arg14: memref<1x64xf32, #tpu.memory_space<vmem>>, %arg15: memref<32x64xbf16, #tpu.memory_space<vmem>>, %arg16: memref<1x64xf32, #tpu.memory_space<vmem>>, %arg17: memref<1x64x64xf32, #tpu.memory_space<vmem>>, %arg18: memref<10x10x32xbf16, #tpu.memory_space<vmem>>, %arg19: memref<10x10x64xbf16, #tpu.memory_space<vmem>>) attributes {dimension_semantics = [#tpu.dimension_semantics<parallel>], iteration_bounds = array<i64: 2>, scalar_prefetch = 0 : i64, scratch_operands = 2 : i64, tpu.core_type = #tpu.core_type<tc>, window_params = [{transform_indices = @transform_0, window_bounds = array<i64: 1, 64, 32>}, {transform_indices = @transform_1, window_bounds = array<i64: 1, 1, 64>}, {pipeline_mode = #tpu.pipeline_mode<synchronous>, transform_indices = @transform_2, window_bounds = array<i64: 1, 32>}, {pipeline_mode = #tpu.pipeline_mode<synchronous>, transform_indices = @transform_3, window_bounds = array<i64: 1, 32>}, {pipeline_mode = #tpu.pipeline_mode<synchronous>, transform_indices = @transform_4, window_bounds = array<i64: 32, 32>}, {pipeline_mode = #tpu.pipeline_mode<synchronous>, transform_indices = @transform_5, window_bounds = array<i64: 32, 32>}, {pipeline_mode = #tpu.pipeline_mode<synchronous>, transform_indices = @transform_6, window_bounds = array<i64: 9, 32, 64>}, {pipeline_mode = #tpu.pipeline_mode<synchronous>, transform_indices = @transform_7, window_bounds = array<i64: 1, 64>}, {pipeline_mode = #tpu.pipeline_mode<synchronous>, transform_indices = @transform_8, window_bounds = array<i64: 1, 64>}, {pipeline_mode = #tpu.pipeline_mode<synchronous>, transform_indices = @transform_9, window_bounds = array<i64: 1, 64>}, {pipeline_mode = #tpu.pipeline_mode<synchronous>, transform_indices = @transform_10, window_bounds = array<i64: 64, 32>}, {pipeline_mode = #tpu.pipeline_mode<synchronous>, transform_indices = @transform_11, window_bounds = array<i64: 32, 64>}, {pipeline_mode = #tpu.pipeline_mode<synchronous>, transform_indices = @transform_12, window_bounds = array<i64: 9, 64, 64>}, {pipeline_mode = #tpu.pipeline_mode<synchronous>, transform_indices = @transform_13, window_bounds = array<i64: 1, 64>}, {pipeline_mode = #tpu.pipeline_mode<synchronous>, transform_indices = @transform_14, window_bounds = array<i64: 32, 64>}, {pipeline_mode = #tpu.pipeline_mode<synchronous>, transform_indices = @transform_15, window_bounds = array<i64: 1, 64>}, {transform_indices = @transform_16, window_bounds = array<i64: 1, 64, 64>}]} {
    %c0 = arith.constant 0 : index
    %c0_0 = arith.constant 0 : index
    %c0_1 = arith.constant 0 : index
    %0 = vector.load %arg1[%c0, %c0_0, %c0_1] : memref<1x64x32xf32, #tpu.memory_space<vmem>>, vector<1x64x32xf32>
    %1 = vector.shape_cast %0 : vector<1x64x32xf32> to vector<64x32xf32>
    %c0_2 = arith.constant 0 : index
    %c0_3 = arith.constant 0 : index
    %2 = vector.load %arg5[%c0_2, %c0_3] : memref<32x32xf32, #tpu.memory_space<vmem>>, vector<32x32xf32>
    %c0_4 = arith.constant 0 : index
    %c0_5 = arith.constant 0 : index
    %3 = vector.load %arg6[%c0_4, %c0_5] : memref<32x32xf32, #tpu.memory_space<vmem>>, vector<32x32xf32>
    %c0_6 = arith.constant 0 : index
    %c0_7 = arith.constant 0 : index
    %4 = vector.load %arg3[%c0_6, %c0_7] : memref<1x32xf32, #tpu.memory_space<vmem>>, vector<1x32xf32>
    %c0_8 = arith.constant 0 : index
    %c0_9 = arith.constant 0 : index
    %5 = vector.load %arg4[%c0_8, %c0_9] : memref<1x32xf32, #tpu.memory_space<vmem>>, vector<1x32xf32>
    %cst = arith.constant dense<0.000000e+00> : vector<32xf32>
    %6 = vector.multi_reduction <add>, %1, %cst [0] : vector<64x32xf32> to vector<32xf32>
    %7 = vector.shape_cast %6 : vector<32xf32> to vector<1x32xf32>
    %cst_10 = arith.constant dense<0.000000e+00> : vector<1x32xf32>
    %8 = tpu.matmul %7, %2, %cst_10 {dimension_numbers = #tpu.dot_dimension_numbers<[1], [0], [0], [1], [0, 0, 1, 1], [], []>} : vector<1x32xf32>, vector<32x32xf32>, vector<1x32xf32> -> vector<1x32xf32>
    %cst_11 = arith.constant 1.562500e-02 : f32
    %9 = vector.broadcast %cst_11 : f32 to vector<1x32xf32>
    %10 = arith.mulf %8, %9 : vector<1x32xf32>
    %cst_12 = arith.constant dense<0.000000e+00> : vector<1x32xf32>
    %11 = tpu.matmul %10, %3, %cst_12 {dimension_numbers = #tpu.dot_dimension_numbers<[1], [0], [0], [1], [0, 0, 1, 1], [], []>} : vector<1x32xf32>, vector<32x32xf32>, vector<1x32xf32> -> vector<1x32xf32>
    %12 = vector.broadcast %11 : vector<1x32xf32> to vector<64x32xf32>
    %13 = arith.subf %1, %12 : vector<64x32xf32>
    %14 = arith.mulf %13, %13 : vector<64x32xf32>
    %cst_13 = arith.constant dense<0.000000e+00> : vector<32xf32>
    %15 = vector.multi_reduction <add>, %14, %cst_13 [0] : vector<64x32xf32> to vector<32xf32>
    %16 = vector.shape_cast %15 : vector<32xf32> to vector<1x32xf32>
    %cst_14 = arith.constant dense<0.000000e+00> : vector<1x32xf32>
    %17 = tpu.matmul %16, %2, %cst_14 {dimension_numbers = #tpu.dot_dimension_numbers<[1], [0], [0], [1], [0, 0, 1, 1], [], []>} : vector<1x32xf32>, vector<32x32xf32>, vector<1x32xf32> -> vector<1x32xf32>
    %cst_15 = arith.constant 1.562500e-02 : f32
    %18 = vector.broadcast %cst_15 : f32 to vector<1x32xf32>
    %19 = arith.mulf %17, %18 : vector<1x32xf32>
    %cst_16 = arith.constant dense<0.000000e+00> : vector<1x32xf32>
    %20 = tpu.matmul %19, %3, %cst_16 {dimension_numbers = #tpu.dot_dimension_numbers<[1], [0], [0], [1], [0, 0, 1, 1], [], []>} : vector<1x32xf32>, vector<32x32xf32>, vector<1x32xf32> -> vector<1x32xf32>
    %cst_17 = arith.constant 9.99999974E-6 : f32
    %21 = vector.broadcast %cst_17 : f32 to vector<1x32xf32>
    %22 = arith.addf %20, %21 : vector<1x32xf32>
    %23 = math.rsqrt %22 : vector<1x32xf32>
    %24 = vector.broadcast %23 : vector<1x32xf32> to vector<64x32xf32>
    %25 = arith.mulf %13, %24 : vector<64x32xf32>
    %26 = vector.broadcast %4 : vector<1x32xf32> to vector<64x32xf32>
    %27 = arith.mulf %25, %26 : vector<64x32xf32>
    %28 = vector.broadcast %5 : vector<1x32xf32> to vector<64x32xf32>
    %29 = arith.addf %27, %28 : vector<64x32xf32>
    %30 = arith.negf %29 : vector<64x32xf32>
    %31 = math.exp %30 : vector<64x32xf32>
    %cst_18 = arith.constant 1.000000e+00 : f32
    %32 = vector.broadcast %cst_18 : f32 to vector<64x32xf32>
    %33 = arith.addf %32, %31 : vector<64x32xf32>
    %34 = arith.divf %32, %33 : vector<64x32xf32>
    %35 = arith.mulf %29, %34 : vector<64x32xf32>
    %cst_19 = arith.constant 0.000000e+00 : bf16
    %36 = vector.broadcast %cst_19 : bf16 to vector<1x10x32xbf16>
    %c0_20 = arith.constant 0 : index
    %c0_21 = arith.constant 0 : index
    %c0_22 = arith.constant 0 : index
    %37 = vector.load %arg18[%c0_20, %c0_21, %c0_22] : memref<10x10x32xbf16, #tpu.memory_space<vmem>>, vector<1x10x32xbf16>
    tpu.vector_store %arg18[%c0_20, %c0_21, %c0_22], %36 {strides = array<i32>} : memref<10x10x32xbf16, #tpu.memory_space<vmem>>, vector<1x10x32xbf16>,
    %cst_23 = arith.constant 0.000000e+00 : bf16
    %38 = vector.broadcast %cst_23 : bf16 to vector<1x10x32xbf16>
    %c9 = arith.constant 9 : index
    %c0_24 = arith.constant 0 : index
    %c0_25 = arith.constant 0 : index
    %39 = vector.load %arg18[%c9, %c0_24, %c0_25] : memref<10x10x32xbf16, #tpu.memory_space<vmem>>, vector<1x10x32xbf16>
    tpu.vector_store %arg18[%c9, %c0_24, %c0_25], %38 {strides = array<i32>} : memref<10x10x32xbf16, #tpu.memory_space<vmem>>, vector<1x10x32xbf16>,
    %cst_26 = arith.constant 0.000000e+00 : bf16
    %40 = vector.broadcast %cst_26 : bf16 to vector<10x1x32xbf16>
    %c0_27 = arith.constant 0 : index
    %c0_28 = arith.constant 0 : index
    %c0_29 = arith.constant 0 : index
    %41 = vector.load %arg18[%c0_27, %c0_28, %c0_29] : memref<10x10x32xbf16, #tpu.memory_space<vmem>>, vector<10x1x32xbf16>
    tpu.vector_store %arg18[%c0_27, %c0_28, %c0_29], %40 {strides = array<i32>} : memref<10x10x32xbf16, #tpu.memory_space<vmem>>, vector<10x1x32xbf16>,
    %cst_30 = arith.constant 0.000000e+00 : bf16
    %42 = vector.broadcast %cst_30 : bf16 to vector<10x1x32xbf16>
    %c0_31 = arith.constant 0 : index
    %c9_32 = arith.constant 9 : index
    %c0_33 = arith.constant 0 : index
    %43 = vector.load %arg18[%c0_31, %c9_32, %c0_33] : memref<10x10x32xbf16, #tpu.memory_space<vmem>>, vector<10x1x32xbf16>
    tpu.vector_store %arg18[%c0_31, %c9_32, %c0_33], %42 {strides = array<i32>} : memref<10x10x32xbf16, #tpu.memory_space<vmem>>, vector<10x1x32xbf16>,
    %44 = vector.shape_cast %35 : vector<64x32xf32> to vector<8x8x32xf32>
    %45 = arith.truncf %44 : vector<8x8x32xf32> to vector<8x8x32xbf16>
    %c1 = arith.constant 1 : index
    %c1_34 = arith.constant 1 : index
    %c0_35 = arith.constant 0 : index
    %46 = vector.load %arg18[%c1, %c1_34, %c0_35] : memref<10x10x32xbf16, #tpu.memory_space<vmem>>, vector<8x8x32xbf16>
    tpu.vector_store %arg18[%c1, %c1_34, %c0_35], %45 {strides = array<i32>} : memref<10x10x32xbf16, #tpu.memory_space<vmem>>, vector<8x8x32xbf16>,
    %c0_36 = arith.constant 0 : index
    %c0_37 = arith.constant 0 : index
    %c0_38 = arith.constant 0 : index
    %47 = vector.load %arg18[%c0_36, %c0_37, %c0_38] : memref<10x10x32xbf16, #tpu.memory_space<vmem>>, vector<8x8x32xbf16>
    %48 = vector.shape_cast %47 : vector<8x8x32xbf16> to vector<64x32xbf16>
    %c0_39 = arith.constant 0 : index
    %c0_40 = arith.constant 0 : index
    %c0_41 = arith.constant 0 : index
    %49 = vector.load %arg7[%c0_39, %c0_40, %c0_41] : memref<9x32x64xbf16, #tpu.memory_space<vmem>>, vector<1x32x64xbf16>
    %50 = vector.shape_cast %49 : vector<1x32x64xbf16> to vector<32x64xbf16>
    %cst_42 = arith.constant dense<0.000000e+00> : vector<64x64xf32>
    %51 = tpu.matmul %48, %50, %cst_42 {dimension_numbers = #tpu.dot_dimension_numbers<[1], [0], [0], [1], [0, 0, 1, 1], [], []>} : vector<64x32xbf16>, vector<32x64xbf16>, vector<64x64xf32> -> vector<64x64xf32>
    %c0_43 = arith.constant 0 : index
    %c1_44 = arith.constant 1 : index
    %c0_45 = arith.constant 0 : index
    %52 = vector.load %arg18[%c0_43, %c1_44, %c0_45] : memref<10x10x32xbf16, #tpu.memory_space<vmem>>, vector<8x8x32xbf16>
    %53 = vector.shape_cast %52 : vector<8x8x32xbf16> to vector<64x32xbf16>
    %c1_46 = arith.constant 1 : index
    %c0_47 = arith.constant 0 : index
    %c0_48 = arith.constant 0 : index
    %54 = vector.load %arg7[%c1_46, %c0_47, %c0_48] : memref<9x32x64xbf16, #tpu.memory_space<vmem>>, vector<1x32x64xbf16>
    %55 = vector.shape_cast %54 : vector<1x32x64xbf16> to vector<32x64xbf16>
    %cst_49 = arith.constant dense<0.000000e+00> : vector<64x64xf32>
    %56 = tpu.matmul %53, %55, %cst_49 {dimension_numbers = #tpu.dot_dimension_numbers<[1], [0], [0], [1], [0, 0, 1, 1], [], []>} : vector<64x32xbf16>, vector<32x64xbf16>, vector<64x64xf32> -> vector<64x64xf32>
    %57 = arith.addf %51, %56 : vector<64x64xf32>
    %c0_50 = arith.constant 0 : index
    %c2 = arith.constant 2 : index
    %c0_51 = arith.constant 0 : index
    %58 = vector.load %arg18[%c0_50, %c2, %c0_51] : memref<10x10x32xbf16, #tpu.memory_space<vmem>>, vector<8x8x32xbf16>
    %59 = vector.shape_cast %58 : vector<8x8x32xbf16> to vector<64x32xbf16>
    %c2_52 = arith.constant 2 : index
    %c0_53 = arith.constant 0 : index
    %c0_54 = arith.constant 0 : index
    %60 = vector.load %arg7[%c2_52, %c0_53, %c0_54] : memref<9x32x64xbf16, #tpu.memory_space<vmem>>, vector<1x32x64xbf16>
    %61 = vector.shape_cast %60 : vector<1x32x64xbf16> to vector<32x64xbf16>
    %cst_55 = arith.constant dense<0.000000e+00> : vector<64x64xf32>
    %62 = tpu.matmul %59, %61, %cst_55 {dimension_numbers = #tpu.dot_dimension_numbers<[1], [0], [0], [1], [0, 0, 1, 1], [], []>} : vector<64x32xbf16>, vector<32x64xbf16>, vector<64x64xf32> -> vector<64x64xf32>
    %63 = arith.addf %57, %62 : vector<64x64xf32>
    %c1_56 = arith.constant 1 : index
    %c0_57 = arith.constant 0 : index
    %c0_58 = arith.constant 0 : index
    %64 = vector.load %arg18[%c1_56, %c0_57, %c0_58] : memref<10x10x32xbf16, #tpu.memory_space<vmem>>, vector<8x8x32xbf16>
    %65 = vector.shape_cast %64 : vector<8x8x32xbf16> to vector<64x32xbf16>
    %c3 = arith.constant 3 : index
    %c0_59 = arith.constant 0 : index
    %c0_60 = arith.constant 0 : index
    %66 = vector.load %arg7[%c3, %c0_59, %c0_60] : memref<9x32x64xbf16, #tpu.memory_space<vmem>>, vector<1x32x64xbf16>
    %67 = vector.shape_cast %66 : vector<1x32x64xbf16> to vector<32x64xbf16>
    %cst_61 = arith.constant dense<0.000000e+00> : vector<64x64xf32>
    %68 = tpu.matmul %65, %67, %cst_61 {dimension_numbers = #tpu.dot_dimension_numbers<[1], [0], [0], [1], [0, 0, 1, 1], [], []>} : vector<64x32xbf16>, vector<32x64xbf16>, vector<64x64xf32> -> vector<64x64xf32>
    %69 = arith.addf %63, %68 : vector<64x64xf32>
    %c1_62 = arith.constant 1 : index
    %c1_63 = arith.constant 1 : index
    %c0_64 = arith.constant 0 : index
    %70 = vector.load %arg18[%c1_62, %c1_63, %c0_64] : memref<10x10x32xbf16, #tpu.memory_space<vmem>>, vector<8x8x32xbf16>
    %71 = vector.shape_cast %70 : vector<8x8x32xbf16> to vector<64x32xbf16>
    %c4 = arith.constant 4 : index
    %c0_65 = arith.constant 0 : index
    %c0_66 = arith.constant 0 : index
    %72 = vector.load %arg7[%c4, %c0_65, %c0_66] : memref<9x32x64xbf16, #tpu.memory_space<vmem>>, vector<1x32x64xbf16>
    %73 = vector.shape_cast %72 : vector<1x32x64xbf16> to vector<32x64xbf16>
    %cst_67 = arith.constant dense<0.000000e+00> : vector<64x64xf32>
    %74 = tpu.matmul %71, %73, %cst_67 {dimension_numbers = #tpu.dot_dimension_numbers<[1], [0], [0], [1], [0, 0, 1, 1], [], []>} : vector<64x32xbf16>, vector<32x64xbf16>, vector<64x64xf32> -> vector<64x64xf32>
    %75 = arith.addf %69, %74 : vector<64x64xf32>
    %c1_68 = arith.constant 1 : index
    %c2_69 = arith.constant 2 : index
    %c0_70 = arith.constant 0 : index
    %76 = vector.load %arg18[%c1_68, %c2_69, %c0_70] : memref<10x10x32xbf16, #tpu.memory_space<vmem>>, vector<8x8x32xbf16>
    %77 = vector.shape_cast %76 : vector<8x8x32xbf16> to vector<64x32xbf16>
    %c5 = arith.constant 5 : index
    %c0_71 = arith.constant 0 : index
    %c0_72 = arith.constant 0 : index
    %78 = vector.load %arg7[%c5, %c0_71, %c0_72] : memref<9x32x64xbf16, #tpu.memory_space<vmem>>, vector<1x32x64xbf16>
    %79 = vector.shape_cast %78 : vector<1x32x64xbf16> to vector<32x64xbf16>
    %cst_73 = arith.constant dense<0.000000e+00> : vector<64x64xf32>
    %80 = tpu.matmul %77, %79, %cst_73 {dimension_numbers = #tpu.dot_dimension_numbers<[1], [0], [0], [1], [0, 0, 1, 1], [], []>} : vector<64x32xbf16>, vector<32x64xbf16>, vector<64x64xf32> -> vector<64x64xf32>
    %81 = arith.addf %75, %80 : vector<64x64xf32>
    %c2_74 = arith.constant 2 : index
    %c0_75 = arith.constant 0 : index
    %c0_76 = arith.constant 0 : index
    %82 = vector.load %arg18[%c2_74, %c0_75, %c0_76] : memref<10x10x32xbf16, #tpu.memory_space<vmem>>, vector<8x8x32xbf16>
    %83 = vector.shape_cast %82 : vector<8x8x32xbf16> to vector<64x32xbf16>
    %c6 = arith.constant 6 : index
    %c0_77 = arith.constant 0 : index
    %c0_78 = arith.constant 0 : index
    %84 = vector.load %arg7[%c6, %c0_77, %c0_78] : memref<9x32x64xbf16, #tpu.memory_space<vmem>>, vector<1x32x64xbf16>
    %85 = vector.shape_cast %84 : vector<1x32x64xbf16> to vector<32x64xbf16>
    %cst_79 = arith.constant dense<0.000000e+00> : vector<64x64xf32>
    %86 = tpu.matmul %83, %85, %cst_79 {dimension_numbers = #tpu.dot_dimension_numbers<[1], [0], [0], [1], [0, 0, 1, 1], [], []>} : vector<64x32xbf16>, vector<32x64xbf16>, vector<64x64xf32> -> vector<64x64xf32>
    %87 = arith.addf %81, %86 : vector<64x64xf32>
    %c2_80 = arith.constant 2 : index
    %c1_81 = arith.constant 1 : index
    %c0_82 = arith.constant 0 : index
    %88 = vector.load %arg18[%c2_80, %c1_81, %c0_82] : memref<10x10x32xbf16, #tpu.memory_space<vmem>>, vector<8x8x32xbf16>
    %89 = vector.shape_cast %88 : vector<8x8x32xbf16> to vector<64x32xbf16>
    %c7 = arith.constant 7 : index
    %c0_83 = arith.constant 0 : index
    %c0_84 = arith.constant 0 : index
    %90 = vector.load %arg7[%c7, %c0_83, %c0_84] : memref<9x32x64xbf16, #tpu.memory_space<vmem>>, vector<1x32x64xbf16>
    %91 = vector.shape_cast %90 : vector<1x32x64xbf16> to vector<32x64xbf16>
    %cst_85 = arith.constant dense<0.000000e+00> : vector<64x64xf32>
    %92 = tpu.matmul %89, %91, %cst_85 {dimension_numbers = #tpu.dot_dimension_numbers<[1], [0], [0], [1], [0, 0, 1, 1], [], []>} : vector<64x32xbf16>, vector<32x64xbf16>, vector<64x64xf32> -> vector<64x64xf32>
    %93 = arith.addf %87, %92 : vector<64x64xf32>
    %c2_86 = arith.constant 2 : index
    %c2_87 = arith.constant 2 : index
    %c0_88 = arith.constant 0 : index
    %94 = vector.load %arg18[%c2_86, %c2_87, %c0_88] : memref<10x10x32xbf16, #tpu.memory_space<vmem>>, vector<8x8x32xbf16>
    %95 = vector.shape_cast %94 : vector<8x8x32xbf16> to vector<64x32xbf16>
    %c8 = arith.constant 8 : index
    %c0_89 = arith.constant 0 : index
    %c0_90 = arith.constant 0 : index
    %96 = vector.load %arg7[%c8, %c0_89, %c0_90] : memref<9x32x64xbf16, #tpu.memory_space<vmem>>, vector<1x32x64xbf16>
    %97 = vector.shape_cast %96 : vector<1x32x64xbf16> to vector<32x64xbf16>
    %cst_91 = arith.constant dense<0.000000e+00> : vector<64x64xf32>
    %98 = tpu.matmul %95, %97, %cst_91 {dimension_numbers = #tpu.dot_dimension_numbers<[1], [0], [0], [1], [0, 0, 1, 1], [], []>} : vector<64x32xbf16>, vector<32x64xbf16>, vector<64x64xf32> -> vector<64x64xf32>
    %99 = arith.addf %93, %98 : vector<64x64xf32>
    %c0_92 = arith.constant 0 : index
    %c0_93 = arith.constant 0 : index
    %100 = vector.load %arg8[%c0_92, %c0_93] : memref<1x64xf32, #tpu.memory_space<vmem>>, vector<1x64xf32>
    %101 = vector.broadcast %100 : vector<1x64xf32> to vector<64x64xf32>
    %102 = arith.addf %99, %101 : vector<64x64xf32>
    %c0_94 = arith.constant 0 : index
    %c0_95 = arith.constant 0 : index
    %c0_96 = arith.constant 0 : index
    %103 = vector.load %arg2[%c0_94, %c0_95, %c0_96] : memref<1x1x64xf32, #tpu.memory_space<vmem>>, vector<1x1x64xf32>
    %104 = vector.shape_cast %103 : vector<1x1x64xf32> to vector<1x64xf32>
    %105 = vector.broadcast %104 : vector<1x64xf32> to vector<64x64xf32>
    %106 = arith.addf %102, %105 : vector<64x64xf32>
    %c0_97 = arith.constant 0 : index
    %c0_98 = arith.constant 0 : index
    %107 = vector.load %arg11[%c0_97, %c0_98] : memref<64x32xf32, #tpu.memory_space<vmem>>, vector<64x32xf32>
    %c0_99 = arith.constant 0 : index
    %c0_100 = arith.constant 0 : index
    %108 = vector.load %arg12[%c0_99, %c0_100] : memref<32x64xf32, #tpu.memory_space<vmem>>, vector<32x64xf32>
    %c0_101 = arith.constant 0 : index
    %c0_102 = arith.constant 0 : index
    %109 = vector.load %arg9[%c0_101, %c0_102] : memref<1x64xf32, #tpu.memory_space<vmem>>, vector<1x64xf32>
    %c0_103 = arith.constant 0 : index
    %c0_104 = arith.constant 0 : index
    %110 = vector.load %arg10[%c0_103, %c0_104] : memref<1x64xf32, #tpu.memory_space<vmem>>, vector<1x64xf32>
    %cst_105 = arith.constant dense<0.000000e+00> : vector<64xf32>
    %111 = vector.multi_reduction <add>, %106, %cst_105 [0] : vector<64x64xf32> to vector<64xf32>
    %112 = vector.shape_cast %111 : vector<64xf32> to vector<1x64xf32>
    %cst_106 = arith.constant dense<0.000000e+00> : vector<1x32xf32>
    %113 = tpu.matmul %112, %107, %cst_106 {dimension_numbers = #tpu.dot_dimension_numbers<[1], [0], [0], [1], [0, 0, 1, 1], [], []>} : vector<1x64xf32>, vector<64x32xf32>, vector<1x32xf32> -> vector<1x32xf32>
    %cst_107 = arith.constant 7.812500e-03 : f32
    %114 = vector.broadcast %cst_107 : f32 to vector<1x32xf32>
    %115 = arith.mulf %113, %114 : vector<1x32xf32>
    %cst_108 = arith.constant dense<0.000000e+00> : vector<1x64xf32>
    %116 = tpu.matmul %115, %108, %cst_108 {dimension_numbers = #tpu.dot_dimension_numbers<[1], [0], [0], [1], [0, 0, 1, 1], [], []>} : vector<1x32xf32>, vector<32x64xf32>, vector<1x64xf32> -> vector<1x64xf32>
    %117 = vector.broadcast %116 : vector<1x64xf32> to vector<64x64xf32>
    %118 = arith.subf %106, %117 : vector<64x64xf32>
    %119 = arith.mulf %118, %118 : vector<64x64xf32>
    %cst_109 = arith.constant dense<0.000000e+00> : vector<64xf32>
    %120 = vector.multi_reduction <add>, %119, %cst_109 [0] : vector<64x64xf32> to vector<64xf32>
    %121 = vector.shape_cast %120 : vector<64xf32> to vector<1x64xf32>
    %cst_110 = arith.constant dense<0.000000e+00> : vector<1x32xf32>
    %122 = tpu.matmul %121, %107, %cst_110 {dimension_numbers = #tpu.dot_dimension_numbers<[1], [0], [0], [1], [0, 0, 1, 1], [], []>} : vector<1x64xf32>, vector<64x32xf32>, vector<1x32xf32> -> vector<1x32xf32>
    %cst_111 = arith.constant 7.812500e-03 : f32
    %123 = vector.broadcast %cst_111 : f32 to vector<1x32xf32>
    %124 = arith.mulf %122, %123 : vector<1x32xf32>
    %cst_112 = arith.constant dense<0.000000e+00> : vector<1x64xf32>
    %125 = tpu.matmul %124, %108, %cst_112 {dimension_numbers = #tpu.dot_dimension_numbers<[1], [0], [0], [1], [0, 0, 1, 1], [], []>} : vector<1x32xf32>, vector<32x64xf32>, vector<1x64xf32> -> vector<1x64xf32>
    %cst_113 = arith.constant 9.99999974E-6 : f32
    %126 = vector.broadcast %cst_113 : f32 to vector<1x64xf32>
    %127 = arith.addf %125, %126 : vector<1x64xf32>
    %128 = math.rsqrt %127 : vector<1x64xf32>
    %129 = vector.broadcast %128 : vector<1x64xf32> to vector<64x64xf32>
    %130 = arith.mulf %118, %129 : vector<64x64xf32>
    %131 = vector.broadcast %109 : vector<1x64xf32> to vector<64x64xf32>
    %132 = arith.mulf %130, %131 : vector<64x64xf32>
    %133 = vector.broadcast %110 : vector<1x64xf32> to vector<64x64xf32>
    %134 = arith.addf %132, %133 : vector<64x64xf32>
    %135 = arith.negf %134 : vector<64x64xf32>
    %136 = math.exp %135 : vector<64x64xf32>
    %cst_114 = arith.constant 1.000000e+00 : f32
    %137 = vector.broadcast %cst_114 : f32 to vector<64x64xf32>
    %138 = arith.addf %137, %136 : vector<64x64xf32>
    %139 = arith.divf %137, %138 : vector<64x64xf32>
    %140 = arith.mulf %134, %139 : vector<64x64xf32>
    %cst_115 = arith.constant 0.000000e+00 : bf16
    %141 = vector.broadcast %cst_115 : bf16 to vector<1x10x64xbf16>
    %c0_116 = arith.constant 0 : index
    %c0_117 = arith.constant 0 : index
    %c0_118 = arith.constant 0 : index
    %142 = vector.load %arg19[%c0_116, %c0_117, %c0_118] : memref<10x10x64xbf16, #tpu.memory_space<vmem>>, vector<1x10x64xbf16>
    tpu.vector_store %arg19[%c0_116, %c0_117, %c0_118], %141 {strides = array<i32>} : memref<10x10x64xbf16, #tpu.memory_space<vmem>>, vector<1x10x64xbf16>,
    %cst_119 = arith.constant 0.000000e+00 : bf16
    %143 = vector.broadcast %cst_119 : bf16 to vector<1x10x64xbf16>
    %c9_120 = arith.constant 9 : index
    %c0_121 = arith.constant 0 : index
    %c0_122 = arith.constant 0 : index
    %144 = vector.load %arg19[%c9_120, %c0_121, %c0_122] : memref<10x10x64xbf16, #tpu.memory_space<vmem>>, vector<1x10x64xbf16>
    tpu.vector_store %arg19[%c9_120, %c0_121, %c0_122], %143 {strides = array<i32>} : memref<10x10x64xbf16, #tpu.memory_space<vmem>>, vector<1x10x64xbf16>,
    %cst_123 = arith.constant 0.000000e+00 : bf16
    %145 = vector.broadcast %cst_123 : bf16 to vector<10x1x64xbf16>
    %c0_124 = arith.constant 0 : index
    %c0_125 = arith.constant 0 : index
    %c0_126 = arith.constant 0 : index
    %146 = vector.load %arg19[%c0_124, %c0_125, %c0_126] : memref<10x10x64xbf16, #tpu.memory_space<vmem>>, vector<10x1x64xbf16>
    tpu.vector_store %arg19[%c0_124, %c0_125, %c0_126], %145 {strides = array<i32>} : memref<10x10x64xbf16, #tpu.memory_space<vmem>>, vector<10x1x64xbf16>,
    %cst_127 = arith.constant 0.000000e+00 : bf16
    %147 = vector.broadcast %cst_127 : bf16 to vector<10x1x64xbf16>
    %c0_128 = arith.constant 0 : index
    %c9_129 = arith.constant 9 : index
    %c0_130 = arith.constant 0 : index
    %148 = vector.load %arg19[%c0_128, %c9_129, %c0_130] : memref<10x10x64xbf16, #tpu.memory_space<vmem>>, vector<10x1x64xbf16>
    tpu.vector_store %arg19[%c0_128, %c9_129, %c0_130], %147 {strides = array<i32>} : memref<10x10x64xbf16, #tpu.memory_space<vmem>>, vector<10x1x64xbf16>,
    %149 = vector.shape_cast %140 : vector<64x64xf32> to vector<8x8x64xf32>
    %150 = arith.truncf %149 : vector<8x8x64xf32> to vector<8x8x64xbf16>
    %c1_131 = arith.constant 1 : index
    %c1_132 = arith.constant 1 : index
    %c0_133 = arith.constant 0 : index
    %151 = vector.load %arg19[%c1_131, %c1_132, %c0_133] : memref<10x10x64xbf16, #tpu.memory_space<vmem>>, vector<8x8x64xbf16>
    tpu.vector_store %arg19[%c1_131, %c1_132, %c0_133], %150 {strides = array<i32>} : memref<10x10x64xbf16, #tpu.memory_space<vmem>>, vector<8x8x64xbf16>,
    %c0_134 = arith.constant 0 : index
    %c0_135 = arith.constant 0 : index
    %c0_136 = arith.constant 0 : index
    %152 = vector.load %arg19[%c0_134, %c0_135, %c0_136] : memref<10x10x64xbf16, #tpu.memory_space<vmem>>, vector<8x8x64xbf16>
    %153 = vector.shape_cast %152 : vector<8x8x64xbf16> to vector<64x64xbf16>
    %c0_137 = arith.constant 0 : index
    %c0_138 = arith.constant 0 : index
    %c0_139 = arith.constant 0 : index
    %154 = vector.load %arg13[%c0_137, %c0_138, %c0_139] : memref<9x64x64xbf16, #tpu.memory_space<vmem>>, vector<1x64x64xbf16>
    %155 = vector.shape_cast %154 : vector<1x64x64xbf16> to vector<64x64xbf16>
    %cst_140 = arith.constant dense<0.000000e+00> : vector<64x64xf32>
    %156 = tpu.matmul %153, %155, %cst_140 {dimension_numbers = #tpu.dot_dimension_numbers<[1], [0], [0], [1], [0, 0, 1, 1], [], []>} : vector<64x64xbf16>, vector<64x64xbf16>, vector<64x64xf32> -> vector<64x64xf32>
    %c0_141 = arith.constant 0 : index
    %c1_142 = arith.constant 1 : index
    %c0_143 = arith.constant 0 : index
    %157 = vector.load %arg19[%c0_141, %c1_142, %c0_143] : memref<10x10x64xbf16, #tpu.memory_space<vmem>>, vector<8x8x64xbf16>
    %158 = vector.shape_cast %157 : vector<8x8x64xbf16> to vector<64x64xbf16>
    %c1_144 = arith.constant 1 : index
    %c0_145 = arith.constant 0 : index
    %c0_146 = arith.constant 0 : index
    %159 = vector.load %arg13[%c1_144, %c0_145, %c0_146] : memref<9x64x64xbf16, #tpu.memory_space<vmem>>, vector<1x64x64xbf16>
    %160 = vector.shape_cast %159 : vector<1x64x64xbf16> to vector<64x64xbf16>
    %cst_147 = arith.constant dense<0.000000e+00> : vector<64x64xf32>
    %161 = tpu.matmul %158, %160, %cst_147 {dimension_numbers = #tpu.dot_dimension_numbers<[1], [0], [0], [1], [0, 0, 1, 1], [], []>} : vector<64x64xbf16>, vector<64x64xbf16>, vector<64x64xf32> -> vector<64x64xf32>
    %162 = arith.addf %156, %161 : vector<64x64xf32>
    %c0_148 = arith.constant 0 : index
    %c2_149 = arith.constant 2 : index
    %c0_150 = arith.constant 0 : index
    %163 = vector.load %arg19[%c0_148, %c2_149, %c0_150] : memref<10x10x64xbf16, #tpu.memory_space<vmem>>, vector<8x8x64xbf16>
    %164 = vector.shape_cast %163 : vector<8x8x64xbf16> to vector<64x64xbf16>
    %c2_151 = arith.constant 2 : index
    %c0_152 = arith.constant 0 : index
    %c0_153 = arith.constant 0 : index
    %165 = vector.load %arg13[%c2_151, %c0_152, %c0_153] : memref<9x64x64xbf16, #tpu.memory_space<vmem>>, vector<1x64x64xbf16>
    %166 = vector.shape_cast %165 : vector<1x64x64xbf16> to vector<64x64xbf16>
    %cst_154 = arith.constant dense<0.000000e+00> : vector<64x64xf32>
    %167 = tpu.matmul %164, %166, %cst_154 {dimension_numbers = #tpu.dot_dimension_numbers<[1], [0], [0], [1], [0, 0, 1, 1], [], []>} : vector<64x64xbf16>, vector<64x64xbf16>, vector<64x64xf32> -> vector<64x64xf32>
    %168 = arith.addf %162, %167 : vector<64x64xf32>
    %c1_155 = arith.constant 1 : index
    %c0_156 = arith.constant 0 : index
    %c0_157 = arith.constant 0 : index
    %169 = vector.load %arg19[%c1_155, %c0_156, %c0_157] : memref<10x10x64xbf16, #tpu.memory_space<vmem>>, vector<8x8x64xbf16>
    %170 = vector.shape_cast %169 : vector<8x8x64xbf16> to vector<64x64xbf16>
    %c3_158 = arith.constant 3 : index
    %c0_159 = arith.constant 0 : index
    %c0_160 = arith.constant 0 : index
    %171 = vector.load %arg13[%c3_158, %c0_159, %c0_160] : memref<9x64x64xbf16, #tpu.memory_space<vmem>>, vector<1x64x64xbf16>
    %172 = vector.shape_cast %171 : vector<1x64x64xbf16> to vector<64x64xbf16>
    %cst_161 = arith.constant dense<0.000000e+00> : vector<64x64xf32>
    %173 = tpu.matmul %170, %172, %cst_161 {dimension_numbers = #tpu.dot_dimension_numbers<[1], [0], [0], [1], [0, 0, 1, 1], [], []>} : vector<64x64xbf16>, vector<64x64xbf16>, vector<64x64xf32> -> vector<64x64xf32>
    %174 = arith.addf %168, %173 : vector<64x64xf32>
    %c1_162 = arith.constant 1 : index
    %c1_163 = arith.constant 1 : index
    %c0_164 = arith.constant 0 : index
    %175 = vector.load %arg19[%c1_162, %c1_163, %c0_164] : memref<10x10x64xbf16, #tpu.memory_space<vmem>>, vector<8x8x64xbf16>
    %176 = vector.shape_cast %175 : vector<8x8x64xbf16> to vector<64x64xbf16>
    %c4_165 = arith.constant 4 : index
    %c0_166 = arith.constant 0 : index
    %c0_167 = arith.constant 0 : index
    %177 = vector.load %arg13[%c4_165, %c0_166, %c0_167] : memref<9x64x64xbf16, #tpu.memory_space<vmem>>, vector<1x64x64xbf16>
    %178 = vector.shape_cast %177 : vector<1x64x64xbf16> to vector<64x64xbf16>
    %cst_168 = arith.constant dense<0.000000e+00> : vector<64x64xf32>
    %179 = tpu.matmul %176, %178, %cst_168 {dimension_numbers = #tpu.dot_dimension_numbers<[1], [0], [0], [1], [0, 0, 1, 1], [], []>} : vector<64x64xbf16>, vector<64x64xbf16>, vector<64x64xf32> -> vector<64x64xf32>
    %180 = arith.addf %174, %179 : vector<64x64xf32>
    %c1_169 = arith.constant 1 : index
    %c2_170 = arith.constant 2 : index
    %c0_171 = arith.constant 0 : index
    %181 = vector.load %arg19[%c1_169, %c2_170, %c0_171] : memref<10x10x64xbf16, #tpu.memory_space<vmem>>, vector<8x8x64xbf16>
    %182 = vector.shape_cast %181 : vector<8x8x64xbf16> to vector<64x64xbf16>
    %c5_172 = arith.constant 5 : index
    %c0_173 = arith.constant 0 : index
    %c0_174 = arith.constant 0 : index
    %183 = vector.load %arg13[%c5_172, %c0_173, %c0_174] : memref<9x64x64xbf16, #tpu.memory_space<vmem>>, vector<1x64x64xbf16>
    %184 = vector.shape_cast %183 : vector<1x64x64xbf16> to vector<64x64xbf16>
    %cst_175 = arith.constant dense<0.000000e+00> : vector<64x64xf32>
    %185 = tpu.matmul %182, %184, %cst_175 {dimension_numbers = #tpu.dot_dimension_numbers<[1], [0], [0], [1], [0, 0, 1, 1], [], []>} : vector<64x64xbf16>, vector<64x64xbf16>, vector<64x64xf32> -> vector<64x64xf32>
    %186 = arith.addf %180, %185 : vector<64x64xf32>
    %c2_176 = arith.constant 2 : index
    %c0_177 = arith.constant 0 : index
    %c0_178 = arith.constant 0 : index
    %187 = vector.load %arg19[%c2_176, %c0_177, %c0_178] : memref<10x10x64xbf16, #tpu.memory_space<vmem>>, vector<8x8x64xbf16>
    %188 = vector.shape_cast %187 : vector<8x8x64xbf16> to vector<64x64xbf16>
    %c6_179 = arith.constant 6 : index
    %c0_180 = arith.constant 0 : index
    %c0_181 = arith.constant 0 : index
    %189 = vector.load %arg13[%c6_179, %c0_180, %c0_181] : memref<9x64x64xbf16, #tpu.memory_space<vmem>>, vector<1x64x64xbf16>
    %190 = vector.shape_cast %189 : vector<1x64x64xbf16> to vector<64x64xbf16>
    %cst_182 = arith.constant dense<0.000000e+00> : vector<64x64xf32>
    %191 = tpu.matmul %188, %190, %cst_182 {dimension_numbers = #tpu.dot_dimension_numbers<[1], [0], [0], [1], [0, 0, 1, 1], [], []>} : vector<64x64xbf16>, vector<64x64xbf16>, vector<64x64xf32> -> vector<64x64xf32>
    %192 = arith.addf %186, %191 : vector<64x64xf32>
    %c2_183 = arith.constant 2 : index
    %c1_184 = arith.constant 1 : index
    %c0_185 = arith.constant 0 : index
    %193 = vector.load %arg19[%c2_183, %c1_184, %c0_185] : memref<10x10x64xbf16, #tpu.memory_space<vmem>>, vector<8x8x64xbf16>
    %194 = vector.shape_cast %193 : vector<8x8x64xbf16> to vector<64x64xbf16>
    %c7_186 = arith.constant 7 : index
    %c0_187 = arith.constant 0 : index
    %c0_188 = arith.constant 0 : index
    %195 = vector.load %arg13[%c7_186, %c0_187, %c0_188] : memref<9x64x64xbf16, #tpu.memory_space<vmem>>, vector<1x64x64xbf16>
    %196 = vector.shape_cast %195 : vector<1x64x64xbf16> to vector<64x64xbf16>
    %cst_189 = arith.constant dense<0.000000e+00> : vector<64x64xf32>
    %197 = tpu.matmul %194, %196, %cst_189 {dimension_numbers = #tpu.dot_dimension_numbers<[1], [0], [0], [1], [0, 0, 1, 1], [], []>} : vector<64x64xbf16>, vector<64x64xbf16>, vector<64x64xf32> -> vector<64x64xf32>
    %198 = arith.addf %192, %197 : vector<64x64xf32>
    %c2_190 = arith.constant 2 : index
    %c2_191 = arith.constant 2 : index
    %c0_192 = arith.constant 0 : index
    %199 = vector.load %arg19[%c2_190, %c2_191, %c0_192] : memref<10x10x64xbf16, #tpu.memory_space<vmem>>, vector<8x8x64xbf16>
    %200 = vector.shape_cast %199 : vector<8x8x64xbf16> to vector<64x64xbf16>
    %c8_193 = arith.constant 8 : index
    %c0_194 = arith.constant 0 : index
    %c0_195 = arith.constant 0 : index
    %201 = vector.load %arg13[%c8_193, %c0_194, %c0_195] : memref<9x64x64xbf16, #tpu.memory_space<vmem>>, vector<1x64x64xbf16>
    %202 = vector.shape_cast %201 : vector<1x64x64xbf16> to vector<64x64xbf16>
    %cst_196 = arith.constant dense<0.000000e+00> : vector<64x64xf32>
    %203 = tpu.matmul %200, %202, %cst_196 {dimension_numbers = #tpu.dot_dimension_numbers<[1], [0], [0], [1], [0, 0, 1, 1], [], []>} : vector<64x64xbf16>, vector<64x64xbf16>, vector<64x64xf32> -> vector<64x64xf32>
    %204 = arith.addf %198, %203 : vector<64x64xf32>
    %c0_197 = arith.constant 0 : index
    %c0_198 = arith.constant 0 : index
    %205 = vector.load %arg14[%c0_197, %c0_198] : memref<1x64xf32, #tpu.memory_space<vmem>>, vector<1x64xf32>
    %206 = vector.broadcast %205 : vector<1x64xf32> to vector<64x64xf32>
    %207 = arith.addf %204, %206 : vector<64x64xf32>
    %208 = arith.truncf %1 : vector<64x32xf32> to vector<64x32xbf16>
    %c0_199 = arith.constant 0 : index
    %c0_200 = arith.constant 0 : index
    %209 = vector.load %arg15[%c0_199, %c0_200] : memref<32x64xbf16, #tpu.memory_space<vmem>>, vector<32x64xbf16>
    %cst_201 = arith.constant dense<0.000000e+00> : vector<64x64xf32>
    %210 = tpu.matmul %208, %209, %cst_201 {dimension_numbers = #tpu.dot_dimension_numbers<[1], [0], [0], [1], [0, 0, 1, 1], [], []>} : vector<64x32xbf16>, vector<32x64xbf16>, vector<64x64xf32> -> vector<64x64xf32>
    %c0_202 = arith.constant 0 : index
    %c0_203 = arith.constant 0 : index
    %211 = vector.load %arg16[%c0_202, %c0_203] : memref<1x64xf32, #tpu.memory_space<vmem>>, vector<1x64xf32>
    %212 = vector.broadcast %211 : vector<1x64xf32> to vector<64x64xf32>
    %213 = arith.addf %210, %212 : vector<64x64xf32>
    %214 = arith.addf %213, %207 : vector<64x64xf32>
    %c0_204 = arith.constant 0 : index
    %c0_205 = arith.constant 0 : index
    %c0_206 = arith.constant 0 : index
    %215 = vector.load %arg17[%c0_204, %c0_205, %c0_206] : memref<1x64x64xf32, #tpu.memory_space<vmem>>, vector<1x64x64xf32>
    %216 = vector.shape_cast %215 : vector<1x64x64xf32> to vector<64x64xf32>
    %217 = vector.shape_cast %214 : vector<64x64xf32> to vector<1x64x64xf32>
    tpu.vector_store %arg17[%c0_204, %c0_205, %c0_206], %217 {strides = array<i32>} : memref<1x64x64xf32, #tpu.memory_space<vmem>>, vector<1x64x64xf32>,
    return
  }
  func.func @transform_0(%arg0: i32) -> (i32, i32, i32) {
    %c0_i32 = arith.constant 0 : i32
    %c0_i32_0 = arith.constant 0 : i32
    %c0_i32_1 = arith.constant 0 : i32
    return %arg0, %c0_i32, %c0_i32_0 : i32, i32, i32
  }
  func.func @transform_1(%arg0: i32) -> (i32, i32, i32) {
    %c0_i32 = arith.constant 0 : i32
    %c0_i32_0 = arith.constant 0 : i32
    %c0_i32_1 = arith.constant 0 : i32
    return %arg0, %c0_i32, %c0_i32_0 : i32, i32, i32
  }
  func.func @transform_2(%arg0: i32) -> (i32, i32) {
    %c0_i32 = arith.constant 0 : i32
    %c0_i32_0 = arith.constant 0 : i32
    %c0_i32_1 = arith.constant 0 : i32
    return %c0_i32, %c0_i32_0 : i32, i32
  }
  func.func @transform_3(%arg0: i32) -> (i32, i32) {
    %c0_i32 = arith.constant 0 : i32
    %c0_i32_0 = arith.constant 0 : i32
    %c0_i32_1 = arith.constant 0 : i32
    return %c0_i32, %c0_i32_0 : i32, i32
  }
  func.func @transform_4(%arg0: i32) -> (i32, i32) {
    %c0_i32 = arith.constant 0 : i32
    %c0_i32_0 = arith.constant 0 : i32
    %c0_i32_1 = arith.constant 0 : i32
    return %c0_i32, %c0_i32_0 : i32, i32
  }
  func.func @transform_5(%arg0: i32) -> (i32, i32) {
    %c0_i32 = arith.constant 0 : i32
    %c0_i32_0 = arith.constant 0 : i32
    %c0_i32_1 = arith.constant 0 : i32
    return %c0_i32, %c0_i32_0 : i32, i32
  }
  func.func @transform_6(%arg0: i32) -> (i32, i32, i32) {
    %c0_i32 = arith.constant 0 : i32
    %c0_i32_0 = arith.constant 0 : i32
    %c0_i32_1 = arith.constant 0 : i32
    %c0_i32_2 = arith.constant 0 : i32
    return %c0_i32, %c0_i32_0, %c0_i32_1 : i32, i32, i32
  }
  func.func @transform_7(%arg0: i32) -> (i32, i32) {
    %c0_i32 = arith.constant 0 : i32
    %c0_i32_0 = arith.constant 0 : i32
    %c0_i32_1 = arith.constant 0 : i32
    return %c0_i32, %c0_i32_0 : i32, i32
  }
  func.func @transform_8(%arg0: i32) -> (i32, i32) {
    %c0_i32 = arith.constant 0 : i32
    %c0_i32_0 = arith.constant 0 : i32
    %c0_i32_1 = arith.constant 0 : i32
    return %c0_i32, %c0_i32_0 : i32, i32
  }
  func.func @transform_9(%arg0: i32) -> (i32, i32) {
    %c0_i32 = arith.constant 0 : i32
    %c0_i32_0 = arith.constant 0 : i32
    %c0_i32_1 = arith.constant 0 : i32
    return %c0_i32, %c0_i32_0 : i32, i32
  }
  func.func @transform_10(%arg0: i32) -> (i32, i32) {
    %c0_i32 = arith.constant 0 : i32
    %c0_i32_0 = arith.constant 0 : i32
    %c0_i32_1 = arith.constant 0 : i32
    return %c0_i32, %c0_i32_0 : i32, i32
  }
  func.func @transform_11(%arg0: i32) -> (i32, i32) {
    %c0_i32 = arith.constant 0 : i32
    %c0_i32_0 = arith.constant 0 : i32
    %c0_i32_1 = arith.constant 0 : i32
    return %c0_i32, %c0_i32_0 : i32, i32
  }
  func.func @transform_12(%arg0: i32) -> (i32, i32, i32) {
    %c0_i32 = arith.constant 0 : i32
    %c0_i32_0 = arith.constant 0 : i32
    %c0_i32_1 = arith.constant 0 : i32
    %c0_i32_2 = arith.constant 0 : i32
    return %c0_i32, %c0_i32_0, %c0_i32_1 : i32, i32, i32
  }
  func.func @transform_13(%arg0: i32) -> (i32, i32) {
    %c0_i32 = arith.constant 0 : i32
    %c0_i32_0 = arith.constant 0 : i32
    %c0_i32_1 = arith.constant 0 : i32
    return %c0_i32, %c0_i32_0 : i32, i32
  }
  func.func @transform_14(%arg0: i32) -> (i32, i32) {
    %c0_i32 = arith.constant 0 : i32
    %c0_i32_0 = arith.constant 0 : i32
    %c0_i32_1 = arith.constant 0 : i32
    return %c0_i32, %c0_i32_0 : i32, i32
  }
  func.func @transform_15(%arg0: i32) -> (i32, i32) {
    %c0_i32 = arith.constant 0 : i32
    %c0_i32_0 = arith.constant 0 : i32
    %c0_i32_1 = arith.constant 0 : i32
    return %c0_i32, %c0_i32_0 : i32, i32
  }
  func.func @transform_16(%arg0: i32) -> (i32, i32, i32) {
    %c0_i32 = arith.constant 0 : i32
    %c0_i32_0 = arith.constant 0 : i32
    %c0_i32_1 = arith.constant 0 : i32
    return %arg0, %c0_i32, %c0_i32_0 : i32, i32, i32
  }
}

module attributes {stable_mosaic.version = 11 : i64} {
  func.func @_attention_kernel(%arg0: i32, %arg1: memref<1x64x64xf32, #tpu.memory_space<vmem>>, %arg2: memref<1x64xf32, #tpu.memory_space<vmem>>, %arg3: memref<1x64xf32, #tpu.memory_space<vmem>>, %arg4: memref<64x32xf32, #tpu.memory_space<vmem>>, %arg5: memref<32x64xf32, #tpu.memory_space<vmem>>, %arg6: memref<192x64xbf16, #tpu.memory_space<vmem>>, %arg7: memref<192x1xf32, #tpu.memory_space<vmem>>, %arg8: memref<64x64xbf16, #tpu.memory_space<vmem>>, %arg9: memref<1x64xf32, #tpu.memory_space<vmem>>, %arg10: memref<1x64x64xf32, #tpu.memory_space<vmem>>) attributes {dimension_semantics = [#tpu.dimension_semantics<parallel>], iteration_bounds = array<i64: 2>, scalar_prefetch = 0 : i64, scratch_operands = 0 : i64, tpu.core_type = #tpu.core_type<tc>, window_params = [{transform_indices = @transform_0, window_bounds = array<i64: 1, 64, 64>}, {pipeline_mode = #tpu.pipeline_mode<synchronous>, transform_indices = @transform_1, window_bounds = array<i64: 1, 64>}, {pipeline_mode = #tpu.pipeline_mode<synchronous>, transform_indices = @transform_2, window_bounds = array<i64: 1, 64>}, {pipeline_mode = #tpu.pipeline_mode<synchronous>, transform_indices = @transform_3, window_bounds = array<i64: 64, 32>}, {pipeline_mode = #tpu.pipeline_mode<synchronous>, transform_indices = @transform_4, window_bounds = array<i64: 32, 64>}, {pipeline_mode = #tpu.pipeline_mode<synchronous>, transform_indices = @transform_5, window_bounds = array<i64: 192, 64>}, {pipeline_mode = #tpu.pipeline_mode<synchronous>, transform_indices = @transform_6, window_bounds = array<i64: 192, 1>}, {pipeline_mode = #tpu.pipeline_mode<synchronous>, transform_indices = @transform_7, window_bounds = array<i64: 64, 64>}, {pipeline_mode = #tpu.pipeline_mode<synchronous>, transform_indices = @transform_8, window_bounds = array<i64: 1, 64>}, {transform_indices = @transform_9, window_bounds = array<i64: 1, 64, 64>}]} {
    %c0 = arith.constant 0 : index
    %c0_0 = arith.constant 0 : index
    %c0_1 = arith.constant 0 : index
    %0 = vector.load %arg1[%c0, %c0_0, %c0_1] : memref<1x64x64xf32, #tpu.memory_space<vmem>>, vector<1x64x64xf32>
    %1 = vector.shape_cast %0 : vector<1x64x64xf32> to vector<64x64xf32>
    %c0_2 = arith.constant 0 : index
    %c0_3 = arith.constant 0 : index
    %2 = vector.load %arg4[%c0_2, %c0_3] : memref<64x32xf32, #tpu.memory_space<vmem>>, vector<64x32xf32>
    %c0_4 = arith.constant 0 : index
    %c0_5 = arith.constant 0 : index
    %3 = vector.load %arg5[%c0_4, %c0_5] : memref<32x64xf32, #tpu.memory_space<vmem>>, vector<32x64xf32>
    %c0_6 = arith.constant 0 : index
    %c0_7 = arith.constant 0 : index
    %4 = vector.load %arg2[%c0_6, %c0_7] : memref<1x64xf32, #tpu.memory_space<vmem>>, vector<1x64xf32>
    %c0_8 = arith.constant 0 : index
    %c0_9 = arith.constant 0 : index
    %5 = vector.load %arg3[%c0_8, %c0_9] : memref<1x64xf32, #tpu.memory_space<vmem>>, vector<1x64xf32>
    %cst = arith.constant dense<0.000000e+00> : vector<64xf32>
    %6 = vector.multi_reduction <add>, %1, %cst [0] : vector<64x64xf32> to vector<64xf32>
    %7 = vector.shape_cast %6 : vector<64xf32> to vector<1x64xf32>
    %cst_10 = arith.constant dense<0.000000e+00> : vector<1x32xf32>
    %8 = tpu.matmul %7, %2, %cst_10 {dimension_numbers = #tpu.dot_dimension_numbers<[1], [0], [0], [1], [0, 0, 1, 1], [], []>} : vector<1x64xf32>, vector<64x32xf32>, vector<1x32xf32> -> vector<1x32xf32>
    %cst_11 = arith.constant 7.812500e-03 : f32
    %9 = vector.broadcast %cst_11 : f32 to vector<1x32xf32>
    %10 = arith.mulf %8, %9 : vector<1x32xf32>
    %cst_12 = arith.constant dense<0.000000e+00> : vector<1x64xf32>
    %11 = tpu.matmul %10, %3, %cst_12 {dimension_numbers = #tpu.dot_dimension_numbers<[1], [0], [0], [1], [0, 0, 1, 1], [], []>} : vector<1x32xf32>, vector<32x64xf32>, vector<1x64xf32> -> vector<1x64xf32>
    %12 = vector.broadcast %11 : vector<1x64xf32> to vector<64x64xf32>
    %13 = arith.subf %1, %12 : vector<64x64xf32>
    %14 = arith.mulf %13, %13 : vector<64x64xf32>
    %cst_13 = arith.constant dense<0.000000e+00> : vector<64xf32>
    %15 = vector.multi_reduction <add>, %14, %cst_13 [0] : vector<64x64xf32> to vector<64xf32>
    %16 = vector.shape_cast %15 : vector<64xf32> to vector<1x64xf32>
    %cst_14 = arith.constant dense<0.000000e+00> : vector<1x32xf32>
    %17 = tpu.matmul %16, %2, %cst_14 {dimension_numbers = #tpu.dot_dimension_numbers<[1], [0], [0], [1], [0, 0, 1, 1], [], []>} : vector<1x64xf32>, vector<64x32xf32>, vector<1x32xf32> -> vector<1x32xf32>
    %cst_15 = arith.constant 7.812500e-03 : f32
    %18 = vector.broadcast %cst_15 : f32 to vector<1x32xf32>
    %19 = arith.mulf %17, %18 : vector<1x32xf32>
    %cst_16 = arith.constant dense<0.000000e+00> : vector<1x64xf32>
    %20 = tpu.matmul %19, %3, %cst_16 {dimension_numbers = #tpu.dot_dimension_numbers<[1], [0], [0], [1], [0, 0, 1, 1], [], []>} : vector<1x32xf32>, vector<32x64xf32>, vector<1x64xf32> -> vector<1x64xf32>
    %cst_17 = arith.constant 9.99999974E-6 : f32
    %21 = vector.broadcast %cst_17 : f32 to vector<1x64xf32>
    %22 = arith.addf %20, %21 : vector<1x64xf32>
    %23 = math.rsqrt %22 : vector<1x64xf32>
    %24 = vector.broadcast %23 : vector<1x64xf32> to vector<64x64xf32>
    %25 = arith.mulf %13, %24 : vector<64x64xf32>
    %26 = vector.broadcast %4 : vector<1x64xf32> to vector<64x64xf32>
    %27 = arith.mulf %25, %26 : vector<64x64xf32>
    %28 = vector.broadcast %5 : vector<1x64xf32> to vector<64x64xf32>
    %29 = arith.addf %27, %28 : vector<64x64xf32>
    %c0_18 = arith.constant 0 : index
    %c0_19 = arith.constant 0 : index
    %30 = vector.load %arg6[%c0_18, %c0_19] : memref<192x64xbf16, #tpu.memory_space<vmem>>, vector<192x64xbf16>
    %31 = arith.truncf %29 : vector<64x64xf32> to vector<64x64xbf16>
    %cst_20 = arith.constant dense<0.000000e+00> : vector<192x64xf32>
    %32 = tpu.matmul %30, %31, %cst_20 {dimension_numbers = #tpu.dot_dimension_numbers<[1], [1], [0], [0], [0, 0, 1, 0], [], []>} : vector<192x64xbf16>, vector<64x64xbf16>, vector<192x64xf32> -> vector<192x64xf32>
    %c0_21 = arith.constant 0 : index
    %c0_22 = arith.constant 0 : index
    %33 = vector.load %arg7[%c0_21, %c0_22] : memref<192x1xf32, #tpu.memory_space<vmem>>, vector<192x1xf32>
    %34 = vector.broadcast %33 : vector<192x1xf32> to vector<192x64xf32>
    %35 = arith.addf %32, %34 : vector<192x64xf32>
    %36 = vector.extract_strided_slice %35 {offsets = [0, 0], sizes = [64, 64], strides = [1, 1]} : vector<192x64xf32> to vector<64x64xf32>
    %cst_23 = arith.constant 0.594603539 : f32
    %37 = vector.broadcast %cst_23 : f32 to vector<64x64xf32>
    %38 = arith.mulf %36, %37 : vector<64x64xf32>
    %39 = vector.shape_cast %38 : vector<64x64xf32> to vector<8x8x64xf32>
    %40 = vector.extract_strided_slice %35 {offsets = [64, 0], sizes = [64, 64], strides = [1, 1]} : vector<192x64xf32> to vector<64x64xf32>
    %cst_24 = arith.constant 0.594603539 : f32
    %41 = vector.broadcast %cst_24 : f32 to vector<64x64xf32>
    %42 = arith.mulf %40, %41 : vector<64x64xf32>
    %43 = vector.shape_cast %42 : vector<64x64xf32> to vector<8x8x64xf32>
    %44 = vector.extract_strided_slice %35 {offsets = [128, 0], sizes = [64, 64], strides = [1, 1]} : vector<192x64xf32> to vector<64x64xf32>
    %45 = vector.shape_cast %44 : vector<64x64xf32> to vector<8x8x64xf32>
    %46 = tpu.transpose %39, [0, 2, 1] : vector<8x8x64xf32> -> vector<8x64x8xf32>
    %47 = arith.truncf %46 : vector<8x64x8xf32> to vector<8x64x8xbf16>
    %48 = arith.truncf %43 : vector<8x8x64xf32> to vector<8x8x64xbf16>
    %cst_25 = arith.constant dense<0.000000e+00> : vector<8x64x64xf32>
    %49 = tpu.matmul %47, %48, %cst_25 {dimension_numbers = #tpu.dot_dimension_numbers<[2], [1], [1], [2], [0, 0, 0, 1, 1, 2], [0], [0]>} : vector<8x64x8xbf16>, vector<8x8x64xbf16>, vector<8x64x64xf32> -> vector<8x64x64xf32>
    %cst_26 = arith.constant dense<0xFF800000> : vector<8x64xf32>
    %50 = vector.multi_reduction <maximumf>, %49, %cst_26 [2] : vector<8x64x64xf32> to vector<8x64xf32>
    %51 = vector.shape_cast %50 : vector<8x64xf32> to vector<8x64x1xf32>
    %52 = vector.broadcast %51 : vector<8x64x1xf32> to vector<8x64x64xf32>
    %53 = arith.subf %49, %52 : vector<8x64x64xf32>
    %54 = math.exp %53 : vector<8x64x64xf32>
    %cst_27 = arith.constant dense<0.000000e+00> : vector<8x64xf32>
    %55 = vector.multi_reduction <add>, %54, %cst_27 [2] : vector<8x64x64xf32> to vector<8x64xf32>
    %56 = vector.shape_cast %55 : vector<8x64xf32> to vector<8x64x1xf32>
    %57 = tpu.reciprocal %56 {approx = true} : vector<8x64x1xf32> -> vector<8x64x1xf32>
    %58 = vector.broadcast %57 : vector<8x64x1xf32> to vector<8x64x64xf32>
    %59 = arith.mulf %54, %58 : vector<8x64x64xf32>
    %60 = arith.truncf %45 : vector<8x8x64xf32> to vector<8x8x64xbf16>
    %61 = arith.truncf %59 : vector<8x64x64xf32> to vector<8x64x64xbf16>
    %cst_28 = arith.constant dense<0.000000e+00> : vector<8x8x64xf32>
    %62 = tpu.matmul %60, %61, %cst_28 {dimension_numbers = #tpu.dot_dimension_numbers<[2], [2], [1], [1], [0, 0, 0, 1, 1, 1], [0], [0]>} : vector<8x8x64xbf16>, vector<8x64x64xbf16>, vector<8x8x64xf32> -> vector<8x8x64xf32>
    %63 = vector.shape_cast %62 : vector<8x8x64xf32> to vector<64x64xf32>
    %64 = tpu.transpose %63, [1, 0] : vector<64x64xf32> -> vector<64x64xf32>
    %65 = arith.truncf %64 : vector<64x64xf32> to vector<64x64xbf16>
    %c0_29 = arith.constant 0 : index
    %c0_30 = arith.constant 0 : index
    %66 = vector.load %arg8[%c0_29, %c0_30] : memref<64x64xbf16, #tpu.memory_space<vmem>>, vector<64x64xbf16>
    %cst_31 = arith.constant dense<0.000000e+00> : vector<64x64xf32>
    %67 = tpu.matmul %65, %66, %cst_31 {dimension_numbers = #tpu.dot_dimension_numbers<[1], [1], [0], [0], [0, 0, 1, 0], [], []>} : vector<64x64xbf16>, vector<64x64xbf16>, vector<64x64xf32> -> vector<64x64xf32>
    %c0_32 = arith.constant 0 : index
    %c0_33 = arith.constant 0 : index
    %68 = vector.load %arg9[%c0_32, %c0_33] : memref<1x64xf32, #tpu.memory_space<vmem>>, vector<1x64xf32>
    %69 = vector.broadcast %68 : vector<1x64xf32> to vector<64x64xf32>
    %70 = arith.addf %67, %69 : vector<64x64xf32>
    %71 = arith.addf %1, %70 : vector<64x64xf32>
    %c0_34 = arith.constant 0 : index
    %c0_35 = arith.constant 0 : index
    %c0_36 = arith.constant 0 : index
    %72 = vector.load %arg10[%c0_34, %c0_35, %c0_36] : memref<1x64x64xf32, #tpu.memory_space<vmem>>, vector<1x64x64xf32>
    %73 = vector.shape_cast %72 : vector<1x64x64xf32> to vector<64x64xf32>
    %74 = vector.shape_cast %71 : vector<64x64xf32> to vector<1x64x64xf32>
    tpu.vector_store %arg10[%c0_34, %c0_35, %c0_36], %74 {strides = array<i32>} : memref<1x64x64xf32, #tpu.memory_space<vmem>>, vector<1x64x64xf32>,
    return
  }
  func.func @transform_0(%arg0: i32) -> (i32, i32, i32) {
    %c0_i32 = arith.constant 0 : i32
    %c0_i32_0 = arith.constant 0 : i32
    %c0_i32_1 = arith.constant 0 : i32
    return %arg0, %c0_i32, %c0_i32_0 : i32, i32, i32
  }
  func.func @transform_1(%arg0: i32) -> (i32, i32) {
    %c0_i32 = arith.constant 0 : i32
    %c0_i32_0 = arith.constant 0 : i32
    %c0_i32_1 = arith.constant 0 : i32
    return %c0_i32, %c0_i32_0 : i32, i32
  }
  func.func @transform_2(%arg0: i32) -> (i32, i32) {
    %c0_i32 = arith.constant 0 : i32
    %c0_i32_0 = arith.constant 0 : i32
    %c0_i32_1 = arith.constant 0 : i32
    return %c0_i32, %c0_i32_0 : i32, i32
  }
  func.func @transform_3(%arg0: i32) -> (i32, i32) {
    %c0_i32 = arith.constant 0 : i32
    %c0_i32_0 = arith.constant 0 : i32
    %c0_i32_1 = arith.constant 0 : i32
    return %c0_i32, %c0_i32_0 : i32, i32
  }
  func.func @transform_4(%arg0: i32) -> (i32, i32) {
    %c0_i32 = arith.constant 0 : i32
    %c0_i32_0 = arith.constant 0 : i32
    %c0_i32_1 = arith.constant 0 : i32
    return %c0_i32, %c0_i32_0 : i32, i32
  }
  func.func @transform_5(%arg0: i32) -> (i32, i32) {
    %c0_i32 = arith.constant 0 : i32
    %c0_i32_0 = arith.constant 0 : i32
    %c0_i32_1 = arith.constant 0 : i32
    return %c0_i32, %c0_i32_0 : i32, i32
  }
  func.func @transform_6(%arg0: i32) -> (i32, i32) {
    %c0_i32 = arith.constant 0 : i32
    %c0_i32_0 = arith.constant 0 : i32
    %c0_i32_1 = arith.constant 0 : i32
    return %c0_i32, %c0_i32_0 : i32, i32
  }
  func.func @transform_7(%arg0: i32) -> (i32, i32) {
    %c0_i32 = arith.constant 0 : i32
    %c0_i32_0 = arith.constant 0 : i32
    %c0_i32_1 = arith.constant 0 : i32
    return %c0_i32, %c0_i32_0 : i32, i32
  }
  func.func @transform_8(%arg0: i32) -> (i32, i32) {
    %c0_i32 = arith.constant 0 : i32
    %c0_i32_0 = arith.constant 0 : i32
    %c0_i32_1 = arith.constant 0 : i32
    return %c0_i32, %c0_i32_0 : i32, i32
  }
  func.func @transform_9(%arg0: i32) -> (i32, i32, i32) {
    %c0_i32 = arith.constant 0 : i32
    %c0_i32_0 = arith.constant 0 : i32
    %c0_i32_1 = arith.constant 0 : i32
    return %arg0, %c0_i32, %c0_i32_0 : i32, i32, i32
  }
}

module attributes {stable_mosaic.version = 11 : i64} {
  func.func @_resblock_kernel(%arg0: i32, %arg1: memref<1x64x64xf32, #tpu.memory_space<vmem>>, %arg2: memref<1x1x64xf32, #tpu.memory_space<vmem>>, %arg3: memref<1x64xf32, #tpu.memory_space<vmem>>, %arg4: memref<1x64xf32, #tpu.memory_space<vmem>>, %arg5: memref<64x32xf32, #tpu.memory_space<vmem>>, %arg6: memref<32x64xf32, #tpu.memory_space<vmem>>, %arg7: memref<9x64x64xbf16, #tpu.memory_space<vmem>>, %arg8: memref<1x64xf32, #tpu.memory_space<vmem>>, %arg9: memref<1x64xf32, #tpu.memory_space<vmem>>, %arg10: memref<1x64xf32, #tpu.memory_space<vmem>>, %arg11: memref<64x32xf32, #tpu.memory_space<vmem>>, %arg12: memref<32x64xf32, #tpu.memory_space<vmem>>, %arg13: memref<9x64x64xbf16, #tpu.memory_space<vmem>>, %arg14: memref<1x64xf32, #tpu.memory_space<vmem>>, %arg15: memref<1x64x64xf32, #tpu.memory_space<vmem>>, %arg16: memref<10x10x64xbf16, #tpu.memory_space<vmem>>, %arg17: memref<10x10x64xbf16, #tpu.memory_space<vmem>>) attributes {dimension_semantics = [#tpu.dimension_semantics<parallel>], iteration_bounds = array<i64: 2>, scalar_prefetch = 0 : i64, scratch_operands = 2 : i64, tpu.core_type = #tpu.core_type<tc>, window_params = [{transform_indices = @transform_0, window_bounds = array<i64: 1, 64, 64>}, {transform_indices = @transform_1, window_bounds = array<i64: 1, 1, 64>}, {pipeline_mode = #tpu.pipeline_mode<synchronous>, transform_indices = @transform_2, window_bounds = array<i64: 1, 64>}, {pipeline_mode = #tpu.pipeline_mode<synchronous>, transform_indices = @transform_3, window_bounds = array<i64: 1, 64>}, {pipeline_mode = #tpu.pipeline_mode<synchronous>, transform_indices = @transform_4, window_bounds = array<i64: 64, 32>}, {pipeline_mode = #tpu.pipeline_mode<synchronous>, transform_indices = @transform_5, window_bounds = array<i64: 32, 64>}, {pipeline_mode = #tpu.pipeline_mode<synchronous>, transform_indices = @transform_6, window_bounds = array<i64: 9, 64, 64>}, {pipeline_mode = #tpu.pipeline_mode<synchronous>, transform_indices = @transform_7, window_bounds = array<i64: 1, 64>}, {pipeline_mode = #tpu.pipeline_mode<synchronous>, transform_indices = @transform_8, window_bounds = array<i64: 1, 64>}, {pipeline_mode = #tpu.pipeline_mode<synchronous>, transform_indices = @transform_9, window_bounds = array<i64: 1, 64>}, {pipeline_mode = #tpu.pipeline_mode<synchronous>, transform_indices = @transform_10, window_bounds = array<i64: 64, 32>}, {pipeline_mode = #tpu.pipeline_mode<synchronous>, transform_indices = @transform_11, window_bounds = array<i64: 32, 64>}, {pipeline_mode = #tpu.pipeline_mode<synchronous>, transform_indices = @transform_12, window_bounds = array<i64: 9, 64, 64>}, {pipeline_mode = #tpu.pipeline_mode<synchronous>, transform_indices = @transform_13, window_bounds = array<i64: 1, 64>}, {transform_indices = @transform_14, window_bounds = array<i64: 1, 64, 64>}]} {
    %c0 = arith.constant 0 : index
    %c0_0 = arith.constant 0 : index
    %c0_1 = arith.constant 0 : index
    %0 = vector.load %arg1[%c0, %c0_0, %c0_1] : memref<1x64x64xf32, #tpu.memory_space<vmem>>, vector<1x64x64xf32>
    %1 = vector.shape_cast %0 : vector<1x64x64xf32> to vector<64x64xf32>
    %c0_2 = arith.constant 0 : index
    %c0_3 = arith.constant 0 : index
    %2 = vector.load %arg5[%c0_2, %c0_3] : memref<64x32xf32, #tpu.memory_space<vmem>>, vector<64x32xf32>
    %c0_4 = arith.constant 0 : index
    %c0_5 = arith.constant 0 : index
    %3 = vector.load %arg6[%c0_4, %c0_5] : memref<32x64xf32, #tpu.memory_space<vmem>>, vector<32x64xf32>
    %c0_6 = arith.constant 0 : index
    %c0_7 = arith.constant 0 : index
    %4 = vector.load %arg3[%c0_6, %c0_7] : memref<1x64xf32, #tpu.memory_space<vmem>>, vector<1x64xf32>
    %c0_8 = arith.constant 0 : index
    %c0_9 = arith.constant 0 : index
    %5 = vector.load %arg4[%c0_8, %c0_9] : memref<1x64xf32, #tpu.memory_space<vmem>>, vector<1x64xf32>
    %cst = arith.constant dense<0.000000e+00> : vector<64xf32>
    %6 = vector.multi_reduction <add>, %1, %cst [0] : vector<64x64xf32> to vector<64xf32>
    %7 = vector.shape_cast %6 : vector<64xf32> to vector<1x64xf32>
    %cst_10 = arith.constant dense<0.000000e+00> : vector<1x32xf32>
    %8 = tpu.matmul %7, %2, %cst_10 {dimension_numbers = #tpu.dot_dimension_numbers<[1], [0], [0], [1], [0, 0, 1, 1], [], []>} : vector<1x64xf32>, vector<64x32xf32>, vector<1x32xf32> -> vector<1x32xf32>
    %cst_11 = arith.constant 7.812500e-03 : f32
    %9 = vector.broadcast %cst_11 : f32 to vector<1x32xf32>
    %10 = arith.mulf %8, %9 : vector<1x32xf32>
    %cst_12 = arith.constant dense<0.000000e+00> : vector<1x64xf32>
    %11 = tpu.matmul %10, %3, %cst_12 {dimension_numbers = #tpu.dot_dimension_numbers<[1], [0], [0], [1], [0, 0, 1, 1], [], []>} : vector<1x32xf32>, vector<32x64xf32>, vector<1x64xf32> -> vector<1x64xf32>
    %12 = vector.broadcast %11 : vector<1x64xf32> to vector<64x64xf32>
    %13 = arith.subf %1, %12 : vector<64x64xf32>
    %14 = arith.mulf %13, %13 : vector<64x64xf32>
    %cst_13 = arith.constant dense<0.000000e+00> : vector<64xf32>
    %15 = vector.multi_reduction <add>, %14, %cst_13 [0] : vector<64x64xf32> to vector<64xf32>
    %16 = vector.shape_cast %15 : vector<64xf32> to vector<1x64xf32>
    %cst_14 = arith.constant dense<0.000000e+00> : vector<1x32xf32>
    %17 = tpu.matmul %16, %2, %cst_14 {dimension_numbers = #tpu.dot_dimension_numbers<[1], [0], [0], [1], [0, 0, 1, 1], [], []>} : vector<1x64xf32>, vector<64x32xf32>, vector<1x32xf32> -> vector<1x32xf32>
    %cst_15 = arith.constant 7.812500e-03 : f32
    %18 = vector.broadcast %cst_15 : f32 to vector<1x32xf32>
    %19 = arith.mulf %17, %18 : vector<1x32xf32>
    %cst_16 = arith.constant dense<0.000000e+00> : vector<1x64xf32>
    %20 = tpu.matmul %19, %3, %cst_16 {dimension_numbers = #tpu.dot_dimension_numbers<[1], [0], [0], [1], [0, 0, 1, 1], [], []>} : vector<1x32xf32>, vector<32x64xf32>, vector<1x64xf32> -> vector<1x64xf32>
    %cst_17 = arith.constant 9.99999974E-6 : f32
    %21 = vector.broadcast %cst_17 : f32 to vector<1x64xf32>
    %22 = arith.addf %20, %21 : vector<1x64xf32>
    %23 = math.rsqrt %22 : vector<1x64xf32>
    %24 = vector.broadcast %23 : vector<1x64xf32> to vector<64x64xf32>
    %25 = arith.mulf %13, %24 : vector<64x64xf32>
    %26 = vector.broadcast %4 : vector<1x64xf32> to vector<64x64xf32>
    %27 = arith.mulf %25, %26 : vector<64x64xf32>
    %28 = vector.broadcast %5 : vector<1x64xf32> to vector<64x64xf32>
    %29 = arith.addf %27, %28 : vector<64x64xf32>
    %30 = arith.negf %29 : vector<64x64xf32>
    %31 = math.exp %30 : vector<64x64xf32>
    %cst_18 = arith.constant 1.000000e+00 : f32
    %32 = vector.broadcast %cst_18 : f32 to vector<64x64xf32>
    %33 = arith.addf %32, %31 : vector<64x64xf32>
    %34 = arith.divf %32, %33 : vector<64x64xf32>
    %35 = arith.mulf %29, %34 : vector<64x64xf32>
    %cst_19 = arith.constant 0.000000e+00 : bf16
    %36 = vector.broadcast %cst_19 : bf16 to vector<1x10x64xbf16>
    %c0_20 = arith.constant 0 : index
    %c0_21 = arith.constant 0 : index
    %c0_22 = arith.constant 0 : index
    %37 = vector.load %arg16[%c0_20, %c0_21, %c0_22] : memref<10x10x64xbf16, #tpu.memory_space<vmem>>, vector<1x10x64xbf16>
    tpu.vector_store %arg16[%c0_20, %c0_21, %c0_22], %36 {strides = array<i32>} : memref<10x10x64xbf16, #tpu.memory_space<vmem>>, vector<1x10x64xbf16>,
    %cst_23 = arith.constant 0.000000e+00 : bf16
    %38 = vector.broadcast %cst_23 : bf16 to vector<1x10x64xbf16>
    %c9 = arith.constant 9 : index
    %c0_24 = arith.constant 0 : index
    %c0_25 = arith.constant 0 : index
    %39 = vector.load %arg16[%c9, %c0_24, %c0_25] : memref<10x10x64xbf16, #tpu.memory_space<vmem>>, vector<1x10x64xbf16>
    tpu.vector_store %arg16[%c9, %c0_24, %c0_25], %38 {strides = array<i32>} : memref<10x10x64xbf16, #tpu.memory_space<vmem>>, vector<1x10x64xbf16>,
    %cst_26 = arith.constant 0.000000e+00 : bf16
    %40 = vector.broadcast %cst_26 : bf16 to vector<10x1x64xbf16>
    %c0_27 = arith.constant 0 : index
    %c0_28 = arith.constant 0 : index
    %c0_29 = arith.constant 0 : index
    %41 = vector.load %arg16[%c0_27, %c0_28, %c0_29] : memref<10x10x64xbf16, #tpu.memory_space<vmem>>, vector<10x1x64xbf16>
    tpu.vector_store %arg16[%c0_27, %c0_28, %c0_29], %40 {strides = array<i32>} : memref<10x10x64xbf16, #tpu.memory_space<vmem>>, vector<10x1x64xbf16>,
    %cst_30 = arith.constant 0.000000e+00 : bf16
    %42 = vector.broadcast %cst_30 : bf16 to vector<10x1x64xbf16>
    %c0_31 = arith.constant 0 : index
    %c9_32 = arith.constant 9 : index
    %c0_33 = arith.constant 0 : index
    %43 = vector.load %arg16[%c0_31, %c9_32, %c0_33] : memref<10x10x64xbf16, #tpu.memory_space<vmem>>, vector<10x1x64xbf16>
    tpu.vector_store %arg16[%c0_31, %c9_32, %c0_33], %42 {strides = array<i32>} : memref<10x10x64xbf16, #tpu.memory_space<vmem>>, vector<10x1x64xbf16>,
    %44 = vector.shape_cast %35 : vector<64x64xf32> to vector<8x8x64xf32>
    %45 = arith.truncf %44 : vector<8x8x64xf32> to vector<8x8x64xbf16>
    %c1 = arith.constant 1 : index
    %c1_34 = arith.constant 1 : index
    %c0_35 = arith.constant 0 : index
    %46 = vector.load %arg16[%c1, %c1_34, %c0_35] : memref<10x10x64xbf16, #tpu.memory_space<vmem>>, vector<8x8x64xbf16>
    tpu.vector_store %arg16[%c1, %c1_34, %c0_35], %45 {strides = array<i32>} : memref<10x10x64xbf16, #tpu.memory_space<vmem>>, vector<8x8x64xbf16>,
    %c0_36 = arith.constant 0 : index
    %c0_37 = arith.constant 0 : index
    %c0_38 = arith.constant 0 : index
    %47 = vector.load %arg16[%c0_36, %c0_37, %c0_38] : memref<10x10x64xbf16, #tpu.memory_space<vmem>>, vector<8x8x64xbf16>
    %48 = vector.shape_cast %47 : vector<8x8x64xbf16> to vector<64x64xbf16>
    %c0_39 = arith.constant 0 : index
    %c0_40 = arith.constant 0 : index
    %c0_41 = arith.constant 0 : index
    %49 = vector.load %arg7[%c0_39, %c0_40, %c0_41] : memref<9x64x64xbf16, #tpu.memory_space<vmem>>, vector<1x64x64xbf16>
    %50 = vector.shape_cast %49 : vector<1x64x64xbf16> to vector<64x64xbf16>
    %cst_42 = arith.constant dense<0.000000e+00> : vector<64x64xf32>
    %51 = tpu.matmul %48, %50, %cst_42 {dimension_numbers = #tpu.dot_dimension_numbers<[1], [0], [0], [1], [0, 0, 1, 1], [], []>} : vector<64x64xbf16>, vector<64x64xbf16>, vector<64x64xf32> -> vector<64x64xf32>
    %c0_43 = arith.constant 0 : index
    %c1_44 = arith.constant 1 : index
    %c0_45 = arith.constant 0 : index
    %52 = vector.load %arg16[%c0_43, %c1_44, %c0_45] : memref<10x10x64xbf16, #tpu.memory_space<vmem>>, vector<8x8x64xbf16>
    %53 = vector.shape_cast %52 : vector<8x8x64xbf16> to vector<64x64xbf16>
    %c1_46 = arith.constant 1 : index
    %c0_47 = arith.constant 0 : index
    %c0_48 = arith.constant 0 : index
    %54 = vector.load %arg7[%c1_46, %c0_47, %c0_48] : memref<9x64x64xbf16, #tpu.memory_space<vmem>>, vector<1x64x64xbf16>
    %55 = vector.shape_cast %54 : vector<1x64x64xbf16> to vector<64x64xbf16>
    %cst_49 = arith.constant dense<0.000000e+00> : vector<64x64xf32>
    %56 = tpu.matmul %53, %55, %cst_49 {dimension_numbers = #tpu.dot_dimension_numbers<[1], [0], [0], [1], [0, 0, 1, 1], [], []>} : vector<64x64xbf16>, vector<64x64xbf16>, vector<64x64xf32> -> vector<64x64xf32>
    %57 = arith.addf %51, %56 : vector<64x64xf32>
    %c0_50 = arith.constant 0 : index
    %c2 = arith.constant 2 : index
    %c0_51 = arith.constant 0 : index
    %58 = vector.load %arg16[%c0_50, %c2, %c0_51] : memref<10x10x64xbf16, #tpu.memory_space<vmem>>, vector<8x8x64xbf16>
    %59 = vector.shape_cast %58 : vector<8x8x64xbf16> to vector<64x64xbf16>
    %c2_52 = arith.constant 2 : index
    %c0_53 = arith.constant 0 : index
    %c0_54 = arith.constant 0 : index
    %60 = vector.load %arg7[%c2_52, %c0_53, %c0_54] : memref<9x64x64xbf16, #tpu.memory_space<vmem>>, vector<1x64x64xbf16>
    %61 = vector.shape_cast %60 : vector<1x64x64xbf16> to vector<64x64xbf16>
    %cst_55 = arith.constant dense<0.000000e+00> : vector<64x64xf32>
    %62 = tpu.matmul %59, %61, %cst_55 {dimension_numbers = #tpu.dot_dimension_numbers<[1], [0], [0], [1], [0, 0, 1, 1], [], []>} : vector<64x64xbf16>, vector<64x64xbf16>, vector<64x64xf32> -> vector<64x64xf32>
    %63 = arith.addf %57, %62 : vector<64x64xf32>
    %c1_56 = arith.constant 1 : index
    %c0_57 = arith.constant 0 : index
    %c0_58 = arith.constant 0 : index
    %64 = vector.load %arg16[%c1_56, %c0_57, %c0_58] : memref<10x10x64xbf16, #tpu.memory_space<vmem>>, vector<8x8x64xbf16>
    %65 = vector.shape_cast %64 : vector<8x8x64xbf16> to vector<64x64xbf16>
    %c3 = arith.constant 3 : index
    %c0_59 = arith.constant 0 : index
    %c0_60 = arith.constant 0 : index
    %66 = vector.load %arg7[%c3, %c0_59, %c0_60] : memref<9x64x64xbf16, #tpu.memory_space<vmem>>, vector<1x64x64xbf16>
    %67 = vector.shape_cast %66 : vector<1x64x64xbf16> to vector<64x64xbf16>
    %cst_61 = arith.constant dense<0.000000e+00> : vector<64x64xf32>
    %68 = tpu.matmul %65, %67, %cst_61 {dimension_numbers = #tpu.dot_dimension_numbers<[1], [0], [0], [1], [0, 0, 1, 1], [], []>} : vector<64x64xbf16>, vector<64x64xbf16>, vector<64x64xf32> -> vector<64x64xf32>
    %69 = arith.addf %63, %68 : vector<64x64xf32>
    %c1_62 = arith.constant 1 : index
    %c1_63 = arith.constant 1 : index
    %c0_64 = arith.constant 0 : index
    %70 = vector.load %arg16[%c1_62, %c1_63, %c0_64] : memref<10x10x64xbf16, #tpu.memory_space<vmem>>, vector<8x8x64xbf16>
    %71 = vector.shape_cast %70 : vector<8x8x64xbf16> to vector<64x64xbf16>
    %c4 = arith.constant 4 : index
    %c0_65 = arith.constant 0 : index
    %c0_66 = arith.constant 0 : index
    %72 = vector.load %arg7[%c4, %c0_65, %c0_66] : memref<9x64x64xbf16, #tpu.memory_space<vmem>>, vector<1x64x64xbf16>
    %73 = vector.shape_cast %72 : vector<1x64x64xbf16> to vector<64x64xbf16>
    %cst_67 = arith.constant dense<0.000000e+00> : vector<64x64xf32>
    %74 = tpu.matmul %71, %73, %cst_67 {dimension_numbers = #tpu.dot_dimension_numbers<[1], [0], [0], [1], [0, 0, 1, 1], [], []>} : vector<64x64xbf16>, vector<64x64xbf16>, vector<64x64xf32> -> vector<64x64xf32>
    %75 = arith.addf %69, %74 : vector<64x64xf32>
    %c1_68 = arith.constant 1 : index
    %c2_69 = arith.constant 2 : index
    %c0_70 = arith.constant 0 : index
    %76 = vector.load %arg16[%c1_68, %c2_69, %c0_70] : memref<10x10x64xbf16, #tpu.memory_space<vmem>>, vector<8x8x64xbf16>
    %77 = vector.shape_cast %76 : vector<8x8x64xbf16> to vector<64x64xbf16>
    %c5 = arith.constant 5 : index
    %c0_71 = arith.constant 0 : index
    %c0_72 = arith.constant 0 : index
    %78 = vector.load %arg7[%c5, %c0_71, %c0_72] : memref<9x64x64xbf16, #tpu.memory_space<vmem>>, vector<1x64x64xbf16>
    %79 = vector.shape_cast %78 : vector<1x64x64xbf16> to vector<64x64xbf16>
    %cst_73 = arith.constant dense<0.000000e+00> : vector<64x64xf32>
    %80 = tpu.matmul %77, %79, %cst_73 {dimension_numbers = #tpu.dot_dimension_numbers<[1], [0], [0], [1], [0, 0, 1, 1], [], []>} : vector<64x64xbf16>, vector<64x64xbf16>, vector<64x64xf32> -> vector<64x64xf32>
    %81 = arith.addf %75, %80 : vector<64x64xf32>
    %c2_74 = arith.constant 2 : index
    %c0_75 = arith.constant 0 : index
    %c0_76 = arith.constant 0 : index
    %82 = vector.load %arg16[%c2_74, %c0_75, %c0_76] : memref<10x10x64xbf16, #tpu.memory_space<vmem>>, vector<8x8x64xbf16>
    %83 = vector.shape_cast %82 : vector<8x8x64xbf16> to vector<64x64xbf16>
    %c6 = arith.constant 6 : index
    %c0_77 = arith.constant 0 : index
    %c0_78 = arith.constant 0 : index
    %84 = vector.load %arg7[%c6, %c0_77, %c0_78] : memref<9x64x64xbf16, #tpu.memory_space<vmem>>, vector<1x64x64xbf16>
    %85 = vector.shape_cast %84 : vector<1x64x64xbf16> to vector<64x64xbf16>
    %cst_79 = arith.constant dense<0.000000e+00> : vector<64x64xf32>
    %86 = tpu.matmul %83, %85, %cst_79 {dimension_numbers = #tpu.dot_dimension_numbers<[1], [0], [0], [1], [0, 0, 1, 1], [], []>} : vector<64x64xbf16>, vector<64x64xbf16>, vector<64x64xf32> -> vector<64x64xf32>
    %87 = arith.addf %81, %86 : vector<64x64xf32>
    %c2_80 = arith.constant 2 : index
    %c1_81 = arith.constant 1 : index
    %c0_82 = arith.constant 0 : index
    %88 = vector.load %arg16[%c2_80, %c1_81, %c0_82] : memref<10x10x64xbf16, #tpu.memory_space<vmem>>, vector<8x8x64xbf16>
    %89 = vector.shape_cast %88 : vector<8x8x64xbf16> to vector<64x64xbf16>
    %c7 = arith.constant 7 : index
    %c0_83 = arith.constant 0 : index
    %c0_84 = arith.constant 0 : index
    %90 = vector.load %arg7[%c7, %c0_83, %c0_84] : memref<9x64x64xbf16, #tpu.memory_space<vmem>>, vector<1x64x64xbf16>
    %91 = vector.shape_cast %90 : vector<1x64x64xbf16> to vector<64x64xbf16>
    %cst_85 = arith.constant dense<0.000000e+00> : vector<64x64xf32>
    %92 = tpu.matmul %89, %91, %cst_85 {dimension_numbers = #tpu.dot_dimension_numbers<[1], [0], [0], [1], [0, 0, 1, 1], [], []>} : vector<64x64xbf16>, vector<64x64xbf16>, vector<64x64xf32> -> vector<64x64xf32>
    %93 = arith.addf %87, %92 : vector<64x64xf32>
    %c2_86 = arith.constant 2 : index
    %c2_87 = arith.constant 2 : index
    %c0_88 = arith.constant 0 : index
    %94 = vector.load %arg16[%c2_86, %c2_87, %c0_88] : memref<10x10x64xbf16, #tpu.memory_space<vmem>>, vector<8x8x64xbf16>
    %95 = vector.shape_cast %94 : vector<8x8x64xbf16> to vector<64x64xbf16>
    %c8 = arith.constant 8 : index
    %c0_89 = arith.constant 0 : index
    %c0_90 = arith.constant 0 : index
    %96 = vector.load %arg7[%c8, %c0_89, %c0_90] : memref<9x64x64xbf16, #tpu.memory_space<vmem>>, vector<1x64x64xbf16>
    %97 = vector.shape_cast %96 : vector<1x64x64xbf16> to vector<64x64xbf16>
    %cst_91 = arith.constant dense<0.000000e+00> : vector<64x64xf32>
    %98 = tpu.matmul %95, %97, %cst_91 {dimension_numbers = #tpu.dot_dimension_numbers<[1], [0], [0], [1], [0, 0, 1, 1], [], []>} : vector<64x64xbf16>, vector<64x64xbf16>, vector<64x64xf32> -> vector<64x64xf32>
    %99 = arith.addf %93, %98 : vector<64x64xf32>
    %c0_92 = arith.constant 0 : index
    %c0_93 = arith.constant 0 : index
    %100 = vector.load %arg8[%c0_92, %c0_93] : memref<1x64xf32, #tpu.memory_space<vmem>>, vector<1x64xf32>
    %101 = vector.broadcast %100 : vector<1x64xf32> to vector<64x64xf32>
    %102 = arith.addf %99, %101 : vector<64x64xf32>
    %c0_94 = arith.constant 0 : index
    %c0_95 = arith.constant 0 : index
    %c0_96 = arith.constant 0 : index
    %103 = vector.load %arg2[%c0_94, %c0_95, %c0_96] : memref<1x1x64xf32, #tpu.memory_space<vmem>>, vector<1x1x64xf32>
    %104 = vector.shape_cast %103 : vector<1x1x64xf32> to vector<1x64xf32>
    %105 = vector.broadcast %104 : vector<1x64xf32> to vector<64x64xf32>
    %106 = arith.addf %102, %105 : vector<64x64xf32>
    %c0_97 = arith.constant 0 : index
    %c0_98 = arith.constant 0 : index
    %107 = vector.load %arg11[%c0_97, %c0_98] : memref<64x32xf32, #tpu.memory_space<vmem>>, vector<64x32xf32>
    %c0_99 = arith.constant 0 : index
    %c0_100 = arith.constant 0 : index
    %108 = vector.load %arg12[%c0_99, %c0_100] : memref<32x64xf32, #tpu.memory_space<vmem>>, vector<32x64xf32>
    %c0_101 = arith.constant 0 : index
    %c0_102 = arith.constant 0 : index
    %109 = vector.load %arg9[%c0_101, %c0_102] : memref<1x64xf32, #tpu.memory_space<vmem>>, vector<1x64xf32>
    %c0_103 = arith.constant 0 : index
    %c0_104 = arith.constant 0 : index
    %110 = vector.load %arg10[%c0_103, %c0_104] : memref<1x64xf32, #tpu.memory_space<vmem>>, vector<1x64xf32>
    %cst_105 = arith.constant dense<0.000000e+00> : vector<64xf32>
    %111 = vector.multi_reduction <add>, %106, %cst_105 [0] : vector<64x64xf32> to vector<64xf32>
    %112 = vector.shape_cast %111 : vector<64xf32> to vector<1x64xf32>
    %cst_106 = arith.constant dense<0.000000e+00> : vector<1x32xf32>
    %113 = tpu.matmul %112, %107, %cst_106 {dimension_numbers = #tpu.dot_dimension_numbers<[1], [0], [0], [1], [0, 0, 1, 1], [], []>} : vector<1x64xf32>, vector<64x32xf32>, vector<1x32xf32> -> vector<1x32xf32>
    %cst_107 = arith.constant 7.812500e-03 : f32
    %114 = vector.broadcast %cst_107 : f32 to vector<1x32xf32>
    %115 = arith.mulf %113, %114 : vector<1x32xf32>
    %cst_108 = arith.constant dense<0.000000e+00> : vector<1x64xf32>
    %116 = tpu.matmul %115, %108, %cst_108 {dimension_numbers = #tpu.dot_dimension_numbers<[1], [0], [0], [1], [0, 0, 1, 1], [], []>} : vector<1x32xf32>, vector<32x64xf32>, vector<1x64xf32> -> vector<1x64xf32>
    %117 = vector.broadcast %116 : vector<1x64xf32> to vector<64x64xf32>
    %118 = arith.subf %106, %117 : vector<64x64xf32>
    %119 = arith.mulf %118, %118 : vector<64x64xf32>
    %cst_109 = arith.constant dense<0.000000e+00> : vector<64xf32>
    %120 = vector.multi_reduction <add>, %119, %cst_109 [0] : vector<64x64xf32> to vector<64xf32>
    %121 = vector.shape_cast %120 : vector<64xf32> to vector<1x64xf32>
    %cst_110 = arith.constant dense<0.000000e+00> : vector<1x32xf32>
    %122 = tpu.matmul %121, %107, %cst_110 {dimension_numbers = #tpu.dot_dimension_numbers<[1], [0], [0], [1], [0, 0, 1, 1], [], []>} : vector<1x64xf32>, vector<64x32xf32>, vector<1x32xf32> -> vector<1x32xf32>
    %cst_111 = arith.constant 7.812500e-03 : f32
    %123 = vector.broadcast %cst_111 : f32 to vector<1x32xf32>
    %124 = arith.mulf %122, %123 : vector<1x32xf32>
    %cst_112 = arith.constant dense<0.000000e+00> : vector<1x64xf32>
    %125 = tpu.matmul %124, %108, %cst_112 {dimension_numbers = #tpu.dot_dimension_numbers<[1], [0], [0], [1], [0, 0, 1, 1], [], []>} : vector<1x32xf32>, vector<32x64xf32>, vector<1x64xf32> -> vector<1x64xf32>
    %cst_113 = arith.constant 9.99999974E-6 : f32
    %126 = vector.broadcast %cst_113 : f32 to vector<1x64xf32>
    %127 = arith.addf %125, %126 : vector<1x64xf32>
    %128 = math.rsqrt %127 : vector<1x64xf32>
    %129 = vector.broadcast %128 : vector<1x64xf32> to vector<64x64xf32>
    %130 = arith.mulf %118, %129 : vector<64x64xf32>
    %131 = vector.broadcast %109 : vector<1x64xf32> to vector<64x64xf32>
    %132 = arith.mulf %130, %131 : vector<64x64xf32>
    %133 = vector.broadcast %110 : vector<1x64xf32> to vector<64x64xf32>
    %134 = arith.addf %132, %133 : vector<64x64xf32>
    %135 = arith.negf %134 : vector<64x64xf32>
    %136 = math.exp %135 : vector<64x64xf32>
    %cst_114 = arith.constant 1.000000e+00 : f32
    %137 = vector.broadcast %cst_114 : f32 to vector<64x64xf32>
    %138 = arith.addf %137, %136 : vector<64x64xf32>
    %139 = arith.divf %137, %138 : vector<64x64xf32>
    %140 = arith.mulf %134, %139 : vector<64x64xf32>
    %cst_115 = arith.constant 0.000000e+00 : bf16
    %141 = vector.broadcast %cst_115 : bf16 to vector<1x10x64xbf16>
    %c0_116 = arith.constant 0 : index
    %c0_117 = arith.constant 0 : index
    %c0_118 = arith.constant 0 : index
    %142 = vector.load %arg17[%c0_116, %c0_117, %c0_118] : memref<10x10x64xbf16, #tpu.memory_space<vmem>>, vector<1x10x64xbf16>
    tpu.vector_store %arg17[%c0_116, %c0_117, %c0_118], %141 {strides = array<i32>} : memref<10x10x64xbf16, #tpu.memory_space<vmem>>, vector<1x10x64xbf16>,
    %cst_119 = arith.constant 0.000000e+00 : bf16
    %143 = vector.broadcast %cst_119 : bf16 to vector<1x10x64xbf16>
    %c9_120 = arith.constant 9 : index
    %c0_121 = arith.constant 0 : index
    %c0_122 = arith.constant 0 : index
    %144 = vector.load %arg17[%c9_120, %c0_121, %c0_122] : memref<10x10x64xbf16, #tpu.memory_space<vmem>>, vector<1x10x64xbf16>
    tpu.vector_store %arg17[%c9_120, %c0_121, %c0_122], %143 {strides = array<i32>} : memref<10x10x64xbf16, #tpu.memory_space<vmem>>, vector<1x10x64xbf16>,
    %cst_123 = arith.constant 0.000000e+00 : bf16
    %145 = vector.broadcast %cst_123 : bf16 to vector<10x1x64xbf16>
    %c0_124 = arith.constant 0 : index
    %c0_125 = arith.constant 0 : index
    %c0_126 = arith.constant 0 : index
    %146 = vector.load %arg17[%c0_124, %c0_125, %c0_126] : memref<10x10x64xbf16, #tpu.memory_space<vmem>>, vector<10x1x64xbf16>
    tpu.vector_store %arg17[%c0_124, %c0_125, %c0_126], %145 {strides = array<i32>} : memref<10x10x64xbf16, #tpu.memory_space<vmem>>, vector<10x1x64xbf16>,
    %cst_127 = arith.constant 0.000000e+00 : bf16
    %147 = vector.broadcast %cst_127 : bf16 to vector<10x1x64xbf16>
    %c0_128 = arith.constant 0 : index
    %c9_129 = arith.constant 9 : index
    %c0_130 = arith.constant 0 : index
    %148 = vector.load %arg17[%c0_128, %c9_129, %c0_130] : memref<10x10x64xbf16, #tpu.memory_space<vmem>>, vector<10x1x64xbf16>
    tpu.vector_store %arg17[%c0_128, %c9_129, %c0_130], %147 {strides = array<i32>} : memref<10x10x64xbf16, #tpu.memory_space<vmem>>, vector<10x1x64xbf16>,
    %149 = vector.shape_cast %140 : vector<64x64xf32> to vector<8x8x64xf32>
    %150 = arith.truncf %149 : vector<8x8x64xf32> to vector<8x8x64xbf16>
    %c1_131 = arith.constant 1 : index
    %c1_132 = arith.constant 1 : index
    %c0_133 = arith.constant 0 : index
    %151 = vector.load %arg17[%c1_131, %c1_132, %c0_133] : memref<10x10x64xbf16, #tpu.memory_space<vmem>>, vector<8x8x64xbf16>
    tpu.vector_store %arg17[%c1_131, %c1_132, %c0_133], %150 {strides = array<i32>} : memref<10x10x64xbf16, #tpu.memory_space<vmem>>, vector<8x8x64xbf16>,
    %c0_134 = arith.constant 0 : index
    %c0_135 = arith.constant 0 : index
    %c0_136 = arith.constant 0 : index
    %152 = vector.load %arg17[%c0_134, %c0_135, %c0_136] : memref<10x10x64xbf16, #tpu.memory_space<vmem>>, vector<8x8x64xbf16>
    %153 = vector.shape_cast %152 : vector<8x8x64xbf16> to vector<64x64xbf16>
    %c0_137 = arith.constant 0 : index
    %c0_138 = arith.constant 0 : index
    %c0_139 = arith.constant 0 : index
    %154 = vector.load %arg13[%c0_137, %c0_138, %c0_139] : memref<9x64x64xbf16, #tpu.memory_space<vmem>>, vector<1x64x64xbf16>
    %155 = vector.shape_cast %154 : vector<1x64x64xbf16> to vector<64x64xbf16>
    %cst_140 = arith.constant dense<0.000000e+00> : vector<64x64xf32>
    %156 = tpu.matmul %153, %155, %cst_140 {dimension_numbers = #tpu.dot_dimension_numbers<[1], [0], [0], [1], [0, 0, 1, 1], [], []>} : vector<64x64xbf16>, vector<64x64xbf16>, vector<64x64xf32> -> vector<64x64xf32>
    %c0_141 = arith.constant 0 : index
    %c1_142 = arith.constant 1 : index
    %c0_143 = arith.constant 0 : index
    %157 = vector.load %arg17[%c0_141, %c1_142, %c0_143] : memref<10x10x64xbf16, #tpu.memory_space<vmem>>, vector<8x8x64xbf16>
    %158 = vector.shape_cast %157 : vector<8x8x64xbf16> to vector<64x64xbf16>
    %c1_144 = arith.constant 1 : index
    %c0_145 = arith.constant 0 : index
    %c0_146 = arith.constant 0 : index
    %159 = vector.load %arg13[%c1_144, %c0_145, %c0_146] : memref<9x64x64xbf16, #tpu.memory_space<vmem>>, vector<1x64x64xbf16>
    %160 = vector.shape_cast %159 : vector<1x64x64xbf16> to vector<64x64xbf16>
    %cst_147 = arith.constant dense<0.000000e+00> : vector<64x64xf32>
    %161 = tpu.matmul %158, %160, %cst_147 {dimension_numbers = #tpu.dot_dimension_numbers<[1], [0], [0], [1], [0, 0, 1, 1], [], []>} : vector<64x64xbf16>, vector<64x64xbf16>, vector<64x64xf32> -> vector<64x64xf32>
    %162 = arith.addf %156, %161 : vector<64x64xf32>
    %c0_148 = arith.constant 0 : index
    %c2_149 = arith.constant 2 : index
    %c0_150 = arith.constant 0 : index
    %163 = vector.load %arg17[%c0_148, %c2_149, %c0_150] : memref<10x10x64xbf16, #tpu.memory_space<vmem>>, vector<8x8x64xbf16>
    %164 = vector.shape_cast %163 : vector<8x8x64xbf16> to vector<64x64xbf16>
    %c2_151 = arith.constant 2 : index
    %c0_152 = arith.constant 0 : index
    %c0_153 = arith.constant 0 : index
    %165 = vector.load %arg13[%c2_151, %c0_152, %c0_153] : memref<9x64x64xbf16, #tpu.memory_space<vmem>>, vector<1x64x64xbf16>
    %166 = vector.shape_cast %165 : vector<1x64x64xbf16> to vector<64x64xbf16>
    %cst_154 = arith.constant dense<0.000000e+00> : vector<64x64xf32>
    %167 = tpu.matmul %164, %166, %cst_154 {dimension_numbers = #tpu.dot_dimension_numbers<[1], [0], [0], [1], [0, 0, 1, 1], [], []>} : vector<64x64xbf16>, vector<64x64xbf16>, vector<64x64xf32> -> vector<64x64xf32>
    %168 = arith.addf %162, %167 : vector<64x64xf32>
    %c1_155 = arith.constant 1 : index
    %c0_156 = arith.constant 0 : index
    %c0_157 = arith.constant 0 : index
    %169 = vector.load %arg17[%c1_155, %c0_156, %c0_157] : memref<10x10x64xbf16, #tpu.memory_space<vmem>>, vector<8x8x64xbf16>
    %170 = vector.shape_cast %169 : vector<8x8x64xbf16> to vector<64x64xbf16>
    %c3_158 = arith.constant 3 : index
    %c0_159 = arith.constant 0 : index
    %c0_160 = arith.constant 0 : index
    %171 = vector.load %arg13[%c3_158, %c0_159, %c0_160] : memref<9x64x64xbf16, #tpu.memory_space<vmem>>, vector<1x64x64xbf16>
    %172 = vector.shape_cast %171 : vector<1x64x64xbf16> to vector<64x64xbf16>
    %cst_161 = arith.constant dense<0.000000e+00> : vector<64x64xf32>
    %173 = tpu.matmul %170, %172, %cst_161 {dimension_numbers = #tpu.dot_dimension_numbers<[1], [0], [0], [1], [0, 0, 1, 1], [], []>} : vector<64x64xbf16>, vector<64x64xbf16>, vector<64x64xf32> -> vector<64x64xf32>
    %174 = arith.addf %168, %173 : vector<64x64xf32>
    %c1_162 = arith.constant 1 : index
    %c1_163 = arith.constant 1 : index
    %c0_164 = arith.constant 0 : index
    %175 = vector.load %arg17[%c1_162, %c1_163, %c0_164] : memref<10x10x64xbf16, #tpu.memory_space<vmem>>, vector<8x8x64xbf16>
    %176 = vector.shape_cast %175 : vector<8x8x64xbf16> to vector<64x64xbf16>
    %c4_165 = arith.constant 4 : index
    %c0_166 = arith.constant 0 : index
    %c0_167 = arith.constant 0 : index
    %177 = vector.load %arg13[%c4_165, %c0_166, %c0_167] : memref<9x64x64xbf16, #tpu.memory_space<vmem>>, vector<1x64x64xbf16>
    %178 = vector.shape_cast %177 : vector<1x64x64xbf16> to vector<64x64xbf16>
    %cst_168 = arith.constant dense<0.000000e+00> : vector<64x64xf32>
    %179 = tpu.matmul %176, %178, %cst_168 {dimension_numbers = #tpu.dot_dimension_numbers<[1], [0], [0], [1], [0, 0, 1, 1], [], []>} : vector<64x64xbf16>, vector<64x64xbf16>, vector<64x64xf32> -> vector<64x64xf32>
    %180 = arith.addf %174, %179 : vector<64x64xf32>
    %c1_169 = arith.constant 1 : index
    %c2_170 = arith.constant 2 : index
    %c0_171 = arith.constant 0 : index
    %181 = vector.load %arg17[%c1_169, %c2_170, %c0_171] : memref<10x10x64xbf16, #tpu.memory_space<vmem>>, vector<8x8x64xbf16>
    %182 = vector.shape_cast %181 : vector<8x8x64xbf16> to vector<64x64xbf16>
    %c5_172 = arith.constant 5 : index
    %c0_173 = arith.constant 0 : index
    %c0_174 = arith.constant 0 : index
    %183 = vector.load %arg13[%c5_172, %c0_173, %c0_174] : memref<9x64x64xbf16, #tpu.memory_space<vmem>>, vector<1x64x64xbf16>
    %184 = vector.shape_cast %183 : vector<1x64x64xbf16> to vector<64x64xbf16>
    %cst_175 = arith.constant dense<0.000000e+00> : vector<64x64xf32>
    %185 = tpu.matmul %182, %184, %cst_175 {dimension_numbers = #tpu.dot_dimension_numbers<[1], [0], [0], [1], [0, 0, 1, 1], [], []>} : vector<64x64xbf16>, vector<64x64xbf16>, vector<64x64xf32> -> vector<64x64xf32>
    %186 = arith.addf %180, %185 : vector<64x64xf32>
    %c2_176 = arith.constant 2 : index
    %c0_177 = arith.constant 0 : index
    %c0_178 = arith.constant 0 : index
    %187 = vector.load %arg17[%c2_176, %c0_177, %c0_178] : memref<10x10x64xbf16, #tpu.memory_space<vmem>>, vector<8x8x64xbf16>
    %188 = vector.shape_cast %187 : vector<8x8x64xbf16> to vector<64x64xbf16>
    %c6_179 = arith.constant 6 : index
    %c0_180 = arith.constant 0 : index
    %c0_181 = arith.constant 0 : index
    %189 = vector.load %arg13[%c6_179, %c0_180, %c0_181] : memref<9x64x64xbf16, #tpu.memory_space<vmem>>, vector<1x64x64xbf16>
    %190 = vector.shape_cast %189 : vector<1x64x64xbf16> to vector<64x64xbf16>
    %cst_182 = arith.constant dense<0.000000e+00> : vector<64x64xf32>
    %191 = tpu.matmul %188, %190, %cst_182 {dimension_numbers = #tpu.dot_dimension_numbers<[1], [0], [0], [1], [0, 0, 1, 1], [], []>} : vector<64x64xbf16>, vector<64x64xbf16>, vector<64x64xf32> -> vector<64x64xf32>
    %192 = arith.addf %186, %191 : vector<64x64xf32>
    %c2_183 = arith.constant 2 : index
    %c1_184 = arith.constant 1 : index
    %c0_185 = arith.constant 0 : index
    %193 = vector.load %arg17[%c2_183, %c1_184, %c0_185] : memref<10x10x64xbf16, #tpu.memory_space<vmem>>, vector<8x8x64xbf16>
    %194 = vector.shape_cast %193 : vector<8x8x64xbf16> to vector<64x64xbf16>
    %c7_186 = arith.constant 7 : index
    %c0_187 = arith.constant 0 : index
    %c0_188 = arith.constant 0 : index
    %195 = vector.load %arg13[%c7_186, %c0_187, %c0_188] : memref<9x64x64xbf16, #tpu.memory_space<vmem>>, vector<1x64x64xbf16>
    %196 = vector.shape_cast %195 : vector<1x64x64xbf16> to vector<64x64xbf16>
    %cst_189 = arith.constant dense<0.000000e+00> : vector<64x64xf32>
    %197 = tpu.matmul %194, %196, %cst_189 {dimension_numbers = #tpu.dot_dimension_numbers<[1], [0], [0], [1], [0, 0, 1, 1], [], []>} : vector<64x64xbf16>, vector<64x64xbf16>, vector<64x64xf32> -> vector<64x64xf32>
    %198 = arith.addf %192, %197 : vector<64x64xf32>
    %c2_190 = arith.constant 2 : index
    %c2_191 = arith.constant 2 : index
    %c0_192 = arith.constant 0 : index
    %199 = vector.load %arg17[%c2_190, %c2_191, %c0_192] : memref<10x10x64xbf16, #tpu.memory_space<vmem>>, vector<8x8x64xbf16>
    %200 = vector.shape_cast %199 : vector<8x8x64xbf16> to vector<64x64xbf16>
    %c8_193 = arith.constant 8 : index
    %c0_194 = arith.constant 0 : index
    %c0_195 = arith.constant 0 : index
    %201 = vector.load %arg13[%c8_193, %c0_194, %c0_195] : memref<9x64x64xbf16, #tpu.memory_space<vmem>>, vector<1x64x64xbf16>
    %202 = vector.shape_cast %201 : vector<1x64x64xbf16> to vector<64x64xbf16>
    %cst_196 = arith.constant dense<0.000000e+00> : vector<64x64xf32>
    %203 = tpu.matmul %200, %202, %cst_196 {dimension_numbers = #tpu.dot_dimension_numbers<[1], [0], [0], [1], [0, 0, 1, 1], [], []>} : vector<64x64xbf16>, vector<64x64xbf16>, vector<64x64xf32> -> vector<64x64xf32>
    %204 = arith.addf %198, %203 : vector<64x64xf32>
    %c0_197 = arith.constant 0 : index
    %c0_198 = arith.constant 0 : index
    %205 = vector.load %arg14[%c0_197, %c0_198] : memref<1x64xf32, #tpu.memory_space<vmem>>, vector<1x64xf32>
    %206 = vector.broadcast %205 : vector<1x64xf32> to vector<64x64xf32>
    %207 = arith.addf %204, %206 : vector<64x64xf32>
    %208 = arith.addf %1, %207 : vector<64x64xf32>
    %c0_199 = arith.constant 0 : index
    %c0_200 = arith.constant 0 : index
    %c0_201 = arith.constant 0 : index
    %209 = vector.load %arg15[%c0_199, %c0_200, %c0_201] : memref<1x64x64xf32, #tpu.memory_space<vmem>>, vector<1x64x64xf32>
    %210 = vector.shape_cast %209 : vector<1x64x64xf32> to vector<64x64xf32>
    %211 = vector.shape_cast %208 : vector<64x64xf32> to vector<1x64x64xf32>
    tpu.vector_store %arg15[%c0_199, %c0_200, %c0_201], %211 {strides = array<i32>} : memref<1x64x64xf32, #tpu.memory_space<vmem>>, vector<1x64x64xf32>,
    return
  }
  func.func @transform_0(%arg0: i32) -> (i32, i32, i32) {
    %c0_i32 = arith.constant 0 : i32
    %c0_i32_0 = arith.constant 0 : i32
    %c0_i32_1 = arith.constant 0 : i32
    return %arg0, %c0_i32, %c0_i32_0 : i32, i32, i32
  }
  func.func @transform_1(%arg0: i32) -> (i32, i32, i32) {
    %c0_i32 = arith.constant 0 : i32
    %c0_i32_0 = arith.constant 0 : i32
    %c0_i32_1 = arith.constant 0 : i32
    return %arg0, %c0_i32, %c0_i32_0 : i32, i32, i32
  }
  func.func @transform_2(%arg0: i32) -> (i32, i32) {
    %c0_i32 = arith.constant 0 : i32
    %c0_i32_0 = arith.constant 0 : i32
    %c0_i32_1 = arith.constant 0 : i32
    return %c0_i32, %c0_i32_0 : i32, i32
  }
  func.func @transform_3(%arg0: i32) -> (i32, i32) {
    %c0_i32 = arith.constant 0 : i32
    %c0_i32_0 = arith.constant 0 : i32
    %c0_i32_1 = arith.constant 0 : i32
    return %c0_i32, %c0_i32_0 : i32, i32
  }
  func.func @transform_4(%arg0: i32) -> (i32, i32) {
    %c0_i32 = arith.constant 0 : i32
    %c0_i32_0 = arith.constant 0 : i32
    %c0_i32_1 = arith.constant 0 : i32
    return %c0_i32, %c0_i32_0 : i32, i32
  }
  func.func @transform_5(%arg0: i32) -> (i32, i32) {
    %c0_i32 = arith.constant 0 : i32
    %c0_i32_0 = arith.constant 0 : i32
    %c0_i32_1 = arith.constant 0 : i32
    return %c0_i32, %c0_i32_0 : i32, i32
  }
  func.func @transform_6(%arg0: i32) -> (i32, i32, i32) {
    %c0_i32 = arith.constant 0 : i32
    %c0_i32_0 = arith.constant 0 : i32
    %c0_i32_1 = arith.constant 0 : i32
    %c0_i32_2 = arith.constant 0 : i32
    return %c0_i32, %c0_i32_0, %c0_i32_1 : i32, i32, i32
  }
  func.func @transform_7(%arg0: i32) -> (i32, i32) {
    %c0_i32 = arith.constant 0 : i32
    %c0_i32_0 = arith.constant 0 : i32
    %c0_i32_1 = arith.constant 0 : i32
    return %c0_i32, %c0_i32_0 : i32, i32
  }
  func.func @transform_8(%arg0: i32) -> (i32, i32) {
    %c0_i32 = arith.constant 0 : i32
    %c0_i32_0 = arith.constant 0 : i32
    %c0_i32_1 = arith.constant 0 : i32
    return %c0_i32, %c0_i32_0 : i32, i32
  }
  func.func @transform_9(%arg0: i32) -> (i32, i32) {
    %c0_i32 = arith.constant 0 : i32
    %c0_i32_0 = arith.constant 0 : i32
    %c0_i32_1 = arith.constant 0 : i32
    return %c0_i32, %c0_i32_0 : i32, i32
  }
  func.func @transform_10(%arg0: i32) -> (i32, i32) {
    %c0_i32 = arith.constant 0 : i32
    %c0_i32_0 = arith.constant 0 : i32
    %c0_i32_1 = arith.constant 0 : i32
    return %c0_i32, %c0_i32_0 : i32, i32
  }
  func.func @transform_11(%arg0: i32) -> (i32, i32) {
    %c0_i32 = arith.constant 0 : i32
    %c0_i32_0 = arith.constant 0 : i32
    %c0_i32_1 = arith.constant 0 : i32
    return %c0_i32, %c0_i32_0 : i32, i32
  }
  func.func @transform_12(%arg0: i32) -> (i32, i32, i32) {
    %c0_i32 = arith.constant 0 : i32
    %c0_i32_0 = arith.constant 0 : i32
    %c0_i32_1 = arith.constant 0 : i32
    %c0_i32_2 = arith.constant 0 : i32
    return %c0_i32, %c0_i32_0, %c0_i32_1 : i32, i32, i32
  }
  func.func @transform_13(%arg0: i32) -> (i32, i32) {
    %c0_i32 = arith.constant 0 : i32
    %c0_i32_0 = arith.constant 0 : i32
    %c0_i32_1 = arith.constant 0 : i32
    return %c0_i32, %c0_i32_0 : i32, i32
  }
  func.func @transform_14(%arg0: i32) -> (i32, i32, i32) {
    %c0_i32 = arith.constant 0 : i32
    %c0_i32_0 = arith.constant 0 : i32
    %c0_i32_1 = arith.constant 0 : i32
    return %arg0, %c0_i32, %c0_i32_0 : i32, i32, i32
  }
}

</mosaic_0001>

<bundles_post_ra>
// kernel: squeeze.14
= control target key start
LH: loop header
LB: loop body
LE: loop exit
PB: predicated region body
PF: predicated region fallthrough
CT: control target
= control target key end

     0   :  { %s67_s10 = smov 56   ;;  %s68_s11 = smov 40   ;;  %vm3_vm0 = vcmask 64512   ;;  %vm9_vm1 = vcmask 523712   ;;  %vm15_vm2 = vcmask 458112   ;;  %vm21_vm3 = vcmask 392512   ;;  %s111_s0 = inlined_call_operand.vmem [shape: f32[8,8], index: 0, kind: input, shape index: {}]   ;;  %s112_s1 = inlined_call_operand.vmem [shape: f32[64], index: 1, kind: output, shape index: {}]  }
   0x1   :  { %v53_v0 = vld [vmem:[%s111_s0 + $0x7] sm:$0x1]   ;;  %v55_v1 = vld [vmem:[%s111_s0 + $0x5] sm:$0x1]   ;;  %v54_v2 = vld [vmem:[%s111_s0 + $0x6] sm:$0x1]  }
   0x2   :  { %7 = vrot.lane.b32.xlu0 %v53_v0, %s67_s10  ;;  %19 = vrot.lane.b32.xlu1 %v55_v1, %s68_s11  ;;  %v56_v3 = vld [vmem:[%s111_s0 + $0x4] sm:$0x1]   ;;  %v2_v4 = vld [vmem:[%s111_s0] sm:$0x1]   ;;  %s69_s18 = smov 48   ;;  %s70_s19 = smov 32  }
   0x3   :  { %4 = vst.msk [vmem:[#allocation0] sm:$0x1] %vm3_vm0, %v2_v4   ;;  %v57_v5 = vld [vmem:[%s111_s0 + $0x3] sm:$0x1]   ;;  %v58_v6 = vld [vmem:[%s111_s0 + $0x2] sm:$0x1]  }
   0x4   :  { %s71_s24 = smov 24   ;;  %s72_s25 = smov 16   ;;  %v59_v7 = vld [vmem:[%s111_s0 + $0x1] sm:$0x1]   ;;  %vm27_vm4 = vcmask 326912   ;;  %vm33_vm5 = vcmask 261312  }
   0x5   :  { %s73_s0 = smov 8   ;;  %vm39_vm6 = vcmask 195712   ;;  %vm45_vm7 = vcmask 130112  }
   0x6   :  { %13 = vrot.lane.b32.xlu0 %v54_v2, %s69_s18  ;;  %25 = vrot.lane.b32.xlu1 %v56_v3, %s70_s19 }
   0xa   :  { %31 = vrot.lane.b32.xlu0 %v57_v5, %s71_s24  ;;  %37 = vrot.lane.b32.xlu1 %v58_v6, %s72_s25 }
   0xe   :  { %43 = vrot.lane.b32.xlu0 %v59_v7, %s73_s0 }
  0x74   :  { %v8_v8 = vpop.permute.xlu0 %7   ;;  %v20_v9 = vpop.permute.xlu1 %19  }
  0x75   :  { %10 = vst.msk [vmem:[#allocation0] sm:$0x1] %vm9_vm1, %v8_v8  }
  0x78   :  { %v14_v10 = vpop.permute.xlu0 %13   ;;  %v26_v11 = vpop.permute.xlu1 %25  }
  0x79   :  { %16 = vst.msk [vmem:[#allocation0] sm:$0x1] %vm15_vm2, %v14_v10  }
  0x7a   :  { %22 = vst.msk [vmem:[#allocation0] sm:$0x1] %vm21_vm3, %v20_v9  }
  0x7b   :  { %28 = vst.msk [vmem:[#allocation0] sm:$0x1] %vm27_vm4, %v26_v11  }
  0x7c   :  { %v32_v12 = vpop.permute.xlu0 %31   ;;  %v38_v13 = vpop.permute.xlu1 %37  }
  0x7d   :  { %34 = vst.msk [vmem:[#allocation0] sm:$0x1] %vm33_vm5, %v32_v12  }
  0x7e   :  { %40 = vst.msk [vmem:[#allocation0] sm:$0x1] %vm39_vm6, %v38_v13  }
  0x80   :  { %v44_v14 = vpop.permute.xlu0 %43  }
  0x81   :  { %46 = vst.msk [vmem:[#allocation0] sm:$0x1] %vm45_vm7, %v44_v14  }
  0x88   :  { %v50_v15 = vld [vmem:[#allocation0] sm:$0x1] }
  0x89   :  { %52 = vst [vmem:[%s112_s1] sm:$0x1] %v50_v15 }

// kernel: bottleneck_forward.4
= control target key start
LH: loop header
LB: loop body
LE: loop exit
PB: predicated region body
PF: predicated region fallthrough
CT: control target
= control target key end

     0   :  { %s4619_s30 = smov 0   ;;  %s5908_s0 = inlined_call_operand.vmem [shape: f32[2,64,64], index: 0, kind: input, shape index: {}]   ;;  %s5909_s1 = inlined_call_operand.vmem [shape: f32[1,64], index: 1, kind: input, shape index: {}]   ;;  %s5910_s2 = inlined_call_operand.vmem [shape: f32[1,64], index: 2, kind: input, shape index: {}]   ;;  %s5911_s3 = inlined_call_operand.vmem [shape: f32[64,32], index: 3, kind: input, shape index: {}]   ;;  %s5912_s4 = inlined_call_operand.vmem [shape: f32[32,64], index: 4, kind: input, shape index: {}]   ;;  %s5913_s5 = inlined_call_operand.vmem [shape: bf16[192,64], index: 5, kind: input, shape index: {}]   ;;  %s5914_s6 = inlined_call_operand.vmem [shape: f32[192,1], index: 6, kind: input, shape index: {}]   ;;  %s5915_s7 = inlined_call_operand.vmem [shape: bf16[64,64], index: 7, kind: input, shape index: {}]   ;;  %s5916_s8 = inlined_call_operand.vmem [shape: f32[1,64], index: 8, kind: input, shape index: {}]   ;;  %s5917_s9 = inlined_call_operand.vmem [shape: f32[2,64,64], index: 9, kind: output, shape index: {}]  }
   0x1 LB: > { %s3533_s10 = sadd.s32 4294967295, %s4563_s30   ;;  %p3537_p0 = scmp.ge.s32.totalorder %s4563_s30, 1  ;;  %s4563_s30 = sphi %s4619_s30, %s19_s30  }
   0x2   : > { %p287_p1 = scmp.lt.s32.totalorder %s4563_s30, 3 }
   0x4   : > { %p288_p2 = pnand %p3537_p0, %p287_p1 }
   0x6   : > { %291 = sbr.rel (%p288_p2) target bundleno = 2728 (0xaa8), region = 56 }
   0xd   : > { %v342_v0 = vld [vmem:[%s5911_s3] sm:$0xff]  ;;  %v343_v1 = vld [vmem:[%s5911_s3 + $0x8] sm:$0xff]  ;;  %v344_v2 = vld [vmem:[%s5911_s3 + $0x10] sm:$0xff]  ;;  %v4565_v3 = vmov 0.0|0.0   ;;  %vm4566_vm0 = vmmov 0   ;;  %v5918_v6 = vmov 0.0   ;;  %v526_v52 = vlaneseq }
   0xe   : > { %4041 = vmatprep.subr.bf16.mxu0 %v4565_v3  ;;  %v4042_v4 = vpack.c.bf16 %v343_v1, %v342_v0  ;;  %v345_v5 = vld [vmem:[%s5911_s3 + $0x18] sm:$0xff]  ;;  %3773 = vmatprep.mubr.msk.f32.mxu0 %vm4566_vm0, %v5918_v6  ;;  %p323_p3 = scmp.lt.s32.totalorder %s3533_s10, 1  ;;  %v346_v7 = vld [vmem:[%s5911_s3 + $0x20] sm:$0xff]  ;;  %v347_v8 = vld [vmem:[%s5911_s3 + $0x28] sm:$0xff]  ;;  %vm356_vm1 = vcmask 523264   ;;  %vm452_vm2 = vcmask 261120  }
   0xf   : > { %4053 = vmatprep.subr.bf16.mxu1 %v4565_v3  ;;  %v350_v9 = vld [vmem:[%s5912_s4] sm:$0xff]  ;;  %3784 = vmatprep.mubr.msk.f32.mxu1 %vm4566_vm0, %v5918_v6  ;;  %v4045_v10 = vpack.c.bf16 %v345_v5, %v344_v2  ;;  %v351_v11 = vld [vmem:[%s5912_s4 + $0x8] sm:$0xff]  ;;  %v348_v13 = vld [vmem:[%s5911_s3 + $0x30] sm:$0xff]  ;;  %v4048_v15 = vpack.c.bf16 %v347_v8, %v346_v7  ;;  %v4714_v53 = vshrl.u32 %v526_v52, 7  ;;  %vm1489_vm3 = vcmask 1043456  }
  0x10   : > { %4043 = vmatpush3.bf16.msra.mxu0 %v4042_v4  ;;  %s6033_s10 = smov (!%p323_p3, %s3533_s10), 1  ;;  %v4660_v12 = vpack.c.bf16 %v351_v11, %v350_v9  ;;  %v349_v14 = vld [vmem:[%s5911_s3 + $0x38] sm:$0xff]  ;;  %v352_v46 = vld [vmem:[%s5912_s4 + $0x10] sm:$0xff]  ;;  %vm1476_vm4 = vcmask 64512  }
  0x11   : > { %4044 = vmatprep.subr.bf16.mxu0 %v4565_v3  ;;  %s3623_s27 = sshll.u32 %s6033_s10, 6  ;;  %v4051_v31 = vpack.c.bf16 %v349_v14, %v348_v13  ;;  %v353_v47 = vld [vmem:[%s5912_s4 + $0x18] sm:$0xff]  ;;  %v528_v54 = vsub.s32 0, %v4714_v53 }
  0x12   : > { %s4674_s15 = scalar_lea.vmem %s5908_s0, %s3623_s27  ;;  %4055 = vmatpush3.bf16.msra.mxu1 %v4660_v12  ;;  %v4057_v48 = vpack.c.bf16 %v353_v47, %v352_v46  ;;  %v795_v46 = vld [vmem:[%s5914_s6 + $0x60] sm:$0xff]  ;;  %v788_v47 = vld [vmem:[%s5914_s6 + $0x28] sm:$0xff]  ;;  %s5879_s23 = scalar_lea.vmem %s5917_s9, %s3623_s27 }
  0x13   : > { %v334_v16 = vld [vmem:[%s4674_s15] sm:$0xff]  ;;  %v335_v17 = vld [vmem:[%s4674_s15 + $0x8] sm:$0xff]  ;;  %v336_v18 = vld [vmem:[%s4674_s15 + $0x10] sm:$0xff]  ;;  %4056 = vmatprep.subr.bf16.mxu1 %v4565_v3 }
  0x14   : > { %4046 = vmatpush3.bf16.msra.mxu0 %v4045_v10  ;;  %v337_v19 = vld [vmem:[%s4674_s15 + $0x18] sm:$0xff]  ;;  %v338_v20 = vld [vmem:[%s4674_s15 + $0x20] sm:$0xff]  ;;  %v339_v21 = vld [vmem:[%s4674_s15 + $0x28] sm:$0xff]  ;;  %v357_v22 = vsel %vm356_vm1, %v334_v16, 0.0  ;;  %v358_v23 = vsel %vm356_vm1, %v335_v17, 0.0  ;;  %v360_v24 = vsel %vm356_vm1, %v336_v18, 0.0 }
  0x15   : > { %4047 = vmatprep.subr.bf16.mxu0 %v4565_v3  ;;  %v4689_v25 = vld [vmem:[%s4674_s15 + $0x30] sm:$0xff]  ;;  %v359_v26 = vadd.f32 %v358_v23, %v357_v22  ;;  %v362_v27 = vsel %vm356_vm1, %v337_v19, 0.0  ;;  %v364_v28 = vsel %vm356_vm1, %v338_v20, 0.0  ;;  %v366_v29 = vsel %vm356_vm1, %v339_v21, 0.0  ;;  %v341_v33 = vld [vmem:[%s4674_s15 + $0x38] sm:$0xff] }
  0x16   : > { %v368_v30 = vsel %vm356_vm1, %v4689_v25, 0.0  ;;  %v370_v37 = vsel %vm356_vm1, %v341_v33, 0.0  ;;  %4058 = vmatpush3.bf16.msra.mxu1 %v4057_v48 }
  0x17   : > { %v361_v32 = vadd.f32 %v360_v24, %v359_v26 }
  0x18   : > { %4049 = vmatpush3.bf16.msra.mxu0 %v4048_v15 }
  0x19   : > { %4050 = vmatprep.subr.bf16.mxu0 %v4565_v3  ;;  %v363_v34 = vadd.f32 %v362_v27, %v361_v32 }
  0x1b   : > { %v365_v35 = vadd.f32 %v364_v28, %v363_v34 }
  0x1c   : > { %4052 = vmatpush3.bf16.msra.mxu0 %v4051_v31 }
  0x1d   : > { %4059 = vmatprep.subr.bf16.mxu0 %v4565_v3  ;;  %v367_v36 = vadd.f32 %v366_v29, %v365_v35 }
  0x1f   : > { %v369_v38 = vadd.f32 %v368_v30, %v367_v36 }
  0x21   : > { %v371_v39 = vadd.f32 %v370_v37, %v369_v38  ;;  %v4275_v37 = vld [vmem:[%s5913_s5] sm:$0xff]   ;;  %v4568_v38 = vmov 0  }
  0x22   : > { %4105 = vset.pattern.permute.xlu0 %v4568_v38  ;;  %4106 = vset.pattern.permute.xlu1 %v4568_v38 }
  0x23   : > { %v372_v40 = vrot.slane %v371_v39, 4 }
  0x25   : > { %v373_v41 = vadd.f32 %v372_v40, %v371_v39  ;;  %v784_v39 = vld [vmem:[%s5914_s6 + $0x8] sm:$0xff]  ;;  %v791_v40 = vld [vmem:[%s5914_s6 + $0x40] sm:$0xff] }
  0x27   : > { %v374_v42 = vrot.slane %v373_v41, 2 }
  0x29   : > { %v375_v43 = vadd.f32 %v374_v42, %v373_v41  ;;  %v786_v41 = vld [vmem:[%s5914_s6 + $0x18] sm:$0xff]  ;;  %v792_v42 = vld [vmem:[%s5914_s6 + $0x48] sm:$0xff] }
  0x2b   : > { %v376_v44 = vrot.slane %v375_v43, 1 }
  0x2d   : > { %v377_v45 = vadd.f32 %v376_v44, %v375_v43  ;;  %v793_v43 = vld [vmem:[%s5914_s6 + $0x50] sm:$0xff] }
  0x2e   : > { %v789_v44 = vld [vmem:[%s5914_s6 + $0x30] sm:$0xff] }
  0x2f   : > { %3774 = vmatmul.mubr.msk.f32.vlgmr.msra.gmra.mrb[0].mxu0 %vm356_vm1, %v377_v45  ;;  %v787_v45 = vld [vmem:[%s5914_s6 + $0x20] sm:$0xff] }
  0x30   : > { %4061 = vmatpush3.bf16.msra.mxu0 %v4042_v4  ;;  %3803 = vmatprep.mubr.msk.f32.mxu0 %vm4566_vm0, %v5918_v6 }
  0x31   : > { %4062 = vmatprep.subr.bf16.mxu0 %v4565_v3 }
  0x34   : > { %4064 = vmatpush3.bf16.msra.mxu0 %v4045_v10 }
  0x35   : > { %4065 = vmatprep.subr.bf16.mxu0 %v4565_v3 }
  0x38   : > { %4067 = vmatpush3.bf16.msra.mxu0 %v4048_v15 }
  0x39   : > { %4068 = vmatprep.subr.bf16.mxu0 %v4565_v3 }
  0x3c   : > { %4070 = vmatpush3.bf16.msra.mxu0 %v4051_v31 }
  0x3d   : > { %4071 = vmatprep.subr.bf16.mxu0 %v4565_v3 }
 0x102   : > { %v447_v49 = vpop.f32.mrb[0].mxu0 }
 0x103   : > { %v451_v50 = vmul.f32 0.0078125, %v447_v49  ;;  %v3775_v51 = vpop.f32.mrb[1].mxu0  ;;  %v794_v49 = vld [vmem:[%s5914_s6 + $0x58] sm:$0xff] }
 0x105   : > { %3785 = vmatmul.mubr.msk.f32.vlgmr.msra.gmra.mrb[0].mxu1 %vm452_vm2, %v451_v50  ;;  %v790_v50 = vld [vmem:[%s5914_s6 + $0x38] sm:$0xff] }
 0x1d8   : > { %v522_v55 = vpop.f32.mrb[0].mxu1 }
 0x1d9   : > { %v529_v56 = vrot.slane %v522_v55, %v528_v54  ;;  %v3786_v57 = vpop.f32.mrb[1].mxu1 }
 0x1db   : > { %v4719_v58 = vsub.f32 %v334_v16, %v529_v56  ;;  %v4721_v59 = vsub.f32 %v335_v17, %v529_v56  ;;  %v4723_v60 = vsub.f32 %v336_v18, %v529_v56  ;;  %v4725_v61 = vsub.f32 %v337_v19, %v529_v56 }
 0x1dc   : > { %v4727_v62 = vsub.f32 %v338_v20, %v529_v56  ;;  %v4735_v2 = vsub.f32 %v339_v21, %v529_v56  ;;  %v4742_v9 = vsub.f32 %v4689_v25, %v529_v56  ;;  %v4747_v14 = vsub.f32 %v341_v33, %v529_v56 }
 0x1dd   : > { %v538_v63 = vmul.f32 %v4719_v58, %v4719_v58  ;;  %v539_v0 = vmul.f32 %v4721_v59, %v4721_v59  ;;  %v540_v1 = vmul.f32 %v4723_v60, %v4723_v60  ;;  %v541_v4 = vmul.f32 %v4725_v61, %v4725_v61 }
 0x1de   : > { %v542_v10 = vmul.f32 %v4727_v62, %v4727_v62  ;;  %v543_v15 = vmul.f32 %v4735_v2, %v4735_v2  ;;  %v544_v18 = vmul.f32 %v4742_v9, %v4742_v9  ;;  %v545_v21 = vmul.f32 %v4747_v14, %v4747_v14 }
 0x1df   : > { %v546_v5 = vsel %vm356_vm1, %v538_v63, 0.0  ;;  %v547_v7 = vsel %vm356_vm1, %v539_v0, 0.0  ;;  %v549_v11 = vsel %vm356_vm1, %v540_v1, 0.0  ;;  %v551_v16 = vsel %vm356_vm1, %v541_v4, 0.0  ;;  %v3546_v63 = vld [vmem:[%s5909_s1] ss:$0 sm:$0xff] }
 0x1e0   : > { %v548_v8 = vadd.f32 %v547_v7, %v546_v5  ;;  %v553_v19 = vsel %vm356_vm1, %v542_v10, 0.0  ;;  %v555_v22 = vsel %vm356_vm1, %v543_v15, 0.0  ;;  %v557_v24 = vsel %vm356_vm1, %v544_v18, 0.0  ;;  %v3547_v7 = vld [vmem:[%s5910_s2] ss:$0 sm:$0xff] }
 0x1e1   : > { %v559_v26 = vsel %vm356_vm1, %v545_v21, 0.0 }
 0x1e2   : > { %v550_v13 = vadd.f32 %v549_v11, %v548_v8 }
 0x1e4   : > { %v552_v17 = vadd.f32 %v551_v16, %v550_v13 }
 0x1e6   : > { %v554_v20 = vadd.f32 %v553_v19, %v552_v17 }
 0x1e8   : > { %v556_v23 = vadd.f32 %v555_v22, %v554_v20 }
 0x1ea   : > { %v558_v25 = vadd.f32 %v557_v24, %v556_v23 }
 0x1ec   : > { %v560_v27 = vadd.f32 %v559_v26, %v558_v25 }
 0x1ee   : > { %v561_v28 = vrot.slane %v560_v27, 4 }
 0x1f0   : > { %v562_v29 = vadd.f32 %v561_v28, %v560_v27 }
 0x1f2   : > { %v563_v30 = vrot.slane %v562_v29, 2 }
 0x1f4   : > { %v564_v31 = vadd.f32 %v563_v30, %v562_v29  ;;  %v4277_v30 = vld [vmem:[%s5913_s5 + $0x10] sm:$0xff]  }
 0x1f6   : > { %v565_v32 = vrot.slane %v564_v31, 1 }
 0x1f8   : > { %v566_v33 = vadd.f32 %v565_v32, %v564_v31  ;;  %v4278_v31 = vld [vmem:[%s5913_s5 + $0x18] sm:$0xff]   ;;  %v4279_v32 = vld [vmem:[%s5913_s5 + $0x20] sm:$0xff]  }
 0x1fa   : > { %3804 = vmatmul.mubr.msk.f32.vlgmr.msra.gmra.mrb[2].mxu0 %vm356_vm1, %v566_v33  ;;  %v4280_v33 = vld [vmem:[%s5913_s5 + $0x28] sm:$0xff]  }
 0x1fb   : > { %4073 = vmatpush3.bf16.msra.mxu0 %v4660_v12  ;;  %3814 = vmatprep.mubr.msk.f32.mxu0 %vm4566_vm0, %v5918_v6  ;;  %v783_v12 = vld [vmem:[%s5914_s6] sm:$0xff] }
 0x1fc   : > { %4074 = vmatprep.subr.bf16.mxu0 %v4565_v3  ;;  %809 = vperm.xlu0 %4105, %v783_v12   ;;  %v785_v3 = vld [vmem:[%s5914_s6 + $0x10] sm:$0xff] }
 0x1fd   : > { %819 = vperm.xlu1 %4106, %v785_v3  }
 0x1ff   : > { %4076 = vmatpush3.bf16.msra.mxu0 %v4057_v48  ;;  %v796_v48 = vld [vmem:[%s5914_s6 + $0x68] sm:$0xff] }
 0x200   : > { %814 = vperm.xlu0 %4105, %v784_v39  }
 0x201   : > { %849 = vperm.xlu1 %4106, %v791_v40  }
 0x204   : > { %824 = vperm.xlu0 %4105, %v786_v41  }
 0x205   : > { %854 = vperm.xlu1 %4106, %v792_v42  }
 0x208   : > { %859 = vperm.xlu0 %4105, %v793_v43  }
 0x209   : > { %839 = vperm.xlu1 %4106, %v789_v44  }
 0x20c   : > { %829 = vperm.xlu0 %4105, %v787_v45  }
 0x20d   : > { %869 = vperm.xlu1 %4106, %v795_v46  }
 0x210   : > { %834 = vperm.xlu0 %4105, %v788_v47  }
 0x211   : > { %874 = vperm.xlu1 %4106, %v796_v48  }
 0x214   : > { %864 = vperm.xlu0 %4105, %v794_v49  }
 0x218   : > { %844 = vperm.xlu0 %4105, %v790_v50  }
 0x27b   : > { %v810_v12 = vpop.permute.xlu0 %809 }
 0x27c   : > { %v820_v40 = vpop.permute.xlu1 %819 }
 0x27f   : > { %v815_v38 = vpop.permute.xlu0 %814 }
 0x280   : > { %v850_v42 = vpop.permute.xlu1 %849 }
 0x283   : > { %v825_v3 = vpop.permute.xlu0 %824 }
 0x284   : > { %v855_v45 = vpop.permute.xlu1 %854 }
 0x287   : > { %v4872_v39 = vpop.permute.xlu0 %859 }
 0x28b   : > { %v830_v41 = vpop.permute.xlu0 %829 }
 0x28f   : > { %v835_v43 = vpop.permute.xlu0 %834 }
 0x2cd   : > { %v636_v34 = vpop.f32.mrb[2].mxu0 }
 0x2ce   : > { %v640_v35 = vmul.f32 0.0078125, %v636_v34  ;;  %v3805_v36 = vpop.f32.mrb[3].mxu0  ;;  %v4281_v34 = vld [vmem:[%s5913_s5 + $0x30] sm:$0xff]  }
 0x2cf   : > { %v4283_v36 = vld [vmem:[%s5913_s5 + $0x40] sm:$0xff]  }
 0x2d0   : > { %3815 = vmatmul.mubr.msk.f32.vlgmr.msra.gmra.mrb[4].mxu0 %vm452_vm2, %v640_v35  ;;  %v4282_v35 = vld [vmem:[%s5913_s5 + $0x38] sm:$0xff]  }
 0x2d1   : > { %3825 = vmatprep.mubr.msk.bf16.mxu0 %vm356_vm1, %v4275_v37  ;;  %v4284_v37 = vld [vmem:[%s5913_s5 + $0x48] sm:$0xff]  }
 0x3a3   : > { %v710_v51 = vpop.f32.mrb[4].mxu0 }
 0x3a4   : > { %v711_v52 = vadd.f32 1e-05, %v710_v51  ;;  %v3816_v55 = vpop.f32.mrb[5].mxu0 }
 0x3a6   : > { %4291 = vrsqrt.f32 %v711_v52  ;;  %v4874_v52 = vpop.permute.xlu0 %864 }
 0x3b0   : > { %v4292_v56 = vpop.eup %4291 }
 0x3b1   : > { %v718_v57 = vrot.slane %v4292_v56, %v528_v54 }
 0x3b3   : > { %v719_v0 = vmul.f32 %v718_v57, %v4719_v58  ;;  %v720_v1 = vmul.f32 %v718_v57, %v4721_v59  ;;  %v721_v4 = vmul.f32 %v718_v57, %v4723_v60  ;;  %v722_v5 = vmul.f32 %v718_v57, %v4725_v61 }
 0x3b4   : > { %v723_v11 = vmul.f32 %v718_v57, %v4727_v62  ;;  %v724_v13 = vmul.f32 %v718_v57, %v4735_v2  ;;  %v725_v62 = vmul.f32 %v718_v57, %v4742_v9  ;;  %v726_v2 = vmul.f32 %v718_v57, %v4747_v14  ;;  %v4276_v14 = vld [vmem:[%s5913_s5 + $0x8] sm:$0xff]  }
 0x3b5   : > { %v733_v8 = vmul.f32 %v3546_v63, %v719_v0  ;;  %v734_v10 = vmul.f32 %v3546_v63, %v720_v1  ;;  %v735_v53 = vmul.f32 %v3546_v63, %v721_v4  ;;  %v736_v54 = vmul.f32 %v3546_v63, %v722_v5  ;;  %v840_v1 = vpop.permute.xlu1 %839 }
 0x3b6   : > { %v737_v18 = vmul.f32 %v3546_v63, %v723_v11  ;;  %v738_v19 = vmul.f32 %v3546_v63, %v724_v13  ;;  %v739_v24 = vmul.f32 %v3546_v63, %v725_v62  ;;  %v740_v25 = vmul.f32 %v3546_v63, %v726_v2 }
 0x3b7   : > { %v747_v15 = vadd.f32 %v3547_v7, %v733_v8  ;;  %v748_v58 = vadd.f32 %v3547_v7, %v734_v10  ;;  %v749_v16 = vadd.f32 %v3547_v7, %v735_v53  ;;  %v750_v59 = vadd.f32 %v3547_v7, %v736_v54  ;;  %v845_v53 = vpop.permute.xlu0 %844 }
 0x3b8   : > { %v751_v20 = vadd.f32 %v3547_v7, %v737_v18  ;;  %v752_v21 = vadd.f32 %v3547_v7, %v738_v19  ;;  %v753_v26 = vadd.f32 %v3547_v7, %v739_v24  ;;  %v754_v27 = vadd.f32 %v3547_v7, %v740_v25 }
 0x3b9   : > { %v779_v17 = vpack.c.bf16 %v748_v58, %v747_v15  ;;  %v780_v61 = vpack.c.bf16 %v750_v59, %v749_v16  ;;  %v4878_v2 = vpop.permute.xlu1 %869 }
 0x3ba   : > { %v781_v23 = vpack.c.bf16 %v752_v21, %v751_v20  ;;  %v782_v29 = vpack.c.bf16 %v754_v27, %v753_v26 }
 0x3bb   : > { %4077 = vmatprep.subr.msk.bf16.mxu0 %vm356_vm1, %v779_v17  ;;  %v1024_v60 = vsel %vm356_vm1, %v779_v17, 0  ;;  %v1027_v22 = vsel %vm356_vm1, %v780_v61, 0 }
 0x3bc   : > { %3818 = vmatpush3.bf16.xpose.msra.mxu0 %v1024_v60  ;;  %v1030_v28 = vsel %vm356_vm1, %v781_v23, 0  ;;  %v1033_v9 = vsel %vm356_vm1, %v782_v29, 0 }
 0x3bd   : > { %4078 = vmatprep.subr.msk.bf16.mxu0 %vm356_vm1, %v780_v61 }
 0x3c4   : > { %3820 = vmatpush3.bf16.xpose.msra.mxu0 %v1027_v22 }
 0x3c5   : > { %4079 = vmatprep.subr.msk.bf16.mxu0 %vm356_vm1, %v781_v23 }
 0x3cc   : > { %3822 = vmatpush3.bf16.xpose.msra.mxu0 %v1030_v28 }
 0x3cd   : > { %4080 = vmatprep.subr.msk.bf16.mxu0 %vm356_vm1, %v782_v29 }
 0x3d4   : > { %3824 = vmatpush3.bf16.xpose.msra.mxu0 %v1033_v9 }
 0x3db   : > { %3826 = vmatmul.mubr.msk.bf16.vlgmr.msra.gmra.mrb[8].mxu0 %vm356_vm1, %v4276_v14  ;;  %v875_v14 = vpop.permute.xlu1 %874 }
 0x3dc   : > { %3829 = vmatprep.mubr.msk.bf16.mxu0 %vm356_vm1, %v4277_v30 }
 0x3e3   : > { %3830 = vmatmul.mubr.msk.bf16.gmra.mrb[12].mxu0 %vm356_vm1, %v4278_v31 }
 0x3e4   : > { %3833 = vmatprep.mubr.msk.bf16.mxu0 %vm356_vm1, %v4279_v32 }
 0x3eb   : > { %3834 = vmatmul.mubr.msk.bf16.gmra.mrb[16].mxu0 %vm356_vm1, %v4280_v33 }
 0x3ec   : > { %3837 = vmatprep.mubr.msk.bf16.mxu0 %vm356_vm1, %v4281_v34 }
 0x3f3   : > { %3838 = vmatmul.mubr.msk.bf16.gmra.mrb[20].mxu0 %vm356_vm1, %v4282_v35 }
 0x3f4   : > { %3841 = vmatprep.mubr.msk.bf16.mxu0 %vm356_vm1, %v4283_v36  ;;  %v797_v36 = vld [vmem:[%s5914_s6 + $0x70] sm:$0xff] }
 0x3fb   : > { %3842 = vmatmul.mubr.msk.bf16.gmra.mrb[24].mxu0 %vm356_vm1, %v4284_v37  ;;  %v798_v37 = vld [vmem:[%s5914_s6 + $0x78] sm:$0xff] }
 0x4ae   : > { %v3827_v44 = vpop.f32.mrb[8].mxu0 }
 0x4af   : > { %v1078_v46 = vadd.f32 %v3827_v44, %v820_v40  ;;  %v1069_v47 = vpop.f32.mrb[9].mxu0 }
 0x4b0   : > { %v1070_v48 = vadd.f32 %v1069_v47, %v810_v12  ;;  %v3828_v49 = vpop.f32.mrb[10].mxu0  ;;  %v4285_v12 = vld [vmem:[%s5913_s5 + $0x50] sm:$0xff]  }
 0x4b1   : > { %v1081_v50 = vadd.f32 %v3828_v49, %v825_v3  ;;  %v1072_v51 = vpop.f32.mrb[11].mxu0  ;;  %v1166_v56 = vmul.f32 0.59460354, %v1078_v46  ;;  %3845 = vmatprep.mubr.msk.bf16.mxu0 %vm356_vm1, %v4285_v12 }
 0x4b2   : > { %v1073_v55 = vadd.f32 %v1072_v51, %v815_v38  ;;  %v1164_v63 = vmul.f32 0.59460354, %v1070_v48  ;;  %v4286_v38 = vld [vmem:[%s5913_s5 + $0x58] sm:$0xff]  }
 0x4b3   : > { %v1167_v57 = vmul.f32 0.59460354, %v1081_v50  ;;  %3846 = vmatmul.mubr.msk.bf16.gmra.mrb[28].mxu0 %vm356_vm1, %v4286_v38 }
 0x4b4   : > { %v1165_v0 = vmul.f32 0.59460354, %v1073_v55 }
 0x4b5   : > { %v4107_v4 = vpack.i.bf16 %v1167_v57, %v1166_v56 }
 0x4b6   : > { %v4149_v5 = vpack.i.bf16 %v1165_v0, %v1164_v63  ;;  %v3831_v7 = vpop.f32.mrb[12].mxu0 }
 0x4b7   : > { %4108 = vxpose.xlu0.b32.start.end [1/1] (short) (narrow) %v4107_v4, 64  ;;  %v1085_v8 = vpop.f32.mrb[13].mxu0  ;;  %v1094_v10 = vadd.f32 %v3831_v7, %v840_v1 }
 0x4b8   : > { %v1086_v54 = vadd.f32 %v1085_v8, %v830_v41  ;;  %v3832_v11 = vpop.f32.mrb[14].mxu0  ;;  %4150 = vxpose.xlu1.b32.start.end [1/1] (short) (narrow) %v4149_v5, 64 }
 0x4b9   : > { %v1170_v13 = vmul.f32 0.59460354, %v1094_v10  ;;  %v1097_v15 = vadd.f32 %v3832_v11, %v845_v53  ;;  %v1088_v58 = vpop.f32.mrb[15].mxu0 }
 0x4ba   : > { %v1089_v16 = vadd.f32 %v1088_v58, %v835_v43  ;;  %v1168_v17 = vmul.f32 0.59460354, %v1086_v54 }
 0x4bb   : > { %v1171_v59 = vmul.f32 0.59460354, %v1097_v15  ;;  %v799_v15 = vld [vmem:[%s5914_s6 + $0x80] sm:$0xff] }
 0x4bc   : > { %v1169_v60 = vmul.f32 0.59460354, %v1089_v16 }
 0x4bd   : > { %v4233_v61 = vpack.i.bf16 %v1171_v59, %v1170_v13 }
 0x4be   : > { %v4191_v18 = vpack.i.bf16 %v1169_v60, %v1168_v17  ;;  %v3835_v19 = vpop.f32.mrb[16].mxu0 }
 0x4bf   : > { %v1101_v20 = vpop.f32.mrb[17].mxu0  ;;  %v1110_v48 = vadd.f32 %v3835_v19, %v4872_v39 }
 0x4c0   : > { %v1102_v21 = vadd.f32 %v1101_v20, %v850_v42  ;;  %v4876_v62 = vpop.f32.mrb[18].mxu0 }
 0x4c1   : > { %v1104_v22 = vpop.f32.mrb[19].mxu0  ;;  %v1174_v55 = vmul.f32 0.59460354, %v1110_v48 }
 0x4c2   : > { %v1172_v23 = vmul.f32 0.59460354, %v1102_v21  ;;  %v1105_v24 = vadd.f32 %v1104_v22, %v855_v45  ;;  %v1113_v21 = vadd.f32 %v4876_v62, %v4874_v52  ;;  %v802_v52 = vld [vmem:[%s5914_s6 + $0x98] sm:$0xff] }
 0x4c3   : > { %v1470_v1 = vpack.c.bf16 %v1174_v55, %v1174_v55 }
 0x4c4   : > { %v1468_v25 = vpack.c.bf16 %v1172_v23, %v1172_v23  ;;  %v1173_v26 = vmul.f32 0.59460354, %v1105_v24 }
 0x4c6   : > { %v1469_v27 = vpack.c.bf16 %v1173_v26, %v1173_v26  ;;  %v4880_v28 = vpop.f32.mrb[20].mxu0  ;;  %4081 = vmatprep.subr.msk.bf16.mxu1 %vm1489_vm3, %v1468_v25  ;;  %v1491_v29 = vsel %vm1489_vm3, %v1468_v25, 0 }
 0x4c7   : > { %v4884_v9 = vpop.f32.mrb[21].mxu0  ;;  %3850 = vmatpush3.bf16.msra.mxu1 %v1491_v29  ;;  %v1175_v29 = vmul.f32 0.59460354, %v1113_v21 }
 0x4c8   : > { %v4886_v30 = vpop.f32.mrb[22].mxu0  ;;  %4082 = vmatprep.subr.msk.bf16.mxu1 %vm1489_vm3, %v1469_v27  ;;  %v1571_v4 = vsel %vm1489_vm3, %v1469_v27, 0  ;;  %v800_v27 = vld [vmem:[%s5914_s6 + $0x88] sm:$0xff] }
 0x4c9   : > { %v1120_v31 = vpop.f32.mrb[23].mxu0  ;;  %v1471_v62 = vpack.c.bf16 %v1175_v29, %v1175_v29 }
 0x4ca   : > { %v1121_v32 = vadd.f32 %v1120_v31, %v875_v14 }
 0x4cc   : > { %v1177_v33 = vmul.f32 0.59460354, %v1121_v32 }
 0x4ce   : > { %v1473_v34 = vpack.c.bf16 %v1177_v33, %v1177_v33  ;;  %v4928_v58 = vpop.f32.mrb[24].mxu0 }
 0x4cf   : > { %5949 = vst [vmem:[#allocation2_spill] sm:$0xff] %v4928_v58  ;;  %v4932_v17 = vpop.f32.mrb[25].mxu0 }
 0x4d0   : > { %4086 = vmatprep.subr.msk.bf16.mxu0 %vm1489_vm3, %v1473_v34  ;;  %v1891_v35 = vsel %vm1489_vm3, %v1473_v34, 0  ;;  %5950 = vst [vmem:[#allocation3_spill] sm:$0xff] %v4932_v17  ;;  %v4941_v26 = vpop.f32.mrb[26].mxu0 }
 0x4d1   : > { %3900 = vmatpush3.bf16.msra.mxu0 %v1891_v35  ;;  %5951 = vst [vmem:[#allocation4_spill] sm:$0xff] %v4941_v26  ;;  %v4946_v32 = vpop.f32.mrb[27].mxu0  ;;  %v1651_v35 = vsel %vm1489_vm3, %v1470_v1, 0 }
 0x4d2   : > { %5952 = vst [vmem:[#allocation5_spill] sm:$0xff] %v4946_v32 }
 0x4f2   : > { %879 = vperm.xlu1 %4106, %v797_v36  }
 0x4fc   : > { %884 = vperm.xlu0 %4105, %v798_v37  }
 0x51a   : > { %4234 = vxpose.xlu0.b32.start.end [1/1] (short) (narrow) %v4233_v61, 64 }
 0x51b   : > { %4192 = vxpose.xlu1.b32.start.end [1/1] (short) (narrow) %v4191_v18, 64  ;;  %v801_v18 = vld [vmem:[%s5914_s6 + $0x90] sm:$0xff] }
 0x537   : > { %v4905_v3 = vpop.trf.xlu0 }
 0x538   : > { %v4151_v40 = vpop.trf.xlu1  ;;  %v4110_v36 = vunpack.i.l.bf16 %v4905_v3 }
 0x539   : > { %v4152_v41 = vunpack.i.l.bf16 %v4151_v40  ;;  %v4155_v11 = vunpack.i.h.bf16 %v4151_v40  ;;  %v1118_v40 = vadd.f32 %v4884_v9, %v4878_v2  ;;  %v1731_v2 = vsel %vm1489_vm3, %v1471_v62, 0 }
 0x53b   : > { %v4907_v42 = vpop.trf.xlu0 }
 0x53c   : > { %v4156_v43 = vpop.trf.xlu1  ;;  %v4115_v37 = vunpack.i.l.bf16 %v4907_v42 }
 0x53d   : > { %v4157_v44 = vunpack.i.l.bf16 %v4156_v43  ;;  %v4160_v13 = vunpack.i.h.bf16 %v4156_v43 }
 0x53e   : > { %v1444_v38 = vpack.c.bf16 %v4115_v37, %v4110_v36 }
 0x53f   : > { %v1436_v45 = vpack.c.bf16 %v4157_v44, %v4152_v41  ;;  %v4909_v46 = vpop.trf.xlu0  ;;  %v1440_v19 = vpack.c.bf16 %v4160_v13, %v4155_v11 }
 0x540   : > { %v4161_v47 = vpop.trf.xlu1  ;;  %v4120_v41 = vunpack.i.l.bf16 %v4909_v46 }
 0x541   : > { %3851 = vmatprep.mubr.msk.bf16.mxu1 %vm1476_vm4, %v1436_v45  ;;  %v4162_v49 = vunpack.i.l.bf16 %v4161_v47  ;;  %v4165_v22 = vunpack.i.h.bf16 %v4161_v47  ;;  %v1176_v47 = vmul.f32 0.59460354, %v1118_v40 }
 0x543   : > { %v4913_v50 = vpop.trf.xlu0 }
 0x544   : > { %v4166_v51 = vpop.trf.xlu1  ;;  %v4125_v43 = vunpack.i.l.bf16 %v4913_v50 }
 0x545   : > { %v4167_v56 = vunpack.i.l.bf16 %v4166_v51  ;;  %v4170_v23 = vunpack.i.h.bf16 %v4166_v51  ;;  %v1472_v51 = vpack.c.bf16 %v1176_v47, %v1176_v47 }
 0x546   : > { %v1445_v48 = vpack.c.bf16 %v4125_v43, %v4120_v41 }
 0x547   : > { %v1437_v57 = vpack.c.bf16 %v4167_v56, %v4162_v49  ;;  %v4915_v63 = vpop.trf.xlu0  ;;  %v1441_v14 = vpack.c.bf16 %v4170_v23, %v4165_v22  ;;  %v4113_v56 = vunpack.i.h.bf16 %v4905_v3 }
 0x548   : > { %v4171_v0 = vpop.trf.xlu1  ;;  %v4130_v44 = vunpack.i.l.bf16 %v4915_v63  ;;  %v4133_v3 = vunpack.i.h.bf16 %v4915_v63 }
 0x549   : > { %3852 = vmatmul.mubr.msk.bf16.vlgmr.msra.gmra.mrb[4].mxu1 %vm1476_vm4, %v1437_v57  ;;  %v4172_v5 = vunpack.i.l.bf16 %v4171_v0  ;;  %v4175_v24 = vunpack.i.h.bf16 %v4171_v0  ;;  %v4118_v57 = vunpack.i.h.bf16 %v4907_v42 }
 0x54a   : > { %3860 = vmatpush3.bf16.msra.mxu1 %v1571_v4 }
 0x54b   : > { %4083 = vmatprep.subr.msk.bf16.mxu1 %vm1489_vm3, %v1470_v1  ;;  %v4920_v39 = vpop.trf.xlu0  ;;  %v1448_v4 = vpack.c.bf16 %v4118_v57, %v4113_v56 }
 0x54c   : > { %v4176_v7 = vpop.trf.xlu1  ;;  %v4135_v45 = vunpack.i.l.bf16 %v4920_v39  ;;  %v4138_v42 = vunpack.i.h.bf16 %v4920_v39 }
 0x54d   : > { %v4177_v8 = vunpack.i.l.bf16 %v4176_v7  ;;  %v4180_v25 = vunpack.i.h.bf16 %v4176_v7  ;;  %v4128_v7 = vunpack.i.h.bf16 %v4913_v50 }
 0x54e   : > { %v1446_v49 = vpack.c.bf16 %v4135_v45, %v4130_v44 }
 0x54f   : > { %v1438_v10 = vpack.c.bf16 %v4177_v8, %v4172_v5  ;;  %v4922_v53 = vpop.trf.xlu0  ;;  %v1442_v31 = vpack.c.bf16 %v4180_v25, %v4175_v24  ;;  %v4123_v5 = vunpack.i.h.bf16 %v4909_v46 }
 0x550   : > { %v4181_v54 = vpop.trf.xlu1  ;;  %v4140_v55 = vunpack.i.l.bf16 %v4922_v53  ;;  %v4143_v50 = vunpack.i.h.bf16 %v4922_v53 }
 0x551   : > { %3855 = vmatprep.mubr.msk.bf16.mxu1 %vm1476_vm4, %v1438_v10  ;;  %v4182_v16 = vunpack.i.l.bf16 %v4181_v54  ;;  %v4185_v33 = vunpack.i.h.bf16 %v4181_v54  ;;  %v1449_v11 = vpack.c.bf16 %v4128_v7, %v4123_v5 }
 0x553   : > { %v4930_v59 = vpop.trf.xlu0 }
 0x554   : > { %v4186_v60 = vpop.trf.xlu1  ;;  %v4145_v9 = vunpack.i.l.bf16 %v4930_v59 }
 0x555   : > { %v4187_v61 = vunpack.i.l.bf16 %v4186_v60  ;;  %889 = vperm.xlu1 %4106, %v799_v15   ;;  %v4190_v34 = vunpack.i.h.bf16 %v4186_v60 }
 0x556   : > { %v1447_v0 = vpack.c.bf16 %v4145_v9, %v4140_v55 }
 0x557   : > { %v1439_v20 = vpack.c.bf16 %v4187_v61, %v4182_v16  ;;  %v1443_v12 = vpack.c.bf16 %v4190_v34, %v4185_v33  ;;  %v1450_v16 = vpack.c.bf16 %v4138_v42, %v4133_v3  ;;  %v1811_v61 = vsel %vm1489_vm3, %v1472_v51, 0 }
 0x559   : > { %899 = vperm.xlu1 %4106, %v801_v18   ;;  %3856 = vmatmul.mubr.msk.bf16.gmra.mrb[8].mxu1 %vm1476_vm4, %v1439_v20 }
 0x55a   : > { %3861 = vmatprep.mubr.msk.bf16.mxu1 %vm1476_vm4, %v1440_v19 }
 0x55f   : > { %894 = vperm.xlu0 %4105, %v800_v27  }
 0x561   : > { %3862 = vmatmul.mubr.msk.bf16.vlgmr.msra.gmra.mrb[12].mxu1 %vm1476_vm4, %v1441_v14 }
 0x562   : > { %3870 = vmatpush3.bf16.msra.mxu1 %v1651_v35  ;;  %3865 = vmatprep.mubr.msk.bf16.mxu1 %vm1476_vm4, %v1442_v31 }
 0x563   : > { %4084 = vmatprep.subr.msk.bf16.mxu1 %vm1489_vm3, %v1471_v62  ;;  %904 = vperm.xlu0 %4105, %v802_v52  }
 0x569   : > { %3866 = vmatmul.mubr.msk.bf16.gmra.mrb[16].mxu1 %vm1476_vm4, %v1443_v12 }
 0x56a   : > { %3871 = vmatprep.mubr.msk.bf16.mxu1 %vm1476_vm4, %v1444_v38 }
 0x571   : > { %3872 = vmatmul.mubr.msk.bf16.vlgmr.msra.gmra.mrb[20].mxu1 %vm1476_vm4, %v1445_v48  ;;  %v880_v1 = vpop.permute.xlu1 %879 }
 0x572   : > { %3880 = vmatpush3.bf16.msra.mxu1 %v1731_v2  ;;  %3875 = vmatprep.mubr.msk.bf16.mxu1 %vm1476_vm4, %v1446_v49  ;;  %v1126_v8 = vadd.f32 %v4880_v28, %v880_v1  ;;  %v4148_v28 = vunpack.i.h.bf16 %v4930_v59 }
 0x573   : > { %4085 = vmatprep.subr.msk.bf16.mxu1 %vm1489_vm3, %v1472_v51 }
 0x574   : > { %v1178_v13 = vmul.f32 0.59460354, %v1126_v8 }
 0x576   : > { %v1474_v60 = vpack.c.bf16 %v1178_v13, %v1178_v13 }
 0x578   : > { %v1971_v37 = vsel %vm1489_vm3, %v1474_v60, 0 }
 0x579   : > { %3876 = vmatmul.mubr.msk.bf16.gmra.mrb[24].mxu1 %vm1476_vm4, %v1447_v0 }
 0x57a   : > { %3881 = vmatprep.mubr.msk.bf16.mxu1 %vm1476_vm4, %v1448_v4 }
 0x57b   : > { %v885_v10 = vpop.permute.xlu0 %884 }
 0x57c   : > { %v1129_v54 = vadd.f32 %v4886_v30, %v885_v10  ;;  %v1451_v30 = vpack.c.bf16 %v4148_v28, %v4143_v50 }
 0x57e   : > { %v1179_v15 = vmul.f32 0.59460354, %v1129_v54 }
 0x580   : > { %v1475_v46 = vpack.c.bf16 %v1179_v15, %v1179_v15 }
 0x581   : > { %3882 = vmatmul.mubr.msk.bf16.vlgmr.msra.gmra.mrb[28].mxu1 %vm1476_vm4, %v1449_v11 }
 0x582   : > { %3890 = vmatpush3.bf16.msra.mxu1 %v1811_v61  ;;  %4088 = vmatprep.subr.msk.bf16.mxu0 %vm1489_vm3, %v1475_v46  ;;  %v2051_v12 = vsel %vm1489_vm3, %v1475_v46, 0 }
 0x583   : > { %4087 = vmatprep.subr.msk.bf16.mxu1 %vm1489_vm3, %v1474_v60  ;;  %3885 = vmatprep.mubr.msk.bf16.mxu1 %vm1476_vm4, %v1450_v16 }
 0x589   : > { %3886 = vmatmul.mubr.msk.bf16.gmra.mrb[32].mxu1 %vm1476_vm4, %v1451_v30 }
 0x59a   : > { %v4235_v63 = vpop.trf.xlu0 }
 0x59b   : > { %v4193_v39 = vpop.trf.xlu1  ;;  %v4239_v55 = vunpack.i.h.bf16 %v4235_v63  ;;  %v4236_v2 = vunpack.i.l.bf16 %v4235_v63 }
 0x59c   : > { %v4197_v18 = vunpack.i.h.bf16 %v4193_v39  ;;  %v4194_v19 = vunpack.i.l.bf16 %v4193_v39 }
 0x59e   : > { %v4240_v53 = vpop.trf.xlu0 }
 0x59f   : > { %v4198_v59 = vpop.trf.xlu1  ;;  %v4244_v9 = vunpack.i.h.bf16 %v4240_v53  ;;  %v4241_v56 = vunpack.i.l.bf16 %v4240_v53 }
 0x5a0   : > { %v4202_v20 = vunpack.i.h.bf16 %v4198_v59  ;;  %v4199_v21 = vunpack.i.l.bf16 %v4198_v59 }
 0x5a1   : > { %v1460_v8 = vpack.c.bf16 %v4241_v56, %v4236_v2  ;;  %v1464_v3 = vpack.c.bf16 %v4244_v9, %v4239_v55 }
 0x5a2   : > { %v1452_v22 = vpack.c.bf16 %v4199_v21, %v4194_v19  ;;  %v1456_v23 = vpack.c.bf16 %v4202_v20, %v4197_v18  ;;  %v4245_v24 = vpop.trf.xlu0  ;;  %v5013_v21 = vpop.f32.mrb[28].mxu0 }
 0x5a3   : > { %v4203_v25 = vpop.trf.xlu1  ;;  %v4249_v54 = vunpack.i.h.bf16 %v4245_v24  ;;  %v4246_v11 = vunpack.i.l.bf16 %v4245_v24  ;;  %5953 = vst [vmem:[#allocation6_spill] sm:$0xff] %v5013_v21 }
 0x5a4   : > { %3891 = vmatprep.mubr.msk.bf16.mxu1 %vm1476_vm4, %v1452_v22  ;;  %3901 = vmatprep.mubr.msk.bf16.mxu0 %vm1476_vm4, %v1456_v23  ;;  %v4207_v29 = vunpack.i.h.bf16 %v4203_v25  ;;  %v4204_v14 = vunpack.i.l.bf16 %v4203_v25  ;;  %v5015_v22 = vpop.f32.mrb[29].mxu0 }
 0x5a5   : > { %5954 = vst [vmem:[#allocation7_spill] sm:$0xff] %v5015_v22  ;;  %v5017_v23 = vpop.f32.mrb[30].mxu0 }
 0x5a6   : > { %v4250_v27 = vpop.trf.xlu0  ;;  %5955 = vst [vmem:[#allocation8_spill] sm:$0xff] %v5017_v23  ;;  %v5019_v24 = vpop.f32.mrb[31].mxu0 }
 0x5a7   : > { %v4208_v31 = vpop.trf.xlu1  ;;  %v4254_v13 = vunpack.i.h.bf16 %v4250_v27  ;;  %v4251_v15 = vunpack.i.l.bf16 %v4250_v27  ;;  %5956 = vst [vmem:[#allocation9_spill] sm:$0xff] %v5019_v24 }
 0x5a8   : > { %v4212_v52 = vunpack.i.h.bf16 %v4208_v31  ;;  %v4209_v62 = vunpack.i.l.bf16 %v4208_v31 }
 0x5a9   : > { %v1461_v28 = vpack.c.bf16 %v4251_v15, %v4246_v11  ;;  %v1465_v61 = vpack.c.bf16 %v4254_v13, %v4249_v54 }
 0x5aa   : > { %v1453_v33 = vpack.c.bf16 %v4209_v62, %v4204_v14  ;;  %v1457_v34 = vpack.c.bf16 %v4212_v52, %v4207_v29  ;;  %v4255_v35 = vpop.trf.xlu0 }
 0x5ab   : > { %v4213_v36 = vpop.trf.xlu1  ;;  %v4259_v16 = vunpack.i.h.bf16 %v4255_v35  ;;  %v4256_v46 = vunpack.i.l.bf16 %v4255_v35 }
 0x5ac   : > { %3892 = vmatmul.mubr.msk.bf16.vlgmr.msra.gmra.mrb[36].mxu1 %vm1476_vm4, %v1453_v33  ;;  %3902 = vmatmul.mubr.msk.bf16.vlgmr.msra.gmra.mrb[32].mxu0 %vm1476_vm4, %v1457_v34  ;;  %v4217_v38 = vunpack.i.h.bf16 %v4213_v36  ;;  %v4214_v40 = vunpack.i.l.bf16 %v4213_v36 }
 0x5ad   : > { %3910 = vmatpush3.bf16.msra.mxu1 %v1971_v37  ;;  %3920 = vmatpush3.bf16.msra.mxu0 %v2051_v12 }
 0x5ae   : > { %v4260_v41 = vpop.trf.xlu0  ;;  %3929 = vmatprep.subr.bf16.mxu1 %v5918_v6  ;;  %3941 = vmatprep.subr.bf16.mxu0 %v5918_v6 }
 0x5af   : > { %v4218_v43 = vpop.trf.xlu1  ;;  %v4264_v50 = vunpack.i.h.bf16 %v4260_v41  ;;  %v4261_v60 = vunpack.i.l.bf16 %v4260_v41 }
 0x5b0   : > { %v4222_v44 = vunpack.i.h.bf16 %v4218_v43  ;;  %v4219_v45 = vunpack.i.l.bf16 %v4218_v43 }
 0x5b1   : > { %v1462_v30 = vpack.c.bf16 %v4261_v60, %v4256_v46  ;;  %v1466_v63 = vpack.c.bf16 %v4264_v50, %v4259_v16 }
 0x5b2   : > { %v1454_v47 = vpack.c.bf16 %v4219_v45, %v4214_v40  ;;  %v1458_v48 = vpack.c.bf16 %v4222_v44, %v4217_v38  ;;  %v4265_v49 = vpop.trf.xlu0 }
 0x5b3   : > { %v4223_v51 = vpop.trf.xlu1  ;;  %v4269_v39 = vunpack.i.h.bf16 %v4265_v49  ;;  %v4266_v53 = vunpack.i.l.bf16 %v4265_v49 }
 0x5b4   : > { %3895 = vmatprep.mubr.msk.bf16.mxu1 %vm1476_vm4, %v1454_v47  ;;  %3905 = vmatprep.mubr.msk.bf16.mxu0 %vm1476_vm4, %v1458_v48  ;;  %v4227_v57 = vunpack.i.h.bf16 %v4223_v51  ;;  %v4224_v0 = vunpack.i.l.bf16 %v4223_v51 }
 0x5b6   : > { %v4270_v1 = vpop.trf.xlu0 }
 0x5b7   : > { %v4228_v4 = vpop.trf.xlu1  ;;  %v4274_v18 = vunpack.i.h.bf16 %v4270_v1  ;;  %v4271_v19 = vunpack.i.l.bf16 %v4270_v1 }
 0x5b8   : > { %v4232_v5 = vunpack.i.h.bf16 %v4228_v4  ;;  %v4229_v7 = vunpack.i.l.bf16 %v4228_v4 }
 0x5b9   : > { %v1463_v59 = vpack.c.bf16 %v4271_v19, %v4266_v53  ;;  %v1467_v20 = vpack.c.bf16 %v4274_v18, %v4269_v39 }
 0x5ba   : > { %v1455_v42 = vpack.c.bf16 %v4229_v7, %v4224_v0  ;;  %v1459_v10 = vpack.c.bf16 %v4232_v5, %v4227_v57 }
 0x5bc   : > { %3896 = vmatmul.mubr.msk.bf16.gmra.mrb[40].mxu1 %vm1476_vm4, %v1455_v42  ;;  %3906 = vmatmul.mubr.msk.bf16.gmra.mrb[36].mxu0 %vm1476_vm4, %v1459_v10 }
 0x5bd   : > { %3911 = vmatprep.mubr.msk.bf16.mxu1 %vm1476_vm4, %v1460_v8  ;;  %3921 = vmatprep.mubr.msk.bf16.mxu0 %vm1476_vm4, %v1464_v3 }
 0x5c4   : > { %3912 = vmatmul.mubr.msk.bf16.vlgmr.msra.gmra.mrb[44].mxu1 %vm1476_vm4, %v1461_v28  ;;  %3922 = vmatmul.mubr.msk.bf16.vlgmr.msra.gmra.mrb[40].mxu0 %vm1476_vm4, %v1465_v61 }
 0x5c5   : > { %3915 = vmatprep.mubr.msk.bf16.mxu1 %vm1476_vm4, %v1462_v30  ;;  %3925 = vmatprep.mubr.msk.bf16.mxu0 %vm1476_vm4, %v1466_v63 }
 0x5cc   : > { %3916 = vmatmul.mubr.msk.bf16.gmra.mrb[48].mxu1 %vm1476_vm4, %v1463_v59  ;;  %3926 = vmatmul.mubr.msk.bf16.gmra.mrb[44].mxu0 %vm1476_vm4, %v1467_v20 }
 0x5cd   : > { %3937 = vmatprep.mubr.msk.bf16.mxu1 %vm4566_vm0, %v5918_v6  ;;  %3949 = vmatprep.mubr.msk.bf16.mxu0 %vm4566_vm0, %v5918_v6 }
 0x61c   : > { %v5021_v25 = vpop.f32.mrb[4].mxu1 }
 0x61d   : > { %v5023_v27 = vpop.f32.mrb[5].mxu1  ;;  %v2124_v29 = vsel %vm356_vm1, %v5021_v25, -inf }
 0x61e   : > { %2125 = vmax.xlane.f32.xlu1 %v2124_v29  ;;  %v2118_v14 = vsel %vm356_vm1, %v5023_v27, -inf  ;;  %v5029_v31 = vpop.f32.mrb[6].mxu1 }
 0x61f   : > { %2119 = vmax.xlane.f32.xlu0 %v2118_v14  ;;  %v5031_v52 = vpop.f32.mrb[7].mxu1  ;;  %v2127_v33 = vsel %vm356_vm1, %v5029_v31, -inf }
 0x620   : > { %v2121_v62 = vsel %vm356_vm1, %v5031_v52, -inf }
 0x622   : > { %2122 = vmax.xlane.f32.xlu1 %v2121_v62 }
 0x623   : > { %2128 = vmax.xlane.f32.xlu0 %v2127_v33 }
 0x62c   : > { %v5037_v34 = vpop.f32.mrb[8].mxu1 }
 0x62d   : > { %v5039_v35 = vpop.f32.mrb[9].mxu1  ;;  %v2136_v63 = vsel %vm356_vm1, %v5037_v34, -inf }
 0x62e   : > { %v5041_v36 = vpop.f32.mrb[10].mxu1  ;;  %v2130_v53 = vsel %vm356_vm1, %v5039_v35, -inf }
 0x62f   : > { %v5043_v37 = vpop.f32.mrb[11].mxu1  ;;  %v2139_v39 = vsel %vm356_vm1, %v5041_v36, -inf }
 0x630   : > { %v2133_v18 = vsel %vm356_vm1, %v5043_v37, -inf }
 0x634   : > { %v5045_v12 = vpop.f32.mrb[12].mxu1 }
 0x635   : > { %v5047_v38 = vpop.f32.mrb[13].mxu1  ;;  %v2148_v29 = vsel %vm356_vm1, %v5045_v12, -inf }
 0x636   : > { %v5049_v40 = vpop.f32.mrb[14].mxu1 }
 0x637   : > { %v5051_v41 = vpop.f32.mrb[15].mxu1 }
 0x63c   : > { %v5053_v43 = vpop.f32.mrb[16].mxu1 }
 0x63d   : > { %5957 = vst [vmem:[#allocation10_spill] sm:$0xff] %v5053_v43  ;;  %v5055_v44 = vpop.f32.mrb[17].mxu1  ;;  %v2160_v58 = vsel %vm356_vm1, %v5053_v43, -inf }
 0x63e   : > { %v5057_v45 = vpop.f32.mrb[18].mxu1  ;;  %v2154_v43 = vsel %vm356_vm1, %v5055_v44, -inf }
 0x63f   : > { %5958 = vst [vmem:[#allocation11_spill] sm:$0xff] %v5057_v45  ;;  %v5059_v47 = vpop.f32.mrb[19].mxu1 }
 0x644   : > { %v5061_v48 = vpop.f32.mrb[20].mxu1 }
 0x645   : > { %v5063_v49 = vpop.f32.mrb[21].mxu1 }
 0x646   : > { %v5065_v51 = vpop.f32.mrb[22].mxu1 }
 0x647   : > { %v5067_v55 = vpop.f32.mrb[23].mxu1 }
 0x64c   : > { %v5069_v2 = vpop.f32.mrb[24].mxu1 }
 0x64d   : > { %v5071_v9 = vpop.f32.mrb[25].mxu1 }
 0x64e   : > { %v5073_v56 = vpop.f32.mrb[26].mxu1 }
 0x64f   : > { %v5075_v57 = vpop.f32.mrb[27].mxu1 }
 0x654   : > { %v5077_v0 = vpop.f32.mrb[28].mxu1 }
 0x655   : > { %v5079_v1 = vpop.f32.mrb[29].mxu1 }
 0x656   : > { %v5081_v4 = vpop.f32.mrb[30].mxu1 }
 0x657   : > { %v5083_v5 = vpop.f32.mrb[31].mxu1 }
 0x65c   : > { %v5085_v7 = vpop.f32.mrb[32].mxu1 }
 0x65d   : > { %v5087_v8 = vpop.f32.mrb[33].mxu1 }
 0x65e   : > { %v5089_v3 = vpop.f32.mrb[34].mxu1 }
 0x65f   : > { %v5091_v42 = vpop.f32.mrb[35].mxu1 }
 0x67f   : > { %v5093_v10 = vpop.f32.mrb[36].mxu1  ;;  %v5095_v54 = vpop.f32.mrb[32].mxu0 }
 0x680   : > { %v5097_v11 = vpop.f32.mrb[37].mxu1  ;;  %v5099_v13 = vpop.f32.mrb[33].mxu0  ;;  %v2244_v15 = vsel %vm356_vm1, %v5095_v54, -inf }
 0x681   : > { %5959 = vst [vmem:[#allocation12_spill] sm:$0xff] %v5097_v11  ;;  %v5103_v16 = vpop.f32.mrb[34].mxu0  ;;  %2245 = vmax.xlane.f32.xlu1 %v2244_v15  ;;  %v5105_v46 = vpop.f32.mrb[38].mxu1  ;;  %v2238_v61 = vsel %vm356_vm1, %v5099_v13, -inf }
 0x682   : > { %5960 = vst [vmem:[#allocation13_spill] sm:$0xff] %v5105_v46  ;;  %v5107_v50 = vpop.f32.mrb[39].mxu1  ;;  %v5109_v60 = vpop.f32.mrb[35].mxu0  ;;  %v2247_v28 = vsel %vm356_vm1, %v5103_v16, -inf }
 0x683   : > { %5961 = vst [vmem:[#allocation14_spill] sm:$0xff] %v5107_v50  ;;  %2248 = vmax.xlane.f32.xlu0 %v2247_v28  ;;  %v2241_v30 = vsel %vm356_vm1, %v5109_v60, -inf  ;;  %v2151_v28 = vsel %vm356_vm1, %v5049_v40, -inf }
 0x685   : > { %2239 = vmax.xlane.f32.xlu1 %v2238_v61 }
 0x687   : > { %2242 = vmax.xlane.f32.xlu0 %v2241_v30  ;;  %v2142_v30 = vsel %vm356_vm1, %v5047_v38, -inf }
 0x689   : > { %2137 = vmax.xlane.f32.xlu1 %v2136_v63  ;;  %v2145_v63 = vsel %vm356_vm1, %v5051_v41, -inf }
 0x68b   : > { %2140 = vmax.xlane.f32.xlu0 %v2139_v39 }
 0x68d   : > { %2131 = vmax.xlane.f32.xlu1 %v2130_v53 }
 0x68f   : > { %2134 = vmax.xlane.f32.xlu0 %v2133_v18  ;;  %v5125_v19 = vpop.f32.mrb[40].mxu1  ;;  %v5127_v59 = vpop.f32.mrb[36].mxu0 }
 0x690   : > { %5962 = vst [vmem:[#allocation15_spill] sm:$0xff] %v5127_v59  ;;  %v5129_v20 = vpop.f32.mrb[37].mxu0  ;;  %v5133_v14 = vpop.f32.mrb[41].mxu1  ;;  %v2256_v18 = vsel %vm356_vm1, %v5127_v59, -inf }
 0x691   : > { %5963 = vst [vmem:[#allocation16_spill] sm:$0xff] %v5129_v20  ;;  %2149 = vmax.xlane.f32.xlu1 %v2148_v29  ;;  %v5135_v62 = vpop.f32.mrb[42].mxu1  ;;  %v5137_v33 = vpop.f32.mrb[38].mxu0  ;;  %v2250_v24 = vsel %vm356_vm1, %v5129_v20, -inf }
 0x692   : > { %5964 = vst [vmem:[#allocation17_spill] sm:$0xff] %v5135_v62  ;;  %5965 = vst [vmem:[#allocation18_spill] sm:$0xff] %v5137_v33  ;;  %v5139_v15 = vpop.f32.mrb[39].mxu0  ;;  %v5143_v61 = vpop.f32.mrb[43].mxu1 }
 0x693   : > { %5966 = vst [vmem:[#allocation19_spill] sm:$0xff] %v5139_v15  ;;  %2152 = vmax.xlane.f32.xlu0 %v2151_v28  ;;  %v2253_v22 = vsel %vm356_vm1, %v5139_v15, -inf }
 0x695   : > { %2143 = vmax.xlane.f32.xlu1 %v2142_v30  ;;  %v2259_v30 = vsel %vm356_vm1, %v5137_v33, -inf  ;;  %v2157_v33 = vsel %vm356_vm1, %v5059_v47, -inf }
 0x697   : > { %2146 = vmax.xlane.f32.xlu0 %v2145_v63  ;;  %v5149_v39 = vpop.f32.mrb[44].mxu1  ;;  %v5151_v53 = vpop.f32.mrb[40].mxu0 }
 0x698   : > { %v5155_v29 = vpop.f32.mrb[41].mxu0  ;;  %v5157_v6 = vpop.f32.mrb[45].mxu1 }
 0x699   : > { %2257 = vmax.xlane.f32.xlu1 %v2256_v18  ;;  %v5159_v28 = vpop.f32.mrb[46].mxu1  ;;  %v5161_v21 = vpop.f32.mrb[42].mxu0  ;;  %v2286_v59 = vsel %vm356_vm1, %v5155_v29, -inf }
 0x69a   : > { %v5165_v63 = vpop.f32.mrb[43].mxu0  ;;  %v5167_v23 = vpop.f32.mrb[47].mxu1 }
 0x69b   : > { %2260 = vmax.xlane.f32.xlu0 %v2259_v30 }
 0x69d   : > { %2251 = vmax.xlane.f32.xlu1 %v2250_v24  ;;  %v2163_v24 = vsel %vm356_vm1, %v5057_v45, -inf  ;;  %v2295_v45 = vsel %vm356_vm1, %v5161_v21, -inf }
 0x69f   : > { %2254 = vmax.xlane.f32.xlu0 %v2253_v22  ;;  %v5173_v18 = vpop.f32.mrb[44].mxu0  ;;  %v5175_v26 = vpop.f32.mrb[48].mxu1 }
 0x6a0   : > { %5967 = vst [vmem:[#allocation20_spill] sm:$0xff] %v5173_v18  ;;  %v5179_v32 = vpop.f32.mrb[45].mxu0  ;;  %v5181_v17 = vpop.f32.mrb[49].mxu1 }
 0x6a1   : > { %5968 = vst [vmem:[#allocation21_spill] sm:$0xff] %v5181_v17  ;;  %2161 = vmax.xlane.f32.xlu1 %v2160_v58  ;;  %v5183_v30 = vpop.f32.mrb[50].mxu1  ;;  %v5185_v20 = vpop.f32.mrb[46].mxu0  ;;  %v2292_v58 = vsel %vm356_vm1, %v5151_v53, -inf }
 0x6a2   : > { %5969 = vst [vmem:[#allocation22_spill] sm:$0xff] %v5183_v30  ;;  %5970 = vst [vmem:[#allocation23_spill] sm:$0xff] %v5185_v20  ;;  %v5189_v22 = vpop.f32.mrb[47].mxu0  ;;  %v5191_v15 = vpop.f32.mrb[51].mxu1 }
 0x6a3   : > { %2164 = vmax.xlane.f32.xlu0 %v2163_v24  ;;  %v2289_v24 = vsel %vm356_vm1, %v5165_v63, -inf }
 0x6a5   : > { %2155 = vmax.xlane.f32.xlu1 %v2154_v43  ;;  %v2172_v43 = vsel %vm356_vm1, %v5061_v48, -inf }
 0x6a7   : > { %2158 = vmax.xlane.f32.xlu0 %v2157_v33  ;;  %v2175_v33 = vsel %vm356_vm1, %v5065_v51, -inf }
 0x6a9   : > { %2293 = vmax.xlane.f32.xlu1 %v2292_v58  ;;  %v2166_v58 = vsel %vm356_vm1, %v5063_v49, -inf }
 0x6ab   : > { %2296 = vmax.xlane.f32.xlu0 %v2295_v45  ;;  %v2169_v45 = vsel %vm356_vm1, %v5067_v55, -inf }
 0x6ad   : > { %2287 = vmax.xlane.f32.xlu1 %v2286_v59  ;;  %v2304_v59 = vsel %vm356_vm1, %v5173_v18, -inf }
 0x6af   : > { %2290 = vmax.xlane.f32.xlu0 %v2289_v24  ;;  %v2307_v24 = vsel %vm356_vm1, %v5185_v20, -inf  ;;  %v5245_v20 = vpop.permute.xlu1 %889 }
 0x6b0   : > { %5972 = vst [vmem:[#allocation25_spill] sm:$0xff] %v5245_v20  ;;  %v2232_v20 = vsel %vm356_vm1, %v5125_v19, -inf }
 0x6b1   : > { %2173 = vmax.xlane.f32.xlu1 %v2172_v43  ;;  %v2298_v43 = vsel %vm356_vm1, %v5179_v32, -inf }
 0x6b3   : > { %2176 = vmax.xlane.f32.xlu0 %v2175_v33  ;;  %v2301_v33 = vsel %vm356_vm1, %v5189_v22, -inf }
 0x6b5   : > { %2167 = vmax.xlane.f32.xlu1 %v2166_v58  ;;  %v2184_v58 = vsel %vm356_vm1, %v5069_v2, -inf }
 0x6b7   : > { %2170 = vmax.xlane.f32.xlu0 %v2169_v45  ;;  %v2187_v45 = vsel %vm356_vm1, %v5073_v56, -inf }
 0x6b9   : > { %2305 = vmax.xlane.f32.xlu1 %v2304_v59  ;;  %v2178_v59 = vsel %vm356_vm1, %v5071_v9, -inf }
 0x6bb   : > { %2308 = vmax.xlane.f32.xlu0 %v2307_v24  ;;  %v2181_v24 = vsel %vm356_vm1, %v5075_v57, -inf }
 0x6bd   : > { %2299 = vmax.xlane.f32.xlu1 %v2298_v43  ;;  %v2196_v43 = vsel %vm356_vm1, %v5077_v0, -inf }
 0x6bf   : > { %2302 = vmax.xlane.f32.xlu0 %v2301_v33  ;;  %v2199_v33 = vsel %vm356_vm1, %v5081_v4, -inf }
 0x6c1   : > { %2185 = vmax.xlane.f32.xlu1 %v2184_v58  ;;  %v2190_v58 = vsel %vm356_vm1, %v5079_v1, -inf }
 0x6c3   : > { %2188 = vmax.xlane.f32.xlu0 %v2187_v45  ;;  %v2193_v45 = vsel %vm356_vm1, %v5083_v5, -inf }
 0x6c5   : > { %2179 = vmax.xlane.f32.xlu1 %v2178_v59  ;;  %v2208_v59 = vsel %vm356_vm1, %v5085_v7, -inf }
 0x6c7   : > { %2182 = vmax.xlane.f32.xlu0 %v2181_v24  ;;  %v5239_v24 = vpop.permute.xlu0 %894 }
 0x6c8   : > { %5971 = vst [vmem:[#allocation24_spill] sm:$0xff] %v5239_v24  ;;  %v2223_v24 = vsel %vm356_vm1, %v5105_v46, -inf }
 0x6c9   : > { %2197 = vmax.xlane.f32.xlu1 %v2196_v43  ;;  %v2211_v43 = vsel %vm356_vm1, %v5089_v3, -inf }
 0x6cb   : > { %2200 = vmax.xlane.f32.xlu0 %v2199_v33  ;;  %v2202_v33 = vsel %vm356_vm1, %v5087_v8, -inf }
 0x6cd   : > { %2191 = vmax.xlane.f32.xlu1 %v2190_v58  ;;  %v2205_v58 = vsel %vm356_vm1, %v5091_v42, -inf }
 0x6cf   : > { %2194 = vmax.xlane.f32.xlu0 %v2193_v45  ;;  %v5249_v45 = vpop.permute.xlu0 %904 }
 0x6d0   : > { %5973 = vst [vmem:[#allocation26_spill] sm:$0xff] %v5249_v45 }
 0x6d1   : > { %2209 = vmax.xlane.f32.xlu1 %v2208_v59  ;;  %v2220_v59 = vsel %vm356_vm1, %v5093_v10, -inf }
 0x6d3   : > { %2212 = vmax.xlane.f32.xlu0 %v2211_v43  ;;  %v5255_v43 = vpop.permute.xlu1 %899  ;;  %v2120_v18 = vpop.xlane.xlu0 %2119 }
 0x6d4   : > { %5974 = vst [vmem:[#allocation27_spill] sm:$0xff] %v5255_v43 }
 0x6d5   : > { %2203 = vmax.xlane.f32.xlu1 %v2202_v33  ;;  %v2214_v33 = vsel %vm356_vm1, %v5097_v11, -inf  ;;  %v2226_v11 = vsel %vm356_vm1, %v5133_v14, -inf }
 0x6d7   : > { %2206 = vmax.xlane.f32.xlu0 %v2205_v58  ;;  %v2217_v58 = vsel %vm356_vm1, %v5107_v50, -inf  ;;  %v2126_v45 = vpop.xlane.xlu1 %2125 }
 0x6d8   : > { %v2312_v43 = vsub.f32 %v5021_v25, %v2126_v45 }
 0x6d9   : > { %2221 = vmax.xlane.f32.xlu1 %v2220_v59  ;;  %v2129_v59 = vpop.xlane.xlu0 %2128 }
 0x6da   : > { %v2378_v46 = vmul.f32 1.442695, %v2312_v43 }
 0x6db   : > { %2224 = vmax.xlane.f32.xlu0 %v2223_v24  ;;  %v2235_v24 = vsel %vm356_vm1, %v5135_v62, -inf  ;;  %v2123_v50 = vpop.xlane.xlu1 %2122  ;;  %v2268_v62 = vsel %vm356_vm1, %v5149_v39, -inf }
 0x6dc   : > { %v2311_v25 = vsub.f32 %v5031_v52, %v2123_v50  ;;  %4293 = vpow2.f32 %v2378_v46  ;;  %v2280_v52 = vsel %vm356_vm1, %v5175_v26, -inf  ;;  %v2283_v46 = vsel %vm356_vm1, %v5183_v30, -inf }
 0x6dd   : > { %2215 = vmax.xlane.f32.xlu1 %v2214_v33  ;;  %v2313_v33 = vsub.f32 %v5029_v31, %v2129_v59  ;;  %v2274_v50 = vsel %vm356_vm1, %v5181_v17, -inf }
 0x6de   : > { %v2376_v43 = vmul.f32 1.442695, %v2311_v25 }
 0x6df   : > { %2218 = vmax.xlane.f32.xlu0 %v2217_v58  ;;  %v2229_v58 = vsel %vm356_vm1, %v5143_v61, -inf  ;;  %v2380_v45 = vmul.f32 1.442695, %v2313_v33 }
 0x6e1   : > { %2233 = vmax.xlane.f32.xlu1 %v2232_v20  ;;  %v2310_v20 = vsub.f32 %v5023_v27, %v2120_v18  ;;  %4295 = vpow2.f32 %v2380_v45  ;;  %v2265_v27 = vsel %vm356_vm1, %v5167_v23, -inf  ;;  %v2277_v18 = vsel %vm356_vm1, %v5191_v15, -inf }
 0x6e3   : > { %2236 = vmax.xlane.f32.xlu0 %v2235_v24  ;;  %v2271_v24 = vsel %vm356_vm1, %v5159_v28, -inf  ;;  %v2374_v31 = vmul.f32 1.442695, %v2310_v20 }
 0x6e5   : > { %2227 = vmax.xlane.f32.xlu1 %v2226_v11  ;;  %v2262_v11 = vsel %vm356_vm1, %v5157_v6, -inf  ;;  %4297 = vpow2.f32 %v2374_v31 }
 0x6e6   : > { %4299 = vpow2.f32 %v2376_v43 }
 0x6e7   : > { %2230 = vmax.xlane.f32.xlu0 %v2229_v58 }
 0x6e9   : > { %2269 = vmax.xlane.f32.xlu1 %v2268_v62  ;;  %v5287_v62 = vpop.eup %4293 }
 0x6ea   : > { %v2508_v33 = vsel %vm356_vm1, %v5287_v62, 0.0 }
 0x6eb   : > { %2272 = vmax.xlane.f32.xlu0 %v2271_v24  ;;  %v5291_v59 = vpop.eup %4295 }
 0x6ec   : > { %v2511_v20 = vsel %vm356_vm1, %v5291_v59, 0.0 }
 0x6ed   : > { %2263 = vmax.xlane.f32.xlu1 %v2262_v11 }
 0x6ef   : > { %2266 = vmax.xlane.f32.xlu0 %v2265_v27  ;;  %v5295_v58 = vpop.eup %4297 }
 0x6f0   : > { %v5299_v25 = vpop.eup %4299  ;;  %v2502_v45 = vsel %vm356_vm1, %v5295_v58, 0.0 }
 0x6f1   : > { %2281 = vmax.xlane.f32.xlu1 %v2280_v52  ;;  %v2505_v24 = vsel %vm356_vm1, %v5299_v25, 0.0 }
 0x6f3   : > { %2284 = vmax.xlane.f32.xlu0 %v2283_v46 }
 0x6f5   : > { %2275 = vmax.xlane.f32.xlu1 %v2274_v50 }
 0x6f7   : > { %2278 = vmax.xlane.f32.xlu0 %v2277_v18 }
 0x6f9   : > { %2509 = vadd.xlane.f32.xlu1 %v2508_v33 }
 0x6fb   : > { %2512 = vadd.xlane.f32.xlu0 %v2511_v20 }
 0x6fd   : > { %2503 = vadd.xlane.f32.xlu1 %v2502_v45 }
 0x6ff   : > { %2506 = vadd.xlane.f32.xlu0 %v2505_v24 }
 0x70e   : > { %v2246_v31 = vpop.xlane.xlu1 %2245 }
 0x70f   : > { %v2352_v11 = vsub.f32 %v5095_v54, %v2246_v31 }
 0x710   : > { %v2249_v43 = vpop.xlane.xlu0 %2248 }
 0x711   : > { %v2458_v27 = vmul.f32 1.442695, %v2352_v11  ;;  %v2353_v52 = vsub.f32 %v5103_v16, %v2249_v43 }
 0x712   : > { %v2240_v46 = vpop.xlane.xlu1 %2239 }
 0x713   : > { %4301 = vpow2.f32 %v2458_v27  ;;  %v2460_v50 = vmul.f32 1.442695, %v2353_v52  ;;  %v2350_v18 = vsub.f32 %v5099_v13, %v2240_v46 }
 0x714   : > { %v2243_v33 = vpop.xlane.xlu0 %2242 }
 0x715   : > { %4303 = vpow2.f32 %v2460_v50  ;;  %v2454_v20 = vmul.f32 1.442695, %v2350_v18  ;;  %v2351_v45 = vsub.f32 %v5109_v60, %v2243_v33 }
 0x716   : > { %v2138_v30 = vpop.xlane.xlu1 %2137 }
 0x717   : > { %4305 = vpow2.f32 %v2454_v20  ;;  %v2456_v24 = vmul.f32 1.442695, %v2351_v45  ;;  %v2316_v17 = vsub.f32 %v5037_v34, %v2138_v30 }
 0x718   : > { %v2141_v54 = vpop.xlane.xlu0 %2140 }
 0x719   : > { %4307 = vpow2.f32 %v2456_v24  ;;  %v2386_v31 = vmul.f32 1.442695, %v2316_v17  ;;  %v2317_v16 = vsub.f32 %v5041_v36, %v2141_v54 }
 0x71a   : > { %v2132_v11 = vpop.xlane.xlu1 %2131 }
 0x71b   : > { %4309 = vpow2.f32 %v2386_v31  ;;  %v2388_v43 = vmul.f32 1.442695, %v2317_v16  ;;  %v2314_v13 = vsub.f32 %v5039_v35, %v2132_v11 }
 0x71c   : > { %v2135_v27 = vpop.xlane.xlu0 %2134 }
 0x71d   : > { %v5312_v52 = vpop.eup %4301  ;;  %4311 = vpow2.f32 %v2388_v43  ;;  %v2382_v60 = vmul.f32 1.442695, %v2314_v13  ;;  %v2315_v46 = vsub.f32 %v5043_v37, %v2135_v27 }
 0x71e   : > { %v2150_v50 = vpop.xlane.xlu1 %2149  ;;  %v2628_v34 = vsel %vm356_vm1, %v5312_v52, 0.0 }
 0x71f   : > { %v5317_v30 = vpop.eup %4303  ;;  %4313 = vpow2.f32 %v2382_v60  ;;  %v2384_v17 = vmul.f32 1.442695, %v2315_v46  ;;  %v2320_v36 = vsub.f32 %v5045_v12, %v2150_v50  ;;  %2629 = vadd.xlane.f32.xlu1 %v2628_v34  ;;  %v5975_v50 = vld [vmem:[#allocation15_spill] sm:$0xff] }
 0x720   : > { %v2153_v18 = vpop.xlane.xlu0 %2152  ;;  %v2631_v35 = vsel %vm356_vm1, %v5317_v30, 0.0 }
 0x721   : > { %v5322_v33 = vpop.eup %4305  ;;  %4315 = vpow2.f32 %v2384_v17  ;;  %v2394_v20 = vmul.f32 1.442695, %v2320_v36  ;;  %v2321_v37 = vsub.f32 %v5049_v40, %v2153_v18  ;;  %2632 = vadd.xlane.f32.xlu0 %v2631_v35  ;;  %v5976_v35 = vld [vmem:[#allocation18_spill] sm:$0xff] }
 0x722   : > { %v2144_v45 = vpop.xlane.xlu1 %2143  ;;  %v2622_v24 = vsel %vm356_vm1, %v5322_v33, 0.0 }
 0x723   : > { %v5327_v54 = vpop.eup %4307  ;;  %4317 = vpow2.f32 %v2394_v20  ;;  %v2396_v12 = vmul.f32 1.442695, %v2321_v37  ;;  %v2318_v31 = vsub.f32 %v5047_v38, %v2144_v45  ;;  %2623 = vadd.xlane.f32.xlu1 %v2622_v24 }
 0x724   : > { %v2147_v16 = vpop.xlane.xlu0 %2146  ;;  %v2625_v11 = vsel %vm356_vm1, %v5327_v54, 0.0 }
 0x725   : > { %v5332_v43 = vpop.eup %4309  ;;  %4319 = vpow2.f32 %v2396_v12  ;;  %v2390_v40 = vmul.f32 1.442695, %v2318_v31  ;;  %v2319_v13 = vsub.f32 %v5051_v41, %v2147_v16  ;;  %2626 = vadd.xlane.f32.xlu0 %v2625_v11  ;;  %v5977_v31 = vld [vmem:[#allocation16_spill] sm:$0xff] }
 0x726   : > { %v2258_v27 = vpop.xlane.xlu1 %2257  ;;  %v2520_v60 = vsel %vm356_vm1, %v5332_v43, 0.0 }
 0x727   : > { %v5337_v46 = vpop.eup %4311  ;;  %4321 = vpow2.f32 %v2390_v40  ;;  %v2392_v38 = vmul.f32 1.442695, %v2319_v13  ;;  %v2356_v34 = vsub.f32 %v5975_v50, %v2258_v27  ;;  %2521 = vadd.xlane.f32.xlu1 %v2520_v60  ;;  %v5978_v60 = vld [vmem:[#allocation19_spill] sm:$0xff] }
 0x728   : > { %v2261_v17 = vpop.xlane.xlu0 %2260  ;;  %v2523_v36 = vsel %vm356_vm1, %v5337_v46, 0.0 }
 0x729   : > { %v5342_v18 = vpop.eup %4313  ;;  %4323 = vpow2.f32 %v2392_v38  ;;  %v2466_v41 = vmul.f32 1.442695, %v2356_v34  ;;  %v2357_v20 = vsub.f32 %v5976_v35, %v2261_v17  ;;  %2524 = vadd.xlane.f32.xlu0 %v2523_v36 }
 0x72a   : > { %v2252_v37 = vpop.xlane.xlu1 %2251  ;;  %v2514_v45 = vsel %vm356_vm1, %v5342_v18, 0.0 }
 0x72b   : > { %v5347_v24 = vpop.eup %4315  ;;  %4325 = vpow2.f32 %v2466_v41  ;;  %v2468_v12 = vmul.f32 1.442695, %v2357_v20  ;;  %v2354_v16 = vsub.f32 %v5977_v31, %v2252_v37  ;;  %2515 = vadd.xlane.f32.xlu1 %v2514_v45  ;;  %v5979_v41 = vld [vmem:[#allocation10_spill] sm:$0xff]  ;;  %v5980_v31 = vld [vmem:[#allocation11_spill] sm:$0xff] }
 0x72c   : > { %v2255_v11 = vpop.xlane.xlu0 %2254  ;;  %v2517_v40 = vsel %vm356_vm1, %v5347_v24, 0.0 }
 0x72d   : > { %v5352_v13 = vpop.eup %4317  ;;  %4327 = vpow2.f32 %v2468_v12  ;;  %v2462_v27 = vmul.f32 1.442695, %v2354_v16  ;;  %v2355_v38 = vsub.f32 %v5978_v60, %v2255_v11  ;;  %2518 = vadd.xlane.f32.xlu0 %v2517_v40 }
 0x72e   : > { %v2162_v50 = vpop.xlane.xlu1 %2161  ;;  %v2532_v34 = vsel %vm356_vm1, %v5352_v13, 0.0 }
 0x72f   : > { %v5357_v17 = vpop.eup %4319  ;;  %4329 = vpow2.f32 %v2462_v27  ;;  %v2464_v36 = vmul.f32 1.442695, %v2355_v38  ;;  %v2324_v35 = vsub.f32 %v5979_v41, %v2162_v50  ;;  %2533 = vadd.xlane.f32.xlu1 %v2532_v34 }
 0x730   : > { %v2165_v20 = vpop.xlane.xlu0 %2164  ;;  %v2535_v37 = vsel %vm356_vm1, %v5357_v17, 0.0 }
 0x731   : > { %v5362_v45 = vpop.eup %4321  ;;  %4331 = vpow2.f32 %v2464_v36  ;;  %v2402_v12 = vmul.f32 1.442695, %v2324_v35  ;;  %v2325_v16 = vsub.f32 %v5980_v31, %v2165_v20  ;;  %2536 = vadd.xlane.f32.xlu0 %v2535_v37 }
 0x732   : > { %v2156_v11 = vpop.xlane.xlu1 %2155  ;;  %v2526_v40 = vsel %vm356_vm1, %v5362_v45, 0.0 }
 0x733   : > { %v5367_v27 = vpop.eup %4323  ;;  %4333 = vpow2.f32 %v2402_v12  ;;  %v2404_v60 = vmul.f32 1.442695, %v2325_v16  ;;  %v2322_v38 = vsub.f32 %v5055_v44, %v2156_v11  ;;  %2527 = vadd.xlane.f32.xlu1 %v2526_v40 }
 0x734   : > { %v2159_v50 = vpop.xlane.xlu0 %2158  ;;  %v2529_v34 = vsel %vm356_vm1, %v5367_v27, 0.0 }
 0x735   : > { %v5372_v36 = vpop.eup %4325  ;;  %4335 = vpow2.f32 %v2404_v60  ;;  %v2398_v41 = vmul.f32 1.442695, %v2322_v38  ;;  %v2323_v35 = vsub.f32 %v5059_v47, %v2159_v50  ;;  %2530 = vadd.xlane.f32.xlu0 %v2529_v34 }
 0x736   : > { %v2294_v20 = vpop.xlane.xlu1 %2293  ;;  %v2640_v37 = vsel %vm356_vm1, %v5372_v36, 0.0 }
 0x737   : > { %v5377_v12 = vpop.eup %4327  ;;  %4337 = vpow2.f32 %v2398_v41  ;;  %v2400_v44 = vmul.f32 1.442695, %v2323_v35  ;;  %v2368_v31 = vsub.f32 %v5151_v53, %v2294_v20  ;;  %2641 = vadd.xlane.f32.xlu1 %v2640_v37 }
 0x738   : > { %v2297_v16 = vpop.xlane.xlu0 %2296  ;;  %v2643_v11 = vsel %vm356_vm1, %v5377_v12, 0.0 }
 0x739   : > { %v5382_v40 = vpop.eup %4329  ;;  %4339 = vpow2.f32 %v2400_v44  ;;  %v2490_v47 = vmul.f32 1.442695, %v2368_v31  ;;  %v2369_v60 = vsub.f32 %v5161_v21, %v2297_v16  ;;  %2644 = vadd.xlane.f32.xlu0 %v2643_v11 }
 0x73a   : > { %v2288_v38 = vpop.xlane.xlu1 %2287  ;;  %v2634_v50 = vsel %vm356_vm1, %v5382_v40, 0.0 }
 0x73b   : > { %v5387_v34 = vpop.eup %4331  ;;  %4341 = vpow2.f32 %v2490_v47  ;;  %v2492_v53 = vmul.f32 1.442695, %v2369_v60  ;;  %v2366_v41 = vsub.f32 %v5155_v29, %v2288_v38  ;;  %2635 = vadd.xlane.f32.xlu1 %v2634_v50 }
 0x73c   : > { %v2291_v35 = vpop.xlane.xlu0 %2290  ;;  %v2637_v20 = vsel %vm356_vm1, %v5387_v34, 0.0 }
 0x73d   : > { %v5392_v37 = vpop.eup %4333  ;;  %4343 = vpow2.f32 %v2492_v53  ;;  %v2486_v21 = vmul.f32 1.442695, %v2366_v41  ;;  %v2367_v44 = vsub.f32 %v5165_v63, %v2291_v35  ;;  %2638 = vadd.xlane.f32.xlu0 %v2637_v20 }
 0x73e   : > { %5981 = vst [vmem:[#allocation15_spill] sm:$0xff] %v5392_v37  ;;  %v2174_v31 = vpop.xlane.xlu1 %2173  ;;  %v2544_v16 = vsel %vm356_vm1, %v5392_v37, 0.0 }
 0x73f   : > { %v5397_v11 = vpop.eup %4335  ;;  %4345 = vpow2.f32 %v2486_v21  ;;  %v2488_v29 = vmul.f32 1.442695, %v2367_v44  ;;  %v2328_v47 = vsub.f32 %v5061_v48, %v2174_v31  ;;  %2545 = vadd.xlane.f32.xlu1 %v2544_v16 }
 0x740   : > { %v2177_v60 = vpop.xlane.xlu0 %2176  ;;  %v2547_v38 = vsel %vm356_vm1, %v5397_v11, 0.0 }
 0x741   : > { %v5402_v50 = vpop.eup %4337  ;;  %4347 = vpow2.f32 %v2488_v29  ;;  %v2410_v63 = vmul.f32 1.442695, %v2328_v47  ;;  %v2329_v53 = vsub.f32 %v5065_v51, %v2177_v60  ;;  %2548 = vadd.xlane.f32.xlu0 %v2547_v38 }
 0x742   : > { %v2168_v41 = vpop.xlane.xlu1 %2167  ;;  %v2538_v35 = vsel %vm356_vm1, %v5402_v50, 0.0 }
 0x743   : > { %v5407_v20 = vpop.eup %4339  ;;  %4349 = vpow2.f32 %v2410_v63  ;;  %v2412_v48 = vmul.f32 1.442695, %v2329_v53  ;;  %v2326_v21 = vsub.f32 %v5063_v49, %v2168_v41  ;;  %2539 = vadd.xlane.f32.xlu1 %v2538_v35 }
 0x744   : > { %v2171_v44 = vpop.xlane.xlu0 %2170  ;;  %v2541_v31 = vsel %vm356_vm1, %v5407_v20, 0.0 }
 0x745   : > { %v5412_v16 = vpop.eup %4341  ;;  %4351 = vpow2.f32 %v2412_v48  ;;  %v2406_v51 = vmul.f32 1.442695, %v2326_v21  ;;  %v2327_v29 = vsub.f32 %v5067_v55, %v2171_v44  ;;  %2542 = vadd.xlane.f32.xlu0 %v2541_v31 }
 0x746   : > { %v5415_v47 = vpop.xlane.xlu1 %2305  ;;  %v2676_v60 = vsel %vm356_vm1, %v5412_v16, 0.0 }
 0x747   : > { %v5419_v38 = vpop.eup %4343  ;;  %4353 = vpow2.f32 %v2406_v51  ;;  %v2408_v49 = vmul.f32 1.442695, %v2327_v29  ;;  %2677 = vadd.xlane.f32.xlu1 %v2676_v60 }
 0x748   : > { %v5421_v63 = vpop.xlane.xlu0 %2308  ;;  %v2679_v53 = vsel %vm356_vm1, %v5419_v38, 0.0 }
 0x749   : > { %v5425_v41 = vpop.eup %4345  ;;  %4355 = vpow2.f32 %v2408_v49  ;;  %2680 = vadd.xlane.f32.xlu0 %v2679_v53 }
 0x74a   : > { %5982 = vst [vmem:[#allocation18_spill] sm:$0xff] %v5425_v41  ;;  %v2300_v55 = vpop.xlane.xlu1 %2299  ;;  %v2670_v35 = vsel %vm356_vm1, %v5425_v41, 0.0 }
 0x74b   : > { %v5429_v48 = vpop.eup %4347  ;;  %v2370_v21 = vsub.f32 %v5179_v32, %v2300_v55  ;;  %2671 = vadd.xlane.f32.xlu1 %v2670_v35 }
 0x74c   : > { %5983 = vst [vmem:[#allocation16_spill] sm:$0xff] %v5429_v48  ;;  %v2303_v44 = vpop.xlane.xlu0 %2302  ;;  %v2673_v31 = vsel %vm356_vm1, %v5429_v48, 0.0 }
 0x74d   : > { %v5434_v51 = vpop.eup %4349  ;;  %v2494_v29 = vmul.f32 1.442695, %v2370_v21  ;;  %v2371_v60 = vsub.f32 %v5189_v22, %v2303_v44  ;;  %2674 = vadd.xlane.f32.xlu0 %v2673_v31 }
 0x74e   : > { %5984 = vst [vmem:[#allocation19_spill] sm:$0xff] %v5434_v51  ;;  %v2186_v49 = vpop.xlane.xlu1 %2185  ;;  %v2556_v53 = vsel %vm356_vm1, %v5434_v51, 0.0 }
 0x74f   : > { %v5439_v41 = vpop.eup %4351  ;;  %4357 = vpow2.f32 %v2494_v29  ;;  %v2496_v37 = vmul.f32 1.442695, %v2371_v60  ;;  %v2332_v32 = vsub.f32 %v5069_v2, %v2186_v49  ;;  %2557 = vadd.xlane.f32.xlu1 %v2556_v53 }
 0x750   : > { %v2189_v55 = vpop.xlane.xlu0 %2188  ;;  %v2559_v35 = vsel %vm356_vm1, %v5439_v41, 0.0 }
 0x751   : > { %v5444_v48 = vpop.eup %4353  ;;  %4359 = vpow2.f32 %v2496_v37  ;;  %v2418_v22 = vmul.f32 1.442695, %v2332_v32  ;;  %v2333_v21 = vsub.f32 %v5073_v56, %v2189_v55  ;;  %2560 = vadd.xlane.f32.xlu0 %v2559_v35 }
 0x752   : > { %v2180_v44 = vpop.xlane.xlu1 %2179  ;;  %v2550_v31 = vsel %vm356_vm1, %v5444_v48, 0.0 }
 0x753   : > { %v5449_v29 = vpop.eup %4355  ;;  %4361 = vpow2.f32 %v2418_v22  ;;  %v2420_v2 = vmul.f32 1.442695, %v2333_v21  ;;  %v2330_v60 = vsub.f32 %v5071_v9, %v2180_v44  ;;  %2551 = vadd.xlane.f32.xlu1 %v2550_v31 }
 0x754   : > { %v2183_v49 = vpop.xlane.xlu0 %2182  ;;  %v2553_v53 = vsel %vm356_vm1, %v5449_v29, 0.0 }
 0x755   : > { %4363 = vpow2.f32 %v2420_v2  ;;  %v2414_v37 = vmul.f32 1.442695, %v2330_v60  ;;  %v2331_v56 = vsub.f32 %v5075_v57, %v2183_v49  ;;  %2554 = vadd.xlane.f32.xlu0 %v2553_v53 }
 0x756   : > { %v2198_v32 = vpop.xlane.xlu1 %2197 }
 0x757   : > { %4365 = vpow2.f32 %v2414_v37  ;;  %v2416_v55 = vmul.f32 1.442695, %v2331_v56  ;;  %v2336_v35 = vsub.f32 %v5077_v0, %v2198_v32 }
 0x758   : > { %v2201_v51 = vpop.xlane.xlu0 %2200 }
 0x759   : > { %v5456_v22 = vpop.eup %4357  ;;  %4367 = vpow2.f32 %v2416_v55  ;;  %v2426_v9 = vmul.f32 1.442695, %v2336_v35  ;;  %v2337_v21 = vsub.f32 %v5081_v4, %v2201_v51 }
 0x75a   : > { %v2192_v44 = vpop.xlane.xlu1 %2191  ;;  %v2682_v31 = vsel %vm356_vm1, %v5456_v22, 0.0 }
 0x75b   : > { %v5461_v2 = vpop.eup %4359  ;;  %4369 = vpow2.f32 %v2426_v9  ;;  %v2428_v57 = vmul.f32 1.442695, %v2337_v21  ;;  %v2334_v60 = vsub.f32 %v5079_v1, %v2192_v44  ;;  %2683 = vadd.xlane.f32.xlu1 %v2682_v31 }
 0x75c   : > { %v2195_v49 = vpop.xlane.xlu0 %2194  ;;  %v2685_v0 = vsel %vm356_vm1, %v5461_v2, 0.0 }
 0x75d   : > { %v5466_v53 = vpop.eup %4361  ;;  %4371 = vpow2.f32 %v2428_v57  ;;  %v2422_v37 = vmul.f32 1.442695, %v2334_v60  ;;  %v2335_v4 = vsub.f32 %v5083_v5, %v2195_v49  ;;  %2686 = vadd.xlane.f32.xlu0 %v2685_v0 }
 0x75e   : > { %v2210_v51 = vpop.xlane.xlu1 %2209  ;;  %v2568_v56 = vsel %vm356_vm1, %v5466_v53, 0.0 }
 0x75f   : > { %v5471_v32 = vpop.eup %4363  ;;  %4373 = vpow2.f32 %v2422_v37  ;;  %v2424_v1 = vmul.f32 1.442695, %v2335_v4  ;;  %v2340_v55 = vsub.f32 %v5085_v7, %v2210_v51  ;;  %2569 = vadd.xlane.f32.xlu1 %v2568_v56 }
 0x760   : > { %v2213_v35 = vpop.xlane.xlu0 %2212  ;;  %v2571_v9 = vsel %vm356_vm1, %v5471_v32, 0.0 }
 0x761   : > { %v5476_v21 = vpop.eup %4365  ;;  %4375 = vpow2.f32 %v2424_v1  ;;  %v2434_v5 = vmul.f32 1.442695, %v2340_v55  ;;  %v2341_v44 = vsub.f32 %v5089_v3, %v2213_v35  ;;  %2572 = vadd.xlane.f32.xlu0 %v2571_v9 }
 0x762   : > { %v2204_v31 = vpop.xlane.xlu1 %2203  ;;  %v2562_v57 = vsel %vm356_vm1, %v5476_v21, 0.0 }
 0x763   : > { %v5481_v60 = vpop.eup %4367  ;;  %4377 = vpow2.f32 %v2434_v5  ;;  %v2436_v7 = vmul.f32 1.442695, %v2341_v44  ;;  %v2338_v49 = vsub.f32 %v5087_v8, %v2204_v31  ;;  %2563 = vadd.xlane.f32.xlu1 %v2562_v57  ;;  %v5985_v31 = vld [vmem:[#allocation13_spill] sm:$0xff] }
 0x764   : > { %v2207_v0 = vpop.xlane.xlu0 %2206  ;;  %v2565_v37 = vsel %vm356_vm1, %v5481_v60, 0.0 }
 0x765   : > { %v5486_v4 = vpop.eup %4369  ;;  %4379 = vpow2.f32 %v2436_v7  ;;  %v2430_v3 = vmul.f32 1.442695, %v2338_v49  ;;  %v2339_v51 = vsub.f32 %v5091_v42, %v2207_v0  ;;  %2566 = vadd.xlane.f32.xlu0 %v2565_v37  ;;  %v5986_v37 = vld [vmem:[#allocation12_spill] sm:$0xff] }
 0x766   : > { %v2222_v56 = vpop.xlane.xlu1 %2221  ;;  %v2580_v1 = vsel %vm356_vm1, %v5486_v4, 0.0 }
 0x767   : > { %v5491_v55 = vpop.eup %4371  ;;  %4381 = vpow2.f32 %v2430_v3  ;;  %v2432_v8 = vmul.f32 1.442695, %v2339_v51  ;;  %v2344_v35 = vsub.f32 %v5093_v10, %v2222_v56  ;;  %2581 = vadd.xlane.f32.xlu1 %v2580_v1 }
 0x768   : > { %v2225_v9 = vpop.xlane.xlu0 %2224  ;;  %v2583_v5 = vsel %vm356_vm1, %v5491_v55, 0.0 }
 0x769   : > { %v5496_v44 = vpop.eup %4373  ;;  %4383 = vpow2.f32 %v2432_v8  ;;  %v2442_v42 = vmul.f32 1.442695, %v2344_v35  ;;  %v2345_v57 = vsub.f32 %v5985_v31, %v2225_v9  ;;  %2584 = vadd.xlane.f32.xlu0 %v2583_v5  ;;  %v5988_v35 = vld [vmem:[#allocation14_spill] sm:$0xff] }
 0x76a   : > { %v2216_v7 = vpop.xlane.xlu1 %2215  ;;  %v2574_v49 = vsel %vm356_vm1, %v5496_v44, 0.0 }
 0x76b   : > { %v5501_v0 = vpop.eup %4375  ;;  %4385 = vpow2.f32 %v2442_v42  ;;  %v2444_v10 = vmul.f32 1.442695, %v2345_v57  ;;  %v2342_v3 = vsub.f32 %v5986_v37, %v2216_v7  ;;  %2575 = vadd.xlane.f32.xlu1 %v2574_v49 }
 0x76c   : > { %v2219_v51 = vpop.xlane.xlu0 %2218  ;;  %v2577_v56 = vsel %vm356_vm1, %v5501_v0, 0.0 }
 0x76d   : > { %v5506_v1 = vpop.eup %4377  ;;  %4387 = vpow2.f32 %v2444_v10  ;;  %v2438_v8 = vmul.f32 1.442695, %v2342_v3  ;;  %v2343_v9 = vsub.f32 %v5988_v35, %v2219_v51  ;;  %2578 = vadd.xlane.f32.xlu0 %v2577_v56  ;;  %v5989_v51 = vld [vmem:[#allocation17_spill] sm:$0xff] }
 0x76e   : > { %5987 = vst [vmem:[#allocation10_spill] sm:$0xff] %v5506_v1  ;;  %v2234_v5 = vpop.xlane.xlu1 %2233  ;;  %v2592_v31 = vsel %vm356_vm1, %v5506_v1, 0.0 }
 0x76f   : > { %v5511_v42 = vpop.eup %4379  ;;  %4389 = vpow2.f32 %v2438_v8  ;;  %v2440_v57 = vmul.f32 1.442695, %v2343_v9  ;;  %v2348_v7 = vsub.f32 %v5125_v19, %v2234_v5  ;;  %2593 = vadd.xlane.f32.xlu1 %v2592_v31 }
 0x770   : > { %v2237_v49 = vpop.xlane.xlu0 %2236  ;;  %v2595_v37 = vsel %vm356_vm1, %v5511_v42, 0.0 }
 0x771   : > { %v5516_v10 = vpop.eup %4381  ;;  %4391 = vpow2.f32 %v2440_v57  ;;  %v2450_v3 = vmul.f32 1.442695, %v2348_v7  ;;  %v2349_v56 = vsub.f32 %v5989_v51, %v2237_v49  ;;  %2596 = vadd.xlane.f32.xlu0 %v2595_v37 }
 0x772   : > { %v2228_v35 = vpop.xlane.xlu1 %2227  ;;  %v2586_v1 = vsel %vm356_vm1, %v5516_v10, 0.0 }
 0x773   : > { %v5521_v8 = vpop.eup %4383  ;;  %4393 = vpow2.f32 %v2450_v3  ;;  %v2452_v19 = vmul.f32 1.442695, %v2349_v56  ;;  %v2346_v9 = vsub.f32 %v5133_v14, %v2228_v35  ;;  %2587 = vadd.xlane.f32.xlu1 %v2586_v1 }
 0x774   : > { %v2231_v5 = vpop.xlane.xlu0 %2230  ;;  %v2589_v31 = vsel %vm356_vm1, %v5521_v8, 0.0 }
 0x775   : > { %v5526_v57 = vpop.eup %4385  ;;  %4395 = vpow2.f32 %v2452_v19  ;;  %v2446_v7 = vmul.f32 1.442695, %v2346_v9  ;;  %v2347_v49 = vsub.f32 %v5143_v61, %v2231_v5  ;;  %2590 = vadd.xlane.f32.xlu0 %v2589_v31 }
 0x776   : > { %5990 = vst [vmem:[#allocation11_spill] sm:$0xff] %v5526_v57  ;;  %v2270_v37 = vpop.xlane.xlu1 %2269  ;;  %v2604_v51 = vsel %vm356_vm1, %v5526_v57, 0.0 }
 0x777   : > { %v5531_v3 = vpop.eup %4387  ;;  %4397 = vpow2.f32 %v2446_v7  ;;  %v2448_v14 = vmul.f32 1.442695, %v2347_v49  ;;  %v2360_v1 = vsub.f32 %v5149_v39, %v2270_v37  ;;  %2605 = vadd.xlane.f32.xlu1 %v2604_v51 }
 0x778   : > { %5991 = vst [vmem:[#allocation13_spill] sm:$0xff] %v5531_v3  ;;  %v2273_v56 = vpop.xlane.xlu0 %2272  ;;  %v2607_v35 = vsel %vm356_vm1, %v5531_v3, 0.0 }
 0x779   : > { %v5536_v19 = vpop.eup %4389  ;;  %4399 = vpow2.f32 %v2448_v14  ;;  %v2474_v61 = vmul.f32 1.442695, %v2360_v1  ;;  %v2361_v9 = vsub.f32 %v5159_v28, %v2273_v56  ;;  %2608 = vadd.xlane.f32.xlu0 %v2607_v35 }
 0x77a   : > { %v2264_v5 = vpop.xlane.xlu1 %2263  ;;  %v2598_v31 = vsel %vm356_vm1, %v5536_v19, 0.0 }
 0x77b   : > { %v5541_v7 = vpop.eup %4391  ;;  %4401 = vpow2.f32 %v2474_v61  ;;  %v2476_v39 = vmul.f32 1.442695, %v2361_v9  ;;  %v2358_v49 = vsub.f32 %v5157_v6, %v2264_v5  ;;  %2599 = vadd.xlane.f32.xlu1 %v2598_v31 }
 0x77c   : > { %v2267_v37 = vpop.xlane.xlu0 %2266  ;;  %v2601_v51 = vsel %vm356_vm1, %v5541_v7, 0.0 }
 0x77d   : > { %v5546_v14 = vpop.eup %4393  ;;  %4403 = vpow2.f32 %v2476_v39  ;;  %v2470_v28 = vmul.f32 1.442695, %v2358_v49  ;;  %v2359_v1 = vsub.f32 %v5167_v23, %v2267_v37  ;;  %2602 = vadd.xlane.f32.xlu0 %v2601_v51 }
 0x77e   : > { %5992 = vst [vmem:[#allocation12_spill] sm:$0xff] %v5546_v14  ;;  %v2282_v56 = vpop.xlane.xlu1 %2281  ;;  %v2616_v35 = vsel %vm356_vm1, %v5546_v14, 0.0 }
 0x77f   : > { %v5551_v61 = vpop.eup %4395  ;;  %4405 = vpow2.f32 %v2470_v28  ;;  %v2472_v6 = vmul.f32 1.442695, %v2359_v1  ;;  %2617 = vadd.xlane.f32.xlu1 %v2616_v35 }
 0x780   : > { %5993 = vst [vmem:[#allocation14_spill] sm:$0xff] %v5551_v61  ;;  %v5553_v9 = vpop.xlane.xlu0 %2284  ;;  %v2619_v5 = vsel %vm356_vm1, %v5551_v61, 0.0 }
 0x781   : > { %v5557_v31 = vpop.eup %4397  ;;  %4407 = vpow2.f32 %v2472_v6  ;;  %2620 = vadd.xlane.f32.xlu0 %v2619_v5 }
 0x782   : > { %5994 = vst [vmem:[#allocation17_spill] sm:$0xff] %v5557_v31  ;;  %v2276_v23 = vpop.xlane.xlu1 %2275  ;;  %v2610_v39 = vsel %vm356_vm1, %v5557_v31, 0.0 }
 0x783   : > { %v5561_v49 = vpop.eup %4399  ;;  %2611 = vadd.xlane.f32.xlu1 %v2610_v39 }
 0x784   : > { %5995 = vst [vmem:[#allocation28_spill] sm:$0xff] %v5561_v49  ;;  %v2279_v37 = vpop.xlane.xlu0 %2278  ;;  %v2613_v51 = vsel %vm356_vm1, %v5561_v49, 0.0 }
 0x785   : > { %v5565_v28 = vpop.eup %4401  ;;  %2614 = vadd.xlane.f32.xlu0 %v2613_v51 }
 0x786   : > { %5996 = vst [vmem:[#allocation29_spill] sm:$0xff] %v5565_v28  ;;  %v2510_v1 = vpop.xlane.xlu1 %2509  ;;  %v2652_v35 = vsel %vm356_vm1, %v5565_v28, 0.0 }
 0x787   : > { %v5569_v6 = vpop.eup %4403  ;;  %2653 = vadd.xlane.f32.xlu1 %v2652_v35 }
 0x788   : > { %5997 = vst [vmem:[#allocation30_spill] sm:$0xff] %v5569_v6  ;;  %v2513_v5 = vpop.xlane.xlu0 %2512  ;;  %v2655_v14 = vsel %vm356_vm1, %v5569_v6, 0.0 }
 0x789   : > { %v5573_v61 = vpop.eup %4405  ;;  %2656 = vadd.xlane.f32.xlu0 %v2655_v14 }
 0x78a   : > { %5998 = vst [vmem:[#allocation31_spill] sm:$0xff] %v5573_v61  ;;  %v2504_v39 = vpop.xlane.xlu1 %2503  ;;  %v2646_v31 = vsel %vm356_vm1, %v5573_v61, 0.0 }
 0x78b   : > { %v5577_v49 = vpop.eup %4407  ;;  %4409 = vrcp.f32 %v2504_v39  ;;  %2647 = vadd.xlane.f32.xlu1 %v2646_v31  ;;  %v803_v39 = vld [vmem:[%s5914_s6 + $0xa0] sm:$0xff] }
 0x78c   : > { %5999 = vst [vmem:[#allocation32_spill] sm:$0xff] %v5577_v49  ;;  %v2507_v51 = vpop.xlane.xlu0 %2506  ;;  %v2649_v28 = vsel %vm356_vm1, %v5577_v49, 0.0 }
 0x78d   : > { %4411 = vrcp.f32 %v2507_v51  ;;  %2650 = vadd.xlane.f32.xlu0 %v2649_v28  ;;  %v6001_v51 = vld [vmem:[#allocation21_spill] sm:$0xff] }
 0x78e   : > { %4413 = vrcp.f32 %v2513_v5 }
 0x78f   : > { %4415 = vrcp.f32 %v2510_v1  ;;  %v6000_v1 = vmov 0.0  }
 0x795   : > { %v4410_v35 = vpop.eup %4409 }
 0x796   : > { %v2758_v14 = vmul.f32 %v4410_v35, %v5295_v58  ;;  %v804_v58 = vld [vmem:[%s5914_s6 + $0xa8] sm:$0xff]  ;;  %v6002_v35 = vld [vmem:[#allocation20_spill] sm:$0xff] }
 0x797   : > { %v4412_v6 = vpop.eup %4411 }
 0x798   : > { %v2759_v57 = vmul.f32 %v4412_v6, %v5299_v25  ;;  %v4414_v3 = vpop.eup %4413 }
 0x799   : > { %v4416_v61 = vpop.eup %4415  ;;  %v2761_v28 = vmul.f32 %v4414_v3, %v5291_v59  ;;  %v2363_v59 = vsub.f32 %v5191_v15, %v2279_v37 }
 0x79a   : > { %v2830_v31 = vpack.c.bf16 %v2759_v57, %v2758_v14  ;;  %v2760_v5 = vmul.f32 %v4416_v61, %v5287_v62  ;;  %v2364_v57 = vsub.f32 %v5175_v26, %v2282_v56  ;;  %v2362_v62 = vsub.f32 %v6001_v51, %v2276_v23  ;;  %v6004_v26 = vld [vmem:[#allocation23_spill] sm:$0xff] }
 0x79b   : > { %v2372_v14 = vsub.f32 %v6002_v35, %v5415_v47  ;;  %v2373_v56 = vsub.f32 %v6004_v26, %v5421_v63 }
 0x79c   : > { %909 = vperm.xlu1 %4106, %v803_v39   ;;  %v2866_v49 = vsel %vm356_vm1, %v2830_v31, 0  ;;  %v2831_v25 = vpack.c.bf16 %v2761_v28, %v2760_v5  ;;  %v6003_v39 = vld [vmem:[#allocation22_spill] sm:$0xff]  ;;  %v2480_v28 = vmul.f32 1.442695, %v2363_v59  ;;  %v2478_v15 = vmul.f32 1.442695, %v2362_v62 }
 0x79d   : > { %3930 = vmatpush3.bf16.xpose.msra.mxu1 %v2866_v49  ;;  %v2482_v49 = vmul.f32 1.442695, %v2364_v57  ;;  %v2365_v31 = vsub.f32 %v6003_v39, %v5553_v9 }
 0x79e   : > { %3931 = vmatprep.subr.bf16.mxu1 %v6000_v1  ;;  %v2869_v6 = vsel %vm356_vm1, %v2831_v25, 0 }
 0x79f   : > { %v2484_v23 = vmul.f32 1.442695, %v2365_v31 }
 0x7a3   : > { %914 = vperm.xlu0 %4105, %v804_v58   ;;  %v2498_v58 = vmul.f32 1.442695, %v2372_v14 }
 0x7a5   : > { %3932 = vmatpush3.bf16.xpose.msra.mxu1 %v2869_v6  ;;  %v2500_v6 = vmul.f32 1.442695, %v2373_v56 }
 0x7a6   : > { %3933 = vmatprep.subr.bf16.mxu1 %v6000_v1 }
 0x7ac   : > { %v2630_v3 = vpop.xlane.xlu1 %2629 }
 0x7ad   : > { %4417 = vrcp.f32 %v2630_v3 }
 0x7ae   : > { %v2633_v61 = vpop.xlane.xlu0 %2632 }
 0x7af   : > { %4419 = vrcp.f32 %v2633_v61 }
 0x7b0   : > { %v2624_v5 = vpop.xlane.xlu1 %2623 }
 0x7b1   : > { %4421 = vrcp.f32 %v2624_v5 }
 0x7b2   : > { %4423 = vpow2.f32 %v2482_v49  ;;  %v2627_v37 = vpop.xlane.xlu0 %2626 }
 0x7b3   : > { %4425 = vrcp.f32 %v2627_v37 }
 0x7b4   : > { %4427 = vpow2.f32 %v2480_v28  ;;  %v2522_v25 = vpop.xlane.xlu1 %2521 }
 0x7b5   : > { %4429 = vpow2.f32 %v2478_v15 }
 0x7b6   : > { %v2525_v47 = vpop.xlane.xlu0 %2524  ;;  %4431 = vpow2.f32 %v2498_v58 }
 0x7b7   : > { %v4418_v57 = vpop.eup %4417  ;;  %4433 = vpow2.f32 %v2484_v23 }
 0x7b8   : > { %v2516_v9 = vpop.xlane.xlu1 %2515  ;;  %v5605_v63 = vmul.f32 %v4418_v57, %v5312_v52 }
 0x7b9   : > { %v4420_v59 = vpop.eup %4419  ;;  %4435 = vrcp.f32 %v2516_v9 }
 0x7ba   : > { %4437 = vpow2.f32 %v2500_v6  ;;  %v2519_v3 = vpop.xlane.xlu0 %2518  ;;  %v5608_v49 = vmul.f32 %v4420_v59, %v5317_v30 }
 0x7bb   : > { %v4422_v51 = vpop.eup %4421  ;;  %4439 = vrcp.f32 %v2519_v3 }
 0x7bc   : > { %v5610_v62 = vpop.eup %4423  ;;  %4441 = vrcp.f32 %v2525_v47  ;;  %v2534_v61 = vpop.xlane.xlu1 %2533  ;;  %v2851_v35 = vpack.c.bf16 %v5608_v49, %v5605_v63  ;;  %v5617_v52 = vmul.f32 %v4422_v51, %v5322_v33 }
 0x7bd   : > { %v4426_v14 = vpop.eup %4425  ;;  %4443 = vrcp.f32 %v2522_v25  ;;  %v2664_v28 = vsel %vm356_vm1, %v5610_v62, 0.0 }
 0x7be   : > { %v5614_v39 = vpop.eup %4427  ;;  %v2537_v31 = vpop.xlane.xlu0 %2536  ;;  %v5620_v30 = vmul.f32 %v4426_v14, %v5327_v54 }
 0x7bf   : > { %v5624_v5 = vpop.eup %4429  ;;  %v2661_v33 = vsel %vm356_vm1, %v5614_v39, 0.0 }
 0x7c0   : > { %2665 = vadd.xlane.f32.xlu1 %v2664_v28  ;;  %v2528_v26 = vpop.xlane.xlu1 %2527  ;;  %v2850_v56 = vpack.c.bf16 %v5620_v30, %v5617_v52  ;;  %v5628_v15 = vpop.eup %4431  ;;  %v2658_v23 = vsel %vm356_vm1, %v5624_v5, 0.0 }
 0x7c1   : > { %4445 = vrcp.f32 %v2528_v26  ;;  %v5632_v37 = vpop.eup %4433  ;;  %v2688_v14 = vsel %vm356_vm1, %v5628_v15, 0.0 }
 0x7c2   : > { %2662 = vadd.xlane.f32.xlu0 %v2661_v33  ;;  %v2531_v54 = vpop.xlane.xlu0 %2530  ;;  %v2667_v57 = vsel %vm356_vm1, %v5632_v37, 0.0 }
 0x7c3   : > { %v4436_v58 = vpop.eup %4435  ;;  %4447 = vrcp.f32 %v2531_v54 }
 0x7c4   : > { %v5636_v25 = vpop.eup %4437  ;;  %4449 = vrcp.f32 %v2537_v31  ;;  %2659 = vadd.xlane.f32.xlu1 %v2658_v23  ;;  %v2642_v6 = vpop.xlane.xlu1 %2641  ;;  %v2762_v3 = vmul.f32 %v4436_v58, %v5342_v18 }
 0x7c5   : > { %v4440_v47 = vpop.eup %4439  ;;  %4451 = vrcp.f32 %v2642_v6  ;;  %v2691_v33 = vsel %vm356_vm1, %v5636_v25, 0.0 }
 0x7c6   : > { %v4442_v9 = vpop.eup %4441  ;;  %4453 = vrcp.f32 %v2534_v61  ;;  %2668 = vadd.xlane.f32.xlu0 %v2667_v57  ;;  %v2645_v59 = vpop.xlane.xlu0 %2644  ;;  %v2763_v51 = vmul.f32 %v4440_v47, %v5347_v24 }
 0x7c7   : > { %4455 = vrcp.f32 %v2645_v59  ;;  %v4444_v31 = vpop.eup %4443  ;;  %v2765_v61 = vmul.f32 %v4442_v9, %v5337_v46 }
 0x7c8   : > { %2689 = vadd.xlane.f32.xlu1 %v2688_v14  ;;  %v2636_v28 = vpop.xlane.xlu1 %2635  ;;  %v2832_v26 = vpack.c.bf16 %v2763_v51, %v2762_v3  ;;  %v2764_v24 = vmul.f32 %v4444_v31, %v5332_v43 }
 0x7c9   : > { %4457 = vrcp.f32 %v2636_v28 }
 0x7ca   : > { %2692 = vadd.xlane.f32.xlu0 %v2691_v33  ;;  %v2639_v54 = vpop.xlane.xlu0 %2638  ;;  %v2872_v18 = vsel %vm356_vm1, %v2832_v26, 0  ;;  %v2833_v47 = vpack.c.bf16 %v2765_v61, %v2764_v24 }
 0x7cb   : > { %v4446_v58 = vpop.eup %4445  ;;  %4459 = vrcp.f32 %v2639_v54  ;;  %3934 = vmatpush3.bf16.xpose.msra.mxu1 %v2872_v18  ;;  %v6005_v18 = vld [vmem:[#allocation25_spill] sm:$0xff] }
 0x7cc   : > { %v2546_v23 = vpop.xlane.xlu1 %2545  ;;  %3935 = vmatprep.subr.bf16.mxu1 %v6000_v1  ;;  %v2766_v3 = vmul.f32 %v4446_v58, %v5362_v45  ;;  %v2875_v33 = vsel %vm356_vm1, %v2833_v47, 0  ;;  %v6006_v58 = vld [vmem:[#allocation3_spill] sm:$0xff] }
 0x7cd   : > { %v4448_v6 = vpop.eup %4447  ;;  %v1134_v24 = vadd.f32 %v6006_v58, %v6005_v18 }
 0x7ce   : > { %v4450_v57 = vpop.eup %4449  ;;  %v2549_v59 = vpop.xlane.xlu0 %2548  ;;  %v2767_v46 = vmul.f32 %v4448_v6, %v5367_v27 }
 0x7cf   : > { %v4452_v9 = vpop.eup %4451  ;;  %v2769_v54 = vmul.f32 %v4450_v57, %v5357_v17  ;;  %v805_v57 = vld [vmem:[%s5914_s6 + $0xb0] sm:$0xff] }
 0x7d0   : > { %v4454_v51 = vpop.eup %4453  ;;  %v2540_v14 = vpop.xlane.xlu1 %2539  ;;  %v2834_v28 = vpack.c.bf16 %v2767_v46, %v2766_v3  ;;  %v5656_v61 = vmul.f32 %v4452_v9, %v5372_v36 }
 0x7d1   : > { %v4456_v26 = vpop.eup %4455  ;;  %4461 = vrcp.f32 %v2540_v14  ;;  %v2768_v47 = vmul.f32 %v4454_v51, %v5352_v13  ;;  %v2822_v13 = vpack.c.bf16 %v1134_v24, %v1134_v24 }
 0x7d2   : > { %v2543_v43 = vpop.xlane.xlu0 %2542  ;;  %v2921_v31 = vsel %vm356_vm1, %v2834_v28, 0  ;;  %v5659_v45 = vmul.f32 %v4456_v26, %v5377_v12  ;;  %v806_v26 = vld [vmem:[%s5914_s6 + $0xb8] sm:$0xff] }
 0x7d3   : > { %v4458_v27 = vpop.eup %4457  ;;  %4463 = vrcp.f32 %v2543_v43  ;;  %3936 = vmatpush3.bf16.xpose.msra.mxu1 %v2875_v33  ;;  %3942 = vmatpush3.bf16.xpose.msra.mxu0 %v2921_v31  ;;  %v2835_v3 = vpack.c.bf16 %v2769_v54, %v2768_v47 }
 0x7d4   : > { %4465 = vrcp.f32 %v2549_v59  ;;  %v2678_v6 = vpop.xlane.xlu1 %2677  ;;  %3943 = vmatprep.subr.bf16.mxu0 %v6000_v1  ;;  %3953 = vmatprep.subr.bf16.mxu1 %v6000_v1  ;;  %v2853_v17 = vpack.c.bf16 %v5659_v45, %v5656_v61  ;;  %v5672_v59 = vmul.f32 %v4458_v27, %v5382_v40 }
 0x7d5   : > { %v4460_v36 = vpop.eup %4459  ;;  %4467 = vrcp.f32 %v2678_v6  ;;  %v2924_v14 = vsel %vm356_vm1, %v2835_v3, 0 }
 0x7d6   : > { %4469 = vrcp.f32 %v2546_v23  ;;  %v2681_v12 = vpop.xlane.xlu0 %2680  ;;  %v5675_v46 = vmul.f32 %v4460_v36, %v5387_v34 }
 0x7d7   : > { %4471 = vrcp.f32 %v2681_v12 }
 0x7d8   : > { %v2672_v9 = vpop.xlane.xlu1 %2671  ;;  %v2852_v51 = vpack.c.bf16 %v5675_v46, %v5672_v59  ;;  %v3150_v59 = vsel %vm356_vm1, %v2853_v17, 0 }
 0x7d9   : > { %4473 = vrcp.f32 %v2672_v9  ;;  %919 = vperm.xlu1 %4106, %v805_v57  }
 0x7da   : > { %3938 = vmatmul.mubr.msk.bf16.vlgmr.msra.gmra.mrb[52].mxu1 %vm356_vm1, %v2822_v13  ;;  %v2675_v23 = vpop.xlane.xlu0 %2674  ;;  %v3147_v63 = vsel %vm356_vm1, %v2852_v51, 0  ;;  %v6029_v51 = vld [vmem:[#allocation9_spill] sm:$0xff] }
 0x7db   : > { %v4462_v28 = vpop.eup %4461  ;;  %4475 = vrcp.f32 %v2675_v23  ;;  %3944 = vmatpush3.bf16.xpose.msra.mxu0 %v2924_v14  ;;  %3961 = vmatprep.mubr.msk.bf16.mxu1 %vm4566_vm0, %v6000_v1 }
 0x7dc   : > { %v2558_v40 = vpop.xlane.xlu1 %2557  ;;  %3945 = vmatprep.subr.bf16.mxu0 %v6000_v1  ;;  %v2770_v31 = vmul.f32 %v4462_v28, %v5402_v50 }
 0x7dd   : > { %v4464_v34 = vpop.eup %4463 }
 0x7de   : > { %v4466_v33 = vpop.eup %4465  ;;  %v2561_v43 = vpop.xlane.xlu0 %2560  ;;  %v2771_v54 = vmul.f32 %v4464_v34, %v5407_v20  ;;  %v6007_v20 = vld [vmem:[#allocation15_spill] sm:$0xff] }
 0x7df   : > { %v4468_v27 = vpop.eup %4467  ;;  %v2773_v12 = vmul.f32 %v4466_v33, %v5397_v11  ;;  %v6008_v11 = vld [vmem:[#allocation18_spill] sm:$0xff] }
 0x7e0   : > { %v4470_v18 = vpop.eup %4469  ;;  %v2552_v58 = vpop.xlane.xlu1 %2551  ;;  %924 = vperm.xlu0 %4105, %v806_v26   ;;  %v2836_v24 = vpack.c.bf16 %v2771_v54, %v2770_v31  ;;  %v5692_v57 = vmul.f32 %v4468_v27, %v5412_v16  ;;  %v6009_v16 = vld [vmem:[#allocation16_spill] sm:$0xff]  ;;  %v6011_v27 = vld [vmem:[#allocation5_spill] sm:$0xff] }
 0x7e1   : > { %v4472_v6 = vpop.eup %4471  ;;  %4477 = vrcp.f32 %v2552_v58  ;;  %v2772_v13 = vmul.f32 %v4470_v18, %v6007_v20 }
 0x7e2   : > { %v2555_v47 = vpop.xlane.xlu0 %2554  ;;  %v2927_v36 = vsel %vm356_vm1, %v2836_v24, 0  ;;  %v5695_v3 = vmul.f32 %v4472_v6, %v5419_v38 }
 0x7e3   : > { %v4474_v50 = vpop.eup %4473  ;;  %4479 = vrcp.f32 %v2555_v47  ;;  %3946 = vmatpush3.bf16.xpose.msra.mxu0 %v2927_v36  ;;  %v2837_v14 = vpack.c.bf16 %v2773_v12, %v2772_v13 }
 0x7e4   : > { %3947 = vmatprep.subr.bf16.mxu0 %v6000_v1  ;;  %v2859_v9 = vpack.c.bf16 %v5695_v3, %v5692_v57  ;;  %4481 = vrcp.f32 %v2561_v43  ;;  %v5702_v28 = vmul.f32 %v4474_v50, %v6008_v11  ;;  %v6010_v43 = vld [vmem:[#allocation24_spill] sm:$0xff] }
 0x7e5   : > { %v4476_v23 = vpop.eup %4475  ;;  %4483 = vrcp.f32 %v2558_v40  ;;  %v2930_v31 = vsel %vm356_vm1, %v2837_v14, 0  ;;  %v1137_v18 = vadd.f32 %v6011_v27, %v6010_v43 }
 0x7e6   : > { %v5705_v34 = vmul.f32 %v4476_v23, %v6009_v16 }
 0x7e7   : > { %v2823_v12 = vpack.c.bf16 %v1137_v18, %v1137_v18 }
 0x7e8   : > { %v2684_v38 = vpop.xlane.xlu1 %2683  ;;  %v2858_v26 = vpack.c.bf16 %v5705_v34, %v5702_v28 }
 0x7e9   : > { %4485 = vrcp.f32 %v2684_v38 }
 0x7ea   : > { %v2687_v33 = vpop.xlane.xlu0 %2686  ;;  %v3251_v61 = vsel %vm356_vm1, %v2858_v26, 0 }
 0x7eb   : > { %v4478_v54 = vpop.eup %4477  ;;  %4487 = vrcp.f32 %v2687_v33  ;;  %3948 = vmatpush3.bf16.xpose.msra.mxu0 %v2930_v31 }
 0x7ec   : > { %v2570_v58 = vpop.xlane.xlu1 %2569  ;;  %3965 = vmatprep.subr.bf16.mxu0 %v6000_v1  ;;  %v2774_v40 = vmul.f32 %v4478_v54, %v5444_v48 }
 0x7ed   : > { %v4480_v24 = vpop.eup %4479 }
 0x7ee   : > { %v2573_v6 = vpop.xlane.xlu0 %2572  ;;  %v2775_v47 = vmul.f32 %v4480_v24, %v5449_v29  ;;  %v4482_v36 = vpop.eup %4481  ;;  %v6012_v29 = vld [vmem:[#allocation19_spill] sm:$0xff] }
 0x7ef   : > { %v4484_v13 = vpop.eup %4483  ;;  %v2777_v11 = vmul.f32 %v4482_v36, %v5439_v41 }
 0x7f0   : > { %v2564_v50 = vpop.xlane.xlu1 %2563  ;;  %v2838_v20 = vpack.c.bf16 %v2775_v47, %v2774_v40  ;;  %v2776_v38 = vmul.f32 %v4484_v13, %v6012_v29 }
 0x7f1   : > { %4489 = vrcp.f32 %v2564_v50 }
 0x7f2   : > { %3950 = vmatmul.mubr.msk.bf16.vlgmr.msra.gmra.mrb[48].mxu0 %vm356_vm1, %v2823_v12  ;;  %v2567_v23 = vpop.xlane.xlu0 %2566  ;;  %v2976_v14 = vsel %vm356_vm1, %v2838_v20, 0  ;;  %v2839_v54 = vpack.c.bf16 %v2777_v11, %v2776_v38 }
 0x7f3   : > { %v4486_v16 = vpop.eup %4485  ;;  %4491 = vrcp.f32 %v2567_v23  ;;  %3954 = vmatpush3.bf16.xpose.msra.mxu1 %v2976_v14  ;;  %3973 = vmatprep.mubr.msk.bf16.mxu0 %vm4566_vm0, %v6000_v1 }
 0x7f4   : > { %v2582_v48 = vpop.xlane.xlu1 %2581  ;;  %3955 = vmatprep.subr.bf16.mxu1 %v6000_v1  ;;  %4493 = vrcp.f32 %v2573_v6  ;;  %v5723_v43 = vmul.f32 %v4486_v16, %v5456_v22  ;;  %v2979_v40 = vsel %vm356_vm1, %v2839_v54, 0 }
 0x7f5   : > { %v4488_v33 = vpop.eup %4487  ;;  %4495 = vrcp.f32 %v2570_v58 }
 0x7f6   : > { %v2585_v31 = vpop.xlane.xlu0 %2584  ;;  %v5726_v41 = vmul.f32 %v4488_v33, %v5461_v2 }
 0x7f8   : > { %v2576_v27 = vpop.xlane.xlu1 %2575  ;;  %v2860_v18 = vpack.c.bf16 %v5726_v41, %v5723_v43 }
 0x7f9   : > { %4497 = vrcp.f32 %v2576_v27 }
 0x7fa   : > { %v2579_v24 = vpop.xlane.xlu0 %2578 }
 0x7fb   : > { %v4490_v47 = vpop.eup %4489  ;;  %4499 = vrcp.f32 %v2579_v24  ;;  %3956 = vmatpush3.bf16.xpose.msra.mxu1 %v2979_v40 }
 0x7fc   : > { %v2594_v6 = vpop.xlane.xlu1 %2593  ;;  %3957 = vmatprep.subr.bf16.mxu1 %v6000_v1  ;;  %4501 = vrcp.f32 %v2585_v31  ;;  %v2778_v2 = vmul.f32 %v4490_v47, %v5476_v21 }
 0x7fd   : > { %v4492_v22 = vpop.eup %4491  ;;  %4503 = vrcp.f32 %v2582_v48 }
 0x7fe   : > { %v2597_v36 = vpop.xlane.xlu0 %2596  ;;  %v2779_v58 = vmul.f32 %v4492_v22, %v5481_v60  ;;  %v4494_v12 = vpop.eup %4493 }
 0x7ff   : > { %v4496_v13 = vpop.eup %4495  ;;  %v2781_v11 = vmul.f32 %v4494_v12, %v5471_v32 }
 0x800   : > { %v2588_v50 = vpop.xlane.xlu1 %2587  ;;  %v2840_v20 = vpack.c.bf16 %v2779_v58, %v2778_v2  ;;  %v2780_v38 = vmul.f32 %v4496_v13, %v5466_v53  ;;  %v6013_v2 = vld [vmem:[#allocation27_spill] sm:$0xff] }
 0x802   : > { %v2591_v23 = vpop.xlane.xlu0 %2590  ;;  %v2982_v14 = vsel %vm356_vm1, %v2840_v20, 0  ;;  %v2841_v33 = vpack.c.bf16 %v2781_v11, %v2780_v38 }
 0x803   : > { %v4498_v16 = vpop.eup %4497  ;;  %3958 = vmatpush3.bf16.xpose.msra.mxu1 %v2982_v14  ;;  %4505 = vrcp.f32 %v2591_v23 }
 0x804   : > { %v2606_v29 = vpop.xlane.xlu1 %2605  ;;  %3959 = vmatprep.subr.bf16.mxu1 %v6000_v1  ;;  %v2782_v48 = vmul.f32 %v4498_v16, %v5496_v44  ;;  %4507 = vrcp.f32 %v2588_v50  ;;  %v2985_v47 = vsel %vm356_vm1, %v2841_v33, 0  ;;  %v6014_v44 = vld [vmem:[#allocation2_spill] sm:$0xff] }
 0x805   : > { %v4500_v21 = vpop.eup %4499  ;;  %v1142_v58 = vadd.f32 %v6014_v44, %v6013_v2 }
 0x806   : > { %v2609_v60 = vpop.xlane.xlu0 %2608  ;;  %v2783_v31 = vmul.f32 %v4500_v21, %v5501_v0  ;;  %v4502_v54 = vpop.eup %4501 }
 0x807   : > { %v4504_v32 = vpop.eup %4503  ;;  %v2785_v53 = vmul.f32 %v4502_v54, %v5491_v55  ;;  %v2824_v55 = vpack.c.bf16 %v1142_v58, %v1142_v58 }
 0x808   : > { %v2600_v27 = vpop.xlane.xlu1 %2599  ;;  %v2842_v24 = vpack.c.bf16 %v2783_v31, %v2782_v48  ;;  %v2784_v0 = vmul.f32 %v4504_v32, %v5486_v4 }
 0x809   : > { %4509 = vrcp.f32 %v2600_v27 }
 0x80a   : > { %v2603_v40 = vpop.xlane.xlu0 %2602  ;;  %v3031_v22 = vsel %vm356_vm1, %v2842_v24, 0  ;;  %v2843_v20 = vpack.c.bf16 %v2785_v53, %v2784_v0 }
 0x80b   : > { %4511 = vrcp.f32 %v2603_v40  ;;  %3960 = vmatpush3.bf16.xpose.msra.mxu1 %v2985_v47  ;;  %3966 = vmatpush3.bf16.xpose.msra.mxu0 %v3031_v22  ;;  %v6017_v22 = vld [vmem:[#allocation11_spill] sm:$0xff] }
 0x80c   : > { %4513 = vrcp.f32 %v2597_v36  ;;  %3967 = vmatprep.subr.bf16.mxu0 %v6000_v1  ;;  %3977 = vmatprep.subr.bf16.mxu1 %v6000_v1  ;;  %v2618_v12 = vpop.xlane.xlu1 %2617  ;;  %v3034_v36 = vsel %vm356_vm1, %v2843_v20, 0 }
 0x80d   : > { %4515 = vrcp.f32 %v2609_v60  ;;  %v4506_v13 = vpop.eup %4505 }
 0x80e   : > { %4517 = vrcp.f32 %v2594_v6  ;;  %v2621_v50 = vpop.xlane.xlu0 %2620  ;;  %v4508_v23 = vpop.eup %4507  ;;  %v2787_v11 = vmul.f32 %v4506_v13, %v5521_v8 }
 0x80f   : > { %4519 = vrcp.f32 %v2606_v29  ;;  %v2786_v6 = vmul.f32 %v4508_v23, %v5516_v10  ;;  %v6015_v10 = vld [vmem:[#allocation13_spill] sm:$0xff]  ;;  %v6018_v23 = vld [vmem:[#allocation28_spill] sm:$0xff] }
 0x810   : > { %v2612_v4 = vpop.xlane.xlu1 %2611 }
 0x811   : > { %v2844_v21 = vpack.c.bf16 %v2787_v11, %v2786_v6  ;;  %v6020_v11 = vld [vmem:[#allocation4_spill] sm:$0xff] }
 0x812   : > { %3962 = vmatmul.mubr.msk.bf16.vlgmr.msra.gmra.mrb[56].mxu1 %vm356_vm1, %v2824_v55  ;;  %v2615_v14 = vpop.xlane.xlu0 %2614 }
 0x813   : > { %v4510_v16 = vpop.eup %4509  ;;  %3968 = vmatpush3.bf16.xpose.msra.mxu0 %v3034_v36  ;;  %3985 = vmatprep.mubr.msk.bf16.mxu1 %vm4566_vm0, %v6000_v1  ;;  %4521 = vrcp.f32 %v2615_v14  ;;  %v3037_v27 = vsel %vm356_vm1, %v2844_v21, 0  ;;  %v6019_v36 = vld [vmem:[#allocation26_spill] sm:$0xff] }
 0x814   : > { %3969 = vmatprep.subr.bf16.mxu0 %v6000_v1  ;;  %v2790_v60 = vmul.f32 %v4510_v16, %v5536_v19  ;;  %4523 = vrcp.f32 %v2612_v4  ;;  %v6016_v19 = vld [vmem:[#allocation10_spill] sm:$0xff]  ;;  %v2654_v2 = vpop.xlane.xlu1 %2653  ;;  %v1145_v16 = vadd.f32 %v6020_v11, %v6019_v36  ;;  %v3254_v11 = vsel %vm356_vm1, %v2859_v9, 0 }
 0x815   : > { %v4512_v29 = vpop.eup %4511  ;;  %4525 = vrcp.f32 %v2621_v50  ;;  %v6021_v50 = vld [vmem:[#allocation17_spill] sm:$0xff] }
 0x816   : > { %v4514_v38 = vpop.eup %4513  ;;  %v2791_v33 = vmul.f32 %v4512_v29, %v5541_v7  ;;  %v2657_v47 = vpop.xlane.xlu0 %2656  ;;  %4527 = vrcp.f32 %v2618_v12 }
 0x817   : > { %v4516_v48 = vpop.eup %4515  ;;  %v2789_v32 = vmul.f32 %v4514_v38, %v5511_v42  ;;  %v2825_v38 = vpack.c.bf16 %v1145_v16, %v1145_v16 }
 0x818   : > { %v4518_v8 = vpop.eup %4517  ;;  %v2846_v31 = vpack.c.bf16 %v2791_v33, %v2790_v60  ;;  %v2793_v40 = vmul.f32 %v4516_v48, %v6015_v10  ;;  %v2648_v4 = vpop.xlane.xlu1 %2647  ;;  %v3141_v33 = vsel %vm356_vm1, %v2850_v56, 0  ;;  %v6022_v48 = vld [vmem:[#allocation14_spill] sm:$0xff]  ;;  %v6024_v10 = vld [vmem:[#allocation32_spill] sm:$0xff] }
 0x819   : > { %v4520_v54 = vpop.eup %4519  ;;  %v2788_v7 = vmul.f32 %v4518_v8, %v6016_v19 }
 0x81a   : > { %v3086_v24 = vsel %vm356_vm1, %v2846_v31, 0  ;;  %v2792_v53 = vmul.f32 %v4520_v54, %v6017_v22  ;;  %v2651_v20 = vpop.xlane.xlu0 %2650  ;;  %v6023_v31 = vld [vmem:[#allocation12_spill] sm:$0xff] }
 0x81b   : > { %3970 = vmatpush3.bf16.xpose.msra.mxu0 %v3037_v27  ;;  %3978 = vmatpush3.bf16.xpose.msra.mxu1 %v3086_v24  ;;  %v2845_v44 = vpack.c.bf16 %v2789_v32, %v2788_v7  ;;  %4529 = vrcp.f32 %v2651_v20  ;;  %v3144_v32 = vsel %vm356_vm1, %v2851_v35, 0  ;;  %v6026_v7 = vld [vmem:[#allocation31_spill] sm:$0xff]  ;;  %v6027_v35 = vld [vmem:[#allocation30_spill] sm:$0xff] }
 0x81c   : > { %3971 = vmatprep.subr.bf16.mxu0 %v6000_v1  ;;  %3979 = vmatprep.subr.bf16.mxu1 %v6000_v1  ;;  %v2847_v58 = vpack.c.bf16 %v2793_v40, %v2792_v53  ;;  %4531 = vrcp.f32 %v2648_v4  ;;  %v910_v30 = vpop.permute.xlu1 %909  ;;  %v3257_v4 = vsel %vm356_vm1, %v2860_v18, 0 }
 0x81d   : > { %v4522_v0 = vpop.eup %4521  ;;  %v3040_v13 = vsel %vm356_vm1, %v2845_v44, 0  ;;  %4533 = vrcp.f32 %v2657_v47  ;;  %v6025_v47 = vld [vmem:[#allocation7_spill] sm:$0xff] }
 0x81e   : > { %v4524_v42 = vpop.eup %4523  ;;  %v3089_v55 = vsel %vm356_vm1, %v2847_v58, 0  ;;  %v2795_v14 = vmul.f32 %v4522_v0, %v6018_v23  ;;  %4535 = vrcp.f32 %v2654_v2  ;;  %v1150_v19 = vadd.f32 %v6025_v47, %v910_v30  ;;  %v4287_v47 = vld [vmem:[%s5915_s7] sm:$0xff]  }
 0x81f   : > { %v2794_v12 = vmul.f32 %v4524_v42, %v6021_v50  ;;  %v4526_v29 = vpop.eup %4525  ;;  %v6028_v42 = vld [vmem:[#allocation29_spill] sm:$0xff] }
 0x820   : > { %v4528_v21 = vpop.eup %4527  ;;  %v2797_v8 = vmul.f32 %v4526_v29, %v6022_v48  ;;  %v2826_v44 = vpack.c.bf16 %v1150_v19, %v1150_v19  ;;  %v4288_v19 = vld [vmem:[%s5915_s7 + $0x8] sm:$0xff]  }
 0x821   : > { %v2848_v6 = vpack.c.bf16 %v2795_v14, %v2794_v12  ;;  %v2796_v54 = vmul.f32 %v4528_v21, %v6023_v31  ;;  %v6030_v31 = vld [vmem:[#allocation8_spill] sm:$0xff] }
 0x823   : > { %3972 = vmatpush3.bf16.xpose.msra.mxu0 %v3040_v13  ;;  %3980 = vmatpush3.bf16.xpose.msra.mxu1 %v3089_v55  ;;  %v3092_v60 = vsel %vm356_vm1, %v2848_v6, 0  ;;  %v2849_v27 = vpack.c.bf16 %v2797_v8, %v2796_v54  ;;  %v915_v55 = vpop.permute.xlu0 %914 }
 0x824   : > { %3981 = vmatprep.subr.bf16.mxu1 %v6000_v1  ;;  %3989 = vmatprep.subr.bf16.mxu0 %v6000_v1  ;;  %v1153_v23 = vadd.f32 %v6029_v51, %v915_v55 }
 0x825   : > { %v4530_v24 = vpop.eup %4529  ;;  %v3095_v56 = vsel %vm356_vm1, %v2849_v27, 0  ;;  %v6031_v27 = vld [vmem:[#allocation6_spill] sm:$0xff] }
 0x826   : > { %v4532_v52 = vpop.eup %4531  ;;  %v2807_v40 = vmul.f32 %v4530_v24, %v6024_v10  ;;  %v2827_v14 = vpack.c.bf16 %v1153_v23, %v1153_v23 }
 0x827   : > { %v2806_v22 = vmul.f32 %v4532_v52, %v6026_v7  ;;  %v4534_v2 = vpop.eup %4533  ;;  %v3386_v7 = vsel %vm356_vm1, %v4287_v47, 0 }
 0x828   : > { %v4536_v58 = vpop.eup %4535  ;;  %v2809_v0 = vmul.f32 %v4534_v2, %v6027_v35 }
 0x829   : > { %v2854_v53 = vpack.c.bf16 %v2807_v40, %v2806_v22  ;;  %v2808_v20 = vmul.f32 %v4536_v58, %v6028_v42  ;;  %v3389_v22 = vsel %vm356_vm1, %v4288_v19, 0 }
 0x82a   : > { %3974 = vmatmul.mubr.msk.bf16.vlgmr.msra.gmra.mrb[52].mxu0 %vm356_vm1, %v2825_v38 }
 0x82b   : > { %3982 = vmatpush3.bf16.xpose.msra.mxu1 %v3092_v60  ;;  %3990 = vmatpush3.bf16.xpose.msra.mxu0 %v3141_v33  ;;  %v3196_v49 = vsel %vm356_vm1, %v2854_v53, 0  ;;  %v2855_v13 = vpack.c.bf16 %v2809_v0, %v2808_v20  ;;  %v4289_v53 = vld [vmem:[%s5915_s7 + $0x10] sm:$0xff]  }
 0x82c   : > { %3983 = vmatprep.subr.bf16.mxu1 %v6000_v1  ;;  %3991 = vmatprep.subr.bf16.mxu0 %v6000_v1  ;;  %v3392_v2 = vsel %vm356_vm1, %v4289_v53, 0 }
 0x82d   : > { %3997 = vmatprep.mubr.msk.bf16.mxu0 %vm4566_vm0, %v6000_v1  ;;  %v3199_v46 = vsel %vm356_vm1, %v2855_v13, 0 }
 0x833   : > { %3984 = vmatpush3.bf16.xpose.msra.mxu1 %v3095_v56  ;;  %3992 = vmatpush3.bf16.xpose.msra.mxu0 %v3144_v32 }
 0x834   : > { %3993 = vmatprep.subr.bf16.mxu0 %v6000_v1  ;;  %4001 = vmatprep.subr.bf16.mxu1 %v6000_v1 }
 0x83a   : > { %3986 = vmatmul.mubr.msk.bf16.vlgmr.msra.gmra.mrb[60].mxu1 %vm356_vm1, %v2826_v44 }
 0x83b   : > { %3994 = vmatpush3.bf16.xpose.msra.mxu0 %v3147_v63  ;;  %4002 = vmatpush3.bf16.xpose.msra.mxu1 %v3196_v49 }
 0x83c   : > { %3995 = vmatprep.subr.bf16.mxu0 %v6000_v1  ;;  %4003 = vmatprep.subr.bf16.mxu1 %v6000_v1 }
 0x83d   : > { %4009 = vmatprep.mubr.msk.bf16.mxu1 %vm4566_vm0, %v6000_v1 }
 0x843   : > { %3996 = vmatpush3.bf16.xpose.msra.mxu0 %v3150_v59  ;;  %4004 = vmatpush3.bf16.xpose.msra.mxu1 %v3199_v46 }
 0x844   : > { %4013 = vmatprep.subr.bf16.mxu0 %v6000_v1  ;;  %4005 = vmatprep.subr.bf16.mxu1 %v6000_v1 }
 0x84a   : > { %3998 = vmatmul.mubr.msk.bf16.vlgmr.msra.gmra.mrb[56].mxu0 %vm356_vm1, %v2827_v14 }
 0x84b   : > { %4014 = vmatpush3.bf16.xpose.msra.mxu0 %v3251_v61  ;;  %4021 = vmatprep.mubr.msk.bf16.mxu0 %vm4566_vm0, %v6000_v1 }
 0x84c   : > { %4015 = vmatprep.subr.bf16.mxu0 %v6000_v1 }
 0x84d   : > { %v2666_v45 = vpop.xlane.xlu1 %2665 }
 0x84f   : > { %v2663_v17 = vpop.xlane.xlu0 %2662 }
 0x850   : > { %4537 = vrcp.f32 %v2663_v17 }
 0x851   : > { %v2660_v36 = vpop.xlane.xlu1 %2659 }
 0x852   : > { %4539 = vrcp.f32 %v2660_v36 }
 0x853   : > { %4016 = vmatpush3.bf16.xpose.msra.mxu0 %v3254_v11  ;;  %v2669_v28 = vpop.xlane.xlu0 %2668 }
 0x854   : > { %4541 = vrcp.f32 %v2669_v28  ;;  %4017 = vmatprep.subr.bf16.mxu0 %v6000_v1 }
 0x855   : > { %4543 = vrcp.f32 %v2666_v45  ;;  %v2690_v34 = vpop.xlane.xlu1 %2689  ;;  %v4290_v45 = vld [vmem:[%s5915_s7 + $0x18] sm:$0xff]  }
 0x856   : > { %4545 = vrcp.f32 %v2690_v34  ;;  %v3395_v17 = vsel %vm356_vm1, %v4290_v45, 0 }
 0x857   : > { %v2693_v26 = vpop.xlane.xlu0 %2692 }
 0x858   : > { %4547 = vrcp.f32 %v2693_v26 }
 0x859   : > { %v920_v8 = vpop.permute.xlu1 %919 }
 0x85a   : > { %v4538_v16 = vpop.eup %4537 }
 0x85b   : > { %4018 = vmatpush3.bf16.xpose.msra.mxu0 %v3257_v4  ;;  %v2811_v9 = vmul.f32 %v4538_v16, %v5614_v39 }
 0x85c   : > { %v4540_v57 = vpop.eup %4539  ;;  %4019 = vmatprep.subr.bf16.mxu0 %v6000_v1 }
 0x85d   : > { %v2810_v3 = vmul.f32 %v4540_v57, %v5624_v5 }
 0x85e   : > { %v4542_v50 = vpop.eup %4541 }
 0x85f   : > { %v4544_v12 = vpop.eup %4543  ;;  %v2856_v6 = vpack.c.bf16 %v2811_v9, %v2810_v3  ;;  %v2813_v21 = vmul.f32 %v4542_v50, %v5632_v37  ;;  %v925_v33 = vpop.permute.xlu0 %924 }
 0x860   : > { %v4546_v29 = vpop.eup %4545  ;;  %v2812_v5 = vmul.f32 %v4544_v12, %v5610_v62  ;;  %v1161_v54 = vadd.f32 %v6030_v31, %v925_v33 }
 0x861   : > { %v3202_v38 = vsel %vm356_vm1, %v2856_v6, 0  ;;  %v2820_v43 = vmul.f32 %v4546_v29, %v5628_v15  ;;  %v1158_v15 = vadd.f32 %v6031_v27, %v920_v8 }
 0x862   : > { %v4548_v60 = vpop.eup %4547  ;;  %4006 = vmatpush3.bf16.xpose.msra.mxu1 %v3202_v38  ;;  %v2857_v39 = vpack.c.bf16 %v2813_v21, %v2812_v5  ;;  %v2829_v24 = vpack.c.bf16 %v1161_v54, %v1161_v54  ;;  %v4549_v54 = vld [vmem:[%s4674_s15 + $0x10] sm:$0xff] }
 0x863   : > { %v2821_v41 = vmul.f32 %v4548_v60, %v5636_v25  ;;  %4007 = vmatprep.subr.bf16.mxu1 %v6000_v1  ;;  %v2828_v25 = vpack.c.bf16 %v1158_v15, %v1158_v15 }
 0x864   : > { %v3205_v37 = vsel %vm356_vm1, %v2857_v39, 0 }
 0x865   : > { %v2861_v18 = vpack.c.bf16 %v2821_v41, %v2820_v43 }
 0x867   : > { %v3260_v48 = vsel %vm356_vm1, %v2861_v18, 0  ;;  %v3612_v18 = vld [vmem:[%s5916_s8] ss:$0 sm:$0xff] }
 0x868   : > { %4020 = vmatpush3.bf16.xpose.msra.mxu0 %v3260_v48 }
 0x86a   : > { %4008 = vmatpush3.bf16.xpose.msra.mxu1 %v3205_v37 }
 0x86b   : > { %4089 = vmatprep.subr.msk.bf16.mxu1 %vm356_vm1, %v4287_v47 }
 0x86f   : > { %4022 = vmatmul.mubr.msk.bf16.vlgmr.msra.gmra.mrb[60].mxu0 %vm356_vm1, %v2829_v24  ;;  %v4550_v24 = vld [vmem:[%s4674_s15] sm:$0xff] }
 0x871   : > { %4010 = vmatmul.mubr.msk.bf16.vlgmr.msra.gmra.mrb[64].mxu1 %vm356_vm1, %v2828_v25 }
 0x872   : > { %4026 = vmatpush3.bf16.xpose.msra.mxu1 %v3386_v7  ;;  %v4553_v7 = vld [vmem:[%s4674_s15 + $0x30] sm:$0xff] }
 0x873   : > { %4090 = vmatprep.subr.msk.bf16.mxu1 %vm356_vm1, %v4288_v19 }
 0x87a   : > { %4028 = vmatpush3.bf16.xpose.msra.mxu1 %v3389_v22 }
 0x87b   : > { %4091 = vmatprep.subr.msk.bf16.mxu1 %vm356_vm1, %v4289_v53 }
 0x882   : > { %4030 = vmatpush3.bf16.xpose.msra.mxu1 %v3392_v2 }
 0x883   : > { %4092 = vmatprep.subr.msk.bf16.mxu1 %vm356_vm1, %v4290_v45 }
 0x88a   : > { %4032 = vmatpush3.bf16.xpose.msra.mxu1 %v3395_v17 }
 0x8ad   : > { %v2911_v1 = vpop.f32.mrb[52].mxu1 }
 0x8ae   : > { %3302 = vxpose.xlu1.b32.start [1/8] (short) (narrow) %v2911_v1, 64  ;;  %v3939_v62 = vpop.f32.mrb[53].mxu1 }
 0x8af   : > { %v2914_v52 = vpop.f32.mrb[54].mxu1  ;;  %v4551_v62 = vld [vmem:[%s4674_s15 + $0x18] sm:$0xff] }
 0x8b0   : > { %v3940_v30 = vpop.f32.mrb[55].mxu1 }
 0x8b1   : > { %v4552_v30 = vld [vmem:[%s4674_s15 + $0x8] sm:$0xff] }
 0x8c5   : > { %v2966_v56 = vpop.f32.mrb[48].mxu0 }
 0x8c6   : > { %3303 = vxpose.xlu1.b32.cont [2/8] (short) (narrow) %v2966_v56, 64  ;;  %v3951_v32 = vpop.f32.mrb[49].mxu0 }
 0x8c7   : > { %v2969_v10 = vpop.f32.mrb[50].mxu0 }
 0x8c8   : > { %v3952_v40 = vpop.f32.mrb[51].mxu0 }
 0x8e5   : > { %v3021_v44 = vpop.f32.mrb[56].mxu1 }
 0x8e6   : > { %3304 = vxpose.xlu1.b32.cont [3/8] (short) (narrow) %v3021_v44, 64  ;;  %v3963_v58 = vpop.f32.mrb[57].mxu1  ;;  %v4554_v44 = vld [vmem:[%s4674_s15 + $0x20] sm:$0xff] }
 0x8e7   : > { %v3024_v63 = vpop.f32.mrb[58].mxu1 }
 0x8e8   : > { %v3964_v49 = vpop.f32.mrb[59].mxu1 }
 0x8e9   : > { %v4555_v49 = vld [vmem:[%s4674_s15 + $0x38] sm:$0xff] }
 0x8fd   : > { %v3076_v35 = vpop.f32.mrb[52].mxu0 }
 0x8fe   : > { %3305 = vxpose.xlu1.b32.cont [4/8] (short) (narrow) %v3076_v35, 64  ;;  %v3975_v0 = vpop.f32.mrb[53].mxu0 }
 0x8ff   : > { %v3079_v42 = vpop.f32.mrb[54].mxu0  ;;  %v4556_v0 = vld [vmem:[%s4674_s15 + $0x28] sm:$0xff] }
 0x900   : > { %v3976_v20 = vpop.f32.mrb[55].mxu0 }
 0x90d   : > { %v3131_v13 = vpop.f32.mrb[60].mxu1 }
 0x90e   : > { %3306 = vxpose.xlu1.b32.cont [5/8] (short) (narrow) %v3131_v13, 64  ;;  %v3987_v55 = vpop.f32.mrb[61].mxu1 }
 0x90f   : > { %v3134_v59 = vpop.f32.mrb[62].mxu1 }
 0x910   : > { %v3988_v46 = vpop.f32.mrb[63].mxu1 }
 0x91d   : > { %v3186_v51 = vpop.f32.mrb[56].mxu0 }
 0x91e   : > { %3307 = vxpose.xlu1.b32.cont [6/8] (short) (narrow) %v3186_v51, 64  ;;  %v3999_v23 = vpop.f32.mrb[57].mxu0 }
 0x91f   : > { %v3189_v14 = vpop.f32.mrb[58].mxu0 }
 0x920   : > { %v4000_v61 = vpop.f32.mrb[59].mxu0 }
 0x942   : > { %v3296_v36 = vpop.f32.mrb[60].mxu0 }
 0x943   : > { %v4023_v11 = vpop.f32.mrb[61].mxu0 }
 0x944   : > { %v3241_v28 = vpop.f32.mrb[64].mxu1  ;;  %v3299_v34 = vpop.f32.mrb[62].mxu0 }
 0x945   : > { %3308 = vxpose.xlu1.b32.cont [7/8] (short) (narrow) %v3241_v28, 64  ;;  %v4011_v26 = vpop.f32.mrb[65].mxu1  ;;  %v4024_v16 = vpop.f32.mrb[63].mxu0 }
 0x946   : > { %v3244_v4 = vpop.f32.mrb[66].mxu1 }
 0x947   : > { %v4012_v57 = vpop.f32.mrb[67].mxu1 }
 0x949   : > { %3309 = vxpose.xlu1.b32.end [8/8] (short) (narrow) %v3296_v36, 64 }
 0x9ad   : > { %v3318_v3 = vpop.trf.xlu1 }
 0x9b1   : > { %v3319_v9 = vpop.trf.xlu1 }
 0x9b2   : > { %v3334_v50 = vpack.c.bf16 %v3319_v9, %v3318_v3 }
 0x9b4   : > { %4033 = vmatprep.mubr.msk.bf16.mxu1 %vm356_vm1, %v3334_v50 }
 0x9b5   : > { %v3320_v12 = vpop.trf.xlu1 }
 0x9b9   : > { %v3321_v6 = vpop.trf.xlu1 }
 0x9ba   : > { %v3335_v29 = vpack.c.bf16 %v3321_v6, %v3320_v12 }
 0x9bc   : > { %4034 = vmatmul.mubr.msk.bf16.vlgmr.msra.gmra.mrb[68].mxu1 %vm356_vm1, %v3335_v29 }
 0x9bd   : > { %v3322_v38 = vpop.trf.xlu1 }
 0x9c1   : > { %v3323_v21 = vpop.trf.xlu1 }
 0x9c2   : > { %v3336_v60 = vpack.c.bf16 %v3323_v21, %v3322_v38 }
 0x9c4   : > { %4037 = vmatprep.mubr.msk.bf16.mxu1 %vm356_vm1, %v3336_v60 }
 0x9c5   : > { %v3324_v43 = vpop.trf.xlu1 }
 0x9c9   : > { %v3325_v41 = vpop.trf.xlu1 }
 0x9ca   : > { %v3337_v5 = vpack.c.bf16 %v3325_v41, %v3324_v43 }
 0x9cc   : > { %4038 = vmatmul.mubr.msk.bf16.gmra.mrb[72].mxu1 %vm356_vm1, %v3337_v5 }
 0xa8f   : > { %v4035_v39 = vpop.f32.mrb[68].mxu1 }
 0xa90   : > { %v3440_v33 = vadd.f32 %v4035_v39, %v3612_v18  ;;  %v3431_v48 = vpop.f32.mrb[69].mxu1 }
 0xa91   : > { %v3432_v8 = vadd.f32 %v3612_v18, %v3431_v48  ;;  %v4036_v31 = vpop.f32.mrb[70].mxu1 }
 0xa92   : > { %v3464_v37 = vadd.f32 %v4549_v54, %v3440_v33  ;;  %v3443_v27 = vadd.f32 %v4036_v31, %v3612_v18  ;;  %v3434_v15 = vpop.f32.mrb[71].mxu1 }
 0xa93   : > { %v3462_v25 = vadd.f32 %v4550_v24, %v3432_v8  ;;  %v3435_v1 = vadd.f32 %v3612_v18, %v3434_v15 }
 0xa94   : > { %3472 = vst.msk [vmem:[%s5879_s23 + $0x10] sm:$0xff] %vm356_vm1, %v3464_v37  ;;  %v3465_v52 = vadd.f32 %v4551_v62, %v3443_v27 }
 0xa95   : > { %3470 = vst.msk [vmem:[%s5879_s23] sm:$0xff] %vm356_vm1, %v3462_v25  ;;  %v3463_v56 = vadd.f32 %v4552_v30, %v3435_v1 }
 0xa96   : > { %3473 = vst.msk [vmem:[%s5879_s23 + $0x18] sm:$0xff] %vm356_vm1, %v3465_v52 }
 0xa97   : > { %3471 = vst.msk [vmem:[%s5879_s23 + $0x8] sm:$0xff] %vm356_vm1, %v3463_v56 }
 0xa9f   : > { %v4039_v32 = vpop.f32.mrb[72].mxu1 }
 0xaa0   : > { %v3456_v10 = vadd.f32 %v4039_v32, %v3612_v18  ;;  %v3447_v40 = vpop.f32.mrb[73].mxu1 }
 0xaa1   : > { %v3448_v47 = vadd.f32 %v3612_v18, %v3447_v40  ;;  %v4040_v19 = vpop.f32.mrb[74].mxu1 }
 0xaa2   : > { %v3468_v22 = vadd.f32 %v4553_v7, %v3456_v10  ;;  %v3459_v53 = vadd.f32 %v4040_v19, %v3612_v18  ;;  %v3450_v2 = vpop.f32.mrb[75].mxu1 }
 0xaa3   : > { %v3466_v58 = vadd.f32 %v4554_v44, %v3448_v47  ;;  %v3451_v63 = vadd.f32 %v3612_v18, %v3450_v2 }
 0xaa4   : > { %3476 = vst.msk [vmem:[%s5879_s23 + $0x30] sm:$0xff] %vm356_vm1, %v3468_v22  ;;  %v3469_v35 = vadd.f32 %v4555_v49, %v3459_v53 }
 0xaa5   : > { %3474 = vst.msk [vmem:[%s5879_s23 + $0x20] sm:$0xff] %vm356_vm1, %v3466_v58  ;;  %v3467_v42 = vadd.f32 %v4556_v0, %v3451_v63 }
 0xaa6   : > { %3477 = vst.msk [vmem:[%s5879_s23 + $0x38] sm:$0xff] %vm356_vm1, %v3469_v35 }
 0xaa7   : > { %3475 = vst.msk [vmem:[%s5879_s23 + $0x28] sm:$0xff] %vm356_vm1, %v3467_v42 }
 0xaa8 PF: > { %s19_s30 = sadd.s32 1, %s4563_s30  }
 0xaa9   : > { %p16_p4 = scmp.ge.s32.totalorder %s19_s30, 4  }
 0xaab   :  { %18 = sbr.rel (!%p16_p4) target bundleno = 1 (0x1), region = 86 }

// kernel: bottleneck_forward.3
= control target key start
LH: loop header
LB: loop body
LE: loop exit
PB: predicated region body
PF: predicated region fallthrough
CT: control target
= control target key end

     0   :  { %s6976_s21 = smov 0   ;;  %s8279_s0 = inlined_call_operand.vmem [shape: f32[2,64,32], index: 0, kind: input, shape index: {}]   ;;  %s8280_s1 = inlined_call_operand.vmem [shape: f32[2,1,64], index: 1, kind: input, shape index: {}]   ;;  %s8281_s2 = inlined_call_operand.vmem [shape: f32[1,32], index: 2, kind: input, shape index: {}]   ;;  %s8282_s3 = inlined_call_operand.vmem [shape: f32[1,32], index: 3, kind: input, shape index: {}]   ;;  %s8283_s4 = inlined_call_operand.vmem [shape: f32[32,32], index: 4, kind: input, shape index: {}]   ;;  %s8284_s5 = inlined_call_operand.vmem [shape: f32[32,32], index: 5, kind: input, shape index: {}]   ;;  %s8285_s6 = inlined_call_operand.vmem [shape: bf16[9,32,64], index: 6, kind: input, shape index: {}]   ;;  %s8286_s7 = inlined_call_operand.vmem [shape: f32[1,64], index: 7, kind: input, shape index: {}]   ;;  %s8287_s8 = inlined_call_operand.vmem [shape: f32[1,64], index: 8, kind: input, shape index: {}]   ;;  %s8288_s9 = inlined_call_operand.vmem [shape: f32[1,64], index: 9, kind: input, shape index: {}]   ;;  %s8289_s10 = inlined_call_operand.vmem [shape: f32[64,32], index: 10, kind: input, shape index: {}]   ;;  %s8290_s11 = inlined_call_operand.vmem [shape: f32[32,64], index: 11, kind: input, shape index: {}]   ;;  %s8291_s12 = inlined_call_operand.vmem [shape: bf16[9,64,64], index: 12, kind: input, shape index: {}]   ;;  %s8292_s13 = inlined_call_operand.vmem [shape: f32[1,64], index: 13, kind: input, shape index: {}]   ;;  %s8293_s14 = inlined_call_operand.vmem [shape: bf16[32,64], index: 14, kind: input, shape index: {}]   ;;  %s8294_s15 = inlined_call_operand.vmem [shape: f32[1,64], index: 15, kind: input, shape index: {}]   ;;  %s8295_s16 = inlined_call_operand.vmem [shape: f32[2,64,64], index: 16, kind: output, shape index: {}]  }
   0x1   :  { %8296 = sst [smem:[#allocation4_spill]] %s8279_s0 }
   0x2 LB: > { %s5528_s22 = sadd.s32 4294967295, %s6885_s21   ;;  %p5532_p0 = scmp.ge.s32.totalorder %s6885_s21, 1  ;;  %s6885_s21 = sphi %s6976_s21, %s26_s21  }
   0x3   : > { %p470_p1 = scmp.lt.s32.totalorder %s6885_s21, 3 }
   0x5   : > { %p471_p2 = pnand %p5532_p0, %p470_p1 }
   0x6   : > { %v545_v0 = vld [vmem:[%s8283_s4] sm:$0xff] (!%p471_p2)  ;;  %v546_v1 = vld [vmem:[%s8283_s4 + $0x8] sm:$0xff] (!%p471_p2)  ;;  %v547_v2 = vld [vmem:[%s8283_s4 + $0x10] sm:$0xff] (!%p471_p2)  ;;  %v6887_v3 = vmov (!%p471_p2), 0.0|0.0   ;;  %vm6888_vm0 = vmmov (!%p471_p2), 0   ;;  %v6889_v6 = vmov (!%p471_p2), 0.0   ;;  %v724_v46 = vlaneseq (!%p471_p2) }
   0x7   : > { %474 = sbr.rel (%p471_p2) target bundleno = 2729 (0xaa9), region = 84  ;;  %6501 = vmatprep.subr.bf16.mxu0 (!%p471_p2), %v6887_v3  ;;  %v6994_v4 = vpack.c.bf16 (!%p471_p2), %v546_v1, %v545_v0  ;;  %v548_v5 = vld [vmem:[%s8283_s4 + $0x18] sm:$0xff] (!%p471_p2)  ;;  %6141 = vmatprep.mubr.msk.f32.mxu0 (!%p471_p2), %vm6888_vm0, %v6889_v6  ;;  %p523_p3 = scmp.lt.s32.totalorder (!%p471_p2), %s5528_s22, 1  ;;  %v549_v7 = vld [vmem:[%s8284_s5] sm:$0xff] (!%p471_p2)  ;;  %v550_v8 = vld [vmem:[%s8284_s5 + $0x8] sm:$0xff] (!%p471_p2)  ;;  %vm555_vm1 = vcmask (!%p471_p2), 261120  }
   0x8   : > { %v6508_v9 = vpack.c.bf16 (!%p471_p2), %v550_v8, %v549_v7  ;;  %6519 = vmatprep.subr.bf16.mxu1 (!%p471_p2), %v6887_v3  ;;  %6174 = vmatprep.mubr.msk.f32.mxu1 (!%p471_p2), %vm6888_vm0, %v6889_v6  ;;  %v6505_v10 = vpack.c.bf16 (!%p471_p2), %v548_v5, %v547_v2  ;;  %s8297_s25 = sld [smem:[#allocation4_spill]] (!%p471_p2)  ;;  %v551_v40 = vld [vmem:[%s8284_s5 + $0x10] sm:$0xff] (!%p471_p2)  ;;  %v552_v41 = vld [vmem:[%s8284_s5 + $0x18] sm:$0xff] (!%p471_p2)  ;;  %v725_v47 = vshrl.u32 (!%p471_p2), %v724_v46, 7  ;;  %vm1011_vm2 = vcmask (!%p471_p2), 253952  }
   0x9   : > { %6503 = vmatpush3.bf16.msra.mxu0 (!%p471_p2), %v6994_v4  ;;  %v6511_v42 = vpack.c.bf16 (!%p471_p2), %v552_v41, %v551_v40  ;;  %vm1017_vm3 = vsmask.f32 (!%p471_p2), 256  ;;  %vm1049_vm4 = vsmask.f32 (!%p471_p2), 7938  ;;  %vm1009_vm6 = vcmask (!%p471_p2), 257024  }
   0xa   : > { %6504 = vmatprep.subr.bf16.mxu0 (!%p471_p2), %v6887_v3  ;;  %6521 = vmatpush3.bf16.msra.mxu1 (!%p471_p2), %v6508_v9  ;;  %v7057_v48 = vsub.s32 (!%p471_p2), 0, %v725_v47  ;;  %vm7106_vm5 = vmand (!%p471_p2), %vm1011_vm2, %vm1017_vm3  ;;  %v1057_v40 = vld [vmem:[#allocation2 + $0x14] sm:$0x1] (!%p471_p2)  ;;  %v1034_v47 = vld [vmem:[#allocation2 + $0x28] sm:$0x1] (!%p471_p2)  ;;  %vm1618_vm12 = vcmask (!%p471_p2), 1042432  }
   0xb   : > { %6522 = vmatprep.subr.bf16.mxu1 (!%p471_p2), %v6887_v3  ;;  %vm7114_vm7 = vmand (!%p471_p2), %vm1011_vm2, %vm1049_vm4  ;;  %vm1264_vm9 = vsmask.f32 (!%p471_p2), 3328  ;;  %vm1265_vm10 = vsmask.f32 (!%p471_p2), 7440  ;;  %vm1619_vm13 = vcmask (!%p471_p2), 1046532   ;;  %vm2896_vm15 = vcmask (!%p471_p2), 523264  }
   0xc   : > { %vm7221_vm8 = vmand (!%p471_p2), %vm1009_vm6, %vm1049_vm4 }
   0xd   : > { %6506 = vmatpush3.bf16.msra.mxu0 (!%p471_p2), %v6505_v10  ;;  %vm7271_vm11 = vmor (!%p471_p2), %vm1264_vm9, %vm1265_vm10 }
   0xe   : > { %s8315_s22 = smov (!%p523_p3, %s5528_s22), 1  ;;  %6507 = vmatprep.subr.bf16.mxu0 %v6887_v3  ;;  %6524 = vmatpush3.bf16.msra.mxu1 %v6511_v42  ;;  %vm7361_vm14 = vmor %vm1618_vm12, %vm1619_vm13 }
   0xf   : > { %s5935_s20 = sshll.u32 %s8315_s22, 6  ;;  %6537 = vmatprep.subr.bf16.mxu1 %v6887_v3  ;;  %s530_s27 = scalar_lea.vmem %s8280_s1, %s8315_s22 }
  0x10   : > { %s7021_s26 = scalar_lea.vmem %s8297_s25, %s5935_s20 }
  0x11   : > { %v537_v11 = vld [vmem:[%s7021_s26] sm:$0xff]  ;;  %v538_v12 = vld [vmem:[%s7021_s26 + $0x8] sm:$0xff]  ;;  %v539_v13 = vld [vmem:[%s7021_s26 + $0x10] sm:$0xff] }
  0x12   : > { %v540_v14 = vld [vmem:[%s7021_s26 + $0x18] sm:$0xff]  ;;  %v541_v15 = vld [vmem:[%s7021_s26 + $0x20] sm:$0xff]  ;;  %v542_v16 = vld [vmem:[%s7021_s26 + $0x28] sm:$0xff]  ;;  %v556_v17 = vsel %vm555_vm1, %v537_v11, 0.0  ;;  %v557_v18 = vsel %vm555_vm1, %v538_v12, 0.0  ;;  %v559_v19 = vsel %vm555_vm1, %v539_v13, 0.0 }
  0x13   : > { %v543_v20 = vld [vmem:[%s7021_s26 + $0x30] sm:$0xff]  ;;  %v544_v21 = vld [vmem:[%s7021_s26 + $0x38] sm:$0xff]  ;;  %v558_v22 = vadd.f32 %v557_v18, %v556_v17  ;;  %v561_v23 = vsel %vm555_vm1, %v540_v14, 0.0  ;;  %v563_v24 = vsel %vm555_vm1, %v541_v15, 0.0  ;;  %v565_v25 = vsel %vm555_vm1, %v542_v16, 0.0 }
  0x14   : > { %v567_v26 = vsel %vm555_vm1, %v543_v20, 0.0  ;;  %v569_v27 = vsel %vm555_vm1, %v544_v21, 0.0 }
  0x15   : > { %v560_v28 = vadd.f32 %v559_v19, %v558_v22 }
  0x17   : > { %v562_v29 = vadd.f32 %v561_v23, %v560_v28 }
  0x19   : > { %v564_v30 = vadd.f32 %v563_v24, %v562_v29 }
  0x1b   : > { %v566_v31 = vadd.f32 %v565_v25, %v564_v30  ;;  %v6734_v30 = vld [vmem:[%s8285_s6 + $0x30] sm:$0xff]  }
  0x1d   : > { %v568_v32 = vadd.f32 %v567_v26, %v566_v31  ;;  %v1022_v31 = vld [vmem:[#allocation2 + $0x8] sm:$0x1] }
  0x1f   : > { %v570_v33 = vadd.f32 %v569_v27, %v568_v32  ;;  %v1054_v32 = vld [vmem:[#allocation2 + $0xc] sm:$0x1] }
  0x21   : > { %v571_v34 = vrot.slane %v570_v33, 4 }
  0x23   : > { %v572_v35 = vadd.f32 %v571_v34, %v570_v33  ;;  %v1023_v33 = vsel %vm7106_vm5, 0, %v1022_v31  ;;  %v5542_v34 = vld [vmem:[%s8282_s3] ss:$0 sm:$0xff] }
  0x24   : > { %1024 = vst [vmem:[#allocation2 + $0x8] sm:$0x1] %v1023_v33 }
  0x25   : > { %v573_v36 = vrot.slane %v572_v35, 2 }
  0x27   : > { %v574_v37 = vadd.f32 %v573_v36, %v572_v35  ;;  %v1025_v35 = vld [vmem:[#allocation2 + $0x10] sm:$0x1]  ;;  %v6890_v36 = vmov 0  }
  0x28   : > { %1010 = vst.msk [vmem:[#allocation2] sm:$0xf] %vm1009_vm6, %v6890_v36  ;;  %1014 = vst.msk [vmem:[#allocation2 + $0x48] sm:$0xf] %vm1009_vm6, %v6890_v36 }
  0x29   : > { %v575_v38 = vrot.slane %v574_v37, 1  ;;  %1012 = vst.msk [vmem:[#allocation2 + $0x4] sm:$0x1] %vm1011_vm2, %v6890_v36  ;;  %1015 = vst.msk [vmem:[#allocation2 + $0x4c] sm:$0x1] %vm1011_vm2, %v6890_v36  ;;  %vm3352_vm2 = vcmask 516096  }
  0x2a   : > { %3353 = vst.msk [vmem:[#allocation3 + $0x4] sm:$0x1] %vm3352_vm2, %v6890_v36  ;;  %3356 = vst.msk [vmem:[#allocation3 + $0x4c] sm:$0x1] %vm3352_vm2, %v6890_v36 }
  0x2b   : > { %v576_v39 = vadd.f32 %v575_v38, %v574_v37  ;;  %v1055_v37 = vsel %vm7114_vm7, 0, %v1054_v32  ;;  %v1026_v38 = vsel %vm7106_vm5, 0, %v1025_v35  ;;  %vm7739_vm6 = vmand %vm3352_vm2, %vm1049_vm4 }
  0x2c   : > { %1056 = vst [vmem:[#allocation2 + $0xc] sm:$0x1] %v1055_v37  ;;  %1027 = vst [vmem:[#allocation2 + $0x10] sm:$0x1] %v1026_v38 }
  0x2d   : > { %6142 = vmatmul.mubr.msk.f32.vlgmr.msra.gmra.mrb[0].mxu0 %vm555_vm1, %v576_v39  ;;  %v1028_v39 = vld [vmem:[#allocation2 + $0x18] sm:$0x1] }
  0x2e   : > { %6509 = vmatpush3.bf16.msra.mxu0 %v6508_v9  ;;  %6152 = vmatprep.mubr.msk.f32.mxu0 %vm6888_vm0, %v6889_v6  ;;  %v1029_v41 = vsel %vm7106_vm5, 0, %v1028_v39 }
  0x2f   : > { %6510 = vmatprep.subr.bf16.mxu0 %v6887_v3  ;;  %1030 = vst [vmem:[#allocation2 + $0x18] sm:$0x1] %v1029_v41 }
  0x32   : > { %6512 = vmatpush3.bf16.msra.mxu0 %v6511_v42  ;;  %v1058_v42 = vsel %vm7114_vm7, 0, %v1057_v40 }
  0x33   : > { %6513 = vmatprep.subr.bf16.mxu0 %v6887_v3  ;;  %1059 = vst [vmem:[#allocation2 + $0x14] sm:$0x1] %v1058_v42 }
 0x100   : > { %v646_v43 = vpop.f32.mrb[0].mxu0 }
 0x101   : > { %v650_v44 = vmul.f32 0.015625, %v646_v43  ;;  %v6143_v45 = vpop.f32.mrb[1].mxu0  ;;  %v1060_v43 = vld [vmem:[#allocation2 + $0x1c] sm:$0x1] }
 0x102   : > { %v1061_v45 = vsel %vm7114_vm7, 0, %v1060_v43 }
 0x103   : > { %6153 = vmatmul.mubr.msk.f32.vlgmr.msra.gmra.mrb[2].mxu0 %vm555_vm1, %v650_v44  ;;  %v1031_v44 = vld [vmem:[#allocation2 + $0x20] sm:$0x1]  ;;  %1062 = vst [vmem:[#allocation2 + $0x1c] sm:$0x1] %v1061_v45 }
 0x104   : > { %6515 = vmatpush3.bf16.msra.mxu0 %v6994_v4  ;;  %6163 = vmatprep.mubr.msk.f32.mxu0 %vm6888_vm0, %v6889_v6  ;;  %v1032_v46 = vsel %vm7106_vm5, 0, %v1031_v44 }
 0x105   : > { %6516 = vmatprep.subr.bf16.mxu0 %v6887_v3  ;;  %1033 = vst [vmem:[#allocation2 + $0x20] sm:$0x1] %v1032_v46 }
 0x108   : > { %6518 = vmatpush3.bf16.msra.mxu0 %v6505_v10 }
 0x1d6   : > { %v720_v49 = vpop.f32.mrb[2].mxu0 }
 0x1d7   : > { %v727_v50 = vrot.slane %v720_v49, %v7057_v48  ;;  %v6154_v51 = vpop.f32.mrb[3].mxu0  ;;  %v1063_v49 = vld [vmem:[#allocation2 + $0x24] sm:$0x1] }
 0x1d8   : > { %v1064_v51 = vsel %vm7114_vm7, 0, %v1063_v49 }
 0x1d9   : > { %v7060_v52 = vsub.f32 %v537_v11, %v727_v50  ;;  %v7062_v53 = vsub.f32 %v538_v12, %v727_v50  ;;  %v7064_v54 = vsub.f32 %v539_v13, %v727_v50  ;;  %v7066_v55 = vsub.f32 %v540_v14, %v727_v50  ;;  %1065 = vst [vmem:[#allocation2 + $0x24] sm:$0x1] %v1064_v51 }
 0x1da   : > { %v7068_v56 = vsub.f32 %v541_v15, %v727_v50  ;;  %v7076_v60 = vsub.f32 %v542_v16, %v727_v50  ;;  %v7082_v1 = vsub.f32 %v543_v20, %v727_v50  ;;  %v7087_v7 = vsub.f32 %v544_v21, %v727_v50 }
 0x1db   : > { %v736_v57 = vmul.f32 %v7060_v52, %v7060_v52  ;;  %v737_v58 = vmul.f32 %v7062_v53, %v7062_v53  ;;  %v738_v59 = vmul.f32 %v7064_v54, %v7064_v54  ;;  %v739_v61 = vmul.f32 %v7066_v55, %v7066_v55 }
 0x1dc   : > { %v740_v2 = vmul.f32 %v7068_v56, %v7068_v56  ;;  %v741_v8 = vmul.f32 %v7076_v60, %v7076_v60  ;;  %v742_v11 = vmul.f32 %v7082_v1, %v7082_v1  ;;  %v743_v14 = vmul.f32 %v7087_v7, %v7087_v7 }
 0x1dd   : > { %v744_v62 = vsel %vm555_vm1, %v736_v57, 0.0  ;;  %v745_v63 = vsel %vm555_vm1, %v737_v58, 0.0  ;;  %v747_v4 = vsel %vm555_vm1, %v738_v59, 0.0  ;;  %v749_v9 = vsel %vm555_vm1, %v739_v61, 0.0  ;;  %v1066_v57 = vld [vmem:[#allocation2 + $0x2c] sm:$0x1] }
 0x1de   : > { %v746_v0 = vadd.f32 %v745_v63, %v744_v62  ;;  %v751_v12 = vsel %vm555_vm1, %v740_v2, 0.0  ;;  %v753_v15 = vsel %vm555_vm1, %v741_v8, 0.0  ;;  %v755_v17 = vsel %vm555_vm1, %v742_v11, 0.0  ;;  %v1037_v58 = vld [vmem:[#allocation2 + $0x30] sm:$0x1]  ;;  %v6726_v2 = vld [vmem:[%s8285_s6 + $0x18] sm:$0xff]  }
 0x1df   : > { %v757_v19 = vsel %vm555_vm1, %v743_v14, 0.0  ;;  %v1035_v50 = vsel %vm7106_vm5, 0, %v1034_v47  ;;  %v1067_v59 = vsel %vm7114_vm7, 0, %v1066_v57  ;;  %v1038_v61 = vsel %vm7106_vm5, 0, %v1037_v58  ;;  %v1040_v62 = vld [vmem:[#allocation2 + $0x38] sm:$0x1] }
 0x1e0   : > { %v748_v5 = vadd.f32 %v747_v4, %v746_v0  ;;  %1036 = vst [vmem:[#allocation2 + $0x28] sm:$0x1] %v1035_v50  ;;  %v1069_v63 = vld [vmem:[#allocation2 + $0x34] sm:$0x1]  ;;  %1068 = vst [vmem:[#allocation2 + $0x2c] sm:$0x1] %v1067_v59 }
 0x1e1   : > { %v6725_v0 = vld [vmem:[%s8285_s6 + $0x10] sm:$0xff]   ;;  %1039 = vst [vmem:[#allocation2 + $0x30] sm:$0x1] %v1038_v61  ;;  %v1041_v4 = vsel %vm7106_vm5, 0, %v1040_v62  ;;  %v1072_v8 = vld [vmem:[#allocation2 + $0x3c] sm:$0x1] }
 0x1e2   : > { %v750_v10 = vadd.f32 %v749_v9, %v748_v5  ;;  %v1070_v5 = vsel %vm7114_vm7, 0, %v1069_v63  ;;  %1042 = vst [vmem:[#allocation2 + $0x38] sm:$0x1] %v1041_v4  ;;  %6177 = vmatprep.subr.bf16.mxu0 %v6725_v0  ;;  %v1019_v9 = vld [vmem:[#allocation2] sm:$0x1] }
 0x1e3   : > { %1071 = vst [vmem:[#allocation2 + $0x34] sm:$0x1] %v1070_v5  ;;  %v1020_v11 = vsel %vm7106_vm5, 0, %v1019_v9  ;;  %v1043_v14 = vld [vmem:[#allocation2 + $0x40] sm:$0x1] }
 0x1e4   : > { %v752_v13 = vadd.f32 %v751_v12, %v750_v10  ;;  %v1051_v10 = vld [vmem:[#allocation2 + $0x4] sm:$0x1]  ;;  %1021 = vst [vmem:[#allocation2] sm:$0x1] %v1020_v11 }
 0x1e5   : > { %v1052_v12 = vsel %vm7114_vm7, 0, %v1051_v10 }
 0x1e6   : > { %v754_v16 = vadd.f32 %v753_v15, %v752_v13  ;;  %1053 = vst [vmem:[#allocation2 + $0x4] sm:$0x1] %v1052_v12  ;;  %v1073_v13 = vsel %vm7114_vm7, 0, %v1072_v8  ;;  %v1044_v15 = vsel %vm7106_vm5, 0, %v1043_v14 }
 0x1e7   : > { %1074 = vst [vmem:[#allocation2 + $0x3c] sm:$0x1] %v1073_v13  ;;  %1045 = vst [vmem:[#allocation2 + $0x40] sm:$0x1] %v1044_v15 }
 0x1e8   : > { %v756_v18 = vadd.f32 %v755_v17, %v754_v16  ;;  %v7167_v16 = vld [vmem:[%s8285_s6] sm:$0xff]  }
 0x1e9   : > { %v1075_v17 = vld [vmem:[#allocation2 + $0x44] sm:$0x1] }
 0x1ea   : > { %v758_v20 = vadd.f32 %v757_v19, %v756_v18  ;;  %v1076_v18 = vsel %vm7114_vm7, 0, %v1075_v17  ;;  %v1046_v19 = vld [vmem:[#allocation2 + $0x48] sm:$0x1] }
 0x1eb   : > { %1077 = vst [vmem:[#allocation2 + $0x44] sm:$0x1] %v1076_v18  ;;  %v7203_v18 = vld [vmem:[#allocation2] sm:$0xf] }
 0x1ec   : > { %v759_v21 = vrot.slane %v758_v20, 4 }
 0x1ee   : > { %v760_v22 = vadd.f32 %v759_v21, %v758_v20  ;;  %v1047_v20 = vsel %vm7106_vm5, 0, %v1046_v19  ;;  %v1078_v21 = vld [vmem:[#allocation2 + $0x4c] sm:$0x1]  ;;  %v1268_v19 = vshrl.u32 %v7203_v18, 16 }
 0x1ef   : > { %1048 = vst [vmem:[#allocation2 + $0x48] sm:$0x1] %v1047_v20  ;;  %v1271_v20 = vshll.u32 %v7203_v18, 16 }
 0x1f0   : > { %v761_v23 = vrot.slane %v760_v22, 2 }
 0x1f2   : > { %v762_v24 = vadd.f32 %v761_v23, %v760_v22  ;;  %v1079_v22 = vsel %vm7114_vm7, 0, %v1078_v21 }
 0x1f3   : > { %1080 = vst [vmem:[#allocation2 + $0x4c] sm:$0x1] %v1079_v22 }
 0x1f4   : > { %v763_v25 = vrot.slane %v762_v24, 1 }
 0x1f6   : > { %v764_v26 = vadd.f32 %v763_v25, %v762_v24 }
 0x1f8   : > { %6164 = vmatmul.mubr.msk.f32.vlgmr.msra.gmra.mrb[4].mxu0 %vm555_vm1, %v764_v26 }
 0x1f9   : > { %6178 = vmatpush3.bf16.msra.mxu0 %v6725_v0 }
 0x1fa   : > { %6179 = vmatprep.subr.bf16.mxu0 %v6726_v2 }
 0x1fd   : > { %6180 = vmatpush3.bf16.msra.mxu0 %v6726_v2 }
 0x1fe   : > { %6189 = vmatprep.subr.bf16.mxu0 %v7167_v16 }
 0x2cb   : > { %v834_v27 = vpop.f32.mrb[4].mxu0 }
 0x2cc   : > { %v838_v28 = vmul.f32 0.015625, %v834_v27  ;;  %v6165_v29 = vpop.f32.mrb[5].mxu0 }
 0x2ce   : > { %6175 = vmatmul.mubr.msk.f32.vlgmr.msra.gmra.mrb[0].mxu1 %vm555_vm1, %v838_v28  ;;  %v5541_v28 = vld [vmem:[%s8281_s2] ss:$0 sm:$0xff] }
 0x2cf   : > { %6312 = vmatprep.mubr.msk.f32.mxu1 %vm6888_vm0, %v6889_v6 }
 0x3a1   : > { %v908_v23 = vpop.f32.mrb[0].mxu1 }
 0x3a2   : > { %v909_v24 = vadd.f32 1e-05, %v908_v23  ;;  %v6176_v25 = vpop.f32.mrb[1].mxu1 }
 0x3a3   : > { %v7207_v25 = vrot.slane %v1268_v19, 4 }
 0x3a4   : > { %6803 = vrsqrt.f32 %v909_v24 }
 0x3ae   : > { %v6804_v26 = vpop.eup %6803 }
 0x3af   : > { %v916_v27 = vrot.slane %v6804_v26, %v7057_v48  ;;  %v7209_v26 = vrot.slane %v1271_v20, 5  ;;  %v1208_v20 = vld [vmem:[#allocation2 + $0x18] sm:$0xf] }
 0x3b1   : > { %v917_v29 = vmul.f32 %v916_v27, %v7060_v52  ;;  %v918_v31 = vmul.f32 %v916_v27, %v7062_v53  ;;  %v919_v32 = vmul.f32 %v916_v27, %v7064_v54  ;;  %v920_v33 = vmul.f32 %v916_v27, %v7066_v55 }
 0x3b2   : > { %v921_v35 = vmul.f32 %v916_v27, %v7068_v56  ;;  %v922_v37 = vmul.f32 %v916_v27, %v7076_v60  ;;  %v923_v38 = vmul.f32 %v916_v27, %v7082_v1  ;;  %v924_v53 = vmul.f32 %v916_v27, %v7087_v7 }
 0x3b3   : > { %v931_v39 = vmul.f32 %v5541_v28, %v917_v29  ;;  %v932_v40 = vmul.f32 %v5541_v28, %v918_v31  ;;  %v933_v41 = vmul.f32 %v5541_v28, %v919_v32  ;;  %v934_v52 = vmul.f32 %v5541_v28, %v920_v33 }
 0x3b4   : > { %v935_v42 = vmul.f32 %v5541_v28, %v921_v35  ;;  %v936_v54 = vmul.f32 %v5541_v28, %v922_v37  ;;  %v937_v43 = vmul.f32 %v5541_v28, %v923_v38  ;;  %v938_v57 = vmul.f32 %v5541_v28, %v924_v53 }
 0x3b5   : > { %v945_v55 = vadd.f32 %v5542_v34, %v931_v39  ;;  %v946_v44 = vadd.f32 %v5542_v34, %v932_v40  ;;  %v947_v45 = vadd.f32 %v5542_v34, %v933_v41  ;;  %v948_v46 = vadd.f32 %v5542_v34, %v934_v52 }
 0x3b6   : > { %v7191_v47 = vadd.f32 %v5542_v34, %v935_v42  ;;  %v7193_v56 = vadd.f32 %v5542_v34, %v936_v54  ;;  %v7195_v60 = vadd.f32 %v5542_v34, %v937_v43  ;;  %v7200_v61 = vadd.f32 %v5542_v34, %v938_v57  ;;  %v7211_v34 = vld [vmem:[#allocation2 + $0x4] sm:$0x1] }
 0x3b7   : > { %v5543_v1 = vmul.f32 -1.442695, %v945_v55  ;;  %v5544_v49 = vmul.f32 -1.442695, %v946_v44  ;;  %v5545_v50 = vmul.f32 -1.442695, %v947_v45  ;;  %v1274_v42 = vor.u32 %v7209_v26, %v7207_v25 }
 0x3b8   : > { %v5546_v51 = vmul.f32 -1.442695, %v948_v46  ;;  %v5547_v7 = vmul.f32 -1.442695, %v7191_v47  ;;  %v5548_v58 = vmul.f32 -1.442695, %v7193_v56 }
 0x3b9   : > { %6805 = vpow2.f32 %v5543_v1  ;;  %v5549_v59 = vmul.f32 -1.442695, %v7195_v60  ;;  %v5550_v62 = vmul.f32 -1.442695, %v7200_v61  ;;  %v1277_v39 = vshll.u32 %v7211_v34, 16 }
 0x3ba   : > { %6807 = vpow2.f32 %v5544_v49 }
 0x3bb   : > { %6809 = vpow2.f32 %v5545_v50 }
 0x3bc   : > { %6811 = vpow2.f32 %v5546_v51 }
 0x3bd   : > { %6813 = vpow2.f32 %v5547_v7 }
 0x3be   : > { %6815 = vpow2.f32 %v5548_v58 }
 0x3bf   : > { %6817 = vpow2.f32 %v5549_v59 }
 0x3c0   : > { %6819 = vpow2.f32 %v5550_v62 }
 0x3c3   : > { %v6806_v63 = vpop.eup %6805 }
 0x3c4   : > { %v6808_v0 = vpop.eup %6807  ;;  %v977_v2 = vadd.f32 1.0, %v6806_v63  ;;  %v1196_v63 = vld [vmem:[#allocation2 + $0x8] sm:$0xf] }
 0x3c5   : > { %v6810_v4 = vpop.eup %6809  ;;  %v978_v5 = vadd.f32 1.0, %v6808_v0 }
 0x3c6   : > { %v6812_v8 = vpop.eup %6811  ;;  %v979_v9 = vadd.f32 1.0, %v6810_v4  ;;  %6821 = vrcp.f32 %v977_v2 }
 0x3c7   : > { %v6814_v10 = vpop.eup %6813  ;;  %v980_v11 = vadd.f32 1.0, %v6812_v8  ;;  %6823 = vrcp.f32 %v978_v5  ;;  %v1199_v5 = vld [vmem:[#allocation2 + $0xc] sm:$0x1]  ;;  %v1202_v8 = vld [vmem:[#allocation2 + $0x10] sm:$0xf] }
 0x3c8   : > { %v6816_v12 = vpop.eup %6815  ;;  %v981_v13 = vadd.f32 1.0, %v6814_v10  ;;  %6825 = vrcp.f32 %v979_v9 }
 0x3c9   : > { %v6818_v14 = vpop.eup %6817  ;;  %v982_v15 = vadd.f32 1.0, %v6816_v12  ;;  %6827 = vrcp.f32 %v980_v11  ;;  %v6732_v12 = vld [vmem:[%s8285_s6 + $0x28] sm:$0xff]  }
 0x3ca   : > { %v983_v17 = vadd.f32 1.0, %v6818_v14  ;;  %6829 = vrcp.f32 %v981_v13  ;;  %v6820_v21 = vpop.eup %6819  ;;  %v1205_v13 = vld [vmem:[#allocation2 + $0x14] sm:$0x1] }
 0x3cb   : > { %6831 = vrcp.f32 %v982_v15  ;;  %v984_v28 = vadd.f32 1.0, %v6820_v21 }
 0x3cc   : > { %6833 = vrcp.f32 %v983_v17 }
 0x3cd   : > { %6835 = vrcp.f32 %v984_v28 }
 0x3d0   : > { %v6822_v22 = vpop.eup %6821 }
 0x3d1   : > { %v6824_v23 = vpop.eup %6823  ;;  %v1001_v24 = vmul.f32 %v6822_v22, %v945_v55 }
 0x3d2   : > { %v6826_v27 = vpop.eup %6825  ;;  %v1002_v29 = vmul.f32 %v6824_v23, %v946_v44 }
 0x3d3   : > { %v6828_v31 = vpop.eup %6827  ;;  %v1003_v32 = vmul.f32 %v6826_v27, %v947_v45  ;;  %v5937_v33 = vpack.c.bf16 %v1001_v24, %v1001_v24  ;;  %v1211_v27 = vld [vmem:[#allocation2 + $0x1c] sm:$0x1] }
 0x3d4   : > { %v6830_v35 = vpop.eup %6829  ;;  %v1004_v37 = vmul.f32 %v6828_v31, %v948_v46  ;;  %v5938_v38 = vpack.c.bf16 %v1002_v29, %v1002_v29 }
 0x3d5   : > { %v6832_v40 = vpop.eup %6831  ;;  %v1005_v41 = vmul.f32 %v6830_v35, %v7191_v47  ;;  %v5939_v52 = vpack.c.bf16 %v1003_v32, %v1003_v32  ;;  %v1114_v53 = vshrl.u32 %v5937_v33, 16  ;;  %v1117_v51 = vshll.u32 %v5937_v33, 16  ;;  %v1214_v33 = vld [vmem:[#allocation2 + $0x20] sm:$0xf]  ;;  %v1220_v35 = vld [vmem:[#allocation2 + $0x28] sm:$0xf] }
 0x3d6   : > { %v6834_v54 = vpop.eup %6833  ;;  %v1006_v43 = vmul.f32 %v6832_v40, %v7193_v56  ;;  %v5940_v55 = vpack.c.bf16 %v1004_v37, %v1004_v37  ;;  %v1122_v44 = vshrl.u32 %v5938_v38, 16  ;;  %v1125_v47 = vshll.u32 %v5938_v38, 16 }
 0x3d7   : > { %v1007_v45 = vmul.f32 %v6834_v54, %v7195_v60  ;;  %v5941_v46 = vpack.c.bf16 %v1005_v41, %v1005_v41  ;;  %v1116_v1 = vrot.slane %v1114_v53, 7  ;;  %v1130_v49 = vshrl.u32 %v5939_v52, 16  ;;  %v1226_v53 = vld [vmem:[#allocation2 + $0x30] sm:$0xf]  ;;  %v1232_v54 = vld [vmem:[#allocation2 + $0x38] sm:$0xf] }
 0x3d8   : > { %v5942_v50 = vpack.c.bf16 %v1006_v43, %v1006_v43  ;;  %v1124_v57 = vrot.slane %v1122_v44, 7  ;;  %v1133_v59 = vshll.u32 %v5939_v52, 16  ;;  %v1138_v62 = vshrl.u32 %v5940_v55, 16  ;;  %v1217_v52 = vld [vmem:[#allocation2 + $0x24] sm:$0x1]  ;;  %v6836_v43 = vpop.eup %6835 }
 0x3d9   : > { %v5943_v7 = vpack.c.bf16 %v1007_v45, %v1007_v45  ;;  %v1132_v58 = vrot.slane %v1130_v49, 7  ;;  %v1119_v0 = vor.u32 %v1117_v51, %v1116_v1  ;;  %v1141_v56 = vshll.u32 %v5940_v55, 16  ;;  %v1229_v49 = vld [vmem:[#allocation2 + $0x34] sm:$0x1] }
 0x3da   : > { %v1127_v2 = vor.u32 %v1125_v47, %v1124_v57  ;;  %v1128_v4 = vrot.slane %v1124_v57, 4  ;;  %v1140_v10 = vrot.slane %v1138_v62, 7  ;;  %v1146_v11 = vshrl.u32 %v5941_v46, 16 }
 0x3db   : > { %v1135_v9 = vor.u32 %v1133_v59, %v1132_v58  ;;  %v1136_v60 = vrot.slane %v1132_v58, 4  ;;  %v1149_v14 = vshll.u32 %v5941_v46, 16  ;;  %v1154_v15 = vshrl.u32 %v5942_v50, 16 }
 0x3dc   : > { %v1157_v17 = vshll.u32 %v5942_v50, 16  ;;  %v1162_v19 = vshrl.u32 %v5943_v7, 16  ;;  %v1143_v21 = vor.u32 %v1141_v56, %v1140_v10  ;;  %v1148_v22 = vrot.slane %v1146_v11, 7 }
 0x3dd   : > { %v1165_v23 = vshll.u32 %v5943_v7, 16  ;;  %v1120_v24 = vrot.slane %v1116_v1, 4  ;;  %v1156_v28 = vrot.slane %v1154_v15, 7  ;;  %v1197_v31 = vsel %vm7221_vm8, %v1119_v0, %v1196_v63  ;;  %v1223_v1 = vld [vmem:[#allocation2 + $0x2c] sm:$0x1] }
 0x3de   : > { %v1164_v29 = vrot.slane %v1162_v19, 7  ;;  %v1203_v32 = vsel %vm7221_vm8, %v1127_v2, %v1202_v8  ;;  %v1151_v37 = vor.u32 %v1149_v14, %v1148_v22  ;;  %1198 = vst [vmem:[#allocation2 + $0x8] sm:$0xf] %v1197_v31  ;;  %v1206_v40 = vsel %vm7106_vm5, %v1128_v4, %v1205_v13  ;;  %v1235_v7 = vld [vmem:[#allocation2 + $0x3c] sm:$0x1] }
 0x3df   : > { %v1200_v38 = vsel %vm7106_vm5, %v1120_v24, %v1199_v5  ;;  %1204 = vst [vmem:[#allocation2 + $0x10] sm:$0xf] %v1203_v32  ;;  %v1209_v41 = vsel %vm7221_vm8, %v1135_v9, %v1208_v20  ;;  %v1159_v55 = vor.u32 %v1157_v17, %v1156_v28  ;;  %1207 = vst [vmem:[#allocation2 + $0x14] sm:$0x1] %v1206_v40  ;;  %v1144_v46 = vrot.slane %v1140_v10, 4 }
 0x3e0   : > { %v1167_v44 = vor.u32 %v1165_v23, %v1164_v29  ;;  %1201 = vst [vmem:[#allocation2 + $0xc] sm:$0x1] %v1200_v38  ;;  %1210 = vst [vmem:[#allocation2 + $0x18] sm:$0xf] %v1209_v41  ;;  %v1212_v45 = vsel %vm7106_vm5, %v1136_v60, %v1211_v27  ;;  %v1152_v50 = vrot.slane %v1148_v22, 4  ;;  %v1215_v51 = vsel %vm7221_vm8, %v1143_v21, %v1214_v33 }
 0x3e1   : > { %1213 = vst [vmem:[#allocation2 + $0x1c] sm:$0x1] %v1212_v45  ;;  %v1221_v57 = vsel %vm7221_vm8, %v1151_v37, %v1220_v35  ;;  %v1160_v47 = vrot.slane %v1156_v28, 4  ;;  %1216 = vst [vmem:[#allocation2 + $0x20] sm:$0xf] %v1215_v51  ;;  %v1218_v58 = vsel %vm7106_vm5, %v1144_v46, %v1217_v52  ;;  %v1168_v59 = vrot.slane %v1164_v29, 4 }
 0x3e2   : > { %1222 = vst [vmem:[#allocation2 + $0x28] sm:$0xf] %v1221_v57  ;;  %v1227_v62 = vsel %vm7221_vm8, %v1159_v55, %v1226_v53  ;;  %v1233_v63 = vsel %vm7221_vm8, %v1167_v44, %v1232_v54  ;;  %v1008_v0 = vmul.f32 %v6836_v43, %v7200_v61  ;;  %1219 = vst [vmem:[#allocation2 + $0x24] sm:$0x1] %v1218_v58  ;;  %v1275_v61 = vrot.slane %v1274_v42, 4 }
 0x3e3   : > { %v1224_v2 = vsel %vm7106_vm5, %v1152_v50, %v1223_v1  ;;  %1228 = vst [vmem:[#allocation2 + $0x30] sm:$0xf] %v1227_v62  ;;  %v1230_v4 = vsel %vm7106_vm5, %v1160_v47, %v1229_v49  ;;  %1234 = vst [vmem:[#allocation2 + $0x38] sm:$0xf] %v1233_v63  ;;  %v1236_v56 = vsel %vm7106_vm5, %v1168_v59, %v1235_v7  ;;  %v1279_v8 = vrot.slane %v1277_v39, 5 }
 0x3e4   : > { %1225 = vst [vmem:[#allocation2 + $0x2c] sm:$0x1] %v1224_v2  ;;  %1231 = vst [vmem:[#allocation2 + $0x34] sm:$0x1] %v1230_v4  ;;  %v7263_v60 = vpack.c.bf16 %v1008_v0, %v1008_v0 }
 0x3e5   : > { %1237 = vst [vmem:[#allocation2 + $0x3c] sm:$0x1] %v1236_v56  ;;  %v7254_v5 = vld [vmem:[#allocation2 + $0x8] sm:$0xf]  ;;  %v1280_v28 = vsel %vm7271_vm11, %v1275_v61, %v1279_v8 }
 0x3e6   : > { %v7261_v9 = vld [vmem:[#allocation2 + $0x10] sm:$0xf]  ;;  %v1282_v11 = vshrl.u32 %v7254_v5, 16  ;;  %v1285_v13 = vshll.u32 %v7254_v5, 16  ;;  %v7276_v26 = vld [vmem:[#allocation2 + $0x14] sm:$0x1] }
 0x3e7   : > { %v7265_v10 = vld [vmem:[#allocation2 + $0xc] sm:$0x1]  ;;  %v7269_v14 = vld [vmem:[#allocation2 + $0x18] sm:$0xf]  ;;  %v1296_v39 = vshrl.u32 %v7261_v9, 16  ;;  %v1299_v20 = vshll.u32 %v7261_v9, 16 }
 0x3e8   : > { %v1291_v25 = vshll.u32 %v7265_v10, 16  ;;  %v1284_v42 = vrot.slane %v1282_v11, 4  ;;  %v1287_v17 = vrot.slane %v1285_v13, 5  ;;  %v7279_v19 = vld [vmem:[#allocation2 + $0x1c] sm:$0x1]  ;;  %v1305_v21 = vshll.u32 %v7276_v26, 16 }
 0x3e9   : > { %v1298_v22 = vrot.slane %v1296_v39, 4  ;;  %v1310_v23 = vshrl.u32 %v7269_v14, 16  ;;  %v1313_v24 = vshll.u32 %v7269_v14, 16  ;;  %v7285_v27 = vld [vmem:[#allocation2 + $0x20] sm:$0xf]  ;;  %v1301_v31 = vrot.slane %v1299_v20, 5 }
 0x3ea   : > { %v1288_v29 = vor.u32 %v1287_v17, %v1284_v42  ;;  %v7289_v32 = vld [vmem:[#allocation2 + $0x28] sm:$0xf]  ;;  %v7291_v33 = vld [vmem:[#allocation2 + $0x24] sm:$0x1]  ;;  %v1170_v35 = vshrl.u32 %v7263_v60, 16  ;;  %v1293_v37 = vrot.slane %v1291_v25, 5 }
 0x3eb   : > { %v1312_v38 = vrot.slane %v1310_v23, 4  ;;  %v1315_v40 = vrot.slane %v1313_v24, 5  ;;  %v1319_v41 = vshll.u32 %v7279_v19, 16  ;;  %v1302_v53 = vor.u32 %v1301_v31, %v1298_v22  ;;  %v7296_v44 = vld [vmem:[#allocation2 + $0x2c] sm:$0x1] }
 0x3ec   : > { %v1289_v52 = vrot.slane %v1288_v29, 4  ;;  %v1307_v54 = vrot.slane %v1305_v21, 5  ;;  %v1324_v43 = vshrl.u32 %v7285_v27, 16  ;;  %v1327_v45 = vshll.u32 %v7285_v27, 16  ;;  %v7304_v47 = vld [vmem:[#allocation2 + $0x30] sm:$0xf] }
 0x3ed   : > { %v1316_v55 = vor.u32 %v1315_v40, %v1312_v38  ;;  %v1333_v46 = vshll.u32 %v7291_v33, 16  ;;  %v1338_v1 = vshrl.u32 %v7289_v32, 16  ;;  %v1303_v50 = vrot.slane %v1302_v53, 4  ;;  %v7309_v56 = vld [vmem:[#allocation2 + $0x38] sm:$0xf]  ;;  %v6728_v20 = vld [vmem:[%s8285_s6 + $0x8] sm:$0xff]  }
 0x3ee   : > { %v1294_v49 = vsel %vm7271_vm11, %v1289_v52, %v1293_v37  ;;  %v1326_v51 = vrot.slane %v1324_v43, 4  ;;  %v1341_v57 = vshll.u32 %v7289_v32, 16  ;;  %v1321_v59 = vrot.slane %v1319_v41, 5  ;;  %v7314_v11 = vld [vmem:[#allocation2 + $0x34] sm:$0x1]  ;;  %v6729_v53 = vld [vmem:[%s8285_s6 + $0x20] sm:$0xff]  }
 0x3ef   : > { %v5563_v7 = vcombine.low %v1280_v28, %v1294_v49  ;;  %v1317_v58 = vrot.slane %v1316_v55, 4  ;;  %v1329_v62 = vrot.slane %v1327_v45, 5  ;;  %v1308_v63 = vsel %vm7271_vm11, %v1303_v50, %v1307_v54  ;;  %v7321_v22 = vld [vmem:[#allocation2 + $0x3c] sm:$0x1] }
 0x3f0   : > { %v1340_v0 = vrot.slane %v1338_v1, 4  ;;  %v1343_v2 = vrot.slane %v1341_v57, 5  ;;  %v1347_v4 = vshll.u32 %v7296_v44, 16  ;;  %v1352_v13 = vshrl.u32 %v7304_v47, 16 }
 0x3f1   : > { %6181 = vmatprep.mubr.msk.bf16.mxu0 %vm555_vm1, %v5563_v7  ;;  %v1322_v61 = vsel %vm7271_vm11, %v1317_v58, %v1321_v59  ;;  %v1330_v8 = vor.u32 %v1329_v62, %v1326_v51  ;;  %v1355_v25 = vshll.u32 %v7304_v47, 16  ;;  %v1335_v42 = vrot.slane %v1333_v46, 5  ;;  %v1238_v58 = vld [vmem:[#allocation2 + $0x40] sm:$0xf] }
 0x3f2   : > { %v5564_v39 = vcombine.low %v1308_v63, %v1322_v61  ;;  %v1344_v17 = vor.u32 %v1343_v2, %v1340_v0  ;;  %v1354_v23 = vrot.slane %v1352_v13, 4  ;;  %v1366_v28 = vshrl.u32 %v7309_v56, 16  ;;  %v1241_v2 = vld [vmem:[#allocation2 + $0x44] sm:$0x1]  ;;  %v1595_v61 = vld [vmem:[#allocation2 + $0x8] sm:$0xe] }
 0x3f3   : > { %v1331_v21 = vrot.slane %v1330_v8, 4  ;;  %v1357_v24 = vrot.slane %v1355_v25, 5  ;;  %v1349_v31 = vrot.slane %v1347_v4, 5  ;;  %v1361_v37 = vshll.u32 %v7314_v11, 16  ;;  %v1594_v4 = vld [vmem:[#allocation2] sm:$0xe] }
 0x3f4   : > { %6182 = vmatmul.mubr.msk.bf16.vlgmr.msra.gmra.mrb[8].mxu0 %vm555_vm1, %v5564_v39  ;;  %v1345_v29 = vrot.slane %v1344_v17, 4  ;;  %v1369_v38 = vshll.u32 %v7309_v56, 16  ;;  %v1368_v52 = vrot.slane %v1366_v28, 4  ;;  %v1172_v54 = vrot.slane %v1170_v35, 7  ;;  %v1599_v17 = vld [vmem:[#allocation2 + $0x28] sm:$0xe] }
 0x3f5   : > { %6190 = vmatpush3.bf16.msra.mxu0 %v7167_v16  ;;  %v1336_v40 = vsel %vm7271_vm11, %v1331_v21, %v1335_v42  ;;  %v1358_v41 = vor.u32 %v1357_v24, %v1354_v23  ;;  %v1375_v45 = vshll.u32 %v7321_v22, 16  ;;  %v1173_v16 = vshll.u32 %v7263_v60, 16  ;;  %v1598_v42 = vld [vmem:[#allocation2 + $0x20] sm:$0xe] }
 0x3f6   : > { %v1350_v43 = vsel %vm7271_vm11, %v1345_v29, %v1349_v31  ;;  %6191 = vmatprep.subr.bf16.mxu0 %v6728_v20  ;;  %v1371_v55 = vrot.slane %v1369_v38, 5  ;;  %v1363_v49 = vrot.slane %v1361_v37, 5  ;;  %v5573_v63 = vcombine.low %v7203_v18, %v7254_v5 }
 0x3f7   : > { %v5565_v46 = vcombine.low %v1336_v40, %v1350_v43  ;;  %v1359_v1 = vrot.slane %v1358_v41, 4  ;;  %v1175_v51 = vor.u32 %v1173_v16, %v1172_v54  ;;  %v1377_v7 = vrot.slane %v1375_v45, 5  ;;  %v1601_v41 = vld [vmem:[#allocation2 + $0x38] sm:$0xe] }
 0x3f8   : > { %v1372_v50 = vor.u32 %v1371_v55, %v1368_v52  ;;  %v1176_v0 = vrot.slane %v1172_v54, 4  ;;  %v5574_v8 = vcombine.low %v7261_v9, %v7269_v14  ;;  %v5575_v5 = vcombine.low %v7285_v27, %v7289_v32  ;;  %v1596_v32 = vld [vmem:[#allocation2 + $0x10] sm:$0xe]  ;;  %v6735_v55 = vld [vmem:[%s8285_s6 + $0x38] sm:$0xff]  }
 0x3f9   : > { %6185 = vmatprep.mubr.msk.bf16.mxu0 %vm555_vm1, %v5565_v46  ;;  %6192 = vmatpush3.bf16.msra.mxu0 %v6728_v20  ;;  %v1364_v35 = vsel %vm7271_vm11, %v1359_v1, %v1363_v49  ;;  %v1239_v60 = vsel %vm7221_vm8, %v1175_v51, %v1238_v58  ;;  %v5583_v13 = vrot.slane %v1594_v4, 9  ;;  %v1623_v25 = vrot.slane %v7211_v34, 5  ;;  %v1897_v46 = vld [vmem:[#allocation2 + $0x8] sm:$0xf]  ;;  %v1899_v1 = vld [vmem:[#allocation2 + $0x10] sm:$0xf] }
 0x3fa   : > { %v1373_v57 = vrot.slane %v1372_v50, 4  ;;  %6201 = vmatprep.subr.bf16.mxu0 %v6729_v53  ;;  %1240 = vst [vmem:[#allocation2 + $0x40] sm:$0xf] %v1239_v60  ;;  %v1242_v18 = vsel %vm7106_vm5, %v1176_v0, %v1241_v2  ;;  %v5584_v39 = vrot.slane %v1595_v61, 9  ;;  %v1627_v9 = vrot.slane %v7265_v10, 5  ;;  %vm7729_vm5 = vmand %vm3352_vm2, %vm1017_vm3  ;;  %v6877_v14 = vld [vmem:[%s7021_s26 + $0x30] sm:$0xff] }
 0x3fb   : > { %1243 = vst [vmem:[#allocation2 + $0x44] sm:$0x1] %v1242_v18  ;;  %v1624_v27 = vsel %vm7361_vm14, %v5583_v13, %v1623_v25  ;;  %v1597_v10 = vld [vmem:[#allocation2 + $0x18] sm:$0xe]  ;;  %v1631_v20 = vrot.slane %v7276_v26, 5  ;;  %v5576_v21 = vcombine.low %v7304_v47, %v7309_v56  ;;  %v1635_v23 = vrot.slane %v7279_v19, 5 }
 0x3fc   : > { %v1378_v59 = vsel %vm7271_vm11, %v1373_v57, %v1377_v7  ;;  %v1628_v34 = vsel %vm7361_vm14, %v5584_v39, %v1627_v9  ;;  %v5585_v28 = vrot.slane %v1596_v32, 9  ;;  %v5586_v29 = vrot.slane %v1597_v10, 9  ;;  %v1600_v26 = vld [vmem:[#allocation2 + $0x30] sm:$0xe]  ;;  %v1901_v60 = vld [vmem:[#allocation2 + $0x18] sm:$0xf] }
 0x3fd   : > { %v5566_v62 = vcombine.low %v1364_v35, %v1378_v59  ;;  %v5595_v24 = vcombine.low %v1624_v27, %v1628_v34  ;;  %v5587_v31 = vrot.slane %v1598_v42, 9  ;;  %v1639_v37 = vrot.slane %v7291_v33, 5  ;;  %v1903_v0 = vld [vmem:[#allocation2 + $0x20] sm:$0xf]  ;;  %v7403_v2 = vld [vmem:[#allocation2 + $0xc] sm:$0x1] }
 0x3fe   : > { %v5588_v38 = vrot.slane %v1599_v17, 9  ;;  %v1643_v40 = vrot.slane %v7296_v44, 5  ;;  %v1632_v47 = vsel %vm7361_vm14, %v5585_v28, %v1631_v20  ;;  %v1636_v19 = vsel %vm7361_vm14, %v5586_v29, %v1635_v23  ;;  %v7405_v4 = vld [vmem:[#allocation2 + $0x14] sm:$0x1]  ;;  %v1907_v18 = vld [vmem:[#allocation2 + $0x30] sm:$0xf] }
 0x3ff   : > { %6186 = vmatmul.mubr.msk.bf16.gmra.mrb[12].mxu0 %vm555_vm1, %v5566_v62  ;;  %v1640_v56 = vsel %vm7361_vm14, %v5587_v31, %v1639_v37  ;;  %v5589_v33 = vrot.slane %v1600_v26, 9  ;;  %v5590_v44 = vrot.slane %v1601_v41, 9  ;;  %v1651_v54 = vrot.slane %v7321_v22, 5  ;;  %v6737_v22 = vld [vmem:[%s8285_s6 + $0x40] sm:$0xff]   ;;  %v6740_v42 = vld [vmem:[%s8285_s6 + $0x48] sm:$0xff]  }
 0x400   : > { %6193 = vmatprep.mubr.msk.bf16.mxu0 %vm555_vm1, %v5573_v63  ;;  %v1644_v52 = vsel %vm7361_vm14, %v5588_v38, %v1643_v40  ;;  %v5596_v43 = vcombine.low %v1632_v47, %v1636_v19  ;;  %v1914_v49 = vshrl.u32 %v1897_v46, 16  ;;  %v1917_v50 = vshll.u32 %v1897_v46, 16  ;;  %v6736_v63 = vld [vmem:[#allocation2 + $0x8] ss:$8 sps:$4 sm:$0xff]   ;;  %v1909_v40 = vld [vmem:[#allocation2 + $0x38] sm:$0xf] }
 0x401   : > { %v5597_v45 = vcombine.low %v1640_v56, %v1644_v52  ;;  %v1928_v51 = vshrl.u32 %v1899_v1, 16  ;;  %v1931_v35 = vshll.u32 %v1899_v1, 16  ;;  %v1942_v61 = vshrl.u32 %v1901_v60, 16  ;;  %v6739_v31 = vld [vmem:[#allocation2 + $0x28] ss:$8 sps:$4 sm:$0xff]  }
 0x402   : > { %v1916_v7 = vrot.slane %v1914_v49, 4  ;;  %v1919_v58 = vrot.slane %v1917_v50, 5  ;;  %v1956_v25 = vshrl.u32 %v1903_v0, 16  ;;  %v1959_v39 = vshll.u32 %v1903_v0, 16  ;;  %v1911_v56 = vld [vmem:[#allocation2 + $0x40] sm:$0xf] }
 0x403   : > { %v1930_v59 = vrot.slane %v1928_v51, 4  ;;  %v1933_v62 = vrot.slane %v1931_v35, 5  ;;  %v1923_v9 = vshll.u32 %v7403_v2, 16  ;;  %v1984_v32 = vshrl.u32 %v1907_v18, 16  ;;  %v6742_v52 = vld [vmem:[%s8285_s6 + $0x50] sm:$0xff]  }
 0x404   : > { %v1987_v10 = vshll.u32 %v1907_v18, 16  ;;  %v1944_v17 = vrot.slane %v1942_v61, 4  ;;  %v1958_v28 = vrot.slane %v1956_v25, 4  ;;  %v1961_v29 = vrot.slane %v1959_v39, 5  ;;  %v7428_v46 = vld [vmem:[#allocation2 + $0x34] sm:$0x1] }
 0x405   : > { %v1934_v13 = vor.u32 %v1933_v62, %v1930_v59  ;;  %v1925_v37 = vrot.slane %v1923_v9, 5  ;;  %v1986_v47 = vrot.slane %v1984_v32, 4  ;;  %v1998_v1 = vshrl.u32 %v1909_v40, 16  ;;  %v7436_v9 = vld [vmem:[#allocation2 + $0x3c] sm:$0x1] }
 0x406   : > { %v1989_v19 = vrot.slane %v1987_v10, 5 }
 0x407   : > { %6194 = vmatmul.mubr.msk.bf16.vlgmr.msra.gmra.mrb[8].mxu0 %vm555_vm1, %v5574_v8  ;;  %v1945_v8 = vshll.u32 %v1901_v60, 16  ;;  %v1993_v60 = vshll.u32 %v7428_v46, 16 }
 0x408   : > { %6202 = vmatpush3.bf16.msra.mxu0 %v6729_v53  ;;  %6197 = vmatprep.mubr.msk.bf16.mxu0 %vm555_vm1, %v5575_v5  ;;  %v1647_v53 = vrot.slane %v7314_v11, 5  ;;  %v1652_v11 = vsel %vm7361_vm14, %v5590_v44, %v1651_v54  ;;  %v1920_v5 = vor.u32 %v1919_v58, %v1916_v7  ;;  %v7422_v54 = vld [vmem:[#allocation2 + $0x1c] sm:$0x1]  ;;  %v1990_v50 = vor.u32 %v1989_v19, %v1986_v47  ;;  %v6741_v7 = vld [vmem:[#allocation2 + $0x38] ss:$8 sps:$4 sm:$0xff]  }
 0x409   : > { %6203 = vmatprep.subr.bf16.mxu0 %v6732_v12  ;;  %v1947_v20 = vrot.slane %v1945_v8, 5  ;;  %v1951_v35 = vshll.u32 %v7422_v54, 16  ;;  %v1995_v39 = vrot.slane %v1993_v60, 5  ;;  %v2169_v47 = vrot.slane %v7405_v4, 5 }
 0x40a   : > { %v1648_v16 = vsel %vm7361_vm14, %v5589_v33, %v1647_v53  ;;  %v1921_v23 = vrot.slane %v1920_v5, 4  ;;  %v1991_v18 = vrot.slane %v1990_v50, 4  ;;  %v2173_v50 = vrot.slane %v7422_v54, 5  ;;  %v2145_v54 = vld [vmem:[#allocation2 + $0x38] sm:$0xe] }
 0x40b   : > { %v5598_v57 = vcombine.low %v1648_v16, %v1652_v11  ;;  %v1948_v33 = vor.u32 %v1947_v20, %v1944_v17  ;;  %v2001_v16 = vshll.u32 %v1909_v40, 16  ;;  %v2012_v11 = vshrl.u32 %v1911_v56, 16 }
 0x40c   : > { %6204 = vmatpush3.bf16.msra.mxu0 %v6732_v12  ;;  %v1905_v12 = vld [vmem:[#allocation2 + $0x28] sm:$0xf]  ;;  %v1926_v53 = vsel %vm7271_vm11, %v1921_v23, %v1925_v37  ;;  %v1953_v5 = vrot.slane %v1951_v35, 5  ;;  %v1996_v17 = vsel %vm7271_vm11, %v1991_v18, %v1995_v39  ;;  %v2007_v20 = vshll.u32 %v7436_v9, 16 }
 0x40d   : > { %6213 = vmatprep.subr.bf16.mxu0 %v6734_v30  ;;  %v1970_v27 = vshrl.u32 %v1905_v12, 16  ;;  %v1973_v34 = vshll.u32 %v1905_v12, 16  ;;  %v1949_v51 = vrot.slane %v1948_v33, 4  ;;  %v2003_v0 = vrot.slane %v2001_v16, 5  ;;  %v2139_v23 = vld [vmem:[#allocation2 + $0x8] sm:$0xe] }
 0x40e   : > { %v2014_v61 = vrot.slane %v2012_v11, 4  ;;  %v5633_v40 = vrot.slane %v2139_v23, 9  ;;  %v2009_v19 = vrot.slane %v2007_v20, 5  ;;  %v6744_v33 = vld [vmem:[%s8285_s6 + $0x60] sm:$0xff]   ;;  %v2144_v16 = vld [vmem:[#allocation2 + $0x30] sm:$0xe] }
 0x40f   : > { %6198 = vmatmul.mubr.msk.bf16.gmra.mrb[12].mxu0 %vm555_vm1, %v5576_v21  ;;  %v6738_v21 = vld [vmem:[#allocation2 + $0x18] ss:$8 sps:$4 sm:$0xff]   ;;  %v1972_v26 = vrot.slane %v1970_v27, 4  ;;  %v1975_v41 = vrot.slane %v1973_v34, 5  ;;  %v1954_v27 = vsel %vm7271_vm11, %v1949_v51, %v1953_v5 }
 0x410   : > { %6205 = vmatprep.mubr.msk.bf16.mxu0 %vm555_vm1, %v5595_v24  ;;  %v1935_v24 = vrot.slane %v1934_v13, 4 }
 0x411   : > { %v1976_v49 = vor.u32 %v1975_v41, %v1972_v26  ;;  %v2165_v26 = vrot.slane %v7403_v2, 5  ;;  %v2141_v2 = vld [vmem:[#allocation2 + $0x18] sm:$0xe] }
 0x413   : > { %v1977_v12 = vrot.slane %v1976_v49, 4 }
 0x417   : > { %6206 = vmatmul.mubr.msk.bf16.vlgmr.msra.gmra.mrb[8].mxu0 %vm555_vm1, %v5596_v43  ;;  %v7424_v43 = vld [vmem:[#allocation2 + $0x24] sm:$0x1] }
 0x418   : > { %6214 = vmatpush3.bf16.msra.mxu0 %v6734_v30  ;;  %6209 = vmatprep.mubr.msk.bf16.mxu0 %vm555_vm1, %v5597_v45  ;;  %v1937_v30 = vshll.u32 %v7405_v4, 16  ;;  %v7426_v45 = vld [vmem:[#allocation2 + $0x2c] sm:$0x1]  ;;  %v2166_v4 = vsel %vm7361_vm14, %v5633_v40, %v2165_v26  ;;  %v2177_v35 = vrot.slane %v7424_v43, 5  ;;  %v7498_v26 = vld [vmem:[#allocation2 + $0x14] sm:$0x1] }
 0x419   : > { %6215 = vmatprep.subr.bf16.mxu0 %v6735_v55  ;;  %v1979_v62 = vshll.u32 %v7426_v45, 16 }
 0x41a   : > { %v1939_v38 = vrot.slane %v1937_v30, 5  ;;  %v7438_v30 = vld [vmem:[#allocation2 + $0x44] sm:$0x1] }
 0x41b   : > { %v1981_v25 = vrot.slane %v1979_v62, 5  ;;  %v2193_v5 = vrot.slane %v7438_v30, 5 }
 0x41c   : > { %6216 = vmatpush3.bf16.msra.mxu0 %v6735_v55  ;;  %v1940_v44 = vsel %vm7271_vm11, %v1935_v24, %v1939_v38  ;;  %v1962_v55 = vor.u32 %v1961_v29, %v1958_v28  ;;  %v2140_v24 = vld [vmem:[#allocation2 + $0x10] sm:$0xe]  ;;  %v6743_v29 = vld [vmem:[%s8285_s6 + $0x58] sm:$0xff]  }
 0x41d   : > { %6225 = vmatprep.subr.bf16.mxu0 %v6737_v22  ;;  %v5623_v58 = vcombine.low %v1926_v53, %v1940_v44  ;;  %v5634_v41 = vrot.slane %v2140_v24, 9 }
 0x41e   : > { %v1963_v59 = vrot.slane %v1962_v55, 4  ;;  %v2142_v55 = vld [vmem:[#allocation2 + $0x20] sm:$0xe] }
 0x41f   : > { %6210 = vmatmul.mubr.msk.bf16.gmra.mrb[12].mxu0 %vm555_vm1, %v5598_v57  ;;  %v1965_v57 = vshll.u32 %v7424_v43, 16  ;;  %v5636_v51 = vrot.slane %v2142_v55, 9  ;;  %v2454_v55 = vld [vmem:[#allocation2 + $0x48] sm:$0xf] }
 0x420   : > { %6217 = vmatprep.mubr.msk.bf16.mxu0 %vm555_vm1, %v6736_v63  ;;  %v2000_v63 = vrot.slane %v1998_v1, 4  ;;  %v2143_v1 = vld [vmem:[#allocation2 + $0x28] sm:$0xe] }
 0x421   : > { %v1967_v13 = vrot.slane %v1965_v57, 5  ;;  %v5637_v57 = vrot.slane %v2143_v1, 9  ;;  %v2178_v60 = vsel %vm7361_vm14, %v5636_v51, %v2177_v35  ;;  %v6748_v1 = vld [vmem:[#allocation2 + $0x20] ss:$8 sps:$4 sm:$0xff]  }
 0x422   : > { %v2004_v32 = vor.u32 %v2003_v0, %v2000_v63  ;;  %v2146_v0 = vld [vmem:[#allocation2 + $0x40] sm:$0xe] }
 0x423   : > { %v1968_v34 = vsel %vm7271_vm11, %v1963_v59, %v1967_v13  ;;  %v2185_v59 = vrot.slane %v7428_v46, 5  ;;  %v6745_v46 = vld [vmem:[%s8285_s6 + $0x68] sm:$0xff]   ;;  %v5640_v18 = vrot.slane %v2146_v0, 9  ;;  %v2440_v13 = vld [vmem:[#allocation2 + $0x10] sm:$0xf]  ;;  %v2558_v0 = vshll.u32 %v2454_v55, 16 }
 0x424   : > { %v5624_v28 = vcombine.low %v1954_v27, %v1968_v34  ;;  %v2005_v37 = vrot.slane %v2004_v32, 4  ;;  %v6747_v27 = vld [vmem:[%s8285_s6 + $0x70] sm:$0xff]  }
 0x425   : > { %v2194_v34 = vsel %vm7361_vm14, %v5640_v18, %v2193_v5  ;;  %v7516_v5 = vld [vmem:[#allocation2 + $0x34] sm:$0x1] }
 0x426   : > { %v2010_v53 = vsel %vm7271_vm11, %v2005_v37, %v2009_v19  ;;  %v2450_v37 = vld [vmem:[#allocation2 + $0x38] sm:$0xf] }
 0x427   : > { %6218 = vmatmul.mubr.msk.bf16.vlgmr.msra.gmra.mrb[8].mxu0 %vm555_vm1, %v6738_v21  ;;  %v2021_v21 = vshll.u32 %v7438_v30, 16  ;;  %v2460_v30 = vshll.u32 %v2440_v13, 16 }
 0x428   : > { %6226 = vmatpush3.bf16.msra.mxu0 %v6737_v22  ;;  %6221 = vmatprep.mubr.msk.bf16.mxu0 %vm555_vm1, %v6739_v31  ;;  %v2015_v22 = vshll.u32 %v1911_v56, 16 }
 0x429   : > { %6227 = vmatprep.subr.bf16.mxu0 %v6740_v42  ;;  %v2023_v56 = vrot.slane %v2021_v21, 5  ;;  %v2462_v21 = vrot.slane %v2460_v30, 5 }
 0x42a   : > { %v2017_v8 = vrot.slane %v2015_v22, 5  ;;  %v5635_v22 = vrot.slane %v2141_v2, 9  ;;  %v2527_v2 = vshrl.u32 %v2450_v37, 16 }
 0x42c   : > { %6228 = vmatpush3.bf16.msra.mxu0 %v6740_v42  ;;  %v2018_v10 = vor.u32 %v2017_v8, %v2014_v61  ;;  %v1982_v42 = vsel %vm7271_vm11, %v1977_v12, %v1981_v25  ;;  %v2174_v62 = vsel %vm7361_vm14, %v5635_v22, %v2173_v50  ;;  %v5639_v61 = vrot.slane %v2145_v54, 9  ;;  %v2442_v25 = vld [vmem:[#allocation2 + $0x18] sm:$0xf]  ;;  %v2452_v54 = vld [vmem:[#allocation2 + $0x40] sm:$0xf] }
 0x42d   : > { %6237 = vmatprep.subr.bf16.mxu0 %v6742_v52  ;;  %v5625_v31 = vcombine.low %v1982_v42, %v1996_v17  ;;  %v2189_v8 = vrot.slane %v7436_v9, 5  ;;  %v2457_v9 = vshrl.u32 %v2440_v13, 16  ;;  %v2471_v32 = vshrl.u32 %v2442_v25, 16  ;;  %v6746_v17 = vld [vmem:[#allocation2 + $0x10] ss:$8 sps:$4 sm:$0xff]  }
 0x42e   : > { %v2019_v38 = vrot.slane %v2018_v10, 4  ;;  %v2474_v10 = vshll.u32 %v2442_v25, 16  ;;  %v6749_v50 = vld [vmem:[#allocation2 + $0x30] ss:$8 sps:$4 sm:$0xff]   ;;  %v7518_v13 = vld [vmem:[#allocation2 + $0x3c] sm:$0x1] }
 0x42f   : > { %6222 = vmatmul.mubr.msk.bf16.gmra.mrb[12].mxu0 %vm555_vm1, %v6741_v7  ;;  %v2181_v7 = vrot.slane %v7426_v45, 5  ;;  %v5646_v45 = vcombine.low %v2174_v62, %v2178_v60  ;;  %v2190_v39 = vsel %vm7361_vm14, %v5639_v61, %v2189_v8  ;;  %v2459_v20 = vrot.slane %v2457_v9, 4  ;;  %v7512_v61 = vld [vmem:[#allocation2 + $0x24] sm:$0x1]  ;;  %v7514_v8 = vld [vmem:[#allocation2 + $0x2c] sm:$0x1] }
 0x430   : > { %6229 = vmatprep.mubr.msk.bf16.mxu0 %vm555_vm1, %v5623_v58  ;;  %v2024_v44 = vsel %vm7271_vm11, %v2019_v38, %v2023_v56  ;;  %v5638_v58 = vrot.slane %v2144_v16, 9  ;;  %v5648_v42 = vcombine.low %v2190_v39, %v2194_v34  ;;  %v2473_v23 = vrot.slane %v2471_v32, 4 }
 0x431   : > { %v5626_v11 = vcombine.low %v2010_v53, %v2024_v44  ;;  %v2182_v43 = vsel %vm7361_vm14, %v5637_v57, %v2181_v7  ;;  %v2476_v24 = vrot.slane %v2474_v10, 5  ;;  %v2466_v16 = vshll.u32 %v7498_v26, 16 }
 0x432   : > { %v2186_v63 = vsel %vm7361_vm14, %v5638_v58, %v2185_v59  ;;  %v2529_v62 = vrot.slane %v2527_v2, 4  ;;  %v2541_v25 = vshrl.u32 %v2452_v54, 16  ;;  %v2544_v39 = vshll.u32 %v2452_v54, 16 }
 0x433   : > { %v5647_v12 = vcombine.low %v2182_v43, %v2186_v63  ;;  %v2477_v19 = vor.u32 %v2476_v24, %v2473_v23  ;;  %v6752_v43 = vld [vmem:[%s8285_s6 + $0x80] sm:$0xff]   ;;  %v2555_v63 = vshrl.u32 %v2454_v55, 16  ;;  %v2494_v32 = vshll.u32 %v7512_v61, 16 }
 0x434   : > { %v2508_v10 = vshll.u32 %v7514_v8, 16  ;;  %v2536_v23 = vshll.u32 %v7518_v13, 16  ;;  %v2560_v24 = vrot.slane %v2558_v0, 5 }
 0x435   : > { %v2478_v35 = vrot.slane %v2477_v19, 4 }
 0x436   : > { %v2510_v19 = vrot.slane %v2508_v10, 5 }
 0x437   : > { %6230 = vmatmul.mubr.msk.bf16.vlgmr.msra.gmra.mrb[8].mxu0 %vm555_vm1, %v5624_v28  ;;  %v2444_v28 = vld [vmem:[#allocation2 + $0x20] sm:$0xf] }
 0x438   : > { %6238 = vmatpush3.bf16.msra.mxu0 %v6742_v52  ;;  %6233 = vmatprep.mubr.msk.bf16.mxu0 %vm555_vm1, %v5625_v31  ;;  %v2170_v52 = vsel %vm7361_vm14, %v5634_v41, %v2169_v47  ;;  %v2448_v31 = vld [vmem:[#allocation2 + $0x30] sm:$0xf]  ;;  %v2485_v38 = vshrl.u32 %v2444_v28, 16  ;;  %v2488_v40 = vshll.u32 %v2444_v28, 16  ;;  %v7500_v41 = vld [vmem:[#allocation2 + $0x1c] sm:$0x1]  ;;  %v2463_v47 = vor.u32 %v2462_v21, %v2459_v20 }
 0x439   : > { %6239 = vmatprep.subr.bf16.mxu0 %v6743_v29  ;;  %v5645_v49 = vcombine.low %v2166_v4, %v2170_v52  ;;  %v2513_v53 = vshrl.u32 %v2448_v31, 16  ;;  %v2516_v44 = vshll.u32 %v2448_v31, 16  ;;  %v2530_v4 = vshll.u32 %v2450_v37, 16  ;;  %v6750_v52 = vld [vmem:[%s8285_s6 + $0x78] sm:$0xff]  }
 0x43a   : > { %v2487_v22 = vrot.slane %v2485_v38, 4  ;;  %v2464_v51 = vrot.slane %v2463_v47, 4  ;;  %v2522_v21 = vshll.u32 %v7516_v5, 16  ;;  %v2543_v31 = vrot.slane %v2541_v25, 4  ;;  %v2685_v25 = vld [vmem:[#allocation2 + $0x28] sm:$0xe] }
 0x43b   : > { %v2515_v58 = vrot.slane %v2513_v53, 4  ;;  %v2518_v59 = vrot.slane %v2516_v44, 5  ;;  %v2532_v60 = vrot.slane %v2530_v4, 5  ;;  %v2546_v37 = vrot.slane %v2544_v39, 5  ;;  %v7530_v53 = vld [vmem:[#allocation2 + $0x44] sm:$0x1] }
 0x43c   : > { %6240 = vmatpush3.bf16.msra.mxu0 %v6743_v29  ;;  %v2446_v29 = vld [vmem:[#allocation2 + $0x28] sm:$0xf]  ;;  %v2496_v47 = vrot.slane %v2494_v32, 5  ;;  %v7532_v44 = vld [vmem:[#allocation2 + $0x4c] sm:$0x1]  ;;  %v2720_v32 = vrot.slane %v7514_v8, 5 }
 0x43d   : > { %6249 = vmatprep.subr.bf16.mxu0 %v6744_v33  ;;  %v2499_v56 = vshrl.u32 %v2446_v29, 16  ;;  %v2519_v34 = vor.u32 %v2518_v59, %v2515_v58  ;;  %v2533_v30 = vor.u32 %v2532_v60, %v2529_v62  ;;  %v2547_v55 = vor.u32 %v2546_v37, %v2543_v31 }
 0x43e   : > { %v2708_v60 = vrot.slane %v7498_v26, 5  ;;  %v2732_v37 = vrot.slane %v7530_v53, 5 }
 0x43f   : > { %6234 = vmatmul.mubr.msk.bf16.gmra.mrb[12].mxu0 %vm555_vm1, %v5626_v11  ;;  %v2480_v11 = vshll.u32 %v7500_v41, 16  ;;  %v2501_v57 = vrot.slane %v2499_v56, 4  ;;  %v2520_v38 = vrot.slane %v2519_v34, 4  ;;  %v2524_v56 = vrot.slane %v2522_v21, 5 }
 0x440   : > { %6241 = vmatprep.mubr.msk.bf16.mxu0 %vm555_vm1, %v5645_v49  ;;  %v2490_v49 = vrot.slane %v2488_v40, 5  ;;  %v2534_v40 = vrot.slane %v2533_v30, 4  ;;  %v2716_v34 = vrot.slane %v7512_v61, 5  ;;  %v5686_v30 = vrot.slane %v2685_v25, 9  ;;  %v2689_v61 = vld [vmem:[#allocation2 + $0x48] sm:$0xe] }
 0x447   : > { %6242 = vmatmul.mubr.msk.bf16.vlgmr.msra.gmra.mrb[8].mxu0 %vm555_vm1, %v5646_v45  ;;  %v2468_v45 = vrot.slane %v2466_v16, 5  ;;  %v2525_v16 = vsel %vm7271_vm11, %v2520_v38, %v2524_v56  ;;  %v2736_v38 = vrot.slane %v7532_v44, 5  ;;  %v2882_v56 = vld [vmem:[%s8289_s10] sm:$0xff] }
 0x448   : > { %6250 = vmatpush3.bf16.msra.mxu0 %v6744_v33  ;;  %6245 = vmatprep.mubr.msk.bf16.mxu0 %vm555_vm1, %v5647_v12  ;;  %v2502_v33 = vshll.u32 %v2446_v29, 16  ;;  %v2491_v12 = vor.u32 %v2490_v49, %v2487_v22  ;;  %v2550_v22 = vshll.u32 %v7530_v53, 16  ;;  %v2682_v49 = vld [vmem:[#allocation2 + $0x10] sm:$0xe] }
 0x449   : > { %6251 = vmatprep.subr.bf16.mxu0 %v6745_v46  ;;  %v5683_v62 = vrot.slane %v2682_v49, 9  ;;  %v2884_v53 = vld [vmem:[%s8289_s10 + $0x10] sm:$0xff] }
 0x44a   : > { %v2504_v7 = vrot.slane %v2502_v33, 5  ;;  %v2492_v20 = vrot.slane %v2491_v12, 4  ;;  %v2538_v33 = vrot.slane %v2536_v23, 5  ;;  %v2552_v0 = vrot.slane %v2550_v22, 5  ;;  %v2684_v12 = vld [vmem:[#allocation2 + $0x20] sm:$0xe] }
 0x44b   : > { %v2721_v23 = vsel %vm7361_vm14, %v5686_v30, %v2720_v32  ;;  %v2888_v49 = vld [vmem:[%s8289_s10 + $0x30] sm:$0xff] }
 0x44c   : > { %6252 = vmatpush3.bf16.msra.mxu0 %v6745_v46  ;;  %v2482_v46 = vrot.slane %v2480_v11, 5  ;;  %v2505_v18 = vor.u32 %v2504_v7, %v2501_v57  ;;  %v2497_v4 = vsel %vm7271_vm11, %v2492_v20, %v2496_v47  ;;  %v2539_v11 = vsel %vm7271_vm11, %v2534_v40, %v2538_v33  ;;  %v2883_v33 = vld [vmem:[%s8289_s10 + $0x8] sm:$0xff] }
 0x44d   : > { %6261 = vmatprep.subr.bf16.mxu0 %v6747_v27  ;;  %v5675_v57 = vcombine.low %v2525_v16, %v2539_v11  ;;  %v2548_v7 = vrot.slane %v2547_v55, 4  ;;  %v2728_v20 = vrot.slane %v7518_v13, 5  ;;  %v2891_v55 = vld [vmem:[%s8290_s11 + $0x8] sm:$0xff] }
 0x44e   : > { %v2483_v9 = vsel %vm7271_vm11, %v2478_v35, %v2482_v46  ;;  %v2506_v29 = vrot.slane %v2505_v18, 4  ;;  %v6753_v35 = vld [vmem:[%s8285_s6 + $0x88] sm:$0xff]   ;;  %v2709_v18 = vsel %vm7361_vm14, %v5683_v62, %v2708_v60 }
 0x44f   : > { %6246 = vmatmul.mubr.msk.bf16.gmra.mrb[12].mxu0 %vm555_vm1, %v5648_v42  ;;  %v2557_v42 = vrot.slane %v2555_v63, 4  ;;  %v2712_v63 = vrot.slane %v7500_v41, 5  ;;  %v2686_v41 = vld [vmem:[#allocation2 + $0x30] sm:$0xe]  ;;  %v2887_v16 = vld [vmem:[%s8289_s10 + $0x28] sm:$0xff] }
 0x450   : > { %6253 = vmatprep.mubr.msk.bf16.mxu0 %vm555_vm1, %v6746_v17  ;;  %v6751_v17 = vld [vmem:[#allocation2 + $0x40] ss:$8 sps:$4 sm:$0xff]   ;;  %v5687_v10 = vrot.slane %v2686_v41, 9 }
 0x451   : > { %v2561_v2 = vor.u32 %v2560_v24, %v2557_v42  ;;  %v2724_v42 = vrot.slane %v7516_v5, 5 }
 0x453   : > { %v2562_v58 = vrot.slane %v2561_v2, 4  ;;  %v2725_v8 = vsel %vm7361_vm14, %v5687_v10, %v2724_v42  ;;  %v2885_v2 = vld [vmem:[%s8289_s10 + $0x18] sm:$0xff] }
 0x457   : > { %6254 = vmatmul.mubr.msk.bf16.vlgmr.msra.gmra.mrb[8].mxu0 %vm555_vm1, %v6748_v1  ;;  %v2564_v1 = vshll.u32 %v7532_v44, 16  ;;  %v7594_v44 = vpack.c.bf16 %v2883_v33, %v2882_v56 }
 0x458   : > { %6262 = vmatpush3.bf16.msra.mxu0 %v6747_v27  ;;  %6257 = vmatprep.mubr.msk.bf16.mxu0 %vm555_vm1, %v6749_v50  ;;  %v2469_v27 = vsel %vm7271_vm11, %v2464_v51, %v2468_v45  ;;  %v2683_v50 = vld [vmem:[#allocation2 + $0x18] sm:$0xe]  ;;  %v2553_v45 = vsel %vm7271_vm11, %v2548_v7, %v2552_v0  ;;  %v5706_v7 = vld [vmem:[%s530_s27] ss:$0 sm:$0xff] }
 0x459   : > { %6263 = vmatprep.subr.bf16.mxu0 %v6750_v52  ;;  %v5673_v28 = vcombine.low %v2469_v27, %v2483_v9  ;;  %v2566_v59 = vrot.slane %v2564_v1, 5  ;;  %v5684_v54 = vrot.slane %v2683_v50, 9  ;;  %v5685_v27 = vrot.slane %v2684_v12, 9  ;;  %v2886_v1 = vld [vmem:[%s8289_s10 + $0x20] sm:$0xff]  ;;  %v2889_v50 = vld [vmem:[%s8289_s10 + $0x38] sm:$0xff] }
 0x45a   : > { %v7619_v22 = vpack.c.bf16 %v2887_v16, %v2886_v1 }
 0x45b   : > { %v2567_v46 = vsel %vm7271_vm11, %v2562_v58, %v2566_v59  ;;  %v2713_v26 = vsel %vm7361_vm14, %v5684_v54, %v2712_v63  ;;  %v2717_v21 = vsel %vm7361_vm14, %v5685_v27, %v2716_v34 }
 0x45c   : > { %6264 = vmatpush3.bf16.msra.mxu0 %v6750_v52  ;;  %v2511_v52 = vsel %vm7271_vm11, %v2506_v29, %v2510_v19  ;;  %v5676_v39 = vcombine.low %v2553_v45, %v2567_v46  ;;  %v5695_v9 = vcombine.low %v2709_v18, %v2713_v26  ;;  %v5696_v5 = vcombine.low %v2717_v21, %v2721_v23 }
 0x45d   : > { %6273 = vmatprep.subr.bf16.mxu0 %v6752_v43  ;;  %v5674_v51 = vcombine.low %v2497_v4, %v2511_v52  ;;  %v5690_v29 = vrot.slane %v2689_v61, 9  ;;  %v2890_v4 = vld [vmem:[%s8290_s11] sm:$0xff]  ;;  %v7603_v52 = vpack.c.bf16 %v2885_v2, %v2884_v53 }
 0x45e   : > { %v7615_v11 = vpack.c.bf16 %v2891_v55, %v2890_v4  ;;  %v2892_v4 = vld [vmem:[%s8290_s11 + $0x10] sm:$0xff] }
 0x45f   : > { %6258 = vmatmul.mubr.msk.bf16.gmra.mrb[12].mxu0 %vm555_vm1, %v6751_v17  ;;  %v2737_v47 = vsel %vm7361_vm14, %v5690_v29, %v2736_v38 }
 0x460   : > { %6265 = vmatprep.mubr.msk.bf16.mxu0 %vm555_vm1, %v5673_v28  ;;  %v2688_v28 = vld [vmem:[#allocation2 + $0x40] sm:$0xe]  ;;  %6539 = vmatpush3.bf16.msra.mxu1 %v7615_v11 }
 0x461   : > { %v5689_v13 = vrot.slane %v2688_v28, 9  ;;  %6540 = vmatprep.subr.bf16.mxu1 %v6887_v3 }
 0x463   : > { %v2733_v40 = vsel %vm7361_vm14, %v5689_v13, %v2732_v37 }
 0x464   : > { %v5698_v19 = vcombine.low %v2733_v40, %v2737_v47 }
 0x467   : > { %6266 = vmatmul.mubr.msk.bf16.vlgmr.msra.gmra.mrb[8].mxu0 %vm555_vm1, %v5674_v51  ;;  %v6535_v51 = vpack.c.bf16 %v2889_v50, %v2888_v49 }
 0x468   : > { %6274 = vmatpush3.bf16.msra.mxu0 %v6752_v43  ;;  %6269 = vmatprep.mubr.msk.bf16.mxu0 %vm555_vm1, %v5675_v57  ;;  %v2687_v43 = vld [vmem:[#allocation2 + $0x38] sm:$0xe] }
 0x469   : > { %6275 = vmatprep.subr.bf16.mxu0 %v6753_v35  ;;  %v5688_v17 = vrot.slane %v2687_v43, 9 }
 0x46b   : > { %v2729_v24 = vsel %vm7361_vm14, %v5688_v17, %v2728_v20 }
 0x46c   : > { %6276 = vmatpush3.bf16.msra.mxu0 %v6753_v35  ;;  %v5697_v31 = vcombine.low %v2725_v8, %v2729_v24  ;;  %v5705_v35 = vld [vmem:[%s8286_s7] ss:$0 sm:$0xff] }
 0x46d   : > { %6525 = vmatprep.subr.bf16.mxu0 %v6887_v3 }
 0x46f   : > { %6270 = vmatmul.mubr.msk.bf16.gmra.mrb[12].mxu0 %vm555_vm1, %v5676_v39 }
 0x470   : > { %6277 = vmatprep.mubr.msk.bf16.mxu0 %vm555_vm1, %v5695_v9 }
 0x477   : > { %6278 = vmatmul.mubr.msk.bf16.vlgmr.msra.gmra.mrb[8].mxu0 %vm555_vm1, %v5696_v5 }
 0x478   : > { %6281 = vmatprep.mubr.msk.bf16.mxu0 %vm555_vm1, %v5697_v31  ;;  %6527 = vmatpush3.bf16.msra.mxu0 %v7594_v44 }
 0x479   : > { %6528 = vmatprep.subr.bf16.mxu0 %v6887_v3 }
 0x47c   : > { %6530 = vmatpush3.bf16.msra.mxu0 %v7603_v52 }
 0x47d   : > { %6531 = vmatprep.subr.bf16.mxu0 %v6887_v3 }
 0x47f   : > { %6282 = vmatmul.mubr.msk.bf16.gmra.mrb[12].mxu0 %vm555_vm1, %v5698_v19 }
 0x480   : > { %6301 = vmatprep.mubr.msk.f32.mxu0 %vm6888_vm0, %v6889_v6  ;;  %6533 = vmatpush3.bf16.msra.mxu0 %v7619_v22 }
 0x481   : > { %6534 = vmatprep.subr.bf16.mxu0 %v6887_v3 }
 0x484   : > { %6536 = vmatpush3.bf16.msra.mxu0 %v6535_v51 }
 0x485   : > { %6543 = vmatprep.subr.bf16.mxu0 %v6887_v3 }
 0x54a   : > { %v6279_v57 = vpop.f32.mrb[8].mxu0 }
 0x54b   : > { %v2813_v58 = vpop.f32.mrb[9].mxu0  ;;  %v2861_v59 = vadd.f32 %v6279_v57, %v5705_v35 }
 0x54c   : > { %v2859_v62 = vadd.f32 %v5705_v35, %v2813_v58  ;;  %v6280_v60 = vpop.f32.mrb[10].mxu0 }
 0x54d   : > { %v2816_v54 = vpop.f32.mrb[11].mxu0  ;;  %v2862_v0 = vadd.f32 %v6280_v60, %v5705_v35  ;;  %v7641_v46 = vadd.f32 %v5706_v7, %v2861_v59 }
 0x54e   : > { %v7639_v63 = vadd.f32 %v5706_v7, %v2859_v62  ;;  %v2860_v45 = vadd.f32 %v5705_v35, %v2816_v54 }
 0x54f   : > { %v2877_v26 = vadd.f32 %v5706_v7, %v2862_v0  ;;  %v2900_v27 = vsel %vm2896_vm15, %v7641_v46, 0.0 }
 0x550   : > { %v2875_v12 = vadd.f32 %v5706_v7, %v2860_v45  ;;  %v2897_v18 = vsel %vm2896_vm15, %v7639_v63, 0.0 }
 0x551   : > { %v2902_v42 = vsel %vm2896_vm15, %v2877_v26, 0.0 }
 0x552   : > { %v2898_v25 = vsel %vm2896_vm15, %v2875_v12, 0.0  ;;  %v6283_v41 = vpop.f32.mrb[12].mxu0 }
 0x553   : > { %v2899_v43 = vadd.f32 %v2898_v25, %v2897_v18  ;;  %v2829_v39 = vpop.f32.mrb[13].mxu0  ;;  %v2865_v9 = vadd.f32 %v6283_v41, %v5705_v35 }
 0x554   : > { %v2863_v34 = vadd.f32 %v5705_v35, %v2829_v39  ;;  %v6284_v30 = vpop.f32.mrb[14].mxu0 }
 0x555   : > { %v2901_v32 = vadd.f32 %v2900_v27, %v2899_v43  ;;  %v2832_v10 = vpop.f32.mrb[15].mxu0  ;;  %v2866_v20 = vadd.f32 %v6284_v30, %v5705_v35  ;;  %v2880_v61 = vadd.f32 %v5706_v7, %v2865_v9 }
 0x556   : > { %v2878_v17 = vadd.f32 %v5706_v7, %v2863_v34  ;;  %v2864_v21 = vadd.f32 %v5705_v35, %v2832_v10 }
 0x557   : > { %v2903_v23 = vadd.f32 %v2902_v42, %v2901_v32  ;;  %v2881_v5 = vadd.f32 %v5706_v7, %v2866_v20  ;;  %v2908_v13 = vsel %vm2896_vm15, %v2880_v61, 0.0 }
 0x558   : > { %v2904_v8 = vsel %vm2896_vm15, %v2878_v17, 0.0  ;;  %v2879_v24 = vadd.f32 %v5706_v7, %v2864_v21 }
 0x559   : > { %v2905_v28 = vadd.f32 %v2904_v8, %v2903_v23  ;;  %v2910_v38 = vsel %vm2896_vm15, %v2881_v5, 0.0 }
 0x55a   : > { %v2906_v29 = vsel %vm2896_vm15, %v2879_v24, 0.0 }
 0x55b   : > { %v2907_v31 = vadd.f32 %v2906_v29, %v2905_v28 }
 0x55d   : > { %v2909_v37 = vadd.f32 %v2908_v13, %v2907_v31  ;;  %v6754_v31 = vld [vmem:[%s8291_s12 + $0x20] sm:$0xff]   ;;  %v6755_v13 = vld [vmem:[%s8291_s12 + $0x28] sm:$0xff]  }
 0x55f   : > { %v2911_v40 = vadd.f32 %v2910_v38, %v2909_v37  ;;  %v3362_v38 = vld [vmem:[#allocation3 + $0x8] sm:$0x1]  ;;  %v6766_v37 = vld [vmem:[%s8291_s12 + $0x50] sm:$0xff]  }
 0x561   : > { %v2912_v47 = vrot.slane %v2911_v40, 4 }
 0x563   : > { %v2913_v19 = vadd.f32 %v2912_v47, %v2911_v40  ;;  %v3363_v40 = vsel %vm7729_vm5, 0, %v3362_v38  ;;  %v5712_v47 = vld [vmem:[%s8288_s9] ss:$0 sm:$0xff] }
 0x564   : > { %3364 = vst [vmem:[#allocation3 + $0x8] sm:$0x1] %v3363_v40 }
 0x565   : > { %v2914_v56 = vrot.slane %v2913_v19, 2 }
 0x567   : > { %v2915_v33 = vadd.f32 %v2914_v56, %v2913_v19  ;;  %v3393_v19 = vld [vmem:[#allocation3 + $0xc] sm:$0x1] }
 0x568   : > { %v3394_v56 = vsel %vm7739_vm6, 0, %v3393_v19 }
 0x569   : > { %v2916_v53 = vrot.slane %v2915_v33, 1  ;;  %3395 = vst [vmem:[#allocation3 + $0xc] sm:$0x1] %v3394_v56 }
 0x56b   : > { %v2917_v2 = vadd.f32 %v2916_v53, %v2915_v33  ;;  %v6757_v33 = vld [vmem:[%s8291_s12 + $0x38] sm:$0xff]  }
 0x56d   : > { %6302 = vmatmul.mubr.msk.f32.vlgmr.msra.gmra.mrb[6].mxu0 %vm2896_vm15, %v2917_v2  ;;  %v3390_v2 = vld [vmem:[#allocation3 + $0x4] sm:$0x1] }
 0x56e   : > { %6545 = vmatpush3.bf16.msra.mxu0 %v7594_v44  ;;  %6331 = vmatprep.mubr.msk.f32.mxu0 %vm6888_vm0, %v6889_v6  ;;  %v2893_v44 = vld [vmem:[%s8290_s11 + $0x18] sm:$0xff] }
 0x56f   : > { %6546 = vmatprep.subr.bf16.mxu0 %v6887_v3  ;;  %v6541_v55 = vpack.c.bf16 %v2893_v44, %v2892_v4  ;;  %v3391_v44 = vsel %vm7739_vm6, 0, %v3390_v2 }
 0x570   : > { %3392 = vst [vmem:[#allocation3 + $0x4] sm:$0x1] %v3391_v44 }
 0x571   : > { %6542 = vmatpush3.bf16.msra.mxu1 %v6541_v55 }
 0x572   : > { %6548 = vmatpush3.bf16.msra.mxu0 %v7603_v52  ;;  %6555 = vmatprep.subr.bf16.mxu1 %v6887_v3 }
 0x573   : > { %6549 = vmatprep.subr.bf16.mxu0 %v6887_v3 }
 0x576   : > { %6551 = vmatpush3.bf16.msra.mxu0 %v7619_v22 }
 0x577   : > { %6552 = vmatprep.subr.bf16.mxu0 %v6887_v3 }
 0x57a   : > { %6554 = vmatpush3.bf16.msra.mxu0 %v6535_v51 }
 0x640   : > { %v2987_v52 = vpop.f32.mrb[6].mxu0 }
 0x641   : > { %v2991_v1 = vmul.f32 0.0078125, %v2987_v52  ;;  %v6303_v16 = vpop.f32.mrb[7].mxu0  ;;  %v3365_v52 = vld [vmem:[#allocation3 + $0x10] sm:$0x1] }
 0x642   : > { %v3368_v16 = vld [vmem:[#allocation3 + $0x18] sm:$0x1] }
 0x643   : > { %6313 = vmatmul.mubr.msk.f32.vlgmr.msra.gmra.mrb[2].mxu1 %vm555_vm1, %v2991_v1  ;;  %v3366_v1 = vsel %vm7729_vm5, 0, %v3365_v52 }
 0x644   : > { %6557 = vmatpush3.bf16.msra.mxu1 %v7615_v11  ;;  %6342 = vmatprep.mubr.msk.f32.mxu1 %vm6888_vm0, %v6889_v6  ;;  %vm3350_vm0 = vcmask 519168   ;;  %3367 = vst [vmem:[#allocation3 + $0x10] sm:$0x1] %v3366_v1 }
 0x645   : > { %6558 = vmatprep.subr.bf16.mxu1 %v6887_v3  ;;  %3351 = vst.msk [vmem:[#allocation3] sm:$0xf] %vm3350_vm0, %v6890_v36  ;;  %3355 = vst.msk [vmem:[#allocation3 + $0x48] sm:$0xf] %vm3350_vm0, %v6890_v36  ;;  %v6756_v36 = vld [vmem:[%s8291_s12 + $0x30] sm:$0xff]  }
 0x646   : > { %vm7838_vm3 = vmand %vm3350_vm0, %vm1049_vm4 }
 0x648   : > { %6560 = vmatpush3.bf16.msra.mxu1 %v6541_v55  ;;  %v7758_v55 = vld [vmem:[%s8291_s12] sm:$0xff]  }
 0x649   : > { %6345 = vmatprep.subr.bf16.mxu1 %v6754_v31 }
 0x64c   : > { %v3359_v53 = vld [vmem:[#allocation3] sm:$0x1] }
 0x64d   : > { %v3360_v4 = vsel %vm7729_vm5, 0, %v3359_v53 }
 0x64e   : > { %3361 = vst [vmem:[#allocation3] sm:$0x1] %v3360_v4 }
 0x716   : > { %v3061_v22 = vpop.f32.mrb[2].mxu1 }
 0x717   : > { %v3068_v49 = vrot.slane %v3061_v22, %v7057_v48  ;;  %v6314_v50 = vpop.f32.mrb[3].mxu1  ;;  %v3396_v22 = vld [vmem:[#allocation3 + $0x14] sm:$0x1] }
 0x718   : > { %v3399_v50 = vld [vmem:[#allocation3 + $0x1c] sm:$0x1] }
 0x719   : > { %v7676_v51 = vsub.f32 %v7639_v63, %v3068_v49  ;;  %v7678_v35 = vsub.f32 %v2875_v12, %v3068_v49  ;;  %v7681_v57 = vsub.f32 %v7641_v46, %v3068_v49  ;;  %v7683_v7 = vsub.f32 %v2877_v26, %v3068_v49 }
 0x71a   : > { %v7685_v11 = vsub.f32 %v2878_v17, %v3068_v49  ;;  %v7693_v59 = vsub.f32 %v2879_v24, %v3068_v49  ;;  %v7699_v0 = vsub.f32 %v2880_v61, %v3068_v49  ;;  %v7704_v18 = vsub.f32 %v2881_v5, %v3068_v49 }
 0x71b   : > { %v3077_v3 = vmul.f32 %v7676_v51, %v7676_v51  ;;  %v3078_v6 = vmul.f32 %v7678_v35, %v7678_v35  ;;  %v3079_v58 = vmul.f32 %v7681_v57, %v7681_v57  ;;  %v3080_v62 = vmul.f32 %v7683_v7, %v7683_v7 }
 0x71c   : > { %v3081_v45 = vmul.f32 %v7685_v11, %v7685_v11  ;;  %v3082_v26 = vmul.f32 %v7693_v59, %v7693_v59  ;;  %v3083_v43 = vmul.f32 %v7699_v0, %v7699_v0  ;;  %v3084_v9 = vmul.f32 %v7704_v18, %v7704_v18 }
 0x71d   : > { %v3085_v60 = vsel %vm2896_vm15, %v3077_v3, 0.0  ;;  %v3086_v54 = vsel %vm2896_vm15, %v3078_v6, 0.0  ;;  %v3088_v46 = vsel %vm2896_vm15, %v3079_v58, 0.0  ;;  %v3090_v25 = vsel %vm2896_vm15, %v3080_v62, 0.0  ;;  %v3371_v58 = vld [vmem:[#allocation3 + $0x20] sm:$0x1] }
 0x71e   : > { %v3087_v63 = vadd.f32 %v3086_v54, %v3085_v60  ;;  %v3092_v39 = vsel %vm2896_vm15, %v3081_v45, 0.0  ;;  %v3094_v34 = vsel %vm2896_vm15, %v3082_v26, 0.0  ;;  %v3096_v32 = vsel %vm2896_vm15, %v3083_v43, 0.0  ;;  %v3374_v62 = vld [vmem:[#allocation3 + $0x28] sm:$0x1] }
 0x71f   : > { %v3098_v42 = vsel %vm2896_vm15, %v3084_v9, 0.0  ;;  %v3369_v49 = vsel %vm7729_vm5, 0, %v3368_v16  ;;  %v3397_v3 = vsel %vm7739_vm6, 0, %v3396_v22  ;;  %v3400_v6 = vsel %vm7739_vm6, 0, %v3399_v50  ;;  %v3402_v60 = vld [vmem:[#allocation3 + $0x24] sm:$0x1] }
 0x720   : > { %v3089_v12 = vadd.f32 %v3088_v46, %v3087_v63  ;;  %3370 = vst [vmem:[#allocation3 + $0x18] sm:$0x1] %v3369_v49  ;;  %3398 = vst [vmem:[#allocation3 + $0x14] sm:$0x1] %v3397_v3  ;;  %v3372_v54 = vsel %vm7729_vm5, 0, %v3371_v58  ;;  %v3375_v63 = vsel %vm7729_vm5, 0, %v3374_v62 }
 0x721   : > { %3401 = vst [vmem:[#allocation3 + $0x1c] sm:$0x1] %v3400_v6  ;;  %v3403_v45 = vsel %vm7739_vm6, 0, %v3402_v60  ;;  %v3405_v46 = vld [vmem:[#allocation3 + $0x2c] sm:$0x1] }
 0x722   : > { %v3091_v41 = vadd.f32 %v3090_v25, %v3089_v12  ;;  %3373 = vst [vmem:[#allocation3 + $0x20] sm:$0x1] %v3372_v54  ;;  %3376 = vst [vmem:[#allocation3 + $0x28] sm:$0x1] %v3375_v63  ;;  %v3406_v12 = vsel %vm7739_vm6, 0, %v3405_v46 }
 0x723   : > { %3404 = vst [vmem:[#allocation3 + $0x24] sm:$0x1] %v3403_v45  ;;  %3407 = vst [vmem:[#allocation3 + $0x2c] sm:$0x1] %v3406_v12  ;;  %v3377_v26 = vld [vmem:[#allocation3 + $0x30] sm:$0x1] }
 0x724   : > { %v3093_v27 = vadd.f32 %v3092_v39, %v3091_v41  ;;  %v3380_v25 = vld [vmem:[#allocation3 + $0x38] sm:$0x1]  ;;  %v3378_v41 = vsel %vm7729_vm5, 0, %v3377_v26  ;;  %v3408_v39 = vld [vmem:[#allocation3 + $0x34] sm:$0x1] }
 0x725   : > { %v3381_v43 = vsel %vm7729_vm5, 0, %v3380_v25  ;;  %3379 = vst [vmem:[#allocation3 + $0x30] sm:$0x1] %v3378_v41  ;;  %v3411_v9 = vld [vmem:[#allocation3 + $0x3c] sm:$0x1] }
 0x726   : > { %v3095_v30 = vadd.f32 %v3094_v34, %v3093_v27  ;;  %3382 = vst [vmem:[#allocation3 + $0x38] sm:$0x1] %v3381_v43  ;;  %v3409_v27 = vsel %vm7739_vm6, 0, %v3408_v39  ;;  %v3412_v34 = vsel %vm7739_vm6, 0, %v3411_v9 }
 0x727   : > { %3410 = vst [vmem:[#allocation3 + $0x34] sm:$0x1] %v3409_v27  ;;  %3413 = vst [vmem:[#allocation3 + $0x3c] sm:$0x1] %v3412_v34 }
 0x728   : > { %v3097_v10 = vadd.f32 %v3096_v32, %v3095_v30  ;;  %v3383_v30 = vld [vmem:[#allocation3 + $0x40] sm:$0x1]  ;;  %v3414_v32 = vld [vmem:[#allocation3 + $0x44] sm:$0x1] }
 0x72a   : > { %v3099_v17 = vadd.f32 %v3098_v42, %v3097_v10  ;;  %v3384_v10 = vsel %vm7729_vm5, 0, %v3383_v30  ;;  %v3415_v42 = vsel %vm7739_vm6, 0, %v3414_v32  ;;  %v7820_v32 = vld [vmem:[#allocation3] sm:$0xf] }
 0x72b   : > { %3385 = vst [vmem:[#allocation3 + $0x40] sm:$0x1] %v3384_v10  ;;  %3416 = vst [vmem:[#allocation3 + $0x44] sm:$0x1] %v3415_v42  ;;  %v3608_v10 = vshrl.u32 %v7820_v32, 16  ;;  %v3611_v42 = vshll.u32 %v7820_v32, 16 }
 0x72c   : > { %v3100_v20 = vrot.slane %v3099_v17, 4 }
 0x72e   : > { %v3101_v21 = vadd.f32 %v3100_v20, %v3099_v17  ;;  %v3386_v17 = vld [vmem:[#allocation3 + $0x48] sm:$0x1] }
 0x72f   : > { %v3387_v20 = vsel %vm7729_vm5, 0, %v3386_v17 }
 0x730   : > { %v3102_v23 = vrot.slane %v3101_v21, 2  ;;  %3388 = vst [vmem:[#allocation3 + $0x48] sm:$0x1] %v3387_v20 }
 0x732   : > { %v3103_v61 = vadd.f32 %v3102_v23, %v3101_v21  ;;  %v3417_v21 = vld [vmem:[#allocation3 + $0x4c] sm:$0x1] }
 0x733   : > { %v3418_v23 = vsel %vm7739_vm6, 0, %v3417_v21 }
 0x734   : > { %v3104_v8 = vrot.slane %v3103_v61, 1  ;;  %3419 = vst [vmem:[#allocation3 + $0x4c] sm:$0x1] %v3418_v23 }
 0x736   : > { %v3105_v24 = vadd.f32 %v3104_v8, %v3103_v61 }
 0x738   : > { %6332 = vmatmul.mubr.msk.f32.vlgmr.msra.gmra.mrb[16].mxu0 %vm2896_vm15, %v3105_v24 }
 0x80b   : > { %v3175_v28 = vpop.f32.mrb[16].mxu0 }
 0x80c   : > { %v3179_v5 = vmul.f32 0.0078125, %v3175_v28  ;;  %v6333_v29 = vpop.f32.mrb[17].mxu0 }
 0x80d   : > { %v5711_v29 = vld [vmem:[%s8287_s8] ss:$0 sm:$0xff] }
 0x80e   : > { %6343 = vmatmul.mubr.msk.f32.vlgmr.msra.gmra.mrb[4].mxu1 %vm555_vm1, %v3179_v5 }
 0x80f   : > { %6346 = vmatpush3.bf16.msra.mxu1 %v6754_v31 }
 0x810   : > { %6347 = vmatprep.subr.bf16.mxu1 %v6755_v13 }
 0x813   : > { %6348 = vmatpush3.bf16.msra.mxu1 %v6755_v13 }
 0x814   : > { %6349 = vmatprep.subr.bf16.mxu1 %v6756_v36 }
 0x817   : > { %6350 = vmatpush3.bf16.msra.mxu1 %v6756_v36 }
 0x818   : > { %6351 = vmatprep.subr.bf16.mxu1 %v6757_v33 }
 0x81b   : > { %6352 = vmatpush3.bf16.msra.mxu1 %v6757_v33 }
 0x81c   : > { %6361 = vmatprep.subr.bf16.mxu1 %v7758_v55 }
 0x8e1   : > { %v3249_v61 = vpop.f32.mrb[4].mxu1 }
 0x8e2   : > { %v3250_v8 = vadd.f32 1e-05, %v3249_v61  ;;  %v6344_v24 = vpop.f32.mrb[5].mxu1  ;;  %v7824_v61 = vrot.slane %v3608_v10, 4 }
 0x8e4   : > { %6837 = vrsqrt.f32 %v3250_v8  ;;  %v7826_v8 = vrot.slane %v3611_v42, 5 }
 0x8ee   : > { %v6838_v28 = vpop.eup %6837 }
 0x8ef   : > { %v3257_v5 = vrot.slane %v6838_v28, %v7057_v48 }
 0x8f1   : > { %v3258_v31 = vmul.f32 %v3257_v5, %v7676_v51  ;;  %v3259_v13 = vmul.f32 %v3257_v5, %v7678_v35  ;;  %v3260_v38 = vmul.f32 %v3257_v5, %v7681_v57  ;;  %v3261_v40 = vmul.f32 %v3257_v5, %v7683_v7 }
 0x8f2   : > { %v3262_v19 = vmul.f32 %v3257_v5, %v7685_v11  ;;  %v3263_v48 = vmul.f32 %v3257_v5, %v7693_v59  ;;  %v3264_v56 = vmul.f32 %v3257_v5, %v7699_v0  ;;  %v3265_v35 = vmul.f32 %v3257_v5, %v7704_v18 }
 0x8f3   : > { %v3272_v36 = vmul.f32 %v5711_v29, %v3258_v31  ;;  %v3273_v33 = vmul.f32 %v5711_v29, %v3259_v13  ;;  %v3274_v53 = vmul.f32 %v5711_v29, %v3260_v38  ;;  %v3275_v51 = vmul.f32 %v5711_v29, %v3261_v40  ;;  %v7828_v38 = vld [vmem:[#allocation3 + $0x4] sm:$0x1] }
 0x8f4   : > { %v3276_v2 = vmul.f32 %v5711_v29, %v3262_v19  ;;  %v3277_v57 = vmul.f32 %v5711_v29, %v3263_v48  ;;  %v3278_v4 = vmul.f32 %v5711_v29, %v3264_v56  ;;  %v3279_v3 = vmul.f32 %v5711_v29, %v3265_v35 }
 0x8f5   : > { %v3286_v7 = vadd.f32 %v5712_v47, %v3272_v36  ;;  %v3287_v44 = vadd.f32 %v5712_v47, %v3273_v33  ;;  %v3288_v52 = vadd.f32 %v5712_v47, %v3274_v53  ;;  %v3289_v1 = vadd.f32 %v5712_v47, %v3275_v51 }
 0x8f6   : > { %v7808_v16 = vadd.f32 %v5712_v47, %v3276_v2  ;;  %v7810_v11 = vadd.f32 %v5712_v47, %v3277_v57  ;;  %v7812_v59 = vadd.f32 %v5712_v47, %v3278_v4  ;;  %v7817_v62 = vadd.f32 %v5712_v47, %v3279_v3 }
 0x8f7   : > { %v5713_v0 = vmul.f32 -1.442695, %v3286_v7  ;;  %v5714_v22 = vmul.f32 -1.442695, %v3287_v44  ;;  %v5715_v49 = vmul.f32 -1.442695, %v3288_v52  ;;  %v3614_v51 = vor.u32 %v7826_v8, %v7824_v61 }
 0x8f8   : > { %v5716_v50 = vmul.f32 -1.442695, %v3289_v1  ;;  %v5717_v18 = vmul.f32 -1.442695, %v7808_v16  ;;  %v5718_v6 = vmul.f32 -1.442695, %v7810_v11 }
 0x8f9   : > { %6839 = vpow2.f32 %v5713_v0  ;;  %v5719_v58 = vmul.f32 -1.442695, %v7812_v59  ;;  %v5720_v60 = vmul.f32 -1.442695, %v7817_v62  ;;  %v3617_v48 = vshll.u32 %v7828_v38, 16 }
 0x8fa   : > { %6841 = vpow2.f32 %v5714_v22 }
 0x8fb   : > { %6843 = vpow2.f32 %v5715_v49 }
 0x8fc   : > { %6845 = vpow2.f32 %v5716_v50 }
 0x8fd   : > { %6847 = vpow2.f32 %v5717_v18 }
 0x8fe   : > { %6849 = vpow2.f32 %v5718_v6 }
 0x8ff   : > { %6851 = vpow2.f32 %v5719_v58  ;;  %v3535_v58 = vld [vmem:[#allocation3 + $0x8] sm:$0xf] }
 0x900   : > { %6853 = vpow2.f32 %v5720_v60 }
 0x903   : > { %v6840_v54 = vpop.eup %6839 }
 0x904   : > { %v6842_v63 = vpop.eup %6841  ;;  %v3318_v45 = vadd.f32 1.0, %v6840_v54 }
 0x905   : > { %v6844_v46 = vpop.eup %6843  ;;  %v3319_v12 = vadd.f32 1.0, %v6842_v63 }
 0x906   : > { %v6846_v26 = vpop.eup %6845  ;;  %v3320_v25 = vadd.f32 1.0, %v6844_v46  ;;  %6855 = vrcp.f32 %v3318_v45  ;;  %v3538_v45 = vld [vmem:[#allocation3 + $0xc] sm:$0x1]  ;;  %v3541_v46 = vld [vmem:[#allocation3 + $0x10] sm:$0xf] }
 0x907   : > { %v6848_v41 = vpop.eup %6847  ;;  %v3321_v43 = vadd.f32 1.0, %v6846_v26  ;;  %6857 = vrcp.f32 %v3319_v12 }
 0x908   : > { %v6850_v39 = vpop.eup %6849  ;;  %v3322_v27 = vadd.f32 1.0, %v6848_v41  ;;  %6859 = vrcp.f32 %v3320_v25 }
 0x909   : > { %v6852_v9 = vpop.eup %6851  ;;  %v3323_v34 = vadd.f32 1.0, %v6850_v39  ;;  %6861 = vrcp.f32 %v3321_v43  ;;  %v3547_v43 = vld [vmem:[#allocation3 + $0x18] sm:$0xf] }
 0x90a   : > { %v3324_v30 = vadd.f32 1.0, %v6852_v9  ;;  %6863 = vrcp.f32 %v3322_v27  ;;  %v6854_v17 = vpop.eup %6853 }
 0x90b   : > { %6865 = vrcp.f32 %v3323_v34  ;;  %v3325_v28 = vadd.f32 1.0, %v6854_v17 }
 0x90c   : > { %6867 = vrcp.f32 %v3324_v30  ;;  %v3544_v30 = vld [vmem:[#allocation3 + $0x14] sm:$0x1] }
 0x90d   : > { %6869 = vrcp.f32 %v3325_v28 }
 0x910   : > { %v6856_v20 = vpop.eup %6855 }
 0x911   : > { %v6858_v21 = vpop.eup %6857  ;;  %v3342_v23 = vmul.f32 %v6856_v20, %v3286_v7 }
 0x912   : > { %v6860_v24 = vpop.eup %6859  ;;  %v3343_v5 = vmul.f32 %v6858_v21, %v3287_v44  ;;  %v3550_v21 = vld [vmem:[#allocation3 + $0x1c] sm:$0x1] }
 0x913   : > { %v6862_v29 = vpop.eup %6861  ;;  %v3344_v31 = vmul.f32 %v6860_v24, %v3288_v52  ;;  %v5945_v13 = vpack.c.bf16 %v3342_v23, %v3342_v23 }
 0x914   : > { %v6864_v40 = vpop.eup %6863  ;;  %v3345_v47 = vmul.f32 %v6862_v29, %v3289_v1  ;;  %v5946_v19 = vpack.c.bf16 %v3343_v5, %v3343_v5  ;;  %v3553_v29 = vld [vmem:[#allocation3 + $0x20] sm:$0xf] }
 0x915   : > { %v6866_v56 = vpop.eup %6865  ;;  %v3346_v36 = vmul.f32 %v6864_v40, %v7808_v16  ;;  %v5947_v33 = vpack.c.bf16 %v3344_v31, %v3344_v31  ;;  %v3453_v53 = vshrl.u32 %v5945_v13, 16  ;;  %v3456_v22 = vshll.u32 %v5945_v13, 16  ;;  %v3559_v31 = vld [vmem:[#allocation3 + $0x28] sm:$0xf] }
 0x916   : > { %v6868_v35 = vpop.eup %6867  ;;  %v3347_v2 = vmul.f32 %v6866_v56, %v7810_v11  ;;  %v5948_v57 = vpack.c.bf16 %v3345_v47, %v3345_v47  ;;  %v3461_v4 = vshrl.u32 %v5946_v19, 16  ;;  %v3464_v16 = vshll.u32 %v5946_v19, 16  ;;  %v3556_v56 = vld [vmem:[#allocation3 + $0x24] sm:$0x1] }
 0x917   : > { %v3348_v7 = vmul.f32 %v6868_v35, %v7812_v59  ;;  %v5949_v44 = vpack.c.bf16 %v3346_v36, %v3346_v36  ;;  %v3455_v52 = vrot.slane %v3453_v53, 7  ;;  %v3469_v1 = vshrl.u32 %v5947_v33, 16  ;;  %v3565_v36 = vld [vmem:[#allocation3 + $0x30] sm:$0xf]  ;;  %v6870_v53 = vpop.eup %6869 }
 0x918   : > { %v5950_v0 = vpack.c.bf16 %v3347_v2, %v3347_v2  ;;  %v3463_v49 = vrot.slane %v3461_v4, 7  ;;  %v3472_v18 = vshll.u32 %v5947_v33, 16  ;;  %v3477_v6 = vshrl.u32 %v5948_v57, 16  ;;  %v3571_v33 = vld [vmem:[#allocation3 + $0x38] sm:$0xf] }
 0x919   : > { %v5951_v50 = vpack.c.bf16 %v3348_v7, %v3348_v7  ;;  %v3471_v3 = vrot.slane %v3469_v1, 7  ;;  %v3458_v60 = vor.u32 %v3456_v22, %v3455_v52  ;;  %v3480_v11 = vshll.u32 %v5948_v57, 16  ;;  %v3562_v7 = vld [vmem:[#allocation3 + $0x2c] sm:$0x1] }
 0x91a   : > { %v3466_v54 = vor.u32 %v3464_v16, %v3463_v49  ;;  %v3467_v63 = vrot.slane %v3463_v49, 4  ;;  %v3479_v26 = vrot.slane %v3477_v6, 7  ;;  %v3485_v25 = vshrl.u32 %v5949_v44, 16  ;;  %v3574_v49 = vld [vmem:[#allocation3 + $0x3c] sm:$0x1] }
 0x91b   : > { %v3474_v12 = vor.u32 %v3472_v18, %v3471_v3  ;;  %v3475_v59 = vrot.slane %v3471_v3, 4  ;;  %v3488_v39 = vshll.u32 %v5949_v44, 16  ;;  %v3493_v27 = vshrl.u32 %v5950_v0, 16  ;;  %v3568_v44 = vld [vmem:[#allocation3 + $0x34] sm:$0x1] }
 0x91c   : > { %v3496_v9 = vshll.u32 %v5950_v0, 16  ;;  %v3501_v34 = vshrl.u32 %v5951_v50, 16  ;;  %v3482_v10 = vor.u32 %v3480_v11, %v3479_v26  ;;  %v3487_v42 = vrot.slane %v3485_v25, 7 }
 0x91d   : > { %v3504_v17 = vshll.u32 %v5951_v50, 16  ;;  %v3459_v20 = vrot.slane %v3455_v52, 4  ;;  %v3495_v23 = vrot.slane %v3493_v27, 7  ;;  %v3536_v28 = vsel %vm7838_vm3, %v3458_v60, %v3535_v58 }
 0x91e   : > { %v3503_v24 = vrot.slane %v3501_v34, 7  ;;  %v3542_v5 = vsel %vm7838_vm3, %v3466_v54, %v3541_v46  ;;  %v3490_v13 = vor.u32 %v3488_v39, %v3487_v42  ;;  %3537 = vst [vmem:[#allocation3 + $0x8] sm:$0xf] %v3536_v28  ;;  %v3545_v47 = vsel %vm7729_vm5, %v3467_v63, %v3544_v30 }
 0x91f   : > { %v3539_v40 = vsel %vm7729_vm5, %v3459_v20, %v3538_v45  ;;  %3543 = vst [vmem:[#allocation3 + $0x10] sm:$0xf] %v3542_v5  ;;  %v3548_v19 = vsel %vm7838_vm3, %v3474_v12, %v3547_v43  ;;  %v3498_v35 = vor.u32 %v3496_v9, %v3495_v23  ;;  %3546 = vst [vmem:[#allocation3 + $0x14] sm:$0x1] %v3545_v47  ;;  %v3483_v4 = vrot.slane %v3479_v26, 4 }
 0x920   : > { %v3506_v2 = vor.u32 %v3504_v17, %v3503_v24  ;;  %3540 = vst [vmem:[#allocation3 + $0xc] sm:$0x1] %v3539_v40  ;;  %3549 = vst [vmem:[#allocation3 + $0x18] sm:$0xf] %v3548_v19  ;;  %v3551_v57 = vsel %vm7729_vm5, %v3475_v59, %v3550_v21  ;;  %v3491_v52 = vrot.slane %v3487_v42, 4  ;;  %v3554_v1 = vsel %vm7838_vm3, %v3482_v10, %v3553_v29 }
 0x921   : > { %3552 = vst [vmem:[#allocation3 + $0x1c] sm:$0x1] %v3551_v57  ;;  %v3560_v0 = vsel %vm7838_vm3, %v3490_v13, %v3559_v31  ;;  %v3499_v22 = vrot.slane %v3495_v23, 4  ;;  %3555 = vst [vmem:[#allocation3 + $0x20] sm:$0xf] %v3554_v1  ;;  %v3557_v16 = vsel %vm7729_vm5, %v3483_v4, %v3556_v56  ;;  %v3507_v50 = vrot.slane %v3503_v24, 4 }
 0x922   : > { %3561 = vst [vmem:[#allocation3 + $0x28] sm:$0xf] %v3560_v0  ;;  %v3566_v3 = vsel %vm7838_vm3, %v3498_v35, %v3565_v36  ;;  %v3572_v18 = vsel %vm7838_vm3, %v3506_v2, %v3571_v33  ;;  %v3349_v6 = vmul.f32 %v6870_v53, %v7817_v62  ;;  %3558 = vst [vmem:[#allocation3 + $0x24] sm:$0x1] %v3557_v16  ;;  %v3615_v62 = vrot.slane %v3614_v51, 4 }
 0x923   : > { %v3563_v58 = vsel %vm7729_vm5, %v3491_v52, %v3562_v7  ;;  %3567 = vst [vmem:[#allocation3 + $0x30] sm:$0xf] %v3566_v3  ;;  %v3569_v60 = vsel %vm7729_vm5, %v3499_v22, %v3568_v44  ;;  %3573 = vst [vmem:[#allocation3 + $0x38] sm:$0xf] %v3572_v18  ;;  %v3575_v54 = vsel %vm7729_vm5, %v3507_v50, %v3574_v49  ;;  %v3619_v11 = vrot.slane %v3617_v48, 5 }
 0x924   : > { %3564 = vst [vmem:[#allocation3 + $0x2c] sm:$0x1] %v3563_v58  ;;  %3570 = vst [vmem:[#allocation3 + $0x34] sm:$0x1] %v3569_v60  ;;  %v7880_v46 = vpack.c.bf16 %v3349_v6, %v3349_v6 }
 0x925   : > { %3576 = vst [vmem:[#allocation3 + $0x3c] sm:$0x1] %v3575_v54  ;;  %v7871_v63 = vld [vmem:[#allocation3 + $0x8] sm:$0xf]  ;;  %v3620_v17 = vsel %vm7271_vm11, %v3615_v62, %v3619_v11 }
 0x926   : > { %v7878_v45 = vld [vmem:[#allocation3 + $0x10] sm:$0xf]  ;;  %v3622_v59 = vshrl.u32 %v7871_v63, 16  ;;  %v3625_v26 = vshll.u32 %v7871_v63, 16  ;;  %v7889_v39 = vld [vmem:[#allocation3 + $0x14] sm:$0x1] }
 0x927   : > { %v7882_v12 = vld [vmem:[#allocation3 + $0xc] sm:$0x1]  ;;  %v7886_v25 = vld [vmem:[#allocation3 + $0x18] sm:$0xf]  ;;  %v3636_v61 = vshrl.u32 %v7878_v45, 16  ;;  %v3639_v27 = vshll.u32 %v7878_v45, 16 }
 0x928   : > { %v3631_v43 = vshll.u32 %v7882_v12, 16  ;;  %v3624_v8 = vrot.slane %v3622_v59, 4  ;;  %v3627_v48 = vrot.slane %v3625_v26, 5  ;;  %v7892_v51 = vld [vmem:[#allocation3 + $0x1c] sm:$0x1]  ;;  %v3645_v9 = vshll.u32 %v7889_v39, 16 }
 0x929   : > { %v3638_v34 = vrot.slane %v3636_v61, 4  ;;  %v3650_v30 = vshrl.u32 %v7886_v25, 16  ;;  %v3653_v10 = vshll.u32 %v7886_v25, 16  ;;  %v7898_v42 = vld [vmem:[#allocation3 + $0x20] sm:$0xf]  ;;  %v3641_v21 = vrot.slane %v3639_v27, 5 }
 0x92a   : > { %v3628_v20 = vor.u32 %v3627_v48, %v3624_v8  ;;  %v7902_v23 = vld [vmem:[#allocation3 + $0x28] sm:$0xf]  ;;  %v7904_v24 = vld [vmem:[#allocation3 + $0x24] sm:$0x1]  ;;  %v3509_v28 = vshrl.u32 %v7880_v46, 16  ;;  %v3633_v5 = vrot.slane %v3631_v43, 5 }
 0x92b   : > { %v3652_v29 = vrot.slane %v3650_v30, 4  ;;  %v3655_v31 = vrot.slane %v3653_v10, 5  ;;  %v3659_v13 = vshll.u32 %v7892_v51, 16  ;;  %v3642_v47 = vor.u32 %v3641_v21, %v3638_v34  ;;  %v7909_v33 = vld [vmem:[#allocation3 + $0x2c] sm:$0x1]  ;;  %v6759_v61 = vld [vmem:[%s8291_s12 + $0x8] sm:$0xff]  }
 0x92c   : > { %v3629_v40 = vrot.slane %v3628_v20, 4  ;;  %v3647_v19 = vrot.slane %v3645_v9, 5  ;;  %v3664_v56 = vshrl.u32 %v7898_v42, 16  ;;  %v3667_v53 = vshll.u32 %v7898_v42, 16  ;;  %v7917_v52 = vld [vmem:[#allocation3 + $0x30] sm:$0xf] }
 0x92d   : > { %v3656_v36 = vor.u32 %v3655_v31, %v3652_v29  ;;  %v3673_v35 = vshll.u32 %v7904_v24, 16  ;;  %v3678_v2 = vshrl.u32 %v7902_v23, 16  ;;  %v3643_v4 = vrot.slane %v3642_v47, 4  ;;  %v7922_v6 = vld [vmem:[#allocation3 + $0x38] sm:$0xf] }
 0x92e   : > { %v3634_v57 = vsel %vm7271_vm11, %v3629_v40, %v3633_v5  ;;  %v3666_v7 = vrot.slane %v3664_v56, 4  ;;  %v3681_v44 = vshll.u32 %v7902_v23, 16  ;;  %v3661_v22 = vrot.slane %v3659_v13, 5  ;;  %v7927_v54 = vld [vmem:[#allocation3 + $0x34] sm:$0x1]  ;;  %v6760_v5 = vld [vmem:[%s8291_s12 + $0x10] sm:$0xff]  }
 0x92f   : > { %v5737_v1 = vcombine.low %v3620_v17, %v3634_v57  ;;  %v3657_v0 = vrot.slane %v3656_v36, 4  ;;  %v3669_v49 = vrot.slane %v3667_v53, 5  ;;  %v3648_v16 = vsel %vm7271_vm11, %v3643_v4, %v3647_v19  ;;  %v7934_v48 = vld [vmem:[#allocation3 + $0x3c] sm:$0x1]  ;;  %v3963_v41 = vld [vmem:[#allocation3 + $0x8] sm:$0xe] }
 0x930   : > { %v3680_v50 = vrot.slane %v3678_v2, 4  ;;  %v3683_v3 = vrot.slane %v3681_v44, 5  ;;  %v3687_v18 = vshll.u32 %v7909_v33, 16  ;;  %v3692_v62 = vshrl.u32 %v7917_v52, 16  ;;  %v3577_v44 = vld [vmem:[#allocation3 + $0x40] sm:$0xf] }
 0x931   : > { %6353 = vmatprep.mubr.msk.bf16.mxu1 %vm2896_vm15, %v5737_v1  ;;  %v3662_v58 = vsel %vm7271_vm11, %v3657_v0, %v3661_v22  ;;  %v3670_v60 = vor.u32 %v3669_v49, %v3666_v7  ;;  %v3695_v11 = vshll.u32 %v7917_v52, 16  ;;  %v3675_v26 = vrot.slane %v3673_v35, 5  ;;  %v6762_v49 = vld [vmem:[%s8291_s12 + $0x40] sm:$0xff]  }
 0x932   : > { %v5738_v59 = vcombine.low %v3648_v16, %v3662_v58  ;;  %v3684_v43 = vor.u32 %v3683_v3, %v3680_v50  ;;  %v3694_v27 = vrot.slane %v3692_v62, 4  ;;  %v3706_v34 = vshrl.u32 %v7922_v6, 16  ;;  %v3580_v50 = vld [vmem:[#allocation3 + $0x44] sm:$0x1]  ;;  %v3962_v3 = vld [vmem:[#allocation3] sm:$0xe] }
 0x933   : > { %v3671_v8 = vrot.slane %v3670_v60, 4  ;;  %v3697_v9 = vrot.slane %v3695_v11, 5  ;;  %v3689_v10 = vrot.slane %v3687_v18, 5  ;;  %v3701_v17 = vshll.u32 %v7927_v54, 16 }
 0x934   : > { %6354 = vmatmul.mubr.msk.bf16.vlgmr.msra.gmra.mrb[8].mxu1 %vm2896_vm15, %v5738_v59  ;;  %v3685_v30 = vrot.slane %v3684_v43, 4  ;;  %v3709_v20 = vshll.u32 %v7922_v6, 16  ;;  %v3708_v31 = vrot.slane %v3706_v34, 4  ;;  %v3511_v13 = vrot.slane %v3509_v28, 7  ;;  %v6761_v28 = vld [vmem:[%s8291_s12 + $0x18] sm:$0xff]  }
 0x935   : > { %6362 = vmatpush3.bf16.msra.mxu1 %v7758_v55  ;;  %v3676_v21 = vsel %vm7271_vm11, %v3671_v8, %v3675_v26  ;;  %v3698_v29 = vor.u32 %v3697_v9, %v3694_v27  ;;  %v3715_v19 = vshll.u32 %v7934_v48, 16  ;;  %v3512_v55 = vshll.u32 %v7880_v46, 16  ;;  %v3967_v26 = vld [vmem:[#allocation3 + $0x28] sm:$0xe] }
 0x936   : > { %v3690_v40 = vsel %vm7271_vm11, %v3685_v30, %v3689_v10  ;;  %6363 = vmatprep.subr.bf16.mxu1 %v6759_v61  ;;  %v3711_v47 = vrot.slane %v3709_v20, 5  ;;  %v3703_v53 = vrot.slane %v3701_v17, 5  ;;  %v5749_v22 = vcombine.low %v7820_v32, %v7871_v63  ;;  %v6765_v32 = vld [vmem:[%s8291_s12 + $0x48] sm:$0xff]  }
 0x937   : > { %v5739_v56 = vcombine.low %v3676_v21, %v3690_v40  ;;  %v3699_v36 = vrot.slane %v3698_v29, 4  ;;  %v3514_v2 = vor.u32 %v3512_v55, %v3511_v13  ;;  %v3717_v7 = vrot.slane %v3715_v19, 5  ;;  %v6771_v55 = vld [vmem:[%s8291_s12 + $0x70] sm:$0xff]  }
 0x938   : > { %v3712_v35 = vor.u32 %v3711_v47, %v3708_v31  ;;  %v3515_v16 = vrot.slane %v3511_v13, 4  ;;  %v5750_v18 = vcombine.low %v7878_v45, %v7886_v25  ;;  %v5751_v58 = vcombine.low %v7898_v42, %v7902_v23  ;;  %v3964_v42 = vld [vmem:[#allocation3 + $0x10] sm:$0xe]  ;;  %v3965_v23 = vld [vmem:[#allocation3 + $0x18] sm:$0xe] }
 0x939   : > { %6357 = vmatprep.mubr.msk.bf16.mxu1 %vm2896_vm15, %v5739_v56  ;;  %6364 = vmatpush3.bf16.msra.mxu1 %v6759_v61  ;;  %v3704_v57 = vsel %vm7271_vm11, %v3699_v36, %v3703_v53  ;;  %v3578_v0 = vsel %vm7838_vm3, %v3514_v2, %v3577_v44  ;;  %v5761_v60 = vrot.slane %v3962_v3, 9  ;;  %v3988_v62 = vrot.slane %v7828_v38, 5  ;;  %v3966_v38 = vld [vmem:[#allocation3 + $0x20] sm:$0xe]  ;;  %v6768_v61 = vld [vmem:[%s8291_s12 + $0x58] sm:$0xff]   ;;  %v6770_v47 = vld [vmem:[%s8291_s12 + $0x68] sm:$0xff]  }
 0x93a   : > { %6365 = vmatprep.subr.bf16.mxu1 %v6760_v5  ;;  %v3713_v4 = vrot.slane %v3712_v35, 4  ;;  %3579 = vst [vmem:[#allocation3 + $0x40] sm:$0xf] %v3578_v0  ;;  %v3581_v63 = vsel %vm7729_vm5, %v3515_v16, %v3580_v50  ;;  %v5762_v11 = vrot.slane %v3963_v41, 9  ;;  %v3992_v59 = vrot.slane %v7882_v12, 5 }
 0x93b   : > { %3582 = vst [vmem:[#allocation3 + $0x44] sm:$0x1] %v3581_v63  ;;  %v3989_v45 = vsel %vm7361_vm14, %v5761_v60, %v3988_v62  ;;  %v3996_v12 = vrot.slane %v7889_v39, 5  ;;  %v5752_v43 = vcombine.low %v7917_v52, %v7922_v6  ;;  %v4000_v8 = vrot.slane %v7892_v51, 5  ;;  %v6769_v52 = vld [vmem:[%s8291_s12 + $0x60] sm:$0xff]  }
 0x93c   : > { %v3718_v46 = vsel %vm7271_vm11, %v3713_v4, %v3717_v7  ;;  %v3993_v25 = vsel %vm7361_vm14, %v5762_v11, %v3992_v59  ;;  %v5763_v9 = vrot.slane %v3964_v42, 9  ;;  %v5764_v34 = vrot.slane %v3965_v23, 9  ;;  %v3968_v51 = vld [vmem:[#allocation3 + $0x30] sm:$0xe]  ;;  %v3969_v6 = vld [vmem:[#allocation3 + $0x38] sm:$0xe] }
 0x93d   : > { %v5740_v1 = vcombine.low %v3704_v57, %v3718_v46  ;;  %6366 = vmatpush3.bf16.msra.mxu1 %v6760_v5  ;;  %v5777_v27 = vcombine.low %v3989_v45, %v3993_v25  ;;  %v5765_v30 = vrot.slane %v3966_v38, 9  ;;  %v4004_v10 = vrot.slane %v7904_v24, 5  ;;  %v4294_v56 = vld [vmem:[#allocation3 + $0x8] sm:$0xf]  ;;  %v4296_v36 = vld [vmem:[#allocation3 + $0x10] sm:$0xf] }
 0x93e   : > { %6367 = vmatprep.subr.bf16.mxu1 %v6761_v28  ;;  %v5766_v17 = vrot.slane %v3967_v26, 9  ;;  %v4008_v39 = vrot.slane %v7909_v33, 5  ;;  %v3997_v20 = vsel %vm7361_vm14, %v5763_v9, %v3996_v12  ;;  %v4001_v21 = vsel %vm7361_vm14, %v5764_v34, %v4000_v8  ;;  %v6773_v4 = vld [vmem:[%s8291_s12 + $0x78] sm:$0xff]   ;;  %v4298_v0 = vld [vmem:[#allocation3 + $0x18] sm:$0xf]  ;;  %v6774_v63 = vld [vmem:[%s8291_s12 + $0x80] sm:$0xff]  }
 0x93f   : > { %6358 = vmatmul.mubr.msk.bf16.gmra.mrb[12].mxu1 %vm2896_vm15, %v5740_v1  ;;  %v4005_v24 = vsel %vm7361_vm14, %v5765_v30, %v4004_v10  ;;  %v5767_v5 = vrot.slane %v3968_v51, 9  ;;  %v4012_v29 = vrot.slane %v7927_v54, 5  ;;  %v5768_v31 = vrot.slane %v3969_v6, 9  ;;  %v8027_v16 = vld [vmem:[#allocation3 + $0xc] sm:$0x1]  ;;  %v6777_v38 = vld [vmem:[%s8291_s12 + $0x88] sm:$0xff]  }
 0x940   : > { %6369 = vmatprep.mubr.msk.bf16.mxu1 %vm2896_vm15, %v5749_v22  ;;  %v4009_v33 = vsel %vm7361_vm14, %v5766_v17, %v4008_v39  ;;  %v4016_v13 = vrot.slane %v7934_v48, 5  ;;  %v5778_v40 = vcombine.low %v3997_v20, %v4001_v21  ;;  %v4311_v53 = vshrl.u32 %v4294_v56, 16  ;;  %v6772_v22 = vld [vmem:[#allocation3 + $0x8] ss:$8 sps:$4 sm:$0xff]   ;;  %v8029_v50 = vld [vmem:[#allocation3 + $0x14] sm:$0x1] }
 0x941   : > { %6368 = vmatpush3.bf16.msra.mxu1 %v6761_v28  ;;  %v5779_v19 = vcombine.low %v4005_v24, %v4009_v33  ;;  %v4013_v54 = vsel %vm7361_vm14, %v5767_v5, %v4012_v29  ;;  %v4314_v35 = vshll.u32 %v4294_v56, 16  ;;  %v4325_v28 = vshrl.u32 %v4296_v36, 16  ;;  %v6776_v34 = vld [vmem:[#allocation3 + $0x28] ss:$8 sps:$4 sm:$0xff]   ;;  %v4306_v17 = vld [vmem:[#allocation3 + $0x38] sm:$0xf] }
 0x942   : > { %6377 = vmatprep.subr.bf16.mxu1 %v6762_v49  ;;  %v4017_v48 = vsel %vm7361_vm14, %v5768_v31, %v4016_v13  ;;  %v4328_v2 = vshll.u32 %v4296_v36, 16  ;;  %v4313_v7 = vrot.slane %v4311_v53, 4  ;;  %v4339_v3 = vshrl.u32 %v4298_v0, 16  ;;  %v4308_v20 = vld [vmem:[#allocation3 + $0x40] sm:$0xf] }
 0x943   : > { %v5780_v57 = vcombine.low %v4013_v54, %v4017_v48  ;;  %v4316_v44 = vrot.slane %v4314_v35, 5  ;;  %v4327_v46 = vrot.slane %v4325_v28, 4  ;;  %v4342_v41 = vshll.u32 %v4298_v0, 16  ;;  %v6778_v21 = vld [vmem:[%s8291_s12 + $0x90] sm:$0xff]   ;;  %v8049_v29 = vld [vmem:[#allocation3 + $0x1c] sm:$0x1] }
 0x944   : > { %v4330_v1 = vrot.slane %v4328_v2, 5  ;;  %v4320_v59 = vshll.u32 %v8027_v16, 16  ;;  %v4341_v26 = vrot.slane %v4339_v3, 4  ;;  %v8051_v31 = vld [vmem:[#allocation3 + $0x24] sm:$0x1]  ;;  %v4398_v56 = vshll.u32 %v4306_v17, 16 }
 0x945   : > { %v4344_v12 = vrot.slane %v4342_v41, 5  ;;  %v4409_v36 = vshrl.u32 %v4308_v20, 16  ;;  %v4412_v54 = vshll.u32 %v4308_v20, 16  ;;  %v4348_v35 = vshll.u32 %v8049_v29, 16  ;;  %v6779_v2 = vld [vmem:[#allocation3 + $0x38] ss:$8 sps:$4 sm:$0xff]  }
 0x946   : > { %v4331_v60 = vor.u32 %v4330_v1, %v4327_v46  ;;  %v4322_v30 = vrot.slane %v4320_v59, 5  ;;  %v4362_v28 = vshll.u32 %v8051_v31, 16  ;;  %v4400_v0 = vrot.slane %v4398_v56, 5  ;;  %v6784_v56 = vld [vmem:[%s8291_s12 + $0xb8] sm:$0xff]  }
 0x947   : > { %6370 = vmatmul.mubr.msk.bf16.vlgmr.msra.gmra.mrb[8].mxu1 %vm2896_vm15, %v5750_v18  ;;  %v4302_v18 = vld [vmem:[#allocation3 + $0x28] sm:$0xf]  ;;  %v4345_v24 = vor.u32 %v4344_v12, %v4341_v26 }
 0x948   : > { %6378 = vmatpush3.bf16.msra.mxu1 %v6762_v49  ;;  %6373 = vmatprep.mubr.msk.bf16.mxu1 %vm2896_vm15, %v5751_v58  ;;  %v4300_v49 = vld [vmem:[#allocation3 + $0x20] sm:$0xf]  ;;  %v4317_v58 = vor.u32 %v4316_v44, %v4313_v7  ;;  %v4367_v45 = vshrl.u32 %v4302_v18, 16  ;;  %v4370_v25 = vshll.u32 %v4302_v18, 16  ;;  %v4332_v8 = vrot.slane %v4331_v60, 4  ;;  %v6781_v18 = vld [vmem:[%s8291_s12 + $0xa0] sm:$0xff]  }
 0x949   : > { %6379 = vmatprep.subr.bf16.mxu1 %v6765_v32  ;;  %v4353_v62 = vshrl.u32 %v4300_v49, 16  ;;  %v4356_v11 = vshll.u32 %v4300_v49, 16  ;;  %v4346_v53 = vrot.slane %v4345_v24, 4  ;;  %v4414_v49 = vrot.slane %v4412_v54, 5  ;;  %v4552_v12 = vld [vmem:[#allocation3 + $0x8] sm:$0xe] }
 0x94a   : > { %v4369_v39 = vrot.slane %v4367_v45, 4 }
 0x94b   : > { %v4358_v9 = vrot.slane %v4356_v11, 5  ;;  %v8071_v11 = vld [vmem:[#allocation3 + $0x44] sm:$0x1] }
 0x94c   : > { %6380 = vmatpush3.bf16.msra.mxu1 %v6765_v32  ;;  %v4304_v32 = vld [vmem:[#allocation3 + $0x30] sm:$0xf]  ;;  %v4418_v26 = vshll.u32 %v8071_v11, 16 }
 0x94d   : > { %6381 = vmatprep.subr.bf16.mxu1 %v6766_v37  ;;  %v4381_v42 = vshrl.u32 %v4304_v32, 16  ;;  %v4384_v23 = vshll.u32 %v4304_v32, 16  ;;  %v4350_v32 = vrot.slane %v4348_v35, 5 }
 0x94f   : > { %6374 = vmatmul.mubr.msk.bf16.gmra.mrb[12].mxu1 %vm2896_vm15, %v5752_v43  ;;  %v6775_v43 = vld [vmem:[#allocation3 + $0x18] ss:$8 sps:$4 sm:$0xff]   ;;  %v4383_v51 = vrot.slane %v4381_v42, 4  ;;  %v4386_v6 = vrot.slane %v4384_v23, 5  ;;  %v4351_v59 = vsel %vm7271_vm11, %v4346_v53, %v4350_v32  ;;  %v4590_v53 = vrot.slane %v8051_v31, 5 }
 0x950   : > { %6382 = vmatpush3.bf16.msra.mxu1 %v6766_v37  ;;  %6385 = vmatprep.mubr.msk.bf16.mxu1 %vm2896_vm15, %v5777_v27  ;;  %v4334_v37 = vshll.u32 %v8029_v50, 16  ;;  %v4355_v27 = vrot.slane %v4353_v62, 4  ;;  %v8069_v62 = vld [vmem:[#allocation3 + $0x3c] sm:$0x1]  ;;  %v4887_v32 = vld [vmem:[#allocation3 + $0x18] sm:$0xf] }
 0x951   : > { %6383 = vmatprep.subr.bf16.mxu1 %v6768_v61 }
 0x952   : > { %v4336_v10 = vrot.slane %v4334_v37, 5  ;;  %v4359_v13 = vor.u32 %v4358_v9, %v4355_v27 }
 0x954   : > { %6384 = vmatpush3.bf16.msra.mxu1 %v6768_v61  ;;  %v4318_v61 = vrot.slane %v4317_v58, 4  ;;  %v4337_v5 = vsel %vm7271_vm11, %v4332_v8, %v4336_v10  ;;  %v4360_v7 = vrot.slane %v4359_v13, 4  ;;  %v6782_v8 = vld [vmem:[%s8291_s12 + $0xa8] sm:$0xff]   ;;  %v4578_v10 = vrot.slane %v8027_v16, 5  ;;  %v4557_v13 = vld [vmem:[#allocation3 + $0x30] sm:$0xe] }
 0x955   : > { %6393 = vmatprep.subr.bf16.mxu1 %v6769_v52  ;;  %v4554_v16 = vld [vmem:[#allocation3 + $0x18] sm:$0xe] }
 0x956   : > { %v4323_v33 = vsel %vm7271_vm11, %v4318_v61, %v4322_v30  ;;  %v5829_v30 = vrot.slane %v4552_v12, 9 }
 0x957   : > { %6386 = vmatmul.mubr.msk.bf16.vlgmr.msra.gmra.mrb[8].mxu1 %vm2896_vm15, %v5778_v40  ;;  %v8053_v40 = vld [vmem:[#allocation3 + $0x2c] sm:$0x1] }
 0x958   : > { %6394 = vmatpush3.bf16.msra.mxu1 %v6769_v52  ;;  %6389 = vmatprep.mubr.msk.bf16.mxu1 %vm2896_vm15, %v5779_v19  ;;  %v4372_v52 = vrot.slane %v4370_v25, 5  ;;  %v4395_v19 = vshrl.u32 %v4306_v17, 16  ;;  %v4376_v44 = vshll.u32 %v8053_v40, 16 }
 0x959   : > { %6395 = vmatprep.subr.bf16.mxu1 %v6770_v47 }
 0x95a   : > { %v4373_v48 = vor.u32 %v4372_v52, %v4369_v39  ;;  %v4397_v1 = vrot.slane %v4395_v19, 4  ;;  %v4378_v58 = vrot.slane %v4376_v44, 5  ;;  %v4582_v39 = vrot.slane %v8029_v50, 5  ;;  %v4559_v44 = vld [vmem:[#allocation3 + $0x40] sm:$0xe] }
 0x95b   : > { %v4579_v50 = vsel %vm7361_vm14, %v5829_v30, %v4578_v10  ;;  %v8143_v10 = vld [vmem:[#allocation3 + $0x14] sm:$0x1] }
 0x95c   : > { %6396 = vmatpush3.bf16.msra.mxu1 %v6770_v47  ;;  %v8055_v47 = vld [vmem:[#allocation3 + $0x34] sm:$0x1]  ;;  %v4374_v3 = vrot.slane %v4373_v48, 4  ;;  %v4401_v45 = vor.u32 %v4400_v0, %v4397_v1  ;;  %v4586_v48 = vrot.slane %v8049_v29, 5  ;;  %v6786_v1 = vld [vmem:[%s8291_s12 + $0xc8] sm:$0xff]  }
 0x95d   : > { %6397 = vmatprep.subr.bf16.mxu1 %v6771_v55  ;;  %v4390_v46 = vshll.u32 %v8055_v47, 16 }
 0x95e   : > { %v4379_v42 = vsel %vm7271_vm11, %v4374_v3, %v4378_v58  ;;  %v4402_v9 = vrot.slane %v4401_v45, 4  ;;  %v5836_v3 = vrot.slane %v4559_v44, 9 }
 0x95f   : > { %6390 = vmatmul.mubr.msk.bf16.gmra.mrb[12].mxu1 %vm2896_vm15, %v5780_v57  ;;  %v5817_v57 = vcombine.low %v4323_v33, %v4337_v5  ;;  %v4392_v60 = vrot.slane %v4390_v46, 5  ;;  %v4555_v33 = vld [vmem:[#allocation3 + $0x20] sm:$0xe]  ;;  %v4556_v5 = vld [vmem:[#allocation3 + $0x28] sm:$0xe] }
 0x960   : > { %6398 = vmatpush3.bf16.msra.mxu1 %v6771_v55  ;;  %6401 = vmatprep.mubr.msk.bf16.mxu1 %vm2896_vm15, %v6772_v22  ;;  %v4387_v55 = vor.u32 %v4386_v6, %v4383_v51  ;;  %v4411_v22 = vrot.slane %v4409_v36, 4  ;;  %v4420_v51 = vrot.slane %v4418_v26, 5  ;;  %v6783_v6 = vld [vmem:[%s8291_s12 + $0xb0] sm:$0xff]   ;;  %v5831_v36 = vrot.slane %v4554_v16, 9 }
 0x961   : > { %6399 = vmatprep.subr.bf16.mxu1 %v6773_v4  ;;  %v5833_v35 = vrot.slane %v4556_v5, 9  ;;  %v6791_v5 = vld [vmem:[#allocation3 + $0x20] ss:$8 sps:$4 sm:$0xff]  }
 0x962   : > { %v4388_v41 = vrot.slane %v4387_v55, 4  ;;  %v4415_v25 = vor.u32 %v4414_v49, %v4411_v22  ;;  %v5832_v55 = vrot.slane %v4555_v33, 9  ;;  %v4587_v29 = vsel %vm7361_vm14, %v5831_v36, %v4586_v48  ;;  %v4899_v33 = vld [vmem:[#allocation3 + $0x48] sm:$0xf] }
 0x963   : > { %v4602_v22 = vrot.slane %v8069_v62, 5 }
 0x964   : > { %6400 = vmatpush3.bf16.msra.mxu1 %v6773_v4  ;;  %v6780_v4 = vld [vmem:[%s8291_s12 + $0x98] sm:$0xff]   ;;  %v4393_v23 = vsel %vm7271_vm11, %v4388_v41, %v4392_v60  ;;  %v4591_v31 = vsel %vm7361_vm14, %v5832_v55, %v4590_v53  ;;  %v4606_v41 = vrot.slane %v8071_v11, 5 }
 0x965   : > { %6409 = vmatprep.subr.bf16.mxu1 %v6774_v63  ;;  %v5819_v27 = vcombine.low %v4379_v42, %v4393_v23  ;;  %v5846_v46 = vcombine.low %v4587_v29, %v4591_v31  ;;  %v6789_v42 = vld [vmem:[%s8291_s12 + $0xd8] sm:$0xff]   ;;  %v4897_v29 = vld [vmem:[#allocation3 + $0x40] sm:$0xf] }
 0x966   : > { %v6794_v31 = vld [vmem:[%s8291_s12 + $0xf0] sm:$0xff]  }
 0x967   : > { %6402 = vmatmul.mubr.msk.bf16.vlgmr.msra.gmra.mrb[8].mxu1 %vm2896_vm15, %v6775_v43  ;;  %v4553_v43 = vld [vmem:[#allocation3 + $0x10] sm:$0xe] }
 0x968   : > { %6410 = vmatpush3.bf16.msra.mxu1 %v6774_v63  ;;  %6405 = vmatprep.mubr.msk.bf16.mxu1 %vm2896_vm15, %v6776_v34  ;;  %v4364_v63 = vrot.slane %v4362_v28, 5  ;;  %v4416_v34 = vrot.slane %v4415_v25, 4  ;;  %v5830_v17 = vrot.slane %v4553_v43, 9  ;;  %v4594_v28 = vrot.slane %v8053_v40, 5  ;;  %v6788_v25 = vld [vmem:[#allocation3 + $0x10] ss:$8 sps:$4 sm:$0xff]  }
 0x969   : > { %6411 = vmatprep.subr.bf16.mxu1 %v6777_v38  ;;  %v4889_v43 = vld [vmem:[#allocation3 + $0x20] sm:$0xf] }
 0x96a   : > { %v4365_v37 = vsel %vm7271_vm11, %v4360_v7, %v4364_v63  ;;  %v4583_v24 = vsel %vm7361_vm14, %v5830_v17, %v4582_v39  ;;  %v4558_v7 = vld [vmem:[#allocation3 + $0x38] sm:$0xe]  ;;  %v4595_v40 = vsel %vm7361_vm14, %v5833_v35, %v4594_v28  ;;  %v6787_v63 = vld [vmem:[%s8291_s12 + $0xd0] sm:$0xff]   ;;  %v4933_v30 = vshll.u32 %v4889_v43, 16  ;;  %v8145_v17 = vld [vmem:[#allocation3 + $0x1c] sm:$0x1] }
 0x96b   : > { %v5818_v61 = vcombine.low %v4351_v59, %v4365_v37  ;;  %v5845_v54 = vcombine.low %v4579_v50, %v4583_v24  ;;  %v5835_v0 = vrot.slane %v4558_v7, 9  ;;  %v4916_v59 = vshrl.u32 %v4887_v32, 16  ;;  %v6793_v24 = vld [vmem:[%s8291_s12 + $0xe8] sm:$0xff]  }
 0x96c   : > { %6412 = vmatpush3.bf16.msra.mxu1 %v6777_v38  ;;  %v4404_v38 = vshll.u32 %v8069_v62, 16  ;;  %v4607_v62 = vsel %vm7361_vm14, %v5836_v3, %v4606_v41  ;;  %v4919_v37 = vshll.u32 %v4887_v32, 16  ;;  %v4935_v36 = vrot.slane %v4933_v30, 5  ;;  %v8163_v3 = vld [vmem:[#allocation3 + $0x3c] sm:$0x1] }
 0x96d   : > { %6413 = vmatprep.subr.bf16.mxu1 %v6778_v21  ;;  %v4603_v58 = vsel %vm7361_vm14, %v5835_v0, %v4602_v22  ;;  %v4918_v26 = vrot.slane %v4916_v59, 4  ;;  %v5000_v7 = vshrl.u32 %v4899_v33, 16  ;;  %v4986_v41 = vshrl.u32 %v4897_v29, 16  ;;  %v8178_v30 = vld [vmem:[#allocation3 + $0x4c] sm:$0x1] }
 0x96e   : > { %v4406_v52 = vrot.slane %v4404_v38, 5  ;;  %v5848_v45 = vcombine.low %v4603_v58, %v4607_v62  ;;  %v4921_v12 = vrot.slane %v4919_v37, 5 }
 0x96f   : > { %6406 = vmatmul.mubr.msk.bf16.gmra.mrb[12].mxu1 %vm2896_vm15, %v6779_v2  ;;  %v5834_v2 = vrot.slane %v4557_v13, 9  ;;  %v4911_v13 = vshll.u32 %v8143_v10, 16  ;;  %v5002_v59 = vrot.slane %v5000_v7, 4 }
 0x970   : > { %6414 = vmatpush3.bf16.msra.mxu1 %v6778_v21  ;;  %6417 = vmatprep.mubr.msk.bf16.mxu1 %vm2896_vm15, %v5817_v57  ;;  %v4407_v20 = vsel %vm7271_vm11, %v4402_v9, %v4406_v52  ;;  %v4421_v21 = vsel %vm7271_vm11, %v4416_v34, %v4420_v51  ;;  %v4598_v57 = vrot.slane %v8055_v47, 5  ;;  %v6790_v9 = vld [vmem:[%s8291_s12 + $0xe0] sm:$0xff]   ;;  %v4930_v34 = vshrl.u32 %v4889_v43, 16 }
 0x971   : > { %6415 = vmatprep.subr.bf16.mxu1 %v6780_v4  ;;  %v5820_v19 = vcombine.low %v4407_v20, %v4421_v21  ;;  %v4922_v52 = vor.u32 %v4921_v12, %v4918_v26  ;;  %v4988_v43 = vrot.slane %v4986_v41, 4 }
 0x972   : > { %v4599_v47 = vsel %vm7361_vm14, %v5834_v2, %v4598_v57 }
 0x973   : > { %v5847_v49 = vcombine.low %v4595_v40, %v4599_v47  ;;  %v4923_v55 = vrot.slane %v4922_v52, 4  ;;  %v5003_v40 = vshll.u32 %v4899_v33, 16  ;;  %v4913_v47 = vrot.slane %v4911_v13, 5 }
 0x974   : > { %6416 = vmatpush3.bf16.msra.mxu1 %v6780_v4  ;;  %v6785_v4 = vld [vmem:[%s8291_s12 + $0xc0] sm:$0xff]  }
 0x975   : > { %6425 = vmatprep.subr.bf16.mxu1 %v6781_v18  ;;  %v5005_v37 = vrot.slane %v5003_v40, 5 }
 0x977   : > { %6418 = vmatmul.mubr.msk.bf16.vlgmr.msra.gmra.mrb[8].mxu1 %vm2896_vm15, %v5818_v61  ;;  %v4891_v61 = vld [vmem:[#allocation3 + $0x28] sm:$0xf] }
 0x978   : > { %6426 = vmatpush3.bf16.msra.mxu1 %v6781_v18  ;;  %6421 = vmatprep.mubr.msk.bf16.mxu1 %vm2896_vm15, %v5819_v27  ;;  %v4885_v18 = vld [vmem:[#allocation3 + $0x10] sm:$0xf]  ;;  %v4895_v27 = vld [vmem:[#allocation3 + $0x38] sm:$0xf]  ;;  %v4944_v51 = vshrl.u32 %v4891_v61, 16 }
 0x979   : > { %6427 = vmatprep.subr.bf16.mxu1 %v6782_v8  ;;  %v4902_v60 = vshrl.u32 %v4885_v18, 16  ;;  %v4905_v11 = vshll.u32 %v4885_v18, 16  ;;  %v4972_v16 = vshrl.u32 %v4895_v27, 16  ;;  %v4975_v50 = vshll.u32 %v4895_v27, 16 }
 0x97a   : > { %v4946_v53 = vrot.slane %v4944_v51, 4  ;;  %v4989_v18 = vshll.u32 %v4897_v29, 16 }
 0x97b   : > { %v4904_v23 = vrot.slane %v4902_v60, 4  ;;  %v4907_v38 = vrot.slane %v4905_v11, 5  ;;  %v4974_v57 = vrot.slane %v4972_v16, 4 }
 0x97c   : > { %6428 = vmatpush3.bf16.msra.mxu1 %v6782_v8  ;;  %v4893_v8 = vld [vmem:[#allocation3 + $0x30] sm:$0xf] }
 0x97d   : > { %6429 = vmatprep.subr.bf16.mxu1 %v6783_v6  ;;  %v4908_v39 = vor.u32 %v4907_v38, %v4904_v23  ;;  %v4958_v20 = vshrl.u32 %v4893_v8, 16  ;;  %v4961_v21 = vshll.u32 %v4893_v8, 16  ;;  %v4981_v38 = vshll.u32 %v8163_v3, 16 }
 0x97f   : > { %6422 = vmatmul.mubr.msk.bf16.gmra.mrb[12].mxu1 %vm2896_vm15, %v5820_v19  ;;  %v4925_v19 = vshll.u32 %v8145_v17, 16  ;;  %v4909_v48 = vrot.slane %v4908_v39, 4  ;;  %v4960_v28 = vrot.slane %v4958_v20, 4  ;;  %v4963_v2 = vrot.slane %v4961_v21, 5  ;;  %v6797_v39 = vld [vmem:[%s8291_s12 + $0x100] sm:$0xff]  }
 0x980   : > { %6430 = vmatpush3.bf16.msra.mxu1 %v6783_v6  ;;  %6433 = vmatprep.mubr.msk.bf16.mxu1 %vm2896_vm15, %v5845_v54  ;;  %v4947_v6 = vshll.u32 %v4891_v61, 16  ;;  %v6792_v54 = vld [vmem:[#allocation3 + $0x30] ss:$8 sps:$4 sm:$0xff]   ;;  %v4991_v61 = vrot.slane %v4989_v18, 5  ;;  %v4983_v51 = vrot.slane %v4981_v38, 5  ;;  %v5006_v20 = vor.u32 %v5005_v37, %v5002_v59  ;;  %v6800_v18 = vld [vmem:[%s8291_s12 + $0x118] sm:$0xff]  }
 0x981   : > { %6431 = vmatprep.subr.bf16.mxu1 %v6784_v56  ;;  %v4927_v44 = vrot.slane %v4925_v19, 5  ;;  %v4914_v32 = vsel %vm7271_vm11, %v4909_v48, %v4913_v47  ;;  %v4964_v58 = vor.u32 %v4963_v2, %v4960_v28  ;;  %v5143_v19 = vld [vmem:[#allocation3 + $0x10] sm:$0xe]  ;;  %v5169_v2 = vrot.slane %v8143_v10, 5  ;;  %v5145_v47 = vld [vmem:[#allocation3 + $0x20] sm:$0xe] }
 0x982   : > { %v4949_v35 = vrot.slane %v4947_v6, 5  ;;  %v8183_v6 = vld [vmem:[#allocation3 + $0x44] sm:$0x1]  ;;  %v5897_v28 = vrot.slane %v5143_v19, 9  ;;  %v5189_v37 = vrot.slane %v8163_v3, 5  ;;  %v6802_v38 = vld [vmem:[%s8293_s14 + $0x8] sm:$0xff]  }
 0x983   : > { %v4965_v8 = vrot.slane %v4964_v58, 4  ;;  %v4995_v13 = vshll.u32 %v8183_v6, 16 }
 0x984   : > { %6432 = vmatpush3.bf16.msra.mxu1 %v6784_v56  ;;  %v4932_v56 = vrot.slane %v4930_v34, 4  ;;  %v4950_v22 = vor.u32 %v4949_v35, %v4946_v53  ;;  %v5007_v53 = vrot.slane %v5006_v20, 4  ;;  %v5170_v10 = vsel %vm7361_vm14, %v5897_v28, %v5169_v2 }
 0x985   : > { %6441 = vmatprep.subr.bf16.mxu1 %v6785_v4  ;;  %v4997_v29 = vrot.slane %v4995_v13, 5  ;;  %v5926_v13 = vld [vmem:[%s8294_s15] ss:$0 sm:$0xff] }
 0x986   : > { %v4936_v0 = vor.u32 %v4935_v36, %v4932_v56  ;;  %v4951_v12 = vrot.slane %v4950_v22, 4  ;;  %v5144_v56 = vld [vmem:[#allocation3 + $0x18] sm:$0xe] }
 0x987   : > { %6434 = vmatmul.mubr.msk.bf16.vlgmr.msra.gmra.mrb[8].mxu1 %vm2896_vm15, %v5846_v46  ;;  %v8157_v46 = vld [vmem:[#allocation3 + $0x24] sm:$0x1]  ;;  %v5148_v22 = vld [vmem:[#allocation3 + $0x38] sm:$0xe] }
 0x988   : > { %6442 = vmatpush3.bf16.msra.mxu1 %v6785_v4  ;;  %6437 = vmatprep.mubr.msk.bf16.mxu1 %vm2896_vm15, %v5847_v49  ;;  %v4977_v4 = vrot.slane %v4975_v50, 5  ;;  %v8161_v49 = vld [vmem:[#allocation3 + $0x34] sm:$0x1]  ;;  %v4939_v62 = vshll.u32 %v8157_v46, 16  ;;  %v4992_v50 = vor.u32 %v4991_v61, %v4988_v43  ;;  %v5902_v59 = vrot.slane %v5148_v22, 9 }
 0x989   : > { %6443 = vmatprep.subr.bf16.mxu1 %v6786_v1  ;;  %v4967_v23 = vshll.u32 %v8161_v49, 16  ;;  %v5193_v61 = vrot.slane %v8183_v6, 5  ;;  %v6874_v6 = vld [vmem:[%s7021_s26 + $0x18] sm:$0xff] }
 0x98a   : > { %v4978_v60 = vor.u32 %v4977_v4, %v4974_v57  ;;  %v5898_v57 = vrot.slane %v5144_v56, 9  ;;  %v5173_v4 = vrot.slane %v8145_v17, 5  ;;  %v5190_v3 = vsel %vm7361_vm14, %v5902_v59, %v5189_v37 }
 0x98b   : > { %v4969_v52 = vrot.slane %v4967_v23, 5 }
 0x98c   : > { %6444 = vmatpush3.bf16.msra.mxu1 %v6786_v1  ;;  %v8159_v1 = vld [vmem:[#allocation3 + $0x2c] sm:$0x1]  ;;  %v4979_v27 = vrot.slane %v4978_v60, 4  ;;  %v5174_v17 = vsel %vm7361_vm14, %v5898_v57, %v5173_v4 }
 0x98d   : > { %6445 = vmatprep.subr.bf16.mxu1 %v6787_v63  ;;  %v4953_v11 = vshll.u32 %v8159_v1, 16  ;;  %v4970_v33 = vsel %vm7271_vm11, %v4965_v8, %v4969_v52  ;;  %v5913_v15 = vcombine.low %v5170_v10, %v5174_v17  ;;  %v5181_v60 = vrot.slane %v8159_v1, 5 }
 0x98e   : > { %v5197_v8 = vrot.slane %v8178_v30, 5 }
 0x98f   : > { %6438 = vmatmul.mubr.msk.bf16.gmra.mrb[12].mxu1 %vm2896_vm15, %v5848_v45  ;;  %v6795_v45 = vld [vmem:[#allocation3 + $0x40] ss:$8 sps:$4 sm:$0xff]   ;;  %v4955_v34 = vrot.slane %v4953_v11, 5  ;;  %v5185_v11 = vrot.slane %v8161_v49, 5 }
 0x990   : > { %6446 = vmatpush3.bf16.msra.mxu1 %v6787_v63  ;;  %6449 = vmatprep.mubr.msk.bf16.mxu1 %vm2896_vm15, %v6788_v25  ;;  %v4928_v63 = vsel %vm7271_vm11, %v4923_v55, %v4927_v44  ;;  %v6796_v25 = vld [vmem:[%s8291_s12 + $0xf8] sm:$0xff]   ;;  %v4993_v55 = vrot.slane %v4992_v50, 4 }
 0x991   : > { %6447 = vmatprep.subr.bf16.mxu1 %v6789_v42  ;;  %v5885_v26 = vcombine.low %v4914_v32, %v4928_v63  ;;  %v4956_v16 = vsel %vm7271_vm11, %v4951_v12, %v4955_v34  ;;  %v5146_v44 = vld [vmem:[#allocation3 + $0x28] sm:$0xe]  ;;  %v5899_v32 = vrot.slane %v5145_v47, 9  ;;  %v5177_v63 = vrot.slane %v8157_v46, 5  ;;  %v6871_v34 = vld [vmem:[%s7021_s26] sm:$0xff] }
 0x992   : > { %v4998_v7 = vsel %vm7271_vm11, %v4993_v55, %v4997_v29  ;;  %v5900_v58 = vrot.slane %v5146_v44, 9 }
 0x993   : > { %v5178_v46 = vsel %vm7361_vm14, %v5899_v32, %v5177_v63 }
 0x994   : > { %6448 = vmatpush3.bf16.msra.mxu1 %v6789_v42  ;;  %v4937_v42 = vrot.slane %v4936_v0, 4  ;;  %v5147_v0 = vld [vmem:[#allocation3 + $0x30] sm:$0xe]  ;;  %v5182_v1 = vsel %vm7361_vm14, %v5900_v58, %v5181_v60 }
 0x995   : > { %6457 = vmatprep.subr.bf16.mxu1 %v6790_v9  ;;  %v5914_v23 = vcombine.low %v5178_v46, %v5182_v1 }
 0x997   : > { %6450 = vmatmul.mubr.msk.bf16.vlgmr.msra.gmra.mrb[8].mxu1 %vm2896_vm15, %v6791_v5  ;;  %v4984_v5 = vsel %vm7271_vm11, %v4979_v27, %v4983_v51  ;;  %v6873_v51 = vld [vmem:[%s7021_s26 + $0x10] sm:$0xff] }
 0x998   : > { %6458 = vmatpush3.bf16.msra.mxu1 %v6790_v9  ;;  %6453 = vmatprep.mubr.msk.bf16.mxu1 %vm2896_vm15, %v6792_v54  ;;  %v4941_v9 = vrot.slane %v4939_v62, 5  ;;  %v6798_v54 = vld [vmem:[%s8291_s12 + $0x108] sm:$0xff]   ;;  %v5887_v48 = vcombine.low %v4970_v33, %v4984_v5  ;;  %v5901_v62 = vrot.slane %v5147_v0, 9  ;;  %v5345_v20 = vpack.c.bf16 %v6874_v6, %v6873_v51  ;;  %v5925_v5 = vld [vmem:[%s8292_s13] ss:$0 sm:$0xff] }
 0x999   : > { %6459 = vmatprep.subr.bf16.mxu1 %v6793_v24  ;;  %v6567_v19 = vadd.f32 %v5926_v13, %v5925_v5 }
 0x99a   : > { %v4942_v21 = vsel %vm7271_vm11, %v4937_v42, %v4941_v9  ;;  %v5186_v49 = vsel %vm7361_vm14, %v5901_v62, %v5185_v11  ;;  %v5149_v42 = vld [vmem:[#allocation3 + $0x40] sm:$0xe] }
 0x99b   : > { %v5886_v36 = vcombine.low %v4942_v21, %v4956_v16  ;;  %v5915_v12 = vcombine.low %v5186_v49, %v5190_v3  ;;  %v5903_v43 = vrot.slane %v5149_v42, 9  ;;  %v6875_v21 = vld [vmem:[%s7021_s26 + $0x20] sm:$0xff]  ;;  %v6876_v16 = vld [vmem:[%s7021_s26 + $0x28] sm:$0xff] }
 0x99c   : > { %6460 = vmatpush3.bf16.msra.mxu1 %v6793_v24  ;;  %v5009_v24 = vshll.u32 %v8178_v30, 16  ;;  %v5346_v50 = vpack.c.bf16 %v6876_v16, %v6875_v21 }
 0x99d   : > { %6461 = vmatprep.subr.bf16.mxu1 %v6794_v31  ;;  %v5194_v27 = vsel %vm7361_vm14, %v5903_v43, %v5193_v61 }
 0x99e   : > { %v5011_v35 = vrot.slane %v5009_v24, 5  ;;  %v6878_v24 = vld [vmem:[%s7021_s26 + $0x38] sm:$0xff] }
 0x99f   : > { %6454 = vmatmul.mubr.msk.bf16.gmra.mrb[12].mxu1 %vm2896_vm15, %v6795_v45  ;;  %v6801_v45 = vld [vmem:[%s8293_s14] sm:$0xff]   ;;  %v5347_v33 = vpack.c.bf16 %v6878_v24, %v6877_v14 }
 0x9a0   : > { %6462 = vmatpush3.bf16.msra.mxu1 %v6794_v31  ;;  %6465 = vmatprep.mubr.msk.bf16.mxu1 %vm2896_vm15, %v5885_v26  ;;  %v6799_v31 = vld [vmem:[%s8291_s12 + $0x110] sm:$0xff]   ;;  %v5012_v40 = vsel %vm7271_vm11, %v5007_v53, %v5011_v35 }
 0x9a1   : > { %6463 = vmatprep.subr.bf16.mxu1 %v6796_v25  ;;  %v5888_v41 = vcombine.low %v4998_v7, %v5012_v40 }
 0x9a4   : > { %6464 = vmatpush3.bf16.msra.mxu1 %v6796_v25  ;;  %v5150_v25 = vld [vmem:[#allocation3 + $0x48] sm:$0xe] }
 0x9a5   : > { %6473 = vmatprep.subr.bf16.mxu1 %v6797_v39  ;;  %v5904_v26 = vrot.slane %v5150_v25, 9 }
 0x9a7   : > { %6466 = vmatmul.mubr.msk.bf16.vlgmr.msra.gmra.mrb[8].mxu1 %vm2896_vm15, %v5886_v36  ;;  %v5198_v9 = vsel %vm7361_vm14, %v5904_v26, %v5197_v8 }
 0x9a8   : > { %6474 = vmatpush3.bf16.msra.mxu1 %v6797_v39  ;;  %6469 = vmatprep.mubr.msk.bf16.mxu1 %vm2896_vm15, %v5887_v48  ;;  %v6872_v39 = vld [vmem:[%s7021_s26 + $0x8] sm:$0xff]  ;;  %v5916_v52 = vcombine.low %v5194_v27, %v5198_v9  ;;  %s535_s26 = scalar_lea.vmem %s8295_s16, %s5935_s20 }
 0x9a9   : > { %6475 = vmatprep.subr.bf16.mxu1 %v6798_v54  ;;  %v5344_v30 = vpack.c.bf16 %v6872_v39, %v6871_v34 }
 0x9ac   : > { %6476 = vmatpush3.bf16.msra.mxu1 %v6798_v54 }
 0x9ad   : > { %6477 = vmatprep.subr.bf16.mxu1 %v6799_v31 }
 0x9af   : > { %6470 = vmatmul.mubr.msk.bf16.gmra.mrb[12].mxu1 %vm2896_vm15, %v5888_v41 }
 0x9b0   : > { %6478 = vmatpush3.bf16.msra.mxu1 %v6799_v31  ;;  %6481 = vmatprep.mubr.msk.bf16.mxu1 %vm2896_vm15, %v5913_v15 }
 0x9b1   : > { %6479 = vmatprep.subr.bf16.mxu1 %v6800_v18 }
 0x9b4   : > { %6480 = vmatpush3.bf16.msra.mxu1 %v6800_v18 }
 0x9b5   : > { %6489 = vmatprep.subr.bf16.mxu1 %v6801_v45 }
 0x9b7   : > { %6482 = vmatmul.mubr.msk.bf16.vlgmr.msra.gmra.mrb[8].mxu1 %vm2896_vm15, %v5914_v23 }
 0x9b8   : > { %6490 = vmatpush3.bf16.msra.mxu1 %v6801_v45  ;;  %6485 = vmatprep.mubr.msk.bf16.mxu1 %vm2896_vm15, %v5915_v12 }
 0x9b9   : > { %6491 = vmatprep.subr.bf16.mxu1 %v6802_v38 }
 0x9bc   : > { %6492 = vmatpush3.bf16.msra.mxu1 %v6802_v38 }
 0x9bf   : > { %6486 = vmatmul.mubr.msk.bf16.gmra.mrb[12].mxu1 %vm2896_vm15, %v5916_v52 }
 0x9c0   : > { %6493 = vmatprep.mubr.msk.bf16.mxu1 %vm555_vm1, %v5344_v30 }
 0x9c7   : > { %6494 = vmatmul.mubr.msk.bf16.vlgmr.msra.gmra.mrb[8].mxu1 %vm555_vm1, %v5345_v20 }
 0x9c8   : > { %6497 = vmatprep.mubr.msk.bf16.mxu1 %vm555_vm1, %v5346_v50 }
 0x9cf   : > { %6498 = vmatmul.mubr.msk.bf16.gmra.mrb[12].mxu1 %vm555_vm1, %v5347_v33 }
 0xa9a   : > { %v6495_v56 = vpop.f32.mrb[8].mxu1 }
 0xa9b   : > { %v6561_v36 = vadd.f32 %v6495_v56, %v5925_v5  ;;  %v5417_v54 = vpop.f32.mrb[9].mxu1 }
 0xa9c   : > { %v6563_v48 = vadd.f32 %v5925_v5, %v5417_v54  ;;  %v6496_v55 = vpop.f32.mrb[10].mxu1 }
 0xa9d   : > { %v6562_v53 = vadd.f32 %v6561_v36, %v5926_v13  ;;  %v6566_v35 = vadd.f32 %v6567_v19, %v6496_v55  ;;  %v5420_v28 = vpop.f32.mrb[11].mxu1 }
 0xa9e   : > { %v6564_v2 = vadd.f32 %v6563_v48, %v5926_v13  ;;  %v6568_v57 = vadd.f32 %v6567_v19, %v5420_v28 }
 0xa9f   : > { %5458 = vst.msk [vmem:[%s535_s26 + $0x10] sm:$0xff] %vm2896_vm15, %v6562_v53  ;;  %5459 = vst.msk [vmem:[%s535_s26 + $0x18] sm:$0xff] %vm2896_vm15, %v6566_v35 }
 0xaa0   : > { %5456 = vst.msk [vmem:[%s535_s26] sm:$0xff] %vm2896_vm15, %v6564_v2  ;;  %5457 = vst.msk [vmem:[%s535_s26 + $0x8] sm:$0xff] %vm2896_vm15, %v6568_v57 }
 0xaa2   : > { %v6499_v4 = vpop.f32.mrb[12].mxu1 }
 0xaa3   : > { %v6570_v29 = vadd.f32 %v6567_v19, %v6499_v4  ;;  %v5433_v31 = vpop.f32.mrb[13].mxu1 }
 0xaa4   : > { %v6572_v7 = vadd.f32 %v6567_v19, %v5433_v31  ;;  %v6500_v40 = vpop.f32.mrb[14].mxu1 }
 0xaa5   : > { %5462 = vst.msk [vmem:[%s535_s26 + $0x30] sm:$0xff] %vm2896_vm15, %v6570_v29  ;;  %v6574_v47 = vadd.f32 %v6567_v19, %v6500_v40  ;;  %v5436_v10 = vpop.f32.mrb[15].mxu1 }
 0xaa6   : > { %5460 = vst.msk [vmem:[%s535_s26 + $0x20] sm:$0xff] %vm2896_vm15, %v6572_v7  ;;  %v6576_v17 = vadd.f32 %v6567_v19, %v5436_v10 }
 0xaa7   : > { %5463 = vst.msk [vmem:[%s535_s26 + $0x38] sm:$0xff] %vm2896_vm15, %v6574_v47 }
 0xaa8   : > { %5461 = vst.msk [vmem:[%s535_s26 + $0x28] sm:$0xff] %vm2896_vm15, %v6576_v17 }
 0xaa9 PF: > { %s26_s21 = sadd.s32 1, %s6885_s21  }
 0xaaa   : > { %p23_p4 = scmp.ge.s32.totalorder %s26_s21, 4  }
 0xaac   :  { %25 = sbr.rel (!%p23_p4) target bundleno = 2 (0x2), region = 139 }

// kernel: bottleneck_forward.5
= control target key start
LH: loop header
LB: loop body
LE: loop exit
PB: predicated region body
PF: predicated region fallthrough
CT: control target
= control target key end

     0   :  { %s8623_s0 = inlined_call_operand.vmem [shape: f32[2,64,64], index: 0, kind: input, shape index: {}]   ;;  %s8624_s1 = inlined_call_operand.vmem [shape: f32[2,1,64], index: 1, kind: input, shape index: {}]   ;;  %s8625_s2 = inlined_call_operand.vmem [shape: f32[1,64], index: 2, kind: input, shape index: {}]   ;;  %s8626_s3 = inlined_call_operand.vmem [shape: f32[1,64], index: 3, kind: input, shape index: {}]   ;;  %s8627_s4 = inlined_call_operand.vmem [shape: f32[64,32], index: 4, kind: input, shape index: {}, may-alias: {4,10}]   ;;  %s8628_s5 = inlined_call_operand.vmem [shape: f32[32,64], index: 5, kind: input, shape index: {}, may-alias: {5,11}]   ;;  %s8629_s6 = inlined_call_operand.vmem [shape: bf16[9,64,64], index: 6, kind: input, shape index: {}]   ;;  %s8630_s7 = inlined_call_operand.vmem [shape: f32[1,64], index: 7, kind: input, shape index: {}]   ;;  %s8631_s8 = inlined_call_operand.vmem [shape: f32[1,64], index: 8, kind: input, shape index: {}]   ;;  %s8632_s9 = inlined_call_operand.vmem [shape: f32[1,64], index: 9, kind: input, shape index: {}]   ;;  %s8633_s10 = inlined_call_operand.vmem [shape: f32[64,32], index: 10, kind: input, shape index: {}, may-alias: {4,10}]   ;;  %s8634_s11 = inlined_call_operand.vmem [shape: f32[32,64], index: 11, kind: input, shape index: {}, may-alias: {5,11}]   ;;  %s8635_s12 = inlined_call_operand.vmem [shape: bf16[9,64,64], index: 12, kind: input, shape index: {}]   ;;  %s8636_s13 = inlined_call_operand.vmem [shape: f32[1,64], index: 13, kind: input, shape index: {}]   ;;  %s8637_s14 = inlined_call_operand.hbm [shape: f32[2,64,64], index: 14, kind: output, shape index: {}]  }
   0x1   :  { %8641 = sst [smem:[#allocation10_spill]] %s8623_s0 }
   0x2   :  { %8642 = sst [smem:[#allocation11_spill]] %s8625_s2 }
   0x3   :  { %19 = vsyncpa [#allocation5], 0 }
   0x4   :  { %21 = vsyncpa [#allocation5 + $0x1], 0  ;;  %s7169_s29 = smov 0   ;;  %s7171_s30 = smov 0  }
   0x5   :  { %s7173_s15 = smov 0   ;;  %s7175_s16 = smov 0  }
   0x6 LB: > { %8643 = sst [smem:[#allocation7_spill]] %s7081_s15  ;;  %s7190_s17 = sadd.s32 4294967295, %s7085_s16   ;;  %s7085_s16 = sphi %s7175_s16, %s8660_s16   ;;  %s7081_s15 = sphi %s7173_s15, %s8662_s15   ;;  %s7077_s30 = sphi %s7171_s30, %s8664_s30   ;;  %s7073_s29 = sphi %s7169_s29, %s8663_s29  }
   0x7   : > { %s5530_s18 = sadd.s32 4294967294, %s7085_s16   ;;  %s7194_s19 = sadd.s32 1, %s7085_s16  }
   0x8   : > { %8644 = sst [smem:[#allocation8_spill]] %s7194_s19  ;;  %s338_s20 = sadd.s32 1, %s7081_s15 }
   0x9   : > { %s335_s21 = ssub.s32 %s7085_s16, %s7194_s19  ;;  %p348_p0 = scmp.ne.s32.totalorder %s7081_s15, %s7077_s30 }
   0xa   : > { %p336_p1 = scmp.eq.s32.totalorder %s335_s21, 0  ;;  %p349_p2 = scmp.eq.s32.totalorder %s7190_s17, 1 }
   0xb   : > { %p354_p3 = scmp.ne.s32.totalorder %s7077_s30, %s7073_s29  ;;  %p355_p4 = scmp.eq.s32.totalorder %s5530_s18, 1 }
   0xc   : > { %s7205_s22 = scalar_select %p336_p1, %s7081_s15, %s338_s20  }
   0xd   : > { %p7207_p5 = por %p349_p2, %p348_p0  ;;  %p7211_p6 = por %p355_p4, %p354_p3 }
   0xe   : > { %8645 = sst [smem:[#allocation9_spill]] %s7205_s22  ;;  %p5533_p7 = scmp.ge.s32.totalorder %s7085_s16, 1 }
   0xf   : > { %p423_p8 = scmp.lt.s32.totalorder %s7085_s16, 3 }
  0x11   : > { %p424_p9 = pnand %p5533_p7, %p423_p8 }
  0x12   : > { %v489_v0 = vld [vmem:[%s8627_s4] sm:$0xff] (!%p424_p9)  ;;  %v490_v1 = vld [vmem:[%s8627_s4 + $0x8] sm:$0xff] (!%p424_p9)  ;;  %v491_v2 = vld [vmem:[%s8627_s4 + $0x10] sm:$0xff] (!%p424_p9)  ;;  %v7087_v3 = vmov (!%p424_p9), 0.0|0.0   ;;  %vm7088_vm0 = vmmov (!%p424_p9), 0   ;;  %v7089_v6 = vmov (!%p424_p9), 0.0   ;;  %v673_v52 = vlaneseq (!%p424_p9) }
  0x13   : > { %427 = sbr.rel (%p424_p9) target bundleno = 2742 (0xab6), region = 76  ;;  %6607 = vmatprep.subr.bf16.mxu0 (!%p424_p9), %v7087_v3  ;;  %v6608_v4 = vpack.c.bf16 (!%p424_p9), %v490_v1, %v489_v0  ;;  %v492_v5 = vld [vmem:[%s8627_s4 + $0x18] sm:$0xff] (!%p424_p9)  ;;  %6215 = vmatprep.mubr.msk.f32.mxu0 (!%p424_p9), %vm7088_vm0, %v7089_v6  ;;  %p472_p10 = scmp.lt.s32.totalorder (!%p424_p9), %s7190_s17, 1  ;;  %v493_v7 = vld [vmem:[%s8627_s4 + $0x20] sm:$0xff] (!%p424_p9)  ;;  %v494_v8 = vld [vmem:[%s8627_s4 + $0x28] sm:$0xff] (!%p424_p9)  ;;  %vm503_vm1 = vcmask (!%p424_p9), 523264  }
  0x14   : > { %6619 = vmatprep.subr.bf16.mxu1 (!%p424_p9), %v7087_v3  ;;  %v497_v9 = vld [vmem:[%s8628_s5] sm:$0xff] (!%p424_p9)  ;;  %6226 = vmatprep.mubr.msk.f32.mxu1 (!%p424_p9), %vm7088_vm0, %v7089_v6  ;;  %v6611_v10 = vpack.c.bf16 (!%p424_p9), %v492_v5, %v491_v2  ;;  %v498_v11 = vld [vmem:[%s8628_s5 + $0x8] sm:$0xff] (!%p424_p9)  ;;  %v495_v13 = vld [vmem:[%s8627_s4 + $0x30] sm:$0xff] (!%p424_p9)  ;;  %s8648_s0 = sld [smem:[#allocation10_spill]] (!%p424_p9)  ;;  %v6614_v15 = vpack.c.bf16 (!%p424_p9), %v494_v8, %v493_v7  ;;  %vm599_vm2 = vcmask (!%p424_p9), 261120   ;;  %v674_v53 = vshrl.u32 (!%p424_p9), %v673_v52, 7 }
  0x15   : > { %6609 = vmatpush3.bf16.msra.mxu0 (!%p424_p9), %v6608_v4  ;;  %v7252_v12 = vpack.c.bf16 (!%p424_p9), %v498_v11, %v497_v9  ;;  %v496_v14 = vld [vmem:[%s8627_s4 + $0x38] sm:$0xff] (!%p424_p9)  ;;  %v499_v46 = vld [vmem:[%s8628_s5 + $0x10] sm:$0xff] (!%p424_p9)  ;;  %vm960_vm3 = vcmask (!%p424_p9), 516096   ;;  %vm966_vm4 = vsmask.f32 (!%p424_p9), 256  ;;  %vm958_vm7 = vcmask (!%p424_p9), 519168  }
  0x16   : > { %6610 = vmatprep.subr.bf16.mxu0 (!%p424_p9), %v7087_v3  ;;  %v6617_v33 = vpack.c.bf16 (!%p424_p9), %v496_v14, %v495_v13  ;;  %v500_v47 = vld [vmem:[%s8628_s5 + $0x18] sm:$0xff] (!%p424_p9)  ;;  %v7322_v54 = vsub.s32 (!%p424_p9), 0, %v674_v53  ;;  %vm998_vm5 = vsmask.f32 (!%p424_p9), 7938  ;;  %vm7378_vm6 = vmand (!%p424_p9), %vm960_vm3, %vm966_vm4  ;;  %v983_v53 = vld [vmem:[#allocation2 + $0x28] sm:$0x1] (!%p424_p9) }
  0x17   : > { %6621 = vmatpush3.bf16.msra.mxu1 (!%p424_p9), %v7252_v12  ;;  %v6623_v48 = vpack.c.bf16 (!%p424_p9), %v500_v47, %v499_v46  ;;  %vm7386_vm8 = vmand (!%p424_p9), %vm960_vm3, %vm998_vm5  ;;  %v1006_v46 = vld [vmem:[#allocation2 + $0x14] sm:$0x1] (!%p424_p9)  ;;  %s8655_s2 = sld [smem:[#allocation11_spill]] (!%p424_p9)  ;;  %vm1217_vm10 = vsmask.f32 (!%p424_p9), 3328  ;;  %vm1599_vm13 = vcmask (!%p424_p9), 1042432  }
  0x18   : > { %6622 = vmatprep.subr.bf16.mxu1 (!%p424_p9), %v7087_v3  ;;  %vm7430_vm9 = vmand (!%p424_p9), %vm958_vm7, %vm998_vm5  ;;  %vm1218_vm11 = vsmask.f32 (!%p424_p9), 7440  ;;  %vm1600_vm14 = vcmask (!%p424_p9), 1046532   ;;  %s7091_s18 = smov (!%p424_p9), [#allocation4]  }
  0x19   : > { %6612 = vmatpush3.bf16.msra.mxu0 (!%p424_p9), %v6611_v10  ;;  %vm7549_vm12 = vmor (!%p424_p9), %vm1217_vm10, %vm1218_vm11  ;;  %s7027_s20 = sshll.u32 (!%p424_p9), %s7091_s18, 4  ;;  %s7028_s20 = int_to_ptr.vmem [resolvable:$false] %s7027_s20 }
  0x1a   : > { %s7246_s22 = scalar_select %p472_p10, %s7190_s17, 1  ;;  %6613 = vmatprep.subr.bf16.mxu0 %v7087_v3  ;;  %vm7645_vm15 = vmor %vm1599_vm13, %vm1600_vm14 }
  0x1b   : > { %6624 = vmatpush3.bf16.msra.mxu1 %v6623_v48 }
  0x1c   : > { %s5981_s26 = sshll.u32 %s7246_s22, 6  ;;  %6655 = vmatprep.subr.bf16.mxu1 %v7087_v3  ;;  %s479_s25 = scalar_lea.vmem %s8624_s1, %s7246_s22 }
  0x1d   : > { %s7264_s21 = scalar_lea.vmem %s8648_s0, %s5981_s26  ;;  %6615 = vmatpush3.bf16.msra.mxu0 %v6614_v15 }
  0x1e   : > { %v7268_v16 = vld [vmem:[%s7264_s21] sm:$0xff]  ;;  %v7271_v17 = vld [vmem:[%s7264_s21 + $0x8] sm:$0xff]  ;;  %v7274_v18 = vld [vmem:[%s7264_s21 + $0x10] sm:$0xff]  ;;  %6616 = vmatprep.subr.bf16.mxu0 %v7087_v3 }
  0x1f   : > { %v484_v19 = vld [vmem:[%s7264_s21 + $0x18] sm:$0xff]  ;;  %v485_v20 = vld [vmem:[%s7264_s21 + $0x20] sm:$0xff]  ;;  %v7281_v21 = vld [vmem:[%s7264_s21 + $0x28] sm:$0xff]  ;;  %v504_v22 = vsel %vm503_vm1, %v7268_v16, 0.0  ;;  %v505_v23 = vsel %vm503_vm1, %v7271_v17, 0.0  ;;  %v507_v24 = vsel %vm503_vm1, %v7274_v18, 0.0 }
  0x20   : > { %v7290_v25 = vld [vmem:[%s7264_s21 + $0x30] sm:$0xff]  ;;  %v7293_v26 = vld [vmem:[%s7264_s21 + $0x38] sm:$0xff]  ;;  %v506_v27 = vadd.f32 %v505_v23, %v504_v22  ;;  %v509_v28 = vsel %vm503_vm1, %v484_v19, 0.0  ;;  %v511_v29 = vsel %vm503_vm1, %v485_v20, 0.0  ;;  %v513_v30 = vsel %vm503_vm1, %v7281_v21, 0.0 }
  0x21   : > { %v515_v31 = vsel %vm503_vm1, %v7290_v25, 0.0  ;;  %v517_v32 = vsel %vm503_vm1, %v7293_v26, 0.0  ;;  %6618 = vmatpush3.bf16.msra.mxu0 %v6617_v33 }
  0x22   : > { %v508_v34 = vadd.f32 %v507_v24, %v506_v27  ;;  %6625 = vmatprep.subr.bf16.mxu0 %v7087_v3 }
  0x24   : > { %v510_v35 = vadd.f32 %v509_v28, %v508_v34 }
  0x26   : > { %v512_v36 = vadd.f32 %v511_v29, %v510_v35 }
  0x28   : > { %v514_v37 = vadd.f32 %v513_v30, %v512_v36 }
  0x2a   : > { %v516_v38 = vadd.f32 %v515_v31, %v514_v37  ;;  %v6912_v37 = vld [vmem:[%s8635_s12 + $0x50] sm:$0xff]  }
  0x2c   : > { %v518_v39 = vadd.f32 %v517_v32, %v516_v38  ;;  %v1003_v38 = vld [vmem:[#allocation2 + $0xc] sm:$0x1] }
  0x2e   : > { %v519_v40 = vrot.slane %v518_v39, 4 }
  0x30   : > { %v520_v41 = vadd.f32 %v519_v40, %v518_v39 }
  0x32   : > { %v521_v42 = vrot.slane %v520_v41, 2 }
  0x34   : > { %v522_v43 = vadd.f32 %v521_v42, %v520_v41  ;;  %v974_v41 = vld [vmem:[#allocation2 + $0x10] sm:$0x1]  ;;  %v7090_v42 = vmov 0  }
  0x35   : > { %959 = vst.msk [vmem:[#allocation2] sm:$0xf] %vm958_vm7, %v7090_v42  ;;  %963 = vst.msk [vmem:[#allocation2 + $0x48] sm:$0xf] %vm958_vm7, %v7090_v42 }
  0x36   : > { %v523_v44 = vrot.slane %v522_v43, 1  ;;  %961 = vst.msk [vmem:[#allocation2 + $0x4] sm:$0x1] %vm960_vm3, %v7090_v42  ;;  %964 = vst.msk [vmem:[#allocation2 + $0x4c] sm:$0x1] %vm960_vm3, %v7090_v42 }
  0x37   : > { %3442 = vst.msk [vmem:[#allocation3] sm:$0xf] %vm958_vm7, %v7090_v42  ;;  %3445 = vst.msk [vmem:[#allocation3 + $0x48] sm:$0xf] %vm958_vm7, %v7090_v42 }
  0x38   : > { %v524_v45 = vadd.f32 %v523_v44, %v522_v43  ;;  %v1004_v43 = vsel %vm7386_vm8, 0, %v1003_v38  ;;  %3443 = vst.msk [vmem:[#allocation3 + $0x4] sm:$0x1] %vm960_vm3, %v7090_v42  ;;  %3446 = vst.msk [vmem:[#allocation3 + $0x4c] sm:$0x1] %vm960_vm3, %v7090_v42  ;;  %v975_v44 = vsel %vm7378_vm6, 0, %v974_v41 }
  0x39   : > { %1005 = vst [vmem:[#allocation2 + $0xc] sm:$0x1] %v1004_v43  ;;  %976 = vst [vmem:[#allocation2 + $0x10] sm:$0x1] %v975_v44  ;;  %v5541_v38 = vld [vmem:[%s8655_s2] ss:$0 sm:$0xff] }
  0x3a   : > { %6216 = vmatmul.mubr.msk.f32.vlgmr.msra.gmra.mrb[0].mxu0 %vm503_vm1, %v524_v45  ;;  %v977_v45 = vld [vmem:[#allocation2 + $0x18] sm:$0x1]  ;;  %v5542_v44 = vld [vmem:[%s8626_s3] ss:$0 sm:$0xff]  ;;  %s469_s2 = sand.u32 1, %s7077_s30  }
  0x3b   : > { %6627 = vmatpush3.bf16.msra.mxu0 %v6608_v4  ;;  %6245 = vmatprep.mubr.msk.f32.mxu0 %vm7088_vm0, %v7089_v6  ;;  %v978_v47 = vsel %vm7378_vm6, 0, %v977_v45  ;;  %s5534_s15 = sshll.u32 %s469_s2, 6  ;;  %s8582_s28 = scalar_lea.sflag [#allocation5], %s469_s2 }
  0x3c   : > { %6628 = vmatprep.subr.bf16.mxu0 %v7087_v3  ;;  %979 = vst [vmem:[#allocation2 + $0x18] sm:$0x1] %v978_v47  ;;  %s8547_s19 = scalar_lea.vmem [#allocation4], %s5534_s15  ;;  %s7029_s15 = scalar_lea.vmem %s7028_s20, 2048 }
  0x3d   : > { %s5459_s26 = sshll.u32 %s8547_s19, 4  ;;  %s8571_s26 = int_to_ptr.vmem [resolvable:$true] %s5459_s26 }
  0x3e   : > { %s7023_s0 = scalar_lea.vmem %s8571_s26, 1024  ;;  %p7030_p0 = scmp.lt.s32.totalorder %s8571_s26, %s7028_s20 }
  0x3f   : > { %6630 = vmatpush3.bf16.msra.mxu0 %v6611_v10  ;;  %p7024_p11 = scmp.ne.s32.totalorder %s8571_s26, %s7023_s0  ;;  %p7031_p1 = scmp.lt.s32.totalorder %s7029_s15, %s7023_s0 }
  0x40   : > { %6631 = vmatprep.subr.bf16.mxu0 %v7087_v3 }
  0x41   : > { %p7025_p12 = pnand %p7024_p11, %p7207_p5  ;;  %p7032_p2 = por %p7031_p1, %p7030_p0 }
  0x43   : > { %6633 = vmatpush3.bf16.msra.mxu0 %v6614_v15  ;;  %p7026_p13 = pneg %p7025_p12 }
  0x44   : > { %6634 = vmatprep.subr.bf16.mxu0 %v7087_v3 }
  0x45   : > { %p7033_p3 = pnand %p7032_p2, %p7026_p13 }
  0x47   : > { %6636 = vmatpush3.bf16.msra.mxu0 %v6617_v33 }
  0x48   : > { %6637 = vmatprep.subr.bf16.mxu0 %v7087_v3 }
 0x10d   : > { %v594_v49 = vpop.f32.mrb[0].mxu0 }
 0x10e   : > { %v598_v50 = vmul.f32 0.0078125, %v594_v49  ;;  %v6217_v51 = vpop.f32.mrb[1].mxu0  ;;  %v1009_v49 = vld [vmem:[#allocation2 + $0x1c] sm:$0x1] }
 0x10f   : > { %v1010_v51 = vsel %vm7386_vm8, 0, %v1009_v49 }
 0x110   : > { %6227 = vmatmul.mubr.msk.f32.vlgmr.msra.gmra.mrb[0].mxu1 %vm599_vm2, %v598_v50  ;;  %v980_v50 = vld [vmem:[#allocation2 + $0x20] sm:$0x1]  ;;  %1011 = vst [vmem:[#allocation2 + $0x1c] sm:$0x1] %v1010_v51 }
 0x111   : > { %6430 = vmatprep.mubr.msk.f32.mxu1 %vm7088_vm0, %v7089_v6  ;;  %v981_v52 = vsel %vm7378_vm6, 0, %v980_v50 }
 0x112   : > { %982 = vst [vmem:[#allocation2 + $0x20] sm:$0x1] %v981_v52 }
 0x1e3   : > { %v669_v55 = vpop.f32.mrb[0].mxu1 }
 0x1e4   : > { %v676_v56 = vrot.slane %v669_v55, %v7322_v54  ;;  %v6228_v57 = vpop.f32.mrb[1].mxu1  ;;  %v1012_v55 = vld [vmem:[#allocation2 + $0x24] sm:$0x1] }
 0x1e5   : > { %v1013_v57 = vsel %vm7386_vm8, 0, %v1012_v55 }
 0x1e6   : > { %v7326_v58 = vsub.f32 %v7268_v16, %v676_v56  ;;  %v7329_v59 = vsub.f32 %v7271_v17, %v676_v56  ;;  %v7332_v60 = vsub.f32 %v7274_v18, %v676_v56  ;;  %v7334_v61 = vsub.f32 %v484_v19, %v676_v56  ;;  %1014 = vst [vmem:[#allocation2 + $0x24] sm:$0x1] %v1013_v57 }
 0x1e7   : > { %v7336_v62 = vsub.f32 %v485_v20, %v676_v56  ;;  %v7345_v2 = vsub.f32 %v7281_v21, %v676_v56  ;;  %v7352_v9 = vsub.f32 %v7290_v25, %v676_v56  ;;  %v7358_v14 = vsub.f32 %v7293_v26, %v676_v56 }
 0x1e8   : > { %v685_v63 = vmul.f32 %v7326_v58, %v7326_v58  ;;  %v686_v0 = vmul.f32 %v7329_v59, %v7329_v59  ;;  %v687_v1 = vmul.f32 %v7332_v60, %v7332_v60  ;;  %v688_v4 = vmul.f32 %v7334_v61, %v7334_v61 }
 0x1e9   : > { %v689_v10 = vmul.f32 %v7336_v62, %v7336_v62  ;;  %v690_v15 = vmul.f32 %v7345_v2, %v7345_v2  ;;  %v691_v18 = vmul.f32 %v7352_v9, %v7352_v9  ;;  %v692_v21 = vmul.f32 %v7358_v14, %v7358_v14 }
 0x1ea   : > { %v693_v5 = vsel %vm503_vm1, %v685_v63, 0.0  ;;  %v694_v7 = vsel %vm503_vm1, %v686_v0, 0.0  ;;  %v696_v11 = vsel %vm503_vm1, %v687_v1, 0.0  ;;  %v698_v16 = vsel %vm503_vm1, %v688_v4, 0.0  ;;  %v1015_v63 = vld [vmem:[#allocation2 + $0x2c] sm:$0x1] }
 0x1eb   : > { %v695_v8 = vadd.f32 %v694_v7, %v693_v5  ;;  %v700_v19 = vsel %vm503_vm1, %v689_v10, 0.0  ;;  %v702_v22 = vsel %vm503_vm1, %v690_v15, 0.0  ;;  %v704_v24 = vsel %vm503_vm1, %v691_v18, 0.0  ;;  %v986_v0 = vld [vmem:[#allocation2 + $0x30] sm:$0x1]  ;;  %v6853_v10 = vld [vmem:[%s8629_s6 + $0x28] sm:$0xff]  }
 0x1ec   : > { %v706_v26 = vsel %vm503_vm1, %v692_v21, 0.0  ;;  %v984_v56 = vsel %vm7378_vm6, 0, %v983_v53  ;;  %v1016_v1 = vsel %vm7386_vm8, 0, %v1015_v63  ;;  %v987_v4 = vsel %vm7378_vm6, 0, %v986_v0  ;;  %v989_v5 = vld [vmem:[#allocation2 + $0x38] sm:$0x1] }
 0x1ed   : > { %v697_v13 = vadd.f32 %v696_v11, %v695_v8  ;;  %985 = vst [vmem:[#allocation2 + $0x28] sm:$0x1] %v984_v56  ;;  %v1018_v7 = vld [vmem:[#allocation2 + $0x34] sm:$0x1]  ;;  %v6852_v8 = vld [vmem:[%s8629_s6 + $0x20] sm:$0xff]   ;;  %v990_v11 = vsel %vm7378_vm6, 0, %v989_v5 }
 0x1ee   : > { %1017 = vst [vmem:[#allocation2 + $0x2c] sm:$0x1] %v1016_v1  ;;  %988 = vst [vmem:[#allocation2 + $0x30] sm:$0x1] %v987_v4  ;;  %v1000_v18 = vld [vmem:[#allocation2 + $0x4] sm:$0x1] }
 0x1ef   : > { %v699_v17 = vadd.f32 %v698_v16, %v697_v13  ;;  %v1019_v13 = vsel %vm7386_vm8, 0, %v1018_v7  ;;  %991 = vst [vmem:[#allocation2 + $0x38] sm:$0x1] %v990_v11  ;;  %v1021_v16 = vld [vmem:[#allocation2 + $0x3c] sm:$0x1]  ;;  %v6854_v21 = vld [vmem:[%s8629_s6 + $0x30] sm:$0xff]  }
 0x1f0   : > { %1020 = vst [vmem:[#allocation2 + $0x34] sm:$0x1] %v1019_v13 }
 0x1f1   : > { %v701_v20 = vadd.f32 %v700_v19, %v699_v17  ;;  %v968_v17 = vld [vmem:[#allocation2] sm:$0x1] }
 0x1f2   : > { %v969_v19 = vsel %vm7378_vm6, 0, %v968_v17 }
 0x1f3   : > { %v703_v23 = vadd.f32 %v702_v22, %v701_v20  ;;  %v1001_v20 = vsel %vm7386_vm8, 0, %v1000_v18  ;;  %970 = vst [vmem:[#allocation2] sm:$0x1] %v969_v19  ;;  %v1022_v22 = vsel %vm7386_vm8, 0, %v1021_v16 }
 0x1f4   : > { %1002 = vst [vmem:[#allocation2 + $0x4] sm:$0x1] %v1001_v20  ;;  %1023 = vst [vmem:[#allocation2 + $0x3c] sm:$0x1] %v1022_v22 }
 0x1f5   : > { %v705_v25 = vadd.f32 %v704_v24, %v703_v23  ;;  %v6855_v23 = vld [vmem:[%s8629_s6 + $0x38] sm:$0xff]   ;;  %v992_v24 = vld [vmem:[#allocation2 + $0x40] sm:$0x1] }
 0x1f7   : > { %v707_v27 = vadd.f32 %v706_v26, %v705_v25  ;;  %v993_v25 = vsel %vm7378_vm6, 0, %v992_v24  ;;  %v7451_v26 = vld [vmem:[%s8629_s6] sm:$0xff]  }
 0x1f8   : > { %994 = vst [vmem:[#allocation2 + $0x40] sm:$0x1] %v993_v25 }
 0x1f9   : > { %v708_v28 = vrot.slane %v707_v27, 4 }
 0x1fb   : > { %v709_v29 = vadd.f32 %v708_v28, %v707_v27  ;;  %v1024_v27 = vld [vmem:[#allocation2 + $0x44] sm:$0x1] }
 0x1fc   : > { %v1025_v28 = vsel %vm7386_vm8, 0, %v1024_v27 }
 0x1fd   : > { %v710_v30 = vrot.slane %v709_v29, 2  ;;  %1026 = vst [vmem:[#allocation2 + $0x44] sm:$0x1] %v1025_v28 }
 0x1ff   : > { %v711_v31 = vadd.f32 %v710_v30, %v709_v29  ;;  %v995_v29 = vld [vmem:[#allocation2 + $0x48] sm:$0x1] }
 0x200   : > { %v996_v30 = vsel %vm7378_vm6, 0, %v995_v29  ;;  %v7487_v29 = vld [vmem:[#allocation2] sm:$0xf] }
 0x201   : > { %v712_v32 = vrot.slane %v711_v31, 1  ;;  %997 = vst [vmem:[#allocation2 + $0x48] sm:$0x1] %v996_v30  ;;  %v1221_v30 = vshrl.u32 %v7487_v29, 16 }
 0x203   : > { %v713_v33 = vadd.f32 %v712_v32, %v711_v31  ;;  %v1027_v31 = vld [vmem:[#allocation2 + $0x4c] sm:$0x1] }
 0x204   : > { %v1028_v32 = vsel %vm7386_vm8, 0, %v1027_v31  ;;  %v1224_v31 = vshll.u32 %v7487_v29, 16 }
 0x205   : > { %6246 = vmatmul.mubr.msk.f32.vlgmr.msra.gmra.mrb[2].mxu0 %vm503_vm1, %v713_v33  ;;  %1029 = vst [vmem:[#allocation2 + $0x4c] sm:$0x1] %v1028_v32 }
 0x206   : > { %6639 = vmatpush3.bf16.msra.mxu0 %v7252_v12  ;;  %6256 = vmatprep.mubr.msk.f32.mxu0 %vm7088_vm0, %v7089_v6  ;;  %v971_v12 = vld [vmem:[#allocation2 + $0x8] sm:$0x1] }
 0x207   : > { %6640 = vmatprep.subr.bf16.mxu0 %v7087_v3  ;;  %v972_v39 = vsel %vm7378_vm6, 0, %v971_v12 }
 0x208   : > { %973 = vst [vmem:[#allocation2 + $0x8] sm:$0x1] %v972_v39 }
 0x20a   : > { %6642 = vmatpush3.bf16.msra.mxu0 %v6623_v48  ;;  %v1007_v48 = vsel %vm7386_vm8, 0, %v1006_v46 }
 0x20b   : > { %1008 = vst [vmem:[#allocation2 + $0x14] sm:$0x1] %v1007_v48  ;;  %6259 = vmatprep.subr.bf16.mxu0 %v6852_v8 }
 0x2d8   : > { %v783_v34 = vpop.f32.mrb[2].mxu0 }
 0x2d9   : > { %v787_v35 = vmul.f32 0.0078125, %v783_v34  ;;  %v6247_v36 = vpop.f32.mrb[3].mxu0 }
 0x2db   : > { %6257 = vmatmul.mubr.msk.f32.vlgmr.msra.gmra.mrb[4].mxu0 %vm599_vm2, %v787_v35 }
 0x2dc   : > { %6260 = vmatpush3.bf16.msra.mxu0 %v6852_v8 }
 0x2dd   : > { %6261 = vmatprep.subr.bf16.mxu0 %v6853_v10 }
 0x2e0   : > { %6262 = vmatpush3.bf16.msra.mxu0 %v6853_v10 }
 0x2e1   : > { %6263 = vmatprep.subr.bf16.mxu0 %v6854_v21 }
 0x2e4   : > { %6264 = vmatpush3.bf16.msra.mxu0 %v6854_v21 }
 0x2e5   : > { %6265 = vmatprep.subr.bf16.mxu0 %v6855_v23 }
 0x2e8   : > { %6266 = vmatpush3.bf16.msra.mxu0 %v6855_v23 }
 0x2e9   : > { %6275 = vmatprep.subr.bf16.mxu0 %v7451_v26 }
 0x3ae   : > { %v857_v33 = vpop.f32.mrb[4].mxu0 }
 0x3af   : > { %v858_v34 = vadd.f32 1e-05, %v857_v33  ;;  %v6258_v35 = vpop.f32.mrb[5].mxu0 }
 0x3b1   : > { %6947 = vrsqrt.f32 %v858_v34 }
 0x3bb   : > { %v6948_v36 = vpop.eup %6947 }
 0x3bc   : > { %v865_v12 = vrot.slane %v6948_v36, %v7322_v54  ;;  %v7491_v36 = vrot.slane %v1221_v30, 4 }
 0x3be   : > { %v866_v39 = vmul.f32 %v865_v12, %v7326_v58  ;;  %v867_v41 = vmul.f32 %v865_v12, %v7329_v59  ;;  %v868_v42 = vmul.f32 %v865_v12, %v7332_v60  ;;  %v869_v43 = vmul.f32 %v865_v12, %v7334_v61 }
 0x3bf   : > { %v870_v45 = vmul.f32 %v865_v12, %v7336_v62  ;;  %v871_v46 = vmul.f32 %v865_v12, %v7345_v2  ;;  %v872_v47 = vmul.f32 %v865_v12, %v7352_v9  ;;  %v873_v59 = vmul.f32 %v865_v12, %v7358_v14 }
 0x3c0   : > { %v880_v48 = vmul.f32 %v5541_v38, %v866_v39  ;;  %v881_v49 = vmul.f32 %v5541_v38, %v867_v41  ;;  %v882_v50 = vmul.f32 %v5541_v38, %v868_v42  ;;  %v883_v58 = vmul.f32 %v5541_v38, %v869_v43 }
 0x3c1   : > { %v884_v51 = vmul.f32 %v5541_v38, %v870_v45  ;;  %v885_v60 = vmul.f32 %v5541_v38, %v871_v46  ;;  %v886_v52 = vmul.f32 %v5541_v38, %v872_v47  ;;  %v887_v4 = vmul.f32 %v5541_v38, %v873_v59  ;;  %v7495_v45 = vld [vmem:[#allocation2 + $0x4] sm:$0x1] }
 0x3c2   : > { %v894_v61 = vadd.f32 %v5542_v44, %v880_v48  ;;  %v895_v53 = vadd.f32 %v5542_v44, %v881_v49  ;;  %v896_v55 = vadd.f32 %v5542_v44, %v882_v50  ;;  %v897_v56 = vadd.f32 %v5542_v44, %v883_v58 }
 0x3c3   : > { %v7475_v57 = vadd.f32 %v5542_v44, %v884_v51  ;;  %v7477_v62 = vadd.f32 %v5542_v44, %v885_v60  ;;  %v7479_v2 = vadd.f32 %v5542_v44, %v886_v52  ;;  %v7484_v8 = vadd.f32 %v5542_v44, %v887_v4 }
 0x3c4   : > { %v5543_v9 = vmul.f32 -1.442695, %v894_v61  ;;  %v5544_v63 = vmul.f32 -1.442695, %v895_v53  ;;  %v5545_v0 = vmul.f32 -1.442695, %v896_v55 }
 0x3c5   : > { %v5546_v1 = vmul.f32 -1.442695, %v897_v56  ;;  %v5547_v14 = vmul.f32 -1.442695, %v7475_v57  ;;  %v5548_v5 = vmul.f32 -1.442695, %v7477_v62 }
 0x3c6   : > { %6949 = vpow2.f32 %v5543_v9  ;;  %v5549_v7 = vmul.f32 -1.442695, %v7479_v2  ;;  %v5550_v10 = vmul.f32 -1.442695, %v7484_v8  ;;  %v7493_v12 = vrot.slane %v1224_v31, 5 }
 0x3c7   : > { %6951 = vpow2.f32 %v5544_v63  ;;  %v1230_v49 = vshll.u32 %v7495_v45, 16  ;;  %v1157_v31 = vld [vmem:[#allocation2 + $0x18] sm:$0xf] }
 0x3c8   : > { %6953 = vpow2.f32 %v5545_v0  ;;  %v1227_v60 = vor.u32 %v7493_v12, %v7491_v36 }
 0x3c9   : > { %6955 = vpow2.f32 %v5546_v1 }
 0x3ca   : > { %6957 = vpow2.f32 %v5547_v14 }
 0x3cb   : > { %6959 = vpow2.f32 %v5548_v5 }
 0x3cc   : > { %6961 = vpow2.f32 %v5549_v7 }
 0x3cd   : > { %6963 = vpow2.f32 %v5550_v10 }
 0x3d0   : > { %v6950_v11 = vpop.eup %6949 }
 0x3d1   : > { %v6952_v13 = vpop.eup %6951  ;;  %v926_v16 = vadd.f32 1.0, %v6950_v11 }
 0x3d2   : > { %v6954_v17 = vpop.eup %6953  ;;  %v927_v18 = vadd.f32 1.0, %v6952_v13  ;;  %v1145_v13 = vld [vmem:[#allocation2 + $0x8] sm:$0xf] }
 0x3d3   : > { %v6956_v19 = vpop.eup %6955  ;;  %v928_v20 = vadd.f32 1.0, %v6954_v17  ;;  %6965 = vrcp.f32 %v926_v16 }
 0x3d4   : > { %v6958_v21 = vpop.eup %6957  ;;  %v929_v22 = vadd.f32 1.0, %v6956_v19  ;;  %6967 = vrcp.f32 %v927_v18  ;;  %v1148_v19 = vld [vmem:[#allocation2 + $0xc] sm:$0x1] }
 0x3d5   : > { %v6960_v23 = vpop.eup %6959  ;;  %v930_v24 = vadd.f32 1.0, %v6958_v21  ;;  %6969 = vrcp.f32 %v928_v20  ;;  %v1151_v20 = vld [vmem:[#allocation2 + $0x10] sm:$0xf] }
 0x3d6   : > { %v6962_v25 = vpop.eup %6961  ;;  %v931_v27 = vadd.f32 1.0, %v6960_v23  ;;  %6971 = vrcp.f32 %v929_v22 }
 0x3d7   : > { %v932_v28 = vadd.f32 1.0, %v6962_v25  ;;  %6973 = vrcp.f32 %v930_v24  ;;  %v6964_v32 = vpop.eup %6963  ;;  %v1154_v24 = vld [vmem:[#allocation2 + $0x14] sm:$0x1] }
 0x3d8   : > { %6975 = vrcp.f32 %v931_v27  ;;  %v933_v39 = vadd.f32 1.0, %v6964_v32 }
 0x3d9   : > { %6977 = vrcp.f32 %v932_v28 }
 0x3da   : > { %6979 = vrcp.f32 %v933_v39 }
 0x3dd   : > { %v6966_v33 = vpop.eup %6965 }
 0x3de   : > { %v6968_v34 = vpop.eup %6967  ;;  %v950_v35 = vmul.f32 %v6966_v33, %v894_v61 }
 0x3df   : > { %v6970_v38 = vpop.eup %6969  ;;  %v951_v41 = vmul.f32 %v6968_v34, %v895_v53 }
 0x3e0   : > { %v6972_v42 = vpop.eup %6971  ;;  %v952_v43 = vmul.f32 %v6970_v38, %v896_v55  ;;  %v5982_v44 = vpack.c.bf16 %v950_v35, %v950_v35  ;;  %v1160_v38 = vld [vmem:[#allocation2 + $0x1c] sm:$0x1] }
 0x3e1   : > { %v6974_v46 = vpop.eup %6973  ;;  %v953_v47 = vmul.f32 %v6972_v42, %v897_v56  ;;  %v5983_v48 = vpack.c.bf16 %v951_v41, %v951_v41 }
 0x3e2   : > { %v6976_v50 = vpop.eup %6975  ;;  %v954_v58 = vmul.f32 %v6974_v46, %v7475_v57  ;;  %v5984_v59 = vpack.c.bf16 %v952_v43, %v952_v43  ;;  %v1063_v51 = vshrl.u32 %v5982_v44, 16  ;;  %v1066_v4 = vshll.u32 %v5982_v44, 16  ;;  %v1163_v44 = vld [vmem:[#allocation2 + $0x20] sm:$0xf]  ;;  %v1169_v46 = vld [vmem:[#allocation2 + $0x28] sm:$0xf] }
 0x3e3   : > { %v6978_v52 = vpop.eup %6977  ;;  %v955_v61 = vmul.f32 %v6976_v50, %v7477_v62  ;;  %v5985_v53 = vpack.c.bf16 %v953_v47, %v953_v47  ;;  %v1071_v55 = vshrl.u32 %v5983_v48, 16  ;;  %v1074_v57 = vshll.u32 %v5983_v48, 16 }
 0x3e4   : > { %v956_v9 = vmul.f32 %v6978_v52, %v7479_v2  ;;  %v5986_v56 = vpack.c.bf16 %v954_v58, %v954_v58  ;;  %v1065_v63 = vrot.slane %v1063_v51, 7  ;;  %v1079_v0 = vshrl.u32 %v5984_v59, 16  ;;  %v1175_v51 = vld [vmem:[#allocation2 + $0x30] sm:$0xf]  ;;  %v1181_v52 = vld [vmem:[#allocation2 + $0x38] sm:$0xf] }
 0x3e5   : > { %v5987_v1 = vpack.c.bf16 %v955_v61, %v955_v61  ;;  %v1073_v14 = vrot.slane %v1071_v55, 7  ;;  %v1082_v10 = vshll.u32 %v5984_v59, 16  ;;  %v1087_v11 = vshrl.u32 %v5985_v53, 16  ;;  %v1166_v59 = vld [vmem:[#allocation2 + $0x24] sm:$0x1]  ;;  %v6980_v61 = vpop.eup %6979 }
 0x3e6   : > { %v5988_v5 = vpack.c.bf16 %v956_v9, %v956_v9  ;;  %v1081_v7 = vrot.slane %v1079_v0, 7  ;;  %v1068_v16 = vor.u32 %v1066_v4, %v1065_v63  ;;  %v1090_v62 = vshll.u32 %v5985_v53, 16  ;;  %v1178_v0 = vld [vmem:[#allocation2 + $0x34] sm:$0x1] }
 0x3e7   : > { %v1076_v17 = vor.u32 %v1074_v57, %v1073_v14  ;;  %v1077_v18 = vrot.slane %v1073_v14, 4  ;;  %v1089_v22 = vrot.slane %v1087_v11, 7  ;;  %v1095_v23 = vshrl.u32 %v5986_v56, 16 }
 0x3e8   : > { %v1084_v21 = vor.u32 %v1082_v10, %v1081_v7  ;;  %v1085_v2 = vrot.slane %v1081_v7, 4  ;;  %v1098_v25 = vshll.u32 %v5986_v56, 16  ;;  %v1103_v27 = vshrl.u32 %v5987_v1, 16 }
 0x3e9   : > { %v1106_v28 = vshll.u32 %v5987_v1, 16  ;;  %v1111_v30 = vshrl.u32 %v5988_v5, 16  ;;  %v1092_v32 = vor.u32 %v1090_v62, %v1089_v22  ;;  %v1097_v33 = vrot.slane %v1095_v23, 7 }
 0x3ea   : > { %v1114_v34 = vshll.u32 %v5988_v5, 16  ;;  %v1069_v35 = vrot.slane %v1065_v63, 4  ;;  %v1105_v39 = vrot.slane %v1103_v27, 7  ;;  %v1146_v42 = vsel %vm7430_vm9, %v1068_v16, %v1145_v13  ;;  %v1172_v63 = vld [vmem:[#allocation2 + $0x2c] sm:$0x1] }
 0x3eb   : > { %v1113_v41 = vrot.slane %v1111_v30, 7  ;;  %v1152_v43 = vsel %vm7430_vm9, %v1076_v17, %v1151_v20  ;;  %v1100_v47 = vor.u32 %v1098_v25, %v1097_v33  ;;  %1147 = vst [vmem:[#allocation2 + $0x8] sm:$0xf] %v1146_v42  ;;  %v1155_v50 = vsel %vm7378_vm6, %v1077_v18, %v1154_v24  ;;  %v1184_v5 = vld [vmem:[#allocation2 + $0x3c] sm:$0x1] }
 0x3ec   : > { %v1149_v48 = vsel %vm7378_vm6, %v1069_v35, %v1148_v19  ;;  %1153 = vst [vmem:[#allocation2 + $0x10] sm:$0xf] %v1152_v43  ;;  %v1158_v58 = vsel %vm7430_vm9, %v1084_v21, %v1157_v31  ;;  %v1108_v53 = vor.u32 %v1106_v28, %v1105_v39  ;;  %1156 = vst [vmem:[#allocation2 + $0x14] sm:$0x1] %v1155_v50  ;;  %v1093_v56 = vrot.slane %v1089_v22, 4 }
 0x3ed   : > { %v1116_v55 = vor.u32 %v1114_v34, %v1113_v41  ;;  %1150 = vst [vmem:[#allocation2 + $0xc] sm:$0x1] %v1149_v48  ;;  %1159 = vst [vmem:[#allocation2 + $0x18] sm:$0xf] %v1158_v58  ;;  %v1161_v9 = vsel %vm7378_vm6, %v1085_v2, %v1160_v38  ;;  %v1101_v1 = vrot.slane %v1097_v33, 4  ;;  %v1164_v4 = vsel %vm7430_vm9, %v1092_v32, %v1163_v44 }
 0x3ee   : > { %1162 = vst [vmem:[#allocation2 + $0x1c] sm:$0x1] %v1161_v9  ;;  %v1170_v14 = vsel %vm7430_vm9, %v1100_v47, %v1169_v46  ;;  %v1109_v57 = vrot.slane %v1105_v39, 4  ;;  %1165 = vst [vmem:[#allocation2 + $0x20] sm:$0xf] %v1164_v4  ;;  %v1167_v7 = vsel %vm7378_vm6, %v1093_v56, %v1166_v59  ;;  %v1117_v10 = vrot.slane %v1113_v41, 4 }
 0x3ef   : > { %1171 = vst [vmem:[#allocation2 + $0x28] sm:$0xf] %v1170_v14  ;;  %v1176_v11 = vsel %vm7430_vm9, %v1108_v53, %v1175_v51  ;;  %v1182_v13 = vsel %vm7430_vm9, %v1116_v55, %v1181_v52  ;;  %v957_v16 = vmul.f32 %v6980_v61, %v7484_v8  ;;  %1168 = vst [vmem:[#allocation2 + $0x24] sm:$0x1] %v1167_v7  ;;  %v1228_v8 = vrot.slane %v1227_v60, 4 }
 0x3f0   : > { %v1173_v17 = vsel %vm7378_vm6, %v1101_v1, %v1172_v63  ;;  %1177 = vst [vmem:[#allocation2 + $0x30] sm:$0xf] %v1176_v11  ;;  %v1179_v18 = vsel %vm7378_vm6, %v1109_v57, %v1178_v0  ;;  %1183 = vst [vmem:[#allocation2 + $0x38] sm:$0xf] %v1182_v13  ;;  %v1185_v62 = vsel %vm7378_vm6, %v1117_v10, %v1184_v5  ;;  %v1232_v20 = vrot.slane %v1230_v49, 5 }
 0x3f1   : > { %1174 = vst [vmem:[#allocation2 + $0x2c] sm:$0x1] %v1173_v17  ;;  %1180 = vst [vmem:[#allocation2 + $0x34] sm:$0x1] %v1179_v18  ;;  %v7541_v2 = vpack.c.bf16 %v957_v16, %v957_v16 }
 0x3f2   : > { %1186 = vst [vmem:[#allocation2 + $0x3c] sm:$0x1] %v1185_v62  ;;  %v7532_v19 = vld [vmem:[#allocation2 + $0x8] sm:$0xf]  ;;  %v1233_v39 = vsel %vm7549_vm12, %v1228_v8, %v1232_v20 }
 0x3f3   : > { %v7539_v21 = vld [vmem:[#allocation2 + $0x10] sm:$0xf]  ;;  %v1235_v23 = vshrl.u32 %v7532_v19, 16  ;;  %v1238_v24 = vshll.u32 %v7532_v19, 16  ;;  %v7554_v12 = vld [vmem:[#allocation2 + $0x14] sm:$0x1] }
 0x3f4   : > { %v7543_v22 = vld [vmem:[#allocation2 + $0xc] sm:$0x1]  ;;  %v7547_v25 = vld [vmem:[#allocation2 + $0x18] sm:$0xf]  ;;  %v1249_v49 = vshrl.u32 %v7539_v21, 16  ;;  %v1252_v31 = vshll.u32 %v7539_v21, 16 }
 0x3f5   : > { %v1244_v36 = vshll.u32 %v7543_v22, 16  ;;  %v1237_v60 = vrot.slane %v1235_v23, 4  ;;  %v1240_v28 = vrot.slane %v1238_v24, 5  ;;  %v7557_v30 = vld [vmem:[#allocation2 + $0x1c] sm:$0x1]  ;;  %v1258_v32 = vshll.u32 %v7554_v12, 16 }
 0x3f6   : > { %v1251_v33 = vrot.slane %v1249_v49, 4  ;;  %v1263_v34 = vshrl.u32 %v7547_v25, 16  ;;  %v1266_v35 = vshll.u32 %v7547_v25, 16  ;;  %v7563_v38 = vld [vmem:[#allocation2 + $0x20] sm:$0xf]  ;;  %v1254_v42 = vrot.slane %v1252_v31, 5 }
 0x3f7   : > { %v1241_v41 = vor.u32 %v1240_v28, %v1237_v60  ;;  %v7567_v43 = vld [vmem:[#allocation2 + $0x28] sm:$0xf]  ;;  %v7569_v44 = vld [vmem:[#allocation2 + $0x24] sm:$0x1]  ;;  %v1119_v46 = vshrl.u32 %v7541_v2, 16  ;;  %v1246_v47 = vrot.slane %v1244_v36, 5 }
 0x3f8   : > { %v1265_v48 = vrot.slane %v1263_v34, 4  ;;  %v1268_v50 = vrot.slane %v1266_v35, 5  ;;  %v1272_v58 = vshll.u32 %v7557_v30, 16  ;;  %v1255_v51 = vor.u32 %v1254_v42, %v1251_v33  ;;  %v7574_v55 = vld [vmem:[#allocation2 + $0x2c] sm:$0x1] }
 0x3f9   : > { %v1242_v59 = vrot.slane %v1241_v41, 4  ;;  %v1260_v52 = vrot.slane %v1258_v32, 5  ;;  %v1277_v61 = vshrl.u32 %v7563_v38, 16  ;;  %v1280_v9 = vshll.u32 %v7563_v38, 16  ;;  %v7582_v57 = vld [vmem:[#allocation2 + $0x30] sm:$0xf] }
 0x3fa   : > { %v1269_v53 = vor.u32 %v1268_v50, %v1265_v48  ;;  %v1286_v56 = vshll.u32 %v7569_v44, 16  ;;  %v1291_v63 = vshrl.u32 %v7567_v43, 16  ;;  %v1256_v1 = vrot.slane %v1255_v51, 4  ;;  %v7587_v62 = vld [vmem:[#allocation2 + $0x38] sm:$0xf]  ;;  %v6857_v31 = vld [vmem:[%s8629_s6 + $0x8] sm:$0xff]  }
 0x3fb   : > { %v1247_v0 = vsel %vm7549_vm12, %v1242_v59, %v1246_v47  ;;  %v1279_v4 = vrot.slane %v1277_v61, 4  ;;  %v1294_v14 = vshll.u32 %v7567_v43, 16  ;;  %v1274_v10 = vrot.slane %v1272_v58, 5  ;;  %v7592_v23 = vld [vmem:[#allocation2 + $0x34] sm:$0x1] }
 0x3fc   : > { %v5567_v5 = vcombine.low %v1233_v39, %v1247_v0  ;;  %v1270_v7 = vrot.slane %v1269_v53, 4  ;;  %v1282_v11 = vrot.slane %v1280_v9, 5  ;;  %v1261_v13 = vsel %vm7549_vm12, %v1256_v1, %v1260_v52  ;;  %v7599_v33 = vld [vmem:[#allocation2 + $0x3c] sm:$0x1]  ;;  %v6858_v58 = vld [vmem:[%s8629_s6 + $0x10] sm:$0xff]  }
 0x3fd   : > { %v1293_v16 = vrot.slane %v1291_v63, 4  ;;  %v1296_v17 = vrot.slane %v1294_v14, 5  ;;  %v1300_v18 = vshll.u32 %v7574_v55, 16  ;;  %v1305_v24 = vshrl.u32 %v7582_v57, 16  ;;  %v1187_v14 = vld [vmem:[#allocation2 + $0x40] sm:$0xf] }
 0x3fe   : > { %6267 = vmatprep.mubr.msk.bf16.mxu0 %vm503_vm1, %v5567_v5  ;;  %v1275_v8 = vsel %vm7549_vm12, %v1270_v7, %v1274_v10  ;;  %v1283_v20 = vor.u32 %v1282_v11, %v1279_v4  ;;  %v1308_v36 = vshll.u32 %v7582_v57, 16  ;;  %v1288_v60 = vrot.slane %v1286_v56, 5  ;;  %v6859_v10 = vld [vmem:[%s8629_s6 + $0x18] sm:$0xff]  }
 0x3ff   : > { %v5568_v49 = vcombine.low %v1261_v13, %v1275_v8  ;;  %v1297_v28 = vor.u32 %v1296_v17, %v1293_v16  ;;  %v1307_v34 = vrot.slane %v1305_v24, 4  ;;  %v1319_v39 = vshrl.u32 %v7587_v62, 16  ;;  %v6860_v17 = vld [vmem:[%s8629_s6 + $0x40] sm:$0xff]   ;;  %v1576_v24 = vld [vmem:[#allocation2 + $0x8] sm:$0xe] }
 0x400   : > { %v1284_v32 = vrot.slane %v1283_v20, 4  ;;  %v1310_v35 = vrot.slane %v1308_v36, 5  ;;  %v1302_v42 = vrot.slane %v1300_v18, 5  ;;  %v1314_v47 = vshll.u32 %v7592_v23, 16  ;;  %v1190_v8 = vld [vmem:[#allocation2 + $0x44] sm:$0x1] }
 0x401   : > { %6268 = vmatmul.mubr.msk.bf16.vlgmr.msra.gmra.mrb[8].mxu0 %vm503_vm1, %v5568_v49  ;;  %v1298_v41 = vrot.slane %v1297_v28, 4  ;;  %v1322_v48 = vshll.u32 %v7587_v62, 16  ;;  %v1321_v51 = vrot.slane %v1319_v39, 4  ;;  %v1121_v52 = vrot.slane %v1119_v46, 7  ;;  %v1575_v20 = vld [vmem:[#allocation2] sm:$0xe] }
 0x402   : > { %6276 = vmatpush3.bf16.msra.mxu0 %v7451_v26  ;;  %v1289_v50 = vsel %vm7549_vm12, %v1284_v32, %v1288_v60  ;;  %v1311_v59 = vor.u32 %v1310_v35, %v1307_v34  ;;  %v1328_v9 = vshll.u32 %v7599_v33, 16  ;;  %v1122_v26 = vshll.u32 %v7541_v2, 16  ;;  %v1577_v32 = vld [vmem:[#allocation2 + $0x10] sm:$0xe]  ;;  %v1579_v34 = vld [vmem:[#allocation2 + $0x20] sm:$0xe] }
 0x403   : > { %v1303_v61 = vsel %vm7549_vm12, %v1298_v41, %v1302_v42  ;;  %6277 = vmatprep.subr.bf16.mxu0 %v6857_v31  ;;  %v1324_v53 = vrot.slane %v1322_v48, 5  ;;  %v1316_v0 = vrot.slane %v1314_v47, 5  ;;  %v5579_v16 = vcombine.low %v7487_v29, %v7532_v19  ;;  %v6863_v29 = vld [vmem:[%s8629_s6 + $0x48] sm:$0xff]   ;;  %v6866_v42 = vld [vmem:[%s8629_s6 + $0x58] sm:$0xff]  }
 0x404   : > { %v5569_v56 = vcombine.low %v1289_v50, %v1303_v61  ;;  %v1312_v63 = vrot.slane %v1311_v59, 4  ;;  %v1124_v4 = vor.u32 %v1122_v26, %v1121_v52  ;;  %v1330_v7 = vrot.slane %v1328_v9, 5  ;;  %v1580_v35 = vld [vmem:[#allocation2 + $0x28] sm:$0xe] }
 0x405   : > { %v1325_v1 = vor.u32 %v1324_v53, %v1321_v51  ;;  %v1125_v18 = vrot.slane %v1121_v52, 4  ;;  %v5580_v36 = vcombine.low %v7539_v21, %v7547_v25  ;;  %v5581_v49 = vcombine.low %v7563_v38, %v7567_v43  ;;  %v6864_v38 = vld [vmem:[%s8629_s6 + $0x50] sm:$0xff]  }
 0x406   : > { %6271 = vmatprep.mubr.msk.bf16.mxu0 %vm503_vm1, %v5569_v56  ;;  %6278 = vmatpush3.bf16.msra.mxu0 %v6857_v31  ;;  %v1317_v46 = vsel %vm7549_vm12, %v1312_v63, %v1316_v0  ;;  %v1188_v13 = vsel %vm7430_vm9, %v1124_v4, %v1187_v14  ;;  %v5591_v60 = vrot.slane %v1575_v20, 9  ;;  %v1604_v28 = vrot.slane %v7495_v45, 5  ;;  %v1910_v14 = vld [vmem:[#allocation2 + $0x8] sm:$0xf]  ;;  %v7015_v25 = vld [vmem:[%s7264_s21 + $0x10] sm:$0xff] }
 0x407   : > { %6279 = vmatprep.subr.bf16.mxu0 %v6858_v58  ;;  %v1326_v5 = vrot.slane %v1325_v1, 4  ;;  %1189 = vst [vmem:[#allocation2 + $0x40] sm:$0xf] %v1188_v13  ;;  %v1191_v19 = vsel %vm7378_vm6, %v1125_v18, %v1190_v8  ;;  %v5592_v31 = vrot.slane %v1576_v24, 9  ;;  %v1608_v21 = vrot.slane %v7543_v22, 5  ;;  %v6868_v1 = vld [vmem:[%s8629_s6 + $0x68] sm:$0xff]  }
 0x408   : > { %1192 = vst [vmem:[#allocation2 + $0x44] sm:$0x1] %v1191_v19  ;;  %v1605_v43 = vsel %vm7645_vm15, %v5591_v60, %v1604_v28  ;;  %v1578_v22 = vld [vmem:[#allocation2 + $0x18] sm:$0xe]  ;;  %v1612_v39 = vrot.slane %v7554_v12, 5  ;;  %v5582_v41 = vcombine.low %v7582_v57, %v7587_v62  ;;  %v1616_v47 = vrot.slane %v7557_v30, 5 }
 0x409   : > { %v1331_v2 = vsel %vm7549_vm12, %v1326_v5, %v1330_v7  ;;  %v1609_v45 = vsel %vm7645_vm15, %v5592_v31, %v1608_v21  ;;  %v5593_v50 = vrot.slane %v1577_v32, 9  ;;  %v5595_v59 = vrot.slane %v1579_v34, 9  ;;  %v6867_v57 = vld [vmem:[%s8629_s6 + $0x60] sm:$0xff]   ;;  %v1581_v30 = vld [vmem:[#allocation2 + $0x30] sm:$0xe] }
 0x40a   : > { %v5570_v11 = vcombine.low %v1317_v46, %v1331_v2  ;;  %6280 = vmatpush3.bf16.msra.mxu0 %v6858_v58  ;;  %v5607_v48 = vcombine.low %v1605_v43, %v1609_v45  ;;  %v5594_v58 = vrot.slane %v1578_v22, 9  ;;  %v1620_v51 = vrot.slane %v7569_v44, 5  ;;  %v1582_v62 = vld [vmem:[#allocation2 + $0x38] sm:$0xe]  ;;  %v1912_v46 = vld [vmem:[#allocation2 + $0x10] sm:$0xf] }
 0x40b   : > { %6281 = vmatprep.subr.bf16.mxu0 %v6859_v10  ;;  %v5596_v52 = vrot.slane %v1580_v35, 9  ;;  %v1624_v12 = vrot.slane %v7574_v55, 5  ;;  %v1613_v61 = vsel %vm7645_vm15, %v5593_v50, %v1612_v39  ;;  %v5597_v9 = vrot.slane %v1581_v30, 9  ;;  %v6869_v5 = vld [vmem:[%s8629_s6 + $0x70] sm:$0xff]   ;;  %v1914_v24 = vld [vmem:[#allocation2 + $0x18] sm:$0xf] }
 0x40c   : > { %6272 = vmatmul.mubr.msk.bf16.gmra.mrb[12].mxu0 %vm503_vm1, %v5570_v11  ;;  %v1617_v53 = vsel %vm7645_vm15, %v5594_v58, %v1616_v47  ;;  %v1621_v44 = vsel %vm7645_vm15, %v5595_v59, %v1620_v51  ;;  %v1628_v56 = vrot.slane %v7592_v23, 5  ;;  %v5598_v63 = vrot.slane %v1582_v62, 9  ;;  %v7696_v19 = vld [vmem:[#allocation2 + $0xc] sm:$0x1]  ;;  %v1918_v31 = vld [vmem:[#allocation2 + $0x28] sm:$0xf] }
 0x40d   : > { %6283 = vmatprep.mubr.msk.bf16.mxu0 %vm503_vm1, %v5579_v16  ;;  %v1625_v55 = vsel %vm7645_vm15, %v5596_v52, %v1624_v12  ;;  %v1632_v26 = vrot.slane %v7599_v33, 5  ;;  %v5608_v0 = vcombine.low %v1613_v61, %v1617_v53  ;;  %v1927_v7 = vshrl.u32 %v1910_v14, 16  ;;  %v6871_v16 = vld [vmem:[%s8629_s6 + $0x78] sm:$0xff]   ;;  %v1920_v21 = vld [vmem:[#allocation2 + $0x30] sm:$0xf] }
 0x40e   : > { %6282 = vmatpush3.bf16.msra.mxu0 %v6859_v10  ;;  %v5609_v4 = vcombine.low %v1621_v44, %v1625_v55  ;;  %v1629_v23 = vsel %vm7645_vm15, %v5597_v9, %v1628_v56  ;;  %v1930_v10 = vshll.u32 %v1910_v14, 16  ;;  %v1941_v2 = vshrl.u32 %v1912_v46, 16  ;;  %v6873_v59 = vld [vmem:[#allocation2 + $0x18] ss:$8 sps:$4 sm:$0xff]   ;;  %v6874_v30 = vld [vmem:[#allocation2 + $0x28] ss:$8 sps:$4 sm:$0xff]  }
 0x40f   : > { %6291 = vmatprep.subr.bf16.mxu0 %v6860_v17  ;;  %v1633_v33 = vsel %vm7645_vm15, %v5598_v63, %v1632_v26  ;;  %v1944_v11 = vshll.u32 %v1912_v46, 16  ;;  %v1955_v60 = vshrl.u32 %v1914_v24, 16  ;;  %v1958_v28 = vshll.u32 %v1914_v24, 16  ;;  %v1922_v53 = vld [vmem:[#allocation2 + $0x38] sm:$0xf]  ;;  %v6876_v26 = vld [vmem:[%s8629_s6 + $0x90] sm:$0xff]  }
 0x410   : > { %v5610_v13 = vcombine.low %v1629_v23, %v1633_v33  ;;  %v1932_v18 = vrot.slane %v1930_v10, 5  ;;  %v1943_v8 = vrot.slane %v1941_v2, 4  ;;  %v1936_v34 = vshll.u32 %v7696_v19, 16  ;;  %v1924_v63 = vld [vmem:[#allocation2 + $0x40] sm:$0xf] }
 0x411   : > { %v1946_v20 = vrot.slane %v1944_v11, 5  ;;  %v1983_v39 = vshrl.u32 %v1918_v31, 16  ;;  %v2000_v47 = vshll.u32 %v1920_v21, 16  ;;  %v1957_v50 = vrot.slane %v1955_v60, 4  ;;  %v7718_v14 = vld [vmem:[#allocation2 + $0x1c] sm:$0x1] }
 0x412   : > { %v1960_v58 = vrot.slane %v1958_v28, 5  ;;  %v1938_v62 = vrot.slane %v1936_v34, 5  ;;  %v7720_v46 = vld [vmem:[#allocation2 + $0x24] sm:$0x1]  ;;  %v7722_v33 = vld [vmem:[#allocation2 + $0x2c] sm:$0x1] }
 0x413   : > { %v1947_v45 = vor.u32 %v1946_v20, %v1943_v8  ;;  %v1985_v44 = vrot.slane %v1983_v39, 4  ;;  %v2002_v56 = vrot.slane %v2000_v47, 5  ;;  %v2014_v10 = vshll.u32 %v1922_v53, 16  ;;  %v6877_v20 = vld [vmem:[#allocation2 + $0x38] ss:$8 sps:$4 sm:$0xff]  }
 0x414   : > { %6284 = vmatmul.mubr.msk.bf16.vlgmr.msra.gmra.mrb[8].mxu0 %vm503_vm1, %v5580_v36  ;;  %v6870_v36 = vld [vmem:[#allocation2 + $0x8] ss:$8 sps:$4 sm:$0xff]   ;;  %v2025_v2 = vshrl.u32 %v1924_v63, 16  ;;  %v2028_v11 = vshll.u32 %v1924_v63, 16  ;;  %v1978_v8 = vshll.u32 %v7720_v46, 16  ;;  %v1992_v60 = vshll.u32 %v7722_v33, 16 }
 0x415   : > { %6292 = vmatpush3.bf16.msra.mxu0 %v6860_v17  ;;  %6287 = vmatprep.mubr.msk.bf16.mxu0 %vm503_vm1, %v5581_v49  ;;  %v1929_v17 = vrot.slane %v1927_v7, 4  ;;  %v7698_v49 = vld [vmem:[#allocation2 + $0x14] sm:$0x1]  ;;  %v1948_v52 = vrot.slane %v1947_v45, 4  ;;  %v2011_v7 = vshrl.u32 %v1922_v53, 16  ;;  %v6880_v53 = vld [vmem:[%s8629_s6 + $0xa8] sm:$0xff]  }
 0x416   : > { %6293 = vmatprep.subr.bf16.mxu0 %v6863_v29  ;;  %v1950_v35 = vshll.u32 %v7698_v49, 16  ;;  %v1994_v39 = vrot.slane %v1992_v60, 5  ;;  %v7740_v47 = vld [vmem:[#allocation2 + $0x44] sm:$0x1]  ;;  %v2194_v63 = vrot.slane %v7696_v19, 5 }
 0x417   : > { %v1933_v43 = vor.u32 %v1932_v18, %v1929_v17  ;;  %v1964_v18 = vshll.u32 %v7718_v14, 16  ;;  %v2170_v19 = vld [vmem:[#allocation2 + $0x18] sm:$0xe] }
 0x418   : > { %v1952_v61 = vrot.slane %v1950_v35, 5  ;;  %v1980_v35 = vrot.slane %v1978_v8, 5  ;;  %v5661_v8 = vrot.slane %v2170_v19, 9 }
 0x419   : > { %6294 = vmatpush3.bf16.msra.mxu0 %v6863_v29  ;;  %v1916_v29 = vld [vmem:[#allocation2 + $0x20] sm:$0xf]  ;;  %v1934_v51 = vrot.slane %v1933_v43, 4  ;;  %v2030_v43 = vrot.slane %v2028_v11, 5  ;;  %v1966_v34 = vrot.slane %v1964_v18, 5  ;;  %v6882_v18 = vld [vmem:[%s8629_s6 + $0xb8] sm:$0xff]  }
 0x41a   : > { %6295 = vmatprep.subr.bf16.mxu0 %v6864_v38  ;;  %v1969_v32 = vshrl.u32 %v1916_v29, 16  ;;  %v1972_v22 = vshll.u32 %v1916_v29, 16  ;;  %v2171_v11 = vld [vmem:[#allocation2 + $0x20] sm:$0xe] }
 0x41c   : > { %6288 = vmatmul.mubr.msk.bf16.gmra.mrb[12].mxu0 %vm503_vm1, %v5582_v41  ;;  %v1986_v41 = vshll.u32 %v1918_v31, 16  ;;  %v1971_v12 = vrot.slane %v1969_v32, 4  ;;  %v2013_v31 = vrot.slane %v2011_v7, 4 }
 0x41d   : > { %6296 = vmatpush3.bf16.msra.mxu0 %v6864_v38  ;;  %6299 = vmatprep.mubr.msk.bf16.mxu0 %vm503_vm1, %v5607_v48  ;;  %v6872_v38 = vld [vmem:[%s8629_s6 + $0x80] sm:$0xff]   ;;  %v6875_v48 = vld [vmem:[%s8629_s6 + $0x88] sm:$0xff]  }
 0x41e   : > { %6297 = vmatprep.subr.bf16.mxu0 %v6866_v42  ;;  %v1988_v55 = vrot.slane %v1986_v41, 5 }
 0x421   : > { %6298 = vmatpush3.bf16.msra.mxu0 %v6866_v42  ;;  %v1997_v42 = vshrl.u32 %v1920_v21, 16  ;;  %v2016_v21 = vrot.slane %v2014_v10, 5 }
 0x422   : > { %6307 = vmatprep.subr.bf16.mxu0 %v6867_v57 }
 0x423   : > { %v1999_v9 = vrot.slane %v1997_v42, 4  ;;  %v7738_v42 = vld [vmem:[#allocation2 + $0x3c] sm:$0x1] }
 0x424   : > { %6300 = vmatmul.mubr.msk.bf16.vlgmr.msra.gmra.mrb[8].mxu0 %vm503_vm1, %v5608_v0  ;;  %v1961_v0 = vor.u32 %v1960_v58, %v1957_v50  ;;  %v2017_v58 = vor.u32 %v2016_v21, %v2013_v31 }
 0x425   : > { %6308 = vmatpush3.bf16.msra.mxu0 %v6867_v57  ;;  %6303 = vmatprep.mubr.msk.bf16.mxu0 %vm503_vm1, %v5609_v4  ;;  %v1974_v57 = vrot.slane %v1972_v22, 5  ;;  %v1953_v4 = vsel %vm7549_vm12, %v1948_v52, %v1952_v61  ;;  %v6879_v22 = vld [vmem:[%s8629_s6 + $0xa0] sm:$0xff]  }
 0x426   : > { %6309 = vmatprep.subr.bf16.mxu0 %v6868_v1  ;;  %v1962_v17 = vrot.slane %v1961_v0, 4  ;;  %v2198_v0 = vrot.slane %v7698_v49, 5 }
 0x427   : > { %v1975_v23 = vor.u32 %v1974_v57, %v1971_v12  ;;  %v2020_v12 = vshll.u32 %v7738_v42, 16  ;;  %v2034_v57 = vshll.u32 %v7740_v47, 16 }
 0x429   : > { %6310 = vmatpush3.bf16.msra.mxu0 %v6868_v1  ;;  %v1939_v1 = vsel %vm7549_vm12, %v1934_v51, %v1938_v62  ;;  %v1976_v29 = vrot.slane %v1975_v23, 4  ;;  %v2169_v62 = vld [vmem:[#allocation2 + $0x10] sm:$0xe] }
 0x42a   : > { %6311 = vmatprep.subr.bf16.mxu0 %v6869_v5  ;;  %v5647_v24 = vcombine.low %v1939_v1, %v1953_v4  ;;  %v2022_v1 = vrot.slane %v2020_v12, 5  ;;  %v2036_v4 = vrot.slane %v2034_v57, 5  ;;  %v6881_v23 = vld [vmem:[%s8629_s6 + $0xb0] sm:$0xff]  }
 0x42b   : > { %v1981_v50 = vsel %vm7549_vm12, %v1976_v29, %v1980_v35  ;;  %v2206_v29 = vrot.slane %v7720_v46, 5  ;;  %v2218_v35 = vrot.slane %v7738_v42, 5 }
 0x42c   : > { %6304 = vmatmul.mubr.msk.bf16.gmra.mrb[12].mxu0 %vm503_vm1, %v5610_v13  ;;  %v1989_v13 = vor.u32 %v1988_v55, %v1985_v44  ;;  %v2018_v55 = vrot.slane %v2017_v58, 4  ;;  %v2503_v58 = vld [vmem:[#allocation2 + $0x18] sm:$0xf] }
 0x42d   : > { %6312 = vmatpush3.bf16.msra.mxu0 %v6869_v5  ;;  %6315 = vmatprep.mubr.msk.bf16.mxu0 %vm503_vm1, %v6870_v36  ;;  %v7724_v5 = vld [vmem:[#allocation2 + $0x34] sm:$0x1]  ;;  %v6878_v36 = vld [vmem:[%s8629_s6 + $0x98] sm:$0xff]   ;;  %v2532_v12 = vshrl.u32 %v2503_v58, 16  ;;  %v2535_v57 = vshll.u32 %v2503_v58, 16 }
 0x42e   : > { %6313 = vmatprep.subr.bf16.mxu0 %v6871_v16  ;;  %v2006_v28 = vshll.u32 %v7724_v5, 16  ;;  %v1990_v45 = vrot.slane %v1989_v13, 4  ;;  %v2023_v7 = vsel %vm7549_vm12, %v2018_v55, %v2022_v1  ;;  %v2172_v13 = vld [vmem:[#allocation2 + $0x28] sm:$0xe]  ;;  %v2214_v21 = vrot.slane %v7724_v5, 5  ;;  %v6888_v1 = vld [vmem:[%s8629_s6 + $0xe0] sm:$0xff]  }
 0x42f   : > { %v5663_v60 = vrot.slane %v2172_v13, 9  ;;  %v2534_v55 = vrot.slane %v2532_v12, 4 }
 0x430   : > { %v2008_v41 = vrot.slane %v2006_v28, 5  ;;  %v1995_v51 = vsel %vm7549_vm12, %v1990_v45, %v1994_v39  ;;  %v2210_v28 = vrot.slane %v7722_v33, 5  ;;  %v2175_v45 = vld [vmem:[#allocation2 + $0x40] sm:$0xe] }
 0x431   : > { %6314 = vmatpush3.bf16.msra.mxu0 %v6871_v16  ;;  %v2003_v16 = vor.u32 %v2002_v56, %v1999_v9 }
 0x432   : > { %6323 = vmatprep.subr.bf16.mxu0 %v6872_v38  ;;  %v2211_v33 = vsel %vm7645_vm15, %v5663_v60, %v2210_v28 }
 0x433   : > { %v2004_v32 = vrot.slane %v2003_v16, 4  ;;  %v2173_v16 = vld [vmem:[#allocation2 + $0x30] sm:$0xe] }
 0x434   : > { %6316 = vmatmul.mubr.msk.bf16.vlgmr.msra.gmra.mrb[8].mxu0 %vm503_vm1, %v6873_v59  ;;  %v5664_v31 = vrot.slane %v2173_v16, 9 }
 0x435   : > { %6324 = vmatpush3.bf16.msra.mxu0 %v6872_v38  ;;  %6319 = vmatprep.mubr.msk.bf16.mxu0 %vm503_vm1, %v6874_v30  ;;  %v2027_v38 = vrot.slane %v2025_v2, 4  ;;  %v2009_v52 = vsel %vm7549_vm12, %v2004_v32, %v2008_v41  ;;  %v2168_v30 = vld [vmem:[#allocation2 + $0x8] sm:$0xe]  ;;  %v5666_v41 = vrot.slane %v2175_v45, 9 }
 0x436   : > { %6325 = vmatprep.subr.bf16.mxu0 %v6875_v48  ;;  %v5649_v44 = vcombine.low %v1995_v51, %v2009_v52  ;;  %v5659_v56 = vrot.slane %v2168_v30, 9  ;;  %v2215_v5 = vsel %vm7645_vm15, %v5664_v31, %v2214_v21  ;;  %v6890_v31 = vld [vmem:[#allocation2 + $0x30] ss:$8 sps:$4 sm:$0xff]  }
 0x437   : > { %v2031_v59 = vor.u32 %v2030_v43, %v2027_v38  ;;  %v6883_v38 = vld [vmem:[%s8629_s6 + $0xc0] sm:$0xff]   ;;  %v2174_v43 = vld [vmem:[#allocation2 + $0x38] sm:$0xe]  ;;  %v5677_v39 = vcombine.low %v2211_v33, %v2215_v5 }
 0x438   : > { %v2195_v49 = vsel %vm7645_vm15, %v5659_v56, %v2194_v63  ;;  %v2505_v56 = vld [vmem:[#allocation2 + $0x20] sm:$0xf]  ;;  %v2507_v63 = vld [vmem:[#allocation2 + $0x28] sm:$0xf] }
 0x439   : > { %6326 = vmatpush3.bf16.msra.mxu0 %v6875_v48  ;;  %v1967_v48 = vsel %vm7549_vm12, %v1962_v17, %v1966_v34  ;;  %v2032_v9 = vrot.slane %v2031_v59, 4  ;;  %v5665_v34 = vrot.slane %v2174_v43, 9  ;;  %v6885_v59 = vld [vmem:[%s8629_s6 + $0xd0] sm:$0xff]  }
 0x43a   : > { %6327 = vmatprep.subr.bf16.mxu0 %v6876_v26  ;;  %v5648_v61 = vcombine.low %v1967_v48, %v1981_v50  ;;  %v2222_v48 = vrot.slane %v7740_v47, 5  ;;  %v2501_v50 = vld [vmem:[#allocation2 + $0x10] sm:$0xf] }
 0x43b   : > { %v2037_v10 = vsel %vm7549_vm12, %v2032_v9, %v2036_v4  ;;  %v2219_v51 = vsel %vm7645_vm15, %v5665_v34, %v2218_v35  ;;  %v2518_v42 = vshrl.u32 %v2501_v50, 16  ;;  %v2521_v47 = vshll.u32 %v2501_v50, 16  ;;  %v7828_v50 = vld [vmem:[#allocation2 + $0x2c] sm:$0x1] }
 0x43c   : > { %6320 = vmatmul.mubr.msk.bf16.gmra.mrb[12].mxu0 %vm503_vm1, %v6877_v20  ;;  %v5650_v17 = vcombine.low %v2023_v7, %v2037_v10  ;;  %v2223_v52 = vsel %vm7645_vm15, %v5666_v41, %v2222_v48  ;;  %v2537_v9 = vrot.slane %v2535_v57, 5  ;;  %v2546_v4 = vshrl.u32 %v2505_v56, 16  ;;  %v7812_v7 = vld [vmem:[#allocation2 + $0x14] sm:$0x1]  ;;  %v7814_v10 = vld [vmem:[#allocation2 + $0x1c] sm:$0x1] }
 0x43d   : > { %6328 = vmatpush3.bf16.msra.mxu0 %v6876_v26  ;;  %6331 = vmatprep.mubr.msk.bf16.mxu0 %vm503_vm1, %v5647_v24  ;;  %v5660_v26 = vrot.slane %v2169_v62, 9  ;;  %v2202_v24 = vrot.slane %v7718_v14, 5  ;;  %v5678_v30 = vcombine.low %v2219_v51, %v2223_v52  ;;  %v6886_v62 = vld [vmem:[#allocation2 + $0x10] ss:$8 sps:$4 sm:$0xff]   ;;  %v7826_v48 = vld [vmem:[#allocation2 + $0x24] sm:$0x1] }
 0x43e   : > { %6329 = vmatprep.subr.bf16.mxu0 %v6878_v36  ;;  %v2548_v60 = vrot.slane %v2546_v4, 4  ;;  %v7830_v51 = vld [vmem:[#allocation2 + $0x34] sm:$0x1] }
 0x43f   : > { %v2199_v2 = vsel %vm7645_vm15, %v5660_v26, %v2198_v0  ;;  %v2203_v14 = vsel %vm7645_vm15, %v5661_v8, %v2202_v24  ;;  %v2509_v26 = vld [vmem:[#allocation2 + $0x30] sm:$0xf]  ;;  %v2511_v0 = vld [vmem:[#allocation2 + $0x38] sm:$0xf]  ;;  %v6891_v8 = vld [vmem:[%s8629_s6 + $0xe8] sm:$0xff]  }
 0x440   : > { %v5675_v20 = vcombine.low %v2195_v49, %v2199_v2  ;;  %v2538_v49 = vor.u32 %v2537_v9, %v2534_v55  ;;  %v2560_v2 = vshrl.u32 %v2507_v63, 16  ;;  %v2574_v13 = vshrl.u32 %v2509_v26, 16  ;;  %v6889_v24 = vld [vmem:[#allocation2 + $0x20] ss:$8 sps:$4 sm:$0xff]  }
 0x441   : > { %6330 = vmatpush3.bf16.msra.mxu0 %v6878_v36  ;;  %v5662_v36 = vrot.slane %v2171_v11, 9  ;;  %v2563_v11 = vshll.u32 %v2507_v63, 16  ;;  %v2577_v16 = vshll.u32 %v2509_v26, 16  ;;  %v6893_v9 = vld [vmem:[#allocation2 + $0x40] ss:$8 sps:$4 sm:$0xff]   ;;  %v2583_v26 = vshll.u32 %v7830_v51, 16 }
 0x442   : > { %6339 = vmatprep.subr.bf16.mxu0 %v6879_v22  ;;  %v2576_v43 = vrot.slane %v2574_v13, 4 }
 0x443   : > { %v2207_v46 = vsel %vm7645_vm15, %v5662_v36, %v2206_v29  ;;  %v2527_v36 = vshll.u32 %v7812_v7, 16  ;;  %v2541_v29 = vshll.u32 %v7814_v10, 16  ;;  %v2579_v33 = vrot.slane %v2577_v16, 5  ;;  %v7847_v16 = vld [vmem:[#allocation2 + $0x4c] sm:$0x1] }
 0x444   : > { %6332 = vmatmul.mubr.msk.bf16.vlgmr.msra.gmra.mrb[8].mxu0 %vm503_vm1, %v5648_v61  ;;  %v5676_v32 = vcombine.low %v2203_v14, %v2207_v46  ;;  %v6887_v61 = vld [vmem:[%s8629_s6 + $0xd8] sm:$0xff]   ;;  %v2562_v14 = vrot.slane %v2560_v2, 4  ;;  %v2565_v46 = vrot.slane %v2563_v11, 5 }
 0x445   : > { %6340 = vmatpush3.bf16.msra.mxu0 %v6879_v22  ;;  %6335 = vmatprep.mubr.msk.bf16.mxu0 %vm503_vm1, %v5649_v44  ;;  %v6884_v22 = vld [vmem:[%s8629_s6 + $0xc8] sm:$0xff]   ;;  %v2523_v44 = vrot.slane %v2521_v47, 5  ;;  %v2543_v41 = vrot.slane %v2541_v29, 5 }
 0x446   : > { %6341 = vmatprep.subr.bf16.mxu0 %v6880_v53 }
 0x449   : > { %6342 = vmatpush3.bf16.msra.mxu0 %v6880_v53  ;;  %v2520_v53 = vrot.slane %v2518_v42, 4  ;;  %v7832_v42 = vld [vmem:[#allocation2 + $0x3c] sm:$0x1] }
 0x44a   : > { %6343 = vmatprep.subr.bf16.mxu0 %v6881_v23 }
 0x44b   : > { %v2524_v19 = vor.u32 %v2523_v44, %v2520_v53  ;;  %v2569_v53 = vshll.u32 %v7828_v50, 16 }
 0x44c   : > { %6336 = vmatmul.mubr.msk.bf16.gmra.mrb[12].mxu0 %vm503_vm1, %v5650_v17  ;;  %v2588_v17 = vshrl.u32 %v2511_v0, 16 }
 0x44d   : > { %6344 = vmatpush3.bf16.msra.mxu0 %v6881_v23  ;;  %6347 = vmatprep.mubr.msk.bf16.mxu0 %vm503_vm1, %v5675_v20  ;;  %v2549_v23 = vshll.u32 %v2505_v56, 16  ;;  %v2515_v20 = vld [vmem:[#allocation2 + $0x48] sm:$0xf]  ;;  %v2525_v21 = vrot.slane %v2524_v19, 4  ;;  %v6894_v56 = vld [vmem:[%s8629_s6 + $0xf8] sm:$0xff]   ;;  %v2571_v13 = vrot.slane %v2569_v53, 5 }
 0x44e   : > { %6345 = vmatprep.subr.bf16.mxu0 %v6882_v18  ;;  %v2590_v5 = vrot.slane %v2588_v17, 4  ;;  %v2616_v34 = vshrl.u32 %v2515_v20, 16  ;;  %v2619_v35 = vshll.u32 %v2515_v20, 16  ;;  %v6895_v17 = vld [vmem:[%s8629_s6 + $0x100] sm:$0xff]   ;;  %v6898_v53 = vld [vmem:[%s8629_s6 + $0x118] sm:$0xff]  }
 0x44f   : > { %v2551_v28 = vrot.slane %v2549_v23, 5  ;;  %v7852_v20 = vld [vmem:[#allocation2 + $0x44] sm:$0x1] }
 0x450   : > { %v2618_v44 = vrot.slane %v2616_v34, 4  ;;  %v2621_v55 = vrot.slane %v2619_v35, 5  ;;  %v2785_v35 = vrot.slane %v7812_v7, 5 }
 0x451   : > { %6346 = vmatpush3.bf16.msra.mxu0 %v6882_v18  ;;  %v2591_v18 = vshll.u32 %v2511_v0, 16  ;;  %v2552_v58 = vor.u32 %v2551_v28, %v2548_v60  ;;  %v2597_v0 = vshll.u32 %v7832_v42, 16  ;;  %v2625_v28 = vshll.u32 %v7847_v16, 16 }
 0x452   : > { %6355 = vmatprep.subr.bf16.mxu0 %v6883_v38 }
 0x453   : > { %v2593_v45 = vrot.slane %v2591_v18, 5  ;;  %v2553_v63 = vrot.slane %v2552_v58, 4  ;;  %v2585_v18 = vrot.slane %v2583_v26, 5 }
 0x454   : > { %6348 = vmatmul.mubr.msk.bf16.vlgmr.msra.gmra.mrb[8].mxu0 %vm503_vm1, %v5676_v32  ;;  %v2513_v32 = vld [vmem:[#allocation2 + $0x40] sm:$0xf] }
 0x455   : > { %6356 = vmatpush3.bf16.msra.mxu0 %v6883_v38  ;;  %6351 = vmatprep.mubr.msk.bf16.mxu0 %vm503_vm1, %v5677_v39  ;;  %v2539_v38 = vrot.slane %v2538_v49, 4  ;;  %v2529_v39 = vrot.slane %v2527_v36, 5  ;;  %v2602_v52 = vshrl.u32 %v2513_v32, 16  ;;  %v2605_v47 = vshll.u32 %v2513_v32, 16 }
 0x456   : > { %6357 = vmatprep.subr.bf16.mxu0 %v6884_v22 }
 0x457   : > { %v2530_v12 = vsel %vm7549_vm12, %v2525_v21, %v2529_v39  ;;  %v2544_v57 = vsel %vm7549_vm12, %v2539_v38, %v2543_v41  ;;  %v2604_v23 = vrot.slane %v2602_v52, 4  ;;  %v2607_v19 = vrot.slane %v2605_v47, 5 }
 0x458   : > { %v2611_v38 = vshll.u32 %v7852_v20, 16  ;;  %v2789_v41 = vrot.slane %v7814_v10, 5 }
 0x459   : > { %6358 = vmatpush3.bf16.msra.mxu0 %v6884_v22  ;;  %v6892_v22 = vld [vmem:[%s8629_s6 + $0xf0] sm:$0xff]   ;;  %v2608_v60 = vor.u32 %v2607_v19, %v2604_v23  ;;  %v2766_v19 = vld [vmem:[#allocation2 + $0x48] sm:$0xe] }
 0x45a   : > { %6359 = vmatprep.subr.bf16.mxu0 %v6885_v59  ;;  %v2613_v58 = vrot.slane %v2611_v38, 5  ;;  %v2984_v38 = vld [vmem:[%s8634_s11 + $0x8] sm:$0xff] }
 0x45c   : > { %6352 = vmatmul.mubr.msk.bf16.gmra.mrb[12].mxu0 %vm503_vm1, %v5678_v30  ;;  %v2580_v30 = vor.u32 %v2579_v33, %v2576_v43  ;;  %v6896_v33 = vld [vmem:[%s8629_s6 + $0x108] sm:$0xff]  }
 0x45d   : > { %6360 = vmatpush3.bf16.msra.mxu0 %v6885_v59  ;;  %6363 = vmatprep.mubr.msk.bf16.mxu0 %vm503_vm1, %v6886_v62  ;;  %v2566_v59 = vor.u32 %v2565_v46, %v2562_v14  ;;  %v2594_v62 = vor.u32 %v2593_v45, %v2590_v5  ;;  %v2759_v14 = vld [vmem:[#allocation2 + $0x10] sm:$0xe]  ;;  %v2760_v46 = vld [vmem:[#allocation2 + $0x18] sm:$0xe]  ;;  %v2609_v45 = vrot.slane %v2608_v60, 4 }
 0x45e   : > { %6361 = vmatprep.subr.bf16.mxu0 %v6887_v61  ;;  %v2581_v49 = vrot.slane %v2580_v30, 4  ;;  %v5727_v34 = vrot.slane %v2759_v14, 9  ;;  %v5728_v39 = vrot.slane %v2760_v46, 9  ;;  %v2763_v30 = vld [vmem:[#allocation2 + $0x30] sm:$0xe]  ;;  %v2979_v14 = vld [vmem:[%s8633_s10 + $0x20] sm:$0xff] }
 0x45f   : > { %v2567_v4 = vrot.slane %v2566_v59, 4  ;;  %v2595_v2 = vrot.slane %v2594_v62, 4  ;;  %v6897_v59 = vld [vmem:[%s8629_s6 + $0x110] sm:$0xff]   ;;  %v2614_v52 = vsel %vm7549_vm12, %v2609_v45, %v2613_v58  ;;  %v2764_v62 = vld [vmem:[#allocation2 + $0x38] sm:$0xe]  ;;  %v5731_v26 = vrot.slane %v2763_v30, 9 }
 0x460   : > { %v2786_v7 = vsel %vm7645_vm15, %v5727_v34, %v2785_v35  ;;  %v2790_v10 = vsel %vm7645_vm15, %v5728_v39, %v2789_v41  ;;  %v2980_v46 = vld [vmem:[%s8633_s10 + $0x28] sm:$0xff]  ;;  %v2982_v45 = vld [vmem:[%s8633_s10 + $0x38] sm:$0xff]  ;;  %v5756_v35 = vld [vmem:[%s479_s25] ss:$0 sm:$0xff]  ;;  %s5998_s25 = sshll.u32 %s7190_s17, 10 }
 0x461   : > { %6362 = vmatpush3.bf16.msra.mxu0 %v6887_v61  ;;  %v2555_v61 = vshll.u32 %v7826_v48, 16  ;;  %v2572_v29 = vsel %vm7549_vm12, %v2567_v4, %v2571_v13  ;;  %v2805_v4 = vrot.slane %v7832_v42, 5  ;;  %s8569_s17 = scalar_lea.hbm %s8637_s14, %s5998_s25 }
 0x462   : > { %6371 = vmatprep.subr.bf16.mxu0 %v6888_v1 }
 0x463   : > { %v2557_v11 = vrot.slane %v2555_v61, 5 }
 0x464   : > { %6364 = vmatmul.mubr.msk.bf16.vlgmr.msra.gmra.mrb[8].mxu0 %vm503_vm1, %v6889_v24  ;;  %v2622_v24 = vor.u32 %v2621_v55, %v2618_v44  ;;  %v5743_v55 = vcombine.low %v2786_v7, %v2790_v10 }
 0x465   : > { %6372 = vmatpush3.bf16.msra.mxu0 %v6888_v1  ;;  %6367 = vmatprep.mubr.msk.bf16.mxu0 %vm503_vm1, %v6890_v31  ;;  %v5715_v1 = vcombine.low %v2530_v12, %v2544_v57  ;;  %v2558_v36 = vsel %vm7549_vm12, %v2553_v63, %v2557_v11  ;;  %v2586_v31 = vsel %vm7549_vm12, %v2581_v49, %v2585_v18  ;;  %v2761_v12 = vld [vmem:[#allocation2 + $0x20] sm:$0xe]  ;;  %v2762_v57 = vld [vmem:[#allocation2 + $0x28] sm:$0xe]  ;;  %v2797_v63 = vrot.slane %v7828_v50, 5 }
 0x466   : > { %6373 = vmatprep.subr.bf16.mxu0 %v6891_v8  ;;  %v5716_v43 = vcombine.low %v2558_v36, %v2572_v29  ;;  %v2623_v32 = vrot.slane %v2622_v24, 4  ;;  %v5729_v44 = vrot.slane %v2761_v12, 9  ;;  %v2765_v49 = vld [vmem:[#allocation2 + $0x40] sm:$0xe]  ;;  %v2813_v18 = vrot.slane %v7847_v16, 5  ;;  %v2977_v29 = vld [vmem:[%s8633_s10 + $0x10] sm:$0xff] }
 0x467   : > { %v5733_v13 = vrot.slane %v2765_v49, 9  ;;  %v2975_v16 = vld [vmem:[%s8633_s10] sm:$0xff] }
 0x469   : > { %6374 = vmatpush3.bf16.msra.mxu0 %v6891_v8  ;;  %v2599_v8 = vrot.slane %v2597_v0, 5  ;;  %v2801_v0 = vrot.slane %v7830_v51, 5 }
 0x46a   : > { %6375 = vmatprep.subr.bf16.mxu0 %v6892_v22 }
 0x46b   : > { %v2600_v21 = vsel %vm7549_vm12, %v2595_v2, %v2599_v8  ;;  %v2802_v50 = vsel %vm7645_vm15, %v5731_v26, %v2801_v0  ;;  %v5734_v2 = vrot.slane %v2766_v19, 9 }
 0x46c   : > { %6368 = vmatmul.mubr.msk.bf16.gmra.mrb[12].mxu0 %vm503_vm1, %v6893_v9  ;;  %v5717_v5 = vcombine.low %v2586_v31, %v2600_v21  ;;  %v2793_v9 = vrot.slane %v7826_v48, 5  ;;  %v2983_v31 = vld [vmem:[%s8634_s11] sm:$0xff] }
 0x46d   : > { %6376 = vmatpush3.bf16.msra.mxu0 %v6892_v22  ;;  %6379 = vmatprep.mubr.msk.bf16.mxu0 %vm503_vm1, %v5715_v1  ;;  %v2627_v22 = vrot.slane %v2625_v28, 5  ;;  %v5732_v1 = vrot.slane %v2764_v62, 9  ;;  %v2814_v24 = vsel %vm7645_vm15, %v5734_v2, %v2813_v18  ;;  %v2978_v28 = vld [vmem:[%s8633_s10 + $0x18] sm:$0xff] }
 0x46e   : > { %6377 = vmatprep.subr.bf16.mxu0 %v6894_v56  ;;  %v2794_v23 = vsel %vm7645_vm15, %v5729_v44, %v2793_v9  ;;  %v7929_v21 = vpack.c.bf16 %v2978_v28, %v2977_v29 }
 0x46f   : > { %v2628_v47 = vsel %vm7549_vm12, %v2623_v32, %v2627_v22  ;;  %v2806_v51 = vsel %vm7645_vm15, %v5732_v1, %v2805_v4  ;;  %v5755_v22 = vld [vmem:[%s8630_s7] ss:$0 sm:$0xff] }
 0x470   : > { %v5718_v61 = vcombine.low %v2614_v52, %v2628_v47  ;;  %v5745_v11 = vcombine.low %v2802_v50, %v2806_v51 }
 0x471   : > { %6378 = vmatpush3.bf16.msra.mxu0 %v6894_v56  ;;  %v5730_v56 = vrot.slane %v2762_v57, 9 }
 0x472   : > { %6387 = vmatprep.subr.bf16.mxu0 %v6895_v17 }
 0x473   : > { %v2798_v48 = vsel %vm7645_vm15, %v5730_v56, %v2797_v63 }
 0x474   : > { %6380 = vmatmul.mubr.msk.bf16.vlgmr.msra.gmra.mrb[8].mxu0 %vm503_vm1, %v5716_v43  ;;  %v5744_v42 = vcombine.low %v2794_v23, %v2798_v48  ;;  %v7941_v43 = vpack.c.bf16 %v2984_v38, %v2983_v31 }
 0x475   : > { %6388 = vmatpush3.bf16.msra.mxu0 %v6895_v17  ;;  %6383 = vmatprep.mubr.msk.bf16.mxu0 %vm503_vm1, %v5717_v5  ;;  %v2809_v17 = vrot.slane %v7852_v20, 5  ;;  %v2976_v20 = vld [vmem:[%s8633_s10 + $0x8] sm:$0xff]  ;;  %v2981_v5 = vld [vmem:[%s8633_s10 + $0x30] sm:$0xff] }
 0x476   : > { %6389 = vmatprep.subr.bf16.mxu0 %v6896_v33  ;;  %v7920_v60 = vpack.c.bf16 %v2976_v20, %v2975_v16  ;;  %6657 = vmatpush3.bf16.msra.mxu1 %v7941_v43  ;;  %v7956_v32 = vpack.c.bf16 %v2982_v45, %v2981_v5 }
 0x477   : > { %v2810_v8 = vsel %vm7645_vm15, %v5733_v13, %v2809_v17  ;;  %6658 = vmatprep.subr.bf16.mxu1 %v7087_v3 }
 0x478   : > { %v5746_v36 = vcombine.low %v2810_v8, %v2814_v24 }
 0x479   : > { %6390 = vmatpush3.bf16.msra.mxu0 %v6896_v33  ;;  %v7945_v33 = vpack.c.bf16 %v2980_v46, %v2979_v14  ;;  %v2985_v14 = vld [vmem:[%s8634_s11 + $0x10] sm:$0xff]  ;;  %v2986_v46 = vld [vmem:[%s8634_s11 + $0x18] sm:$0xff] }
 0x47a   : > { %6391 = vmatprep.subr.bf16.mxu0 %v6897_v59  ;;  %v6659_v5 = vpack.c.bf16 %v2986_v46, %v2985_v14  ;;  %v6901_v46 = vld [vmem:[%s8635_s12 + $0x30] sm:$0xff]  }
 0x47c   : > { %6384 = vmatmul.mubr.msk.bf16.gmra.mrb[12].mxu0 %vm503_vm1, %v5718_v61  ;;  %6660 = vmatpush3.bf16.msra.mxu1 %v6659_v5 }
 0x47d   : > { %6392 = vmatpush3.bf16.msra.mxu0 %v6897_v59  ;;  %6395 = vmatprep.mubr.msk.bf16.mxu0 %vm503_vm1, %v5743_v55 }
 0x47e   : > { %6393 = vmatprep.subr.bf16.mxu0 %v6898_v53  ;;  %6661 = vmatprep.subr.bf16.mxu1 %v7087_v3 }
 0x481   : > { %6394 = vmatpush3.bf16.msra.mxu0 %v6898_v53 }
 0x482   : > { %6643 = vmatprep.subr.bf16.mxu0 %v7087_v3 }
 0x484   : > { %6396 = vmatmul.mubr.msk.bf16.vlgmr.msra.gmra.mrb[8].mxu0 %vm503_vm1, %v5744_v42 }
 0x485   : > { %6399 = vmatprep.mubr.msk.bf16.mxu0 %vm503_vm1, %v5745_v11  ;;  %6645 = vmatpush3.bf16.msra.mxu0 %v7920_v60 }
 0x486   : > { %6646 = vmatprep.subr.bf16.mxu0 %v7087_v3 }
 0x489   : > { %6648 = vmatpush3.bf16.msra.mxu0 %v7929_v21 }
 0x48a   : > { %6649 = vmatprep.subr.bf16.mxu0 %v7087_v3 }
 0x48c   : > { %6400 = vmatmul.mubr.msk.bf16.gmra.mrb[12].mxu0 %vm503_vm1, %v5746_v36 }
 0x48d   : > { %6419 = vmatprep.mubr.msk.f32.mxu0 %vm7088_vm0, %v7089_v6  ;;  %6651 = vmatpush3.bf16.msra.mxu0 %v7945_v33 }
 0x48e   : > { %6652 = vmatprep.subr.bf16.mxu0 %v7087_v3 }
 0x491   : > { %6654 = vmatpush3.bf16.msra.mxu0 %v7956_v32 }
 0x557   : > { %v6397_v34 = vpop.f32.mrb[8].mxu0 }
 0x558   : > { %v2906_v39 = vpop.f32.mrb[9].mxu0  ;;  %v2954_v41 = vadd.f32 %v6397_v34, %v5755_v22 }
 0x559   : > { %v2952_v58 = vadd.f32 %v5755_v22, %v2906_v39  ;;  %v6398_v59 = vpop.f32.mrb[10].mxu0 }
 0x55a   : > { %v2909_v52 = vpop.f32.mrb[11].mxu0  ;;  %v2955_v12 = vadd.f32 %v6398_v59, %v5755_v22  ;;  %v2969_v10 = vadd.f32 %v5756_v35, %v2954_v41 }
 0x55b   : > { %v2967_v47 = vadd.f32 %v5756_v35, %v2952_v58  ;;  %v2953_v7 = vadd.f32 %v5755_v22, %v2909_v52 }
 0x55c   : > { %v2970_v62 = vadd.f32 %v5756_v35, %v2955_v12  ;;  %v2992_v9 = vsel %vm503_vm1, %v2969_v10, 0.0 }
 0x55d   : > { %v2968_v57 = vadd.f32 %v5756_v35, %v2953_v7  ;;  %v2989_v30 = vsel %vm503_vm1, %v2967_v47, 0.0 }
 0x55e   : > { %v2994_v4 = vsel %vm503_vm1, %v2970_v62, 0.0 }
 0x55f   : > { %v2990_v61 = vsel %vm503_vm1, %v2968_v57, 0.0  ;;  %v6401_v53 = vpop.f32.mrb[12].mxu0 }
 0x560   : > { %v2991_v44 = vadd.f32 %v2990_v61, %v2989_v30  ;;  %v2922_v55 = vpop.f32.mrb[13].mxu0  ;;  %v2958_v56 = vadd.f32 %v6401_v53, %v5755_v22 }
 0x561   : > { %v2956_v63 = vadd.f32 %v5755_v22, %v2922_v55  ;;  %v6402_v26 = vpop.f32.mrb[14].mxu0 }
 0x562   : > { %v2993_v0 = vadd.f32 %v2992_v9, %v2991_v44  ;;  %v2925_v1 = vpop.f32.mrb[15].mxu0  ;;  %v2959_v48 = vadd.f32 %v6402_v26, %v5755_v22  ;;  %v2973_v51 = vadd.f32 %v5756_v35, %v2958_v56 }
 0x563   : > { %v2971_v23 = vadd.f32 %v5756_v35, %v2956_v63  ;;  %v2957_v19 = vadd.f32 %v5755_v22, %v2925_v1 }
 0x564   : > { %v2995_v50 = vadd.f32 %v2994_v4, %v2993_v0  ;;  %v2974_v11 = vadd.f32 %v5756_v35, %v2959_v48  ;;  %v3000_v18 = vsel %vm503_vm1, %v2973_v51, 0.0 }
 0x565   : > { %v2996_v49 = vsel %vm503_vm1, %v2971_v23, 0.0  ;;  %v2972_v42 = vadd.f32 %v5756_v35, %v2957_v19 }
 0x566   : > { %v2997_v2 = vadd.f32 %v2996_v49, %v2995_v50  ;;  %v3002_v24 = vsel %vm503_vm1, %v2974_v11, 0.0 }
 0x567   : > { %v2998_v13 = vsel %vm503_vm1, %v2972_v42, 0.0 }
 0x568   : > { %v2999_v17 = vadd.f32 %v2998_v13, %v2997_v2 }
 0x56a   : > { %v3001_v8 = vadd.f32 %v3000_v18, %v2999_v17 }
 0x56c   : > { %v3003_v36 = vadd.f32 %v3002_v24, %v3001_v8 }
 0x56e   : > { %v3004_v16 = vrot.slane %v3003_v36, 4 }
 0x570   : > { %v3005_v20 = vadd.f32 %v3004_v16, %v3003_v36  ;;  %v6899_v16 = vld [vmem:[%s8635_s12 + $0x20] sm:$0xff]  }
 0x572   : > { %v3006_v29 = vrot.slane %v3005_v20, 2 }
 0x574   : > { %v3007_v28 = vadd.f32 %v3006_v29, %v3005_v20  ;;  %v6900_v20 = vld [vmem:[%s8635_s12 + $0x28] sm:$0xff]   ;;  %v3450_v29 = vld [vmem:[#allocation3 + $0x8] sm:$0x1] }
 0x576   : > { %v3008_v31 = vrot.slane %v3007_v28, 1 }
 0x578   : > { %v3009_v38 = vadd.f32 %v3008_v31, %v3007_v28  ;;  %v3477_v28 = vld [vmem:[#allocation3 + $0x4] sm:$0x1]  ;;  %v3480_v31 = vld [vmem:[#allocation3 + $0xc] sm:$0x1] }
 0x579   : > { %v3481_v14 = vsel %vm7386_vm8, 0, %v3480_v31 }
 0x57a   : > { %6420 = vmatmul.mubr.msk.f32.vlgmr.msra.gmra.mrb[6].mxu0 %vm503_vm1, %v3009_v38  ;;  %v3478_v38 = vsel %vm7386_vm8, 0, %v3477_v28  ;;  %3482 = vst [vmem:[#allocation3 + $0xc] sm:$0x1] %v3481_v14 }
 0x57b   : > { %3479 = vst [vmem:[#allocation3 + $0x4] sm:$0x1] %v3478_v38 }
 0x64d   : > { %v3079_v45 = vpop.f32.mrb[6].mxu0 }
 0x64e   : > { %v3083_v22 = vmul.f32 0.0078125, %v3079_v45  ;;  %v6421_v34 = vpop.f32.mrb[7].mxu0  ;;  %v8064_v45 = vld [vmem:[%s8635_s12] sm:$0xff]  }
 0x64f   : > { %v3456_v34 = vld [vmem:[#allocation3 + $0x18] sm:$0x1] }
 0x650   : > { %6431 = vmatmul.mubr.msk.f32.vlgmr.msra.gmra.mrb[2].mxu1 %vm599_vm2, %v3083_v22  ;;  %v3453_v22 = vld [vmem:[#allocation3 + $0x10] sm:$0x1] }
 0x651   : > { %6663 = vmatpush3.bf16.msra.mxu1 %v7920_v60  ;;  %6449 = vmatprep.mubr.msk.f32.mxu1 %vm7088_vm0, %v7089_v6 }
 0x652   : > { %6664 = vmatprep.subr.bf16.mxu1 %v7087_v3 }
 0x655   : > { %6666 = vmatpush3.bf16.msra.mxu1 %v7929_v21 }
 0x656   : > { %6667 = vmatprep.subr.bf16.mxu1 %v7087_v3 }
 0x659   : > { %6669 = vmatpush3.bf16.msra.mxu1 %v7945_v33 }
 0x65a   : > { %6670 = vmatprep.subr.bf16.mxu1 %v7087_v3 }
 0x65d   : > { %6672 = vmatpush3.bf16.msra.mxu1 %v7956_v32 }
 0x65e   : > { %6673 = vmatprep.subr.bf16.mxu1 %v7087_v3 }
 0x723   : > { %v3153_v35 = vpop.f32.mrb[2].mxu1 }
 0x724   : > { %v3160_v60 = vrot.slane %v3153_v35, %v7322_v54  ;;  %v6432_v39 = vpop.f32.mrb[3].mxu1  ;;  %v3454_v35 = vsel %vm7378_vm6, 0, %v3453_v22 }
 0x725   : > { %v3483_v39 = vld [vmem:[#allocation3 + $0x14] sm:$0x1]  ;;  %3455 = vst [vmem:[#allocation3 + $0x10] sm:$0x1] %v3454_v35 }
 0x726   : > { %v7995_v41 = vsub.f32 %v2967_v47, %v3160_v60  ;;  %v7997_v58 = vsub.f32 %v2968_v57, %v3160_v60  ;;  %v7999_v59 = vsub.f32 %v2969_v10, %v3160_v60  ;;  %v8001_v21 = vsub.f32 %v2970_v62, %v3160_v60 }
 0x727   : > { %v8003_v52 = vsub.f32 %v2971_v23, %v3160_v60  ;;  %v8011_v7 = vsub.f32 %v2972_v42, %v3160_v60  ;;  %v8017_v62 = vsub.f32 %v2973_v51, %v3160_v60  ;;  %v8022_v55 = vsub.f32 %v2974_v11, %v3160_v60 }
 0x728   : > { %v3169_v33 = vmul.f32 %v7995_v41, %v7995_v41  ;;  %v3170_v32 = vmul.f32 %v7997_v58, %v7997_v58  ;;  %v3171_v12 = vmul.f32 %v7999_v59, %v7999_v59  ;;  %v3172_v47 = vmul.f32 %v8001_v21, %v8001_v21 }
 0x729   : > { %v3173_v61 = vmul.f32 %v8003_v52, %v8003_v52  ;;  %v3174_v9 = vmul.f32 %v8011_v7, %v8011_v7  ;;  %v3175_v26 = vmul.f32 %v8017_v62, %v8017_v62  ;;  %v3176_v4 = vmul.f32 %v8022_v55, %v8022_v55 }
 0x72a   : > { %v3177_v10 = vsel %vm503_vm1, %v3169_v33, 0.0  ;;  %v3178_v57 = vsel %vm503_vm1, %v3170_v32, 0.0  ;;  %v3180_v53 = vsel %vm503_vm1, %v3171_v12, 0.0  ;;  %v3182_v56 = vsel %vm503_vm1, %v3172_v47, 0.0  ;;  %v3486_v33 = vld [vmem:[#allocation3 + $0x1c] sm:$0x1] }
 0x72b   : > { %v3179_v30 = vadd.f32 %v3178_v57, %v3177_v10  ;;  %v3184_v0 = vsel %vm503_vm1, %v3173_v61, 0.0  ;;  %v3186_v23 = vsel %vm503_vm1, %v3174_v9, 0.0  ;;  %v3188_v19 = vsel %vm503_vm1, %v3175_v26, 0.0  ;;  %v3459_v47 = vld [vmem:[#allocation3 + $0x20] sm:$0x1] }
 0x72c   : > { %v3190_v51 = vsel %vm503_vm1, %v3176_v4, 0.0  ;;  %v3457_v60 = vsel %vm7378_vm6, 0, %v3456_v34  ;;  %v3484_v32 = vsel %vm7386_vm8, 0, %v3483_v39  ;;  %v3487_v12 = vsel %vm7386_vm8, 0, %v3486_v33  ;;  %v3462_v10 = vld [vmem:[#allocation3 + $0x28] sm:$0x1] }
 0x72d   : > { %v3181_v44 = vadd.f32 %v3180_v53, %v3179_v30  ;;  %3458 = vst [vmem:[#allocation3 + $0x18] sm:$0x1] %v3457_v60  ;;  %3485 = vst [vmem:[#allocation3 + $0x14] sm:$0x1] %v3484_v32  ;;  %v3489_v57 = vld [vmem:[#allocation3 + $0x24] sm:$0x1] }
 0x72e   : > { %3488 = vst [vmem:[#allocation3 + $0x1c] sm:$0x1] %v3487_v12  ;;  %v3460_v30 = vsel %vm7378_vm6, 0, %v3459_v47  ;;  %v3463_v61 = vsel %vm7378_vm6, 0, %v3462_v10  ;;  %v3490_v53 = vsel %vm7386_vm8, 0, %v3489_v57 }
 0x72f   : > { %v3183_v63 = vadd.f32 %v3182_v56, %v3181_v44  ;;  %v3492_v44 = vld [vmem:[#allocation3 + $0x2c] sm:$0x1]  ;;  %3461 = vst [vmem:[#allocation3 + $0x20] sm:$0x1] %v3460_v30  ;;  %3464 = vst [vmem:[#allocation3 + $0x28] sm:$0x1] %v3463_v61 }
 0x730   : > { %3491 = vst [vmem:[#allocation3 + $0x24] sm:$0x1] %v3490_v53  ;;  %v3493_v9 = vsel %vm7386_vm8, 0, %v3492_v44  ;;  %v3465_v56 = vld [vmem:[#allocation3 + $0x30] sm:$0x1] }
 0x731   : > { %v3185_v1 = vadd.f32 %v3184_v0, %v3183_v63  ;;  %3494 = vst [vmem:[#allocation3 + $0x2c] sm:$0x1] %v3493_v9  ;;  %v3466_v63 = vsel %vm7378_vm6, 0, %v3465_v56  ;;  %v3468_v26 = vld [vmem:[#allocation3 + $0x38] sm:$0x1] }
 0x732   : > { %3467 = vst [vmem:[#allocation3 + $0x30] sm:$0x1] %v3466_v63  ;;  %v3495_v0 = vld [vmem:[#allocation3 + $0x34] sm:$0x1]  ;;  %v3469_v4 = vsel %vm7378_vm6, 0, %v3468_v26 }
 0x733   : > { %v3187_v48 = vadd.f32 %v3186_v23, %v3185_v1  ;;  %v3498_v1 = vld [vmem:[#allocation3 + $0x3c] sm:$0x1]  ;;  %v3496_v23 = vsel %vm7386_vm8, 0, %v3495_v0  ;;  %3470 = vst [vmem:[#allocation3 + $0x38] sm:$0x1] %v3469_v4 }
 0x734   : > { %3497 = vst [vmem:[#allocation3 + $0x34] sm:$0x1] %v3496_v23 }
 0x735   : > { %v3189_v50 = vadd.f32 %v3188_v19, %v3187_v48  ;;  %v3499_v48 = vsel %vm7386_vm8, 0, %v3498_v1  ;;  %v3471_v19 = vld [vmem:[#allocation3 + $0x40] sm:$0x1] }
 0x736   : > { %3500 = vst [vmem:[#allocation3 + $0x3c] sm:$0x1] %v3499_v48 }
 0x737   : > { %v3191_v49 = vadd.f32 %v3190_v51, %v3189_v50  ;;  %v3501_v50 = vld [vmem:[#allocation3 + $0x44] sm:$0x1]  ;;  %v3472_v51 = vsel %vm7378_vm6, 0, %v3471_v19 }
 0x738   : > { %3473 = vst [vmem:[#allocation3 + $0x40] sm:$0x1] %v3472_v51 }
 0x739   : > { %v3192_v42 = vrot.slane %v3191_v49, 4 }
 0x73b   : > { %v3193_v2 = vadd.f32 %v3192_v42, %v3191_v49  ;;  %v3502_v49 = vsel %vm7386_vm8, 0, %v3501_v50  ;;  %v3474_v42 = vld [vmem:[#allocation3 + $0x48] sm:$0x1] }
 0x73c   : > { %3503 = vst [vmem:[#allocation3 + $0x44] sm:$0x1] %v3502_v49 }
 0x73d   : > { %v3194_v11 = vrot.slane %v3193_v2, 2 }
 0x73f   : > { %v3195_v13 = vadd.f32 %v3194_v11, %v3193_v2  ;;  %v3475_v2 = vsel %vm7378_vm6, 0, %v3474_v42  ;;  %v3504_v11 = vld [vmem:[#allocation3 + $0x4c] sm:$0x1] }
 0x740   : > { %3476 = vst [vmem:[#allocation3 + $0x48] sm:$0x1] %v3475_v2 }
 0x741   : > { %v3196_v17 = vrot.slane %v3195_v13, 1 }
 0x743   : > { %v3197_v18 = vadd.f32 %v3196_v17, %v3195_v13  ;;  %v3505_v13 = vsel %vm7386_vm8, 0, %v3504_v11 }
 0x744   : > { %3506 = vst [vmem:[#allocation3 + $0x4c] sm:$0x1] %v3505_v13 }
 0x745   : > { %6450 = vmatmul.mubr.msk.f32.vlgmr.msra.gmra.mrb[4].mxu1 %vm503_vm1, %v3197_v18 }
 0x746   : > { %6675 = vmatpush3.bf16.msra.mxu1 %v7941_v43  ;;  %6460 = vmatprep.mubr.msk.f32.mxu1 %vm7088_vm0, %v7089_v6  ;;  %v3447_v43 = vld [vmem:[#allocation3] sm:$0x1]  ;;  %v3451_v6 = vsel %vm7378_vm6, 0, %v3450_v29 }
 0x747   : > { %6676 = vmatprep.subr.bf16.mxu1 %v7087_v3  ;;  %v3448_v3 = vsel %vm7378_vm6, 0, %v3447_v43  ;;  %3452 = vst [vmem:[#allocation3 + $0x8] sm:$0x1] %v3451_v6 }
 0x748   : > { %3449 = vst [vmem:[#allocation3] sm:$0x1] %v3448_v3  ;;  %v5762_v3 = vld [vmem:[%s8632_s9] ss:$0 sm:$0xff] }
 0x74a   : > { %6678 = vmatpush3.bf16.msra.mxu1 %v6659_v5  ;;  %v6902_v5 = vld [vmem:[%s8635_s12 + $0x38] sm:$0xff]  }
 0x74b   : > { %6463 = vmatprep.subr.bf16.mxu1 %v6899_v16 }
 0x74f   : > { %v8126_v51 = vld [vmem:[#allocation3] sm:$0xf] }
 0x750   : > { %v3693_v49 = vshrl.u32 %v8126_v51, 16  ;;  %v3696_v42 = vshll.u32 %v8126_v51, 16 }
 0x818   : > { %v3267_v8 = vpop.f32.mrb[4].mxu1 }
 0x819   : > { %v3271_v24 = vmul.f32 0.0078125, %v3267_v8  ;;  %v6451_v36 = vpop.f32.mrb[5].mxu1 }
 0x81b   : > { %6461 = vmatmul.mubr.msk.f32.vlgmr.msra.gmra.mrb[6].mxu1 %vm599_vm2, %v3271_v24 }
 0x81c   : > { %6464 = vmatpush3.bf16.msra.mxu1 %v6899_v16  ;;  %v5761_v16 = vld [vmem:[%s8631_s8] ss:$0 sm:$0xff] }
 0x81d   : > { %6465 = vmatprep.subr.bf16.mxu1 %v6900_v20 }
 0x820   : > { %6466 = vmatpush3.bf16.msra.mxu1 %v6900_v20 }
 0x821   : > { %6467 = vmatprep.subr.bf16.mxu1 %v6901_v46 }
 0x824   : > { %6468 = vmatpush3.bf16.msra.mxu1 %v6901_v46 }
 0x825   : > { %6469 = vmatprep.subr.bf16.mxu1 %v6902_v5 }
 0x828   : > { %6470 = vmatpush3.bf16.msra.mxu1 %v6902_v5 }
 0x829   : > { %6479 = vmatprep.subr.bf16.mxu1 %v8064_v45 }
 0x8ee   : > { %v3341_v17 = vpop.f32.mrb[6].mxu1 }
 0x8ef   : > { %v3342_v18 = vadd.f32 1e-05, %v3341_v17  ;;  %v6462_v8 = vpop.f32.mrb[7].mxu1 }
 0x8f0   : > { %v8132_v8 = vrot.slane %v3696_v42, 5 }
 0x8f1   : > { %6981 = vrsqrt.f32 %v3342_v18  ;;  %v8130_v18 = vrot.slane %v3693_v49, 4 }
 0x8fb   : > { %v6982_v24 = vpop.eup %6981 }
 0x8fc   : > { %v3349_v36 = vrot.slane %v6982_v24, %v7322_v54 }
 0x8fe   : > { %v3350_v20 = vmul.f32 %v3349_v36, %v7995_v41  ;;  %v3351_v43 = vmul.f32 %v3349_v36, %v7997_v58  ;;  %v3352_v29 = vmul.f32 %v3349_v36, %v7999_v59  ;;  %v3353_v40 = vmul.f32 %v3349_v36, %v8001_v21 }
 0x8ff   : > { %v3354_v6 = vmul.f32 %v3349_v36, %v8003_v52  ;;  %v3355_v54 = vmul.f32 %v3349_v36, %v8011_v7  ;;  %v3356_v28 = vmul.f32 %v3349_v36, %v8017_v62  ;;  %v3357_v58 = vmul.f32 %v3349_v36, %v8022_v55 }
 0x900   : > { %v3364_v31 = vmul.f32 %v5761_v16, %v3350_v20  ;;  %v3365_v38 = vmul.f32 %v5761_v16, %v3351_v43  ;;  %v3366_v14 = vmul.f32 %v5761_v16, %v3352_v29  ;;  %v3367_v41 = vmul.f32 %v5761_v16, %v3353_v40  ;;  %v8134_v40 = vld [vmem:[#allocation3 + $0x4] sm:$0x1] }
 0x901   : > { %v3368_v46 = vmul.f32 %v5761_v16, %v3354_v6  ;;  %v3369_v59 = vmul.f32 %v5761_v16, %v3355_v54  ;;  %v3370_v5 = vmul.f32 %v5761_v16, %v3356_v28  ;;  %v3371_v12 = vmul.f32 %v5761_v16, %v3357_v58 }
 0x902   : > { %v3378_v21 = vadd.f32 %v5762_v3, %v3364_v31  ;;  %v3379_v22 = vadd.f32 %v5762_v3, %v3365_v38  ;;  %v3380_v34 = vadd.f32 %v5762_v3, %v3366_v14  ;;  %v3381_v35 = vadd.f32 %v5762_v3, %v3367_v41 }
 0x903   : > { %v8114_v60 = vadd.f32 %v5762_v3, %v3368_v46  ;;  %v8116_v52 = vadd.f32 %v5762_v3, %v3369_v59  ;;  %v8118_v7 = vadd.f32 %v5762_v3, %v3370_v5  ;;  %v8123_v57 = vadd.f32 %v5762_v3, %v3371_v12 }
 0x904   : > { %v5763_v62 = vmul.f32 -1.442695, %v3378_v21  ;;  %v5764_v39 = vmul.f32 -1.442695, %v3379_v22  ;;  %v5765_v33 = vmul.f32 -1.442695, %v3380_v34  ;;  %v3699_v58 = vor.u32 %v8132_v8, %v8130_v18 }
 0x905   : > { %v5766_v32 = vmul.f32 -1.442695, %v3381_v35  ;;  %v5767_v55 = vmul.f32 -1.442695, %v8114_v60  ;;  %v5768_v47 = vmul.f32 -1.442695, %v8116_v52 }
 0x906   : > { %6983 = vpow2.f32 %v5763_v62  ;;  %v5769_v10 = vmul.f32 -1.442695, %v8118_v7  ;;  %v5770_v30 = vmul.f32 -1.442695, %v8123_v57  ;;  %v3702_v28 = vshll.u32 %v8134_v40, 16 }
 0x907   : > { %6985 = vpow2.f32 %v5764_v39 }
 0x908   : > { %6987 = vpow2.f32 %v5765_v33 }
 0x909   : > { %6989 = vpow2.f32 %v5766_v32 }
 0x90a   : > { %6991 = vpow2.f32 %v5767_v55 }
 0x90b   : > { %6993 = vpow2.f32 %v5768_v47 }
 0x90c   : > { %6995 = vpow2.f32 %v5769_v10 }
 0x90d   : > { %6997 = vpow2.f32 %v5770_v30  ;;  %v3620_v30 = vld [vmem:[#allocation3 + $0x8] sm:$0xf] }
 0x910   : > { %v6984_v61 = vpop.eup %6983 }
 0x911   : > { %v6986_v53 = vpop.eup %6985  ;;  %v3410_v44 = vadd.f32 1.0, %v6984_v61 }
 0x912   : > { %v6988_v9 = vpop.eup %6987  ;;  %v3411_v56 = vadd.f32 1.0, %v6986_v53 }
 0x913   : > { %v6990_v63 = vpop.eup %6989  ;;  %v3412_v26 = vadd.f32 1.0, %v6988_v9  ;;  %6999 = vrcp.f32 %v3410_v44  ;;  %v3623_v9 = vld [vmem:[#allocation3 + $0xc] sm:$0x1] }
 0x914   : > { %v6992_v0 = vpop.eup %6991  ;;  %v3413_v1 = vadd.f32 1.0, %v6990_v63  ;;  %7001 = vrcp.f32 %v3411_v56  ;;  %v3626_v56 = vld [vmem:[#allocation3 + $0x10] sm:$0xf] }
 0x915   : > { %v6994_v4 = vpop.eup %6993  ;;  %v3414_v23 = vadd.f32 1.0, %v6992_v0  ;;  %7003 = vrcp.f32 %v3412_v26 }
 0x916   : > { %v6996_v48 = vpop.eup %6995  ;;  %v3415_v19 = vadd.f32 1.0, %v6994_v4  ;;  %7005 = vrcp.f32 %v3413_v1  ;;  %v3632_v1 = vld [vmem:[#allocation3 + $0x18] sm:$0xf] }
 0x917   : > { %v3416_v50 = vadd.f32 1.0, %v6996_v48  ;;  %7007 = vrcp.f32 %v3414_v23  ;;  %v6998_v2 = vpop.eup %6997 }
 0x918   : > { %7009 = vrcp.f32 %v3415_v19  ;;  %v3417_v36 = vadd.f32 1.0, %v6998_v2 }
 0x919   : > { %7011 = vrcp.f32 %v3416_v50  ;;  %v3629_v50 = vld [vmem:[#allocation3 + $0x14] sm:$0x1] }
 0x91a   : > { %7013 = vrcp.f32 %v3417_v36 }
 0x91d   : > { %v7000_v11 = vpop.eup %6999 }
 0x91e   : > { %v7002_v13 = vpop.eup %7001  ;;  %v3434_v17 = vmul.f32 %v7000_v11, %v3378_v21 }
 0x91f   : > { %v7004_v24 = vpop.eup %7003  ;;  %v3435_v16 = vmul.f32 %v7002_v13, %v3379_v22  ;;  %v3635_v13 = vld [vmem:[#allocation3 + $0x1c] sm:$0x1] }
 0x920   : > { %v7006_v20 = vpop.eup %7005  ;;  %v3436_v43 = vmul.f32 %v7004_v24, %v3380_v34  ;;  %v5990_v29 = vpack.c.bf16 %v3434_v17, %v3434_v17 }
 0x921   : > { %v7008_v3 = vpop.eup %7007  ;;  %v3437_v6 = vmul.f32 %v7006_v20, %v3381_v35  ;;  %v5991_v54 = vpack.c.bf16 %v3435_v16, %v3435_v16  ;;  %v3638_v20 = vld [vmem:[#allocation3 + $0x20] sm:$0xf] }
 0x922   : > { %v7010_v31 = vpop.eup %7009  ;;  %v3438_v38 = vmul.f32 %v7008_v3, %v8114_v60  ;;  %v5992_v14 = vpack.c.bf16 %v3436_v43, %v3436_v43  ;;  %v3540_v41 = vshrl.u32 %v5990_v29, 16  ;;  %v3543_v33 = vshll.u32 %v5990_v29, 16  ;;  %v3644_v43 = vld [vmem:[#allocation3 + $0x28] sm:$0xf] }
 0x923   : > { %v7012_v46 = vpop.eup %7011  ;;  %v3439_v59 = vmul.f32 %v7010_v31, %v8116_v52  ;;  %v5993_v5 = vpack.c.bf16 %v3437_v6, %v3437_v6  ;;  %v3548_v21 = vshrl.u32 %v5991_v54, 16  ;;  %v3551_v60 = vshll.u32 %v5991_v54, 16  ;;  %v3641_v31 = vld [vmem:[#allocation3 + $0x24] sm:$0x1] }
 0x924   : > { %v3440_v22 = vmul.f32 %v7012_v46, %v8118_v7  ;;  %v5994_v34 = vpack.c.bf16 %v3438_v38, %v3438_v38  ;;  %v3542_v35 = vrot.slane %v3540_v41, 7  ;;  %v3556_v62 = vshrl.u32 %v5992_v14, 16  ;;  %v3650_v38 = vld [vmem:[#allocation3 + $0x30] sm:$0xf]  ;;  %v7014_v41 = vpop.eup %7013 }
 0x925   : > { %v5995_v39 = vpack.c.bf16 %v3439_v59, %v3439_v59  ;;  %v3550_v32 = vrot.slane %v3548_v21, 7  ;;  %v3559_v47 = vshll.u32 %v5992_v14, 16  ;;  %v3564_v10 = vshrl.u32 %v5993_v5, 16  ;;  %v3656_v14 = vld [vmem:[#allocation3 + $0x38] sm:$0xf] }
 0x926   : > { %v5996_v12 = vpack.c.bf16 %v3440_v22, %v3440_v22  ;;  %v3558_v55 = vrot.slane %v3556_v62, 7  ;;  %v3545_v61 = vor.u32 %v3543_v33, %v3542_v35  ;;  %v3567_v52 = vshll.u32 %v5993_v5, 16  ;;  %v3647_v22 = vld [vmem:[#allocation3 + $0x2c] sm:$0x1] }
 0x927   : > { %v3553_v53 = vor.u32 %v3551_v60, %v3550_v32  ;;  %v3554_v44 = vrot.slane %v3550_v32, 4  ;;  %v3566_v26 = vrot.slane %v3564_v10, 7  ;;  %v3572_v0 = vshrl.u32 %v5994_v34, 16  ;;  %v3659_v32 = vld [vmem:[#allocation3 + $0x3c] sm:$0x1] }
 0x928   : > { %v3561_v63 = vor.u32 %v3559_v47, %v3558_v55  ;;  %v3562_v7 = vrot.slane %v3558_v55, 4  ;;  %v3575_v4 = vshll.u32 %v5994_v34, 16  ;;  %v3580_v23 = vshrl.u32 %v5995_v39, 16  ;;  %v3653_v34 = vld [vmem:[#allocation3 + $0x34] sm:$0x1] }
 0x929   : > { %v3583_v48 = vshll.u32 %v5995_v39, 16  ;;  %v3588_v19 = vshrl.u32 %v5996_v12, 16  ;;  %v3569_v49 = vor.u32 %v3567_v52, %v3566_v26  ;;  %v3574_v42 = vrot.slane %v3572_v0, 7 }
 0x92a   : > { %v3591_v2 = vshll.u32 %v5996_v12, 16  ;;  %v3546_v11 = vrot.slane %v3542_v35, 4  ;;  %v3582_v17 = vrot.slane %v3580_v23, 7  ;;  %v3621_v36 = vsel %vm7430_vm9, %v3545_v61, %v3620_v30 }
 0x92b   : > { %v3590_v24 = vrot.slane %v3588_v19, 7  ;;  %v3627_v16 = vsel %vm7430_vm9, %v3553_v53, %v3626_v56  ;;  %v3577_v29 = vor.u32 %v3575_v4, %v3574_v42  ;;  %3622 = vst [vmem:[#allocation3 + $0x8] sm:$0xf] %v3621_v36  ;;  %v3630_v6 = vsel %vm7378_vm6, %v3554_v44, %v3629_v50 }
 0x92c   : > { %v3624_v3 = vsel %vm7378_vm6, %v3546_v11, %v3623_v9  ;;  %3628 = vst [vmem:[#allocation3 + $0x10] sm:$0xf] %v3627_v16  ;;  %v3633_v54 = vsel %vm7430_vm9, %v3561_v63, %v3632_v1  ;;  %v3585_v46 = vor.u32 %v3583_v48, %v3582_v17  ;;  %3631 = vst [vmem:[#allocation3 + $0x14] sm:$0x1] %v3630_v6  ;;  %v3570_v21 = vrot.slane %v3566_v26, 4 }
 0x92d   : > { %v3593_v59 = vor.u32 %v3591_v2, %v3590_v24  ;;  %3625 = vst [vmem:[#allocation3 + $0xc] sm:$0x1] %v3624_v3  ;;  %3634 = vst [vmem:[#allocation3 + $0x18] sm:$0xf] %v3633_v54  ;;  %v3636_v5 = vsel %vm7378_vm6, %v3562_v7, %v3635_v13  ;;  %v3578_v35 = vrot.slane %v3574_v42, 4  ;;  %v3639_v62 = vsel %vm7430_vm9, %v3569_v49, %v3638_v20 }
 0x92e   : > { %3637 = vst [vmem:[#allocation3 + $0x1c] sm:$0x1] %v3636_v5  ;;  %v3645_v39 = vsel %vm7430_vm9, %v3577_v29, %v3644_v43  ;;  %v3586_v33 = vrot.slane %v3582_v17, 4  ;;  %3640 = vst [vmem:[#allocation3 + $0x20] sm:$0xf] %v3639_v62  ;;  %v3642_v60 = vsel %vm7378_vm6, %v3570_v21, %v3641_v31  ;;  %v3594_v12 = vrot.slane %v3590_v24, 4 }
 0x92f   : > { %3646 = vst [vmem:[#allocation3 + $0x28] sm:$0xf] %v3645_v39  ;;  %v3651_v55 = vsel %vm7430_vm9, %v3585_v46, %v3650_v38  ;;  %v3657_v47 = vsel %vm7430_vm9, %v3593_v59, %v3656_v14  ;;  %v3441_v10 = vmul.f32 %v7014_v41, %v8123_v57  ;;  %3643 = vst [vmem:[#allocation3 + $0x24] sm:$0x1] %v3642_v60  ;;  %v3700_v57 = vrot.slane %v3699_v58, 4 }
 0x930   : > { %v3648_v30 = vsel %vm7378_vm6, %v3578_v35, %v3647_v22  ;;  %3652 = vst [vmem:[#allocation3 + $0x30] sm:$0xf] %v3651_v55  ;;  %v3654_v61 = vsel %vm7378_vm6, %v3586_v33, %v3653_v34  ;;  %3658 = vst [vmem:[#allocation3 + $0x38] sm:$0xf] %v3657_v47  ;;  %v3660_v53 = vsel %vm7378_vm6, %v3594_v12, %v3659_v32  ;;  %v3704_v52 = vrot.slane %v3702_v28, 5 }
 0x931   : > { %3649 = vst [vmem:[#allocation3 + $0x2c] sm:$0x1] %v3648_v30  ;;  %3655 = vst [vmem:[#allocation3 + $0x34] sm:$0x1] %v3654_v61  ;;  %v8180_v56 = vpack.c.bf16 %v3441_v10, %v3441_v10 }
 0x932   : > { %3661 = vst [vmem:[#allocation3 + $0x3c] sm:$0x1] %v3660_v53  ;;  %v8171_v44 = vld [vmem:[#allocation3 + $0x8] sm:$0xf]  ;;  %v3705_v2 = vsel %vm7549_vm12, %v3700_v57, %v3704_v52 }
 0x933   : > { %v8178_v9 = vld [vmem:[#allocation3 + $0x10] sm:$0xf]  ;;  %v3707_v7 = vshrl.u32 %v8171_v44, 16  ;;  %v3710_v26 = vshll.u32 %v8171_v44, 16  ;;  %v8189_v4 = vld [vmem:[#allocation3 + $0x14] sm:$0x1] }
 0x934   : > { %v8182_v63 = vld [vmem:[#allocation3 + $0xc] sm:$0x1]  ;;  %v8186_v0 = vld [vmem:[#allocation3 + $0x18] sm:$0xf]  ;;  %v3721_v18 = vshrl.u32 %v8178_v9, 16  ;;  %v3724_v23 = vshll.u32 %v8178_v9, 16 }
 0x935   : > { %v3716_v1 = vshll.u32 %v8182_v63, 16  ;;  %v3709_v8 = vrot.slane %v3707_v7, 4  ;;  %v3712_v28 = vrot.slane %v3710_v26, 5  ;;  %v8192_v58 = vld [vmem:[#allocation3 + $0x1c] sm:$0x1]  ;;  %v3730_v48 = vshll.u32 %v8189_v4, 16 }
 0x936   : > { %v3723_v19 = vrot.slane %v3721_v18, 4  ;;  %v3735_v50 = vshrl.u32 %v8186_v0, 16  ;;  %v3738_v49 = vshll.u32 %v8186_v0, 16  ;;  %v8198_v42 = vld [vmem:[#allocation3 + $0x20] sm:$0xf]  ;;  %v3726_v13 = vrot.slane %v3724_v23, 5 }
 0x937   : > { %v3713_v11 = vor.u32 %v3712_v28, %v3709_v8  ;;  %v8202_v17 = vld [vmem:[#allocation3 + $0x28] sm:$0xf]  ;;  %v8204_v24 = vld [vmem:[#allocation3 + $0x24] sm:$0x1]  ;;  %v3596_v36 = vshrl.u32 %v8180_v56, 16  ;;  %v3718_v16 = vrot.slane %v3716_v1, 5 }
 0x938   : > { %v3737_v20 = vrot.slane %v3735_v50, 4  ;;  %v3740_v43 = vrot.slane %v3738_v49, 5  ;;  %v3744_v29 = vshll.u32 %v8192_v58, 16  ;;  %v3727_v6 = vor.u32 %v3726_v13, %v3723_v19  ;;  %v8209_v14 = vld [vmem:[#allocation3 + $0x2c] sm:$0x1]  ;;  %v6904_v18 = vld [vmem:[%s8635_s12 + $0x8] sm:$0xff]  }
 0x939   : > { %v3714_v3 = vrot.slane %v3713_v11, 4  ;;  %v3732_v54 = vrot.slane %v3730_v48, 5  ;;  %v3749_v31 = vshrl.u32 %v8198_v42, 16  ;;  %v3752_v41 = vshll.u32 %v8198_v42, 16  ;;  %v8217_v35 = vld [vmem:[#allocation3 + $0x30] sm:$0xf] }
 0x93a   : > { %v3741_v38 = vor.u32 %v3740_v43, %v3737_v20  ;;  %v3758_v46 = vshll.u32 %v8204_v24, 16  ;;  %v3763_v59 = vshrl.u32 %v8202_v17, 16  ;;  %v3728_v21 = vrot.slane %v3727_v6, 4  ;;  %v8222_v10 = vld [vmem:[#allocation3 + $0x38] sm:$0xf] }
 0x93b   : > { %v3719_v5 = vsel %vm7549_vm12, %v3714_v3, %v3718_v16  ;;  %v3751_v22 = vrot.slane %v3749_v31, 4  ;;  %v3766_v34 = vshll.u32 %v8202_v17, 16  ;;  %v3746_v33 = vrot.slane %v3744_v29, 5  ;;  %v8227_v53 = vld [vmem:[#allocation3 + $0x34] sm:$0x1]  ;;  %v6905_v16 = vld [vmem:[%s8635_s12 + $0x10] sm:$0xff]  }
 0x93c   : > { %v5787_v62 = vcombine.low %v3705_v2, %v3719_v5  ;;  %v3742_v39 = vrot.slane %v3741_v38, 4  ;;  %v3754_v32 = vrot.slane %v3752_v41, 5  ;;  %v3733_v60 = vsel %vm7549_vm12, %v3728_v21, %v3732_v54  ;;  %v8234_v28 = vld [vmem:[#allocation3 + $0x3c] sm:$0x1]  ;;  %v4048_v15 = vld [vmem:[#allocation3 + $0x8] sm:$0xe] }
 0x93d   : > { %v3765_v12 = vrot.slane %v3763_v59, 4  ;;  %v3768_v55 = vrot.slane %v3766_v34, 5  ;;  %v3772_v47 = vshll.u32 %v8209_v14, 16  ;;  %v3777_v57 = vshrl.u32 %v8217_v35, 16  ;;  %v3662_v34 = vld [vmem:[#allocation3 + $0x40] sm:$0xf] }
 0x93e   : > { %6471 = vmatprep.mubr.msk.bf16.mxu1 %vm503_vm1, %v5787_v62  ;;  %v3747_v30 = vsel %vm7549_vm12, %v3742_v39, %v3746_v33  ;;  %v3755_v61 = vor.u32 %v3754_v32, %v3751_v22  ;;  %v3780_v52 = vshll.u32 %v8217_v35, 16  ;;  %v3760_v26 = vrot.slane %v3758_v46, 5  ;;  %v6908_v32 = vld [vmem:[%s8635_s12 + $0x40] sm:$0xff]  }
 0x93f   : > { %v5788_v7 = vcombine.low %v3733_v60, %v3747_v30  ;;  %v3769_v1 = vor.u32 %v3768_v55, %v3765_v12  ;;  %v3779_v23 = vrot.slane %v3777_v57, 4  ;;  %v3791_v19 = vshrl.u32 %v8222_v10, 16  ;;  %v3665_v12 = vld [vmem:[#allocation3 + $0x44] sm:$0x1]  ;;  %v4047_v55 = vld [vmem:[#allocation3] sm:$0xe] }
 0x940   : > { %v3756_v8 = vrot.slane %v3755_v61, 4  ;;  %v3782_v48 = vrot.slane %v3780_v52, 5  ;;  %v3774_v49 = vrot.slane %v3772_v47, 5  ;;  %v3786_v2 = vshll.u32 %v8227_v53, 16 }
 0x941   : > { %6472 = vmatmul.mubr.msk.bf16.vlgmr.msra.gmra.mrb[8].mxu1 %vm503_vm1, %v5788_v7  ;;  %v3770_v50 = vrot.slane %v3769_v1, 4  ;;  %v3794_v11 = vshll.u32 %v8222_v10, 16  ;;  %v3793_v43 = vrot.slane %v3791_v19, 4  ;;  %v3598_v29 = vrot.slane %v3596_v36, 7  ;;  %v6907_v36 = vld [vmem:[%s8635_s12 + $0x18] sm:$0xff]  }
 0x942   : > { %6480 = vmatpush3.bf16.msra.mxu1 %v8064_v45  ;;  %v3761_v13 = vsel %vm7549_vm12, %v3756_v8, %v3760_v26  ;;  %v3783_v20 = vor.u32 %v3782_v48, %v3779_v23  ;;  %v3800_v54 = vshll.u32 %v8234_v28, 16  ;;  %v3599_v45 = vshll.u32 %v8180_v56, 16  ;;  %v4052_v26 = vld [vmem:[#allocation3 + $0x28] sm:$0xe] }
 0x943   : > { %v3775_v3 = vsel %vm7549_vm12, %v3770_v50, %v3774_v49  ;;  %6481 = vmatprep.subr.bf16.mxu1 %v6904_v18  ;;  %v3796_v6 = vrot.slane %v3794_v11, 5  ;;  %v3788_v41 = vrot.slane %v3786_v2, 5  ;;  %v5799_v33 = vcombine.low %v8126_v51, %v8171_v44  ;;  %v6911_v51 = vld [vmem:[%s8635_s12 + $0x48] sm:$0xff]  }
 0x944   : > { %v5789_v31 = vcombine.low %v3761_v13, %v3775_v3  ;;  %v3784_v38 = vrot.slane %v3783_v20, 4  ;;  %v3601_v59 = vor.u32 %v3599_v45, %v3598_v29  ;;  %v3802_v22 = vrot.slane %v3800_v54, 5  ;;  %v6917_v45 = vld [vmem:[%s8635_s12 + $0x70] sm:$0xff]  }
 0x945   : > { %v3797_v46 = vor.u32 %v3796_v6, %v3793_v43  ;;  %v3602_v60 = vrot.slane %v3598_v29, 4  ;;  %v5800_v47 = vcombine.low %v8178_v9, %v8186_v0  ;;  %v5801_v30 = vcombine.low %v8198_v42, %v8202_v17  ;;  %v4049_v42 = vld [vmem:[#allocation3 + $0x10] sm:$0xe]  ;;  %v4050_v17 = vld [vmem:[#allocation3 + $0x18] sm:$0xe] }
 0x946   : > { %6475 = vmatprep.mubr.msk.bf16.mxu1 %vm503_vm1, %v5789_v31  ;;  %6482 = vmatpush3.bf16.msra.mxu1 %v6904_v18  ;;  %v3789_v5 = vsel %vm7549_vm12, %v3784_v38, %v3788_v41  ;;  %v3663_v39 = vsel %vm7430_vm9, %v3601_v59, %v3662_v34  ;;  %v5811_v61 = vrot.slane %v4047_v55, 9  ;;  %v4073_v57 = vrot.slane %v8134_v40, 5  ;;  %v4051_v40 = vld [vmem:[#allocation3 + $0x20] sm:$0xe]  ;;  %v6914_v18 = vld [vmem:[%s8635_s12 + $0x58] sm:$0xff]   ;;  %v6916_v6 = vld [vmem:[%s8635_s12 + $0x68] sm:$0xff]  }
 0x947   : > { %6483 = vmatprep.subr.bf16.mxu1 %v6905_v16  ;;  %v3798_v21 = vrot.slane %v3797_v46, 4  ;;  %3664 = vst [vmem:[#allocation3 + $0x40] sm:$0xf] %v3663_v39  ;;  %v3666_v44 = vsel %vm7378_vm6, %v3602_v60, %v3665_v12  ;;  %v5812_v52 = vrot.slane %v4048_v15, 9  ;;  %v4077_v7 = vrot.slane %v8182_v63, 5 }
 0x948   : > { %3667 = vst [vmem:[#allocation3 + $0x44] sm:$0x1] %v3666_v44  ;;  %v4074_v9 = vsel %vm7645_vm15, %v5811_v61, %v4073_v57  ;;  %v4081_v63 = vrot.slane %v8189_v4, 5  ;;  %v5802_v1 = vcombine.low %v8217_v35, %v8222_v10  ;;  %v4085_v8 = vrot.slane %v8192_v58, 5  ;;  %v6915_v35 = vld [vmem:[%s8635_s12 + $0x60] sm:$0xff]  }
 0x949   : > { %v3803_v56 = vsel %vm7549_vm12, %v3798_v21, %v3802_v22  ;;  %v4078_v0 = vsel %vm7645_vm15, %v5812_v52, %v4077_v7  ;;  %v5813_v48 = vrot.slane %v4049_v42, 9  ;;  %v5814_v19 = vrot.slane %v4050_v17, 9  ;;  %v4053_v58 = vld [vmem:[#allocation3 + $0x30] sm:$0xe]  ;;  %v4054_v10 = vld [vmem:[#allocation3 + $0x38] sm:$0xe] }
 0x94a   : > { %v5790_v62 = vcombine.low %v3789_v5, %v3803_v56  ;;  %6484 = vmatpush3.bf16.msra.mxu1 %v6905_v16  ;;  %v5827_v23 = vcombine.low %v4074_v9, %v4078_v0  ;;  %v5815_v50 = vrot.slane %v4051_v40, 9  ;;  %v4089_v49 = vrot.slane %v8204_v24, 5  ;;  %v4379_v31 = vld [vmem:[#allocation3 + $0x8] sm:$0xf]  ;;  %v4381_v38 = vld [vmem:[#allocation3 + $0x10] sm:$0xf] }
 0x94b   : > { %6485 = vmatprep.subr.bf16.mxu1 %v6907_v36  ;;  %v5816_v2 = vrot.slane %v4052_v26, 9  ;;  %v4093_v4 = vrot.slane %v8209_v14, 5  ;;  %v4082_v11 = vsel %vm7645_vm15, %v5813_v48, %v4081_v63  ;;  %v4086_v13 = vsel %vm7645_vm15, %v5814_v19, %v4085_v8  ;;  %v6919_v21 = vld [vmem:[%s8635_s12 + $0x78] sm:$0xff]   ;;  %v4383_v39 = vld [vmem:[#allocation3 + $0x18] sm:$0xf]  ;;  %v6920_v44 = vld [vmem:[%s8635_s12 + $0x80] sm:$0xff]  }
 0x94c   : > { %6476 = vmatmul.mubr.msk.bf16.gmra.mrb[12].mxu1 %vm503_vm1, %v5790_v62  ;;  %v4090_v24 = vsel %vm7645_vm15, %v5815_v50, %v4089_v49  ;;  %v5817_v16 = vrot.slane %v4053_v58, 9  ;;  %v4097_v20 = vrot.slane %v8227_v53, 5  ;;  %v5818_v43 = vrot.slane %v4054_v10, 9  ;;  %v8327_v60 = vld [vmem:[#allocation3 + $0xc] sm:$0x1]  ;;  %v6923_v40 = vld [vmem:[%s8635_s12 + $0x88] sm:$0xff]  }
 0x94d   : > { %6487 = vmatprep.mubr.msk.bf16.mxu1 %vm503_vm1, %v5799_v33  ;;  %v4094_v14 = vsel %vm7645_vm15, %v5816_v2, %v4093_v4  ;;  %v4101_v29 = vrot.slane %v8234_v28, 5  ;;  %v5828_v3 = vcombine.low %v4082_v11, %v4086_v13  ;;  %v4396_v41 = vshrl.u32 %v4379_v31, 16  ;;  %v6918_v33 = vld [vmem:[#allocation3 + $0x8] ss:$8 sps:$4 sm:$0xff]   ;;  %v8329_v12 = vld [vmem:[#allocation3 + $0x14] sm:$0x1] }
 0x94e   : > { %6486 = vmatpush3.bf16.msra.mxu1 %v6907_v36  ;;  %v5829_v54 = vcombine.low %v4090_v24, %v4094_v14  ;;  %v4098_v53 = vsel %vm7645_vm15, %v5817_v16, %v4097_v20  ;;  %v4399_v46 = vshll.u32 %v4379_v31, 16  ;;  %v4410_v36 = vshrl.u32 %v4381_v38, 16  ;;  %v6922_v19 = vld [vmem:[#allocation3 + $0x28] ss:$8 sps:$4 sm:$0xff]   ;;  %v4391_v2 = vld [vmem:[#allocation3 + $0x38] sm:$0xf] }
 0x94f   : > { %6495 = vmatprep.subr.bf16.mxu1 %v6908_v32  ;;  %v4102_v28 = vsel %vm7645_vm15, %v5818_v43, %v4101_v29  ;;  %v4413_v59 = vshll.u32 %v4381_v38, 16  ;;  %v4398_v22 = vrot.slane %v4396_v41, 4  ;;  %v4424_v55 = vshrl.u32 %v4383_v39, 16  ;;  %v4393_v11 = vld [vmem:[#allocation3 + $0x40] sm:$0xf] }
 0x950   : > { %v5830_v5 = vcombine.low %v4098_v53, %v4102_v28  ;;  %v4401_v34 = vrot.slane %v4399_v46, 5  ;;  %v4412_v56 = vrot.slane %v4410_v36, 4  ;;  %v4427_v15 = vshll.u32 %v4383_v39, 16  ;;  %v6924_v13 = vld [vmem:[%s8635_s12 + $0x90] sm:$0xff]   ;;  %v8349_v20 = vld [vmem:[#allocation3 + $0x1c] sm:$0x1] }
 0x951   : > { %v4415_v62 = vrot.slane %v4413_v59, 5  ;;  %v4405_v7 = vshll.u32 %v8327_v60, 16  ;;  %v4426_v26 = vrot.slane %v4424_v55, 4  ;;  %v8351_v43 = vld [vmem:[#allocation3 + $0x24] sm:$0x1]  ;;  %v4483_v31 = vshll.u32 %v4391_v2, 16 }
 0x952   : > { %v4429_v63 = vrot.slane %v4427_v15, 5  ;;  %v4494_v38 = vshrl.u32 %v4393_v11, 16  ;;  %v4497_v53 = vshll.u32 %v4393_v11, 16  ;;  %v4433_v46 = vshll.u32 %v8349_v20, 16  ;;  %v6925_v59 = vld [vmem:[#allocation3 + $0x38] ss:$8 sps:$4 sm:$0xff]  }
 0x953   : > { %v4416_v61 = vor.u32 %v4415_v62, %v4412_v56  ;;  %v4407_v50 = vrot.slane %v4405_v7, 5  ;;  %v4447_v36 = vshll.u32 %v8351_v43, 16  ;;  %v4485_v39 = vrot.slane %v4483_v31, 5  ;;  %v6930_v31 = vld [vmem:[%s8635_s12 + $0xb8] sm:$0xff]  }
 0x954   : > { %6488 = vmatmul.mubr.msk.bf16.vlgmr.msra.gmra.mrb[8].mxu1 %vm503_vm1, %v5800_v47  ;;  %v4387_v47 = vld [vmem:[#allocation3 + $0x28] sm:$0xf]  ;;  %v4430_v24 = vor.u32 %v4429_v63, %v4426_v26 }
 0x955   : > { %6496 = vmatpush3.bf16.msra.mxu1 %v6908_v32  ;;  %6491 = vmatprep.mubr.msk.bf16.mxu1 %vm503_vm1, %v5801_v30  ;;  %v4385_v32 = vld [vmem:[#allocation3 + $0x20] sm:$0xf]  ;;  %v4402_v30 = vor.u32 %v4401_v34, %v4398_v22  ;;  %v4452_v9 = vshrl.u32 %v4387_v47, 16  ;;  %v4455_v0 = vshll.u32 %v4387_v47, 16  ;;  %v4417_v8 = vrot.slane %v4416_v61, 4  ;;  %v6927_v47 = vld [vmem:[%s8635_s12 + $0xa0] sm:$0xff]  }
 0x956   : > { %6497 = vmatprep.subr.bf16.mxu1 %v6911_v51  ;;  %v4438_v57 = vshrl.u32 %v4385_v32, 16  ;;  %v4441_v52 = vshll.u32 %v4385_v32, 16  ;;  %v4431_v41 = vrot.slane %v4430_v24, 4  ;;  %v4499_v32 = vrot.slane %v4497_v53, 5  ;;  %v4637_v63 = vld [vmem:[#allocation3 + $0x8] sm:$0xe] }
 0x957   : > { %v4454_v4 = vrot.slane %v4452_v9, 4 }
 0x958   : > { %v4443_v48 = vrot.slane %v4441_v52, 5  ;;  %v8371_v52 = vld [vmem:[#allocation3 + $0x44] sm:$0x1] }
 0x959   : > { %6498 = vmatpush3.bf16.msra.mxu1 %v6911_v51  ;;  %v4389_v51 = vld [vmem:[#allocation3 + $0x30] sm:$0xf]  ;;  %v4503_v26 = vshll.u32 %v8371_v52, 16 }
 0x95a   : > { %6499 = vmatprep.subr.bf16.mxu1 %v6912_v37  ;;  %v4466_v42 = vshrl.u32 %v4389_v51, 16  ;;  %v4469_v17 = vshll.u32 %v4389_v51, 16  ;;  %v4435_v51 = vrot.slane %v4433_v46, 5 }
 0x95c   : > { %6492 = vmatmul.mubr.msk.bf16.gmra.mrb[12].mxu1 %vm503_vm1, %v5802_v1  ;;  %v6921_v1 = vld [vmem:[#allocation3 + $0x18] ss:$8 sps:$4 sm:$0xff]   ;;  %v4468_v58 = vrot.slane %v4466_v42, 4  ;;  %v4471_v10 = vrot.slane %v4469_v17, 5  ;;  %v4436_v7 = vsel %vm7549_vm12, %v4431_v41, %v4435_v51  ;;  %v4675_v41 = vrot.slane %v8351_v43, 5 }
 0x95d   : > { %6500 = vmatpush3.bf16.msra.mxu1 %v6912_v37  ;;  %6503 = vmatprep.mubr.msk.bf16.mxu1 %vm503_vm1, %v5827_v23  ;;  %v4419_v37 = vshll.u32 %v8329_v12, 16  ;;  %v4440_v23 = vrot.slane %v4438_v57, 4  ;;  %v8369_v57 = vld [vmem:[#allocation3 + $0x3c] sm:$0x1]  ;;  %v4972_v51 = vld [vmem:[#allocation3 + $0x18] sm:$0xf] }
 0x95e   : > { %6501 = vmatprep.subr.bf16.mxu1 %v6914_v18 }
 0x95f   : > { %v4421_v49 = vrot.slane %v4419_v37, 5  ;;  %v4444_v29 = vor.u32 %v4443_v48, %v4440_v23 }
 0x961   : > { %6502 = vmatpush3.bf16.msra.mxu1 %v6914_v18  ;;  %v4403_v18 = vrot.slane %v4402_v30, 4  ;;  %v4422_v16 = vsel %vm7549_vm12, %v4417_v8, %v4421_v49  ;;  %v4445_v22 = vrot.slane %v4444_v29, 4  ;;  %v6928_v8 = vld [vmem:[%s8635_s12 + $0xa8] sm:$0xff]   ;;  %v4663_v49 = vrot.slane %v8327_v60, 5  ;;  %v4642_v29 = vld [vmem:[#allocation3 + $0x30] sm:$0xe] }
 0x962   : > { %6511 = vmatprep.subr.bf16.mxu1 %v6915_v35  ;;  %v4639_v60 = vld [vmem:[#allocation3 + $0x18] sm:$0xe] }
 0x963   : > { %v4408_v14 = vsel %vm7549_vm12, %v4403_v18, %v4407_v50  ;;  %v5879_v50 = vrot.slane %v4637_v63, 9 }
 0x964   : > { %6504 = vmatmul.mubr.msk.bf16.vlgmr.msra.gmra.mrb[8].mxu1 %vm503_vm1, %v5828_v3  ;;  %v8353_v3 = vld [vmem:[#allocation3 + $0x2c] sm:$0x1] }
 0x965   : > { %6512 = vmatpush3.bf16.msra.mxu1 %v6915_v35  ;;  %6507 = vmatprep.mubr.msk.bf16.mxu1 %vm503_vm1, %v5829_v54  ;;  %v4457_v35 = vrot.slane %v4455_v0, 5  ;;  %v4480_v54 = vshrl.u32 %v4391_v2, 16  ;;  %v4461_v34 = vshll.u32 %v8353_v3, 16 }
 0x966   : > { %6513 = vmatprep.subr.bf16.mxu1 %v6916_v6 }
 0x967   : > { %v4458_v28 = vor.u32 %v4457_v35, %v4454_v4  ;;  %v4482_v62 = vrot.slane %v4480_v54, 4  ;;  %v4463_v30 = vrot.slane %v4461_v34, 5  ;;  %v4667_v4 = vrot.slane %v8329_v12, 5  ;;  %v4644_v34 = vld [vmem:[#allocation3 + $0x40] sm:$0xe] }
 0x968   : > { %v4664_v12 = vsel %vm7645_vm15, %v5879_v50, %v4663_v49  ;;  %v8443_v49 = vld [vmem:[#allocation3 + $0x14] sm:$0x1] }
 0x969   : > { %6514 = vmatpush3.bf16.msra.mxu1 %v6916_v6  ;;  %v8355_v6 = vld [vmem:[#allocation3 + $0x34] sm:$0x1]  ;;  %v4459_v55 = vrot.slane %v4458_v28, 4  ;;  %v4486_v9 = vor.u32 %v4485_v39, %v4482_v62  ;;  %v4671_v28 = vrot.slane %v8349_v20, 5  ;;  %v6932_v62 = vld [vmem:[%s8635_s12 + $0xc8] sm:$0xff]  }
 0x96a   : > { %6515 = vmatprep.subr.bf16.mxu1 %v6917_v45  ;;  %v4475_v56 = vshll.u32 %v8355_v6, 16 }
 0x96b   : > { %v4464_v42 = vsel %vm7549_vm12, %v4459_v55, %v4463_v30  ;;  %v4487_v48 = vrot.slane %v4486_v9, 4  ;;  %v5886_v55 = vrot.slane %v4644_v34, 9 }
 0x96c   : > { %6508 = vmatmul.mubr.msk.bf16.gmra.mrb[12].mxu1 %vm503_vm1, %v5830_v5  ;;  %v5867_v5 = vcombine.low %v4408_v14, %v4422_v16  ;;  %v4477_v61 = vrot.slane %v4475_v56, 5  ;;  %v4640_v14 = vld [vmem:[#allocation3 + $0x20] sm:$0xe]  ;;  %v4641_v16 = vld [vmem:[#allocation3 + $0x28] sm:$0xe] }
 0x96d   : > { %6516 = vmatpush3.bf16.msra.mxu1 %v6917_v45  ;;  %6519 = vmatprep.mubr.msk.bf16.mxu1 %vm503_vm1, %v6918_v33  ;;  %v4472_v45 = vor.u32 %v4471_v10, %v4468_v58  ;;  %v4496_v33 = vrot.slane %v4494_v38, 4  ;;  %v4505_v58 = vrot.slane %v4503_v26, 5  ;;  %v6929_v10 = vld [vmem:[%s8635_s12 + $0xb0] sm:$0xff]   ;;  %v5881_v38 = vrot.slane %v4639_v60, 9 }
 0x96e   : > { %6517 = vmatprep.subr.bf16.mxu1 %v6919_v21  ;;  %v5883_v46 = vrot.slane %v4641_v16, 9  ;;  %v6937_v16 = vld [vmem:[#allocation3 + $0x20] ss:$8 sps:$4 sm:$0xff]  }
 0x96f   : > { %v4473_v15 = vrot.slane %v4472_v45, 4  ;;  %v4500_v0 = vor.u32 %v4499_v32, %v4496_v33  ;;  %v5882_v45 = vrot.slane %v4640_v14, 9  ;;  %v4672_v20 = vsel %vm7645_vm15, %v5881_v38, %v4671_v28  ;;  %v4984_v14 = vld [vmem:[#allocation3 + $0x48] sm:$0xf] }
 0x970   : > { %v4687_v33 = vrot.slane %v8369_v57, 5 }
 0x971   : > { %6518 = vmatpush3.bf16.msra.mxu1 %v6919_v21  ;;  %v6926_v21 = vld [vmem:[%s8635_s12 + $0x98] sm:$0xff]   ;;  %v4478_v17 = vsel %vm7549_vm12, %v4473_v15, %v4477_v61  ;;  %v4676_v43 = vsel %vm7645_vm15, %v5882_v45, %v4675_v41  ;;  %v4691_v15 = vrot.slane %v8371_v52, 5 }
 0x972   : > { %6527 = vmatprep.subr.bf16.mxu1 %v6920_v44  ;;  %v5869_v23 = vcombine.low %v4464_v42, %v4478_v17  ;;  %v5896_v56 = vcombine.low %v4672_v20, %v4676_v43  ;;  %v6935_v42 = vld [vmem:[%s8635_s12 + $0xd8] sm:$0xff]   ;;  %v4982_v20 = vld [vmem:[#allocation3 + $0x40] sm:$0xf] }
 0x973   : > { %v6940_v43 = vld [vmem:[%s8635_s12 + $0xf0] sm:$0xff]  }
 0x974   : > { %6520 = vmatmul.mubr.msk.bf16.vlgmr.msra.gmra.mrb[8].mxu1 %vm503_vm1, %v6921_v1  ;;  %v4638_v1 = vld [vmem:[#allocation3 + $0x10] sm:$0xe] }
 0x975   : > { %6528 = vmatpush3.bf16.msra.mxu1 %v6920_v44  ;;  %6523 = vmatprep.mubr.msk.bf16.mxu1 %vm503_vm1, %v6922_v19  ;;  %v4449_v44 = vrot.slane %v4447_v36, 5  ;;  %v4501_v19 = vrot.slane %v4500_v0, 4  ;;  %v5880_v2 = vrot.slane %v4638_v1, 9  ;;  %v4679_v36 = vrot.slane %v8353_v3, 5  ;;  %v6934_v0 = vld [vmem:[#allocation3 + $0x10] ss:$8 sps:$4 sm:$0xff]  }
 0x976   : > { %6529 = vmatprep.subr.bf16.mxu1 %v6923_v40  ;;  %v4974_v1 = vld [vmem:[#allocation3 + $0x20] sm:$0xf] }
 0x977   : > { %v4450_v37 = vsel %vm7549_vm12, %v4445_v22, %v4449_v44  ;;  %v4668_v24 = vsel %vm7645_vm15, %v5880_v2, %v4667_v4  ;;  %v4643_v22 = vld [vmem:[#allocation3 + $0x38] sm:$0xe]  ;;  %v4680_v3 = vsel %vm7645_vm15, %v5883_v46, %v4679_v36  ;;  %v6933_v44 = vld [vmem:[%s8635_s12 + $0xd0] sm:$0xff]   ;;  %v5018_v50 = vshll.u32 %v4974_v1, 16  ;;  %v8445_v2 = vld [vmem:[#allocation3 + $0x1c] sm:$0x1] }
 0x978   : > { %v5868_v18 = vcombine.low %v4436_v7, %v4450_v37  ;;  %v5895_v53 = vcombine.low %v4664_v12, %v4668_v24  ;;  %v5885_v39 = vrot.slane %v4643_v22, 9  ;;  %v5001_v7 = vshrl.u32 %v4972_v51, 16  ;;  %v6939_v24 = vld [vmem:[%s8635_s12 + $0xe8] sm:$0xff]  }
 0x979   : > { %6530 = vmatpush3.bf16.msra.mxu1 %v6923_v40  ;;  %v4489_v40 = vshll.u32 %v8369_v57, 16  ;;  %v4692_v57 = vsel %vm7645_vm15, %v5886_v55, %v4691_v15  ;;  %v5004_v37 = vshll.u32 %v4972_v51, 16  ;;  %v5020_v38 = vrot.slane %v5018_v50, 5  ;;  %v8463_v55 = vld [vmem:[#allocation3 + $0x3c] sm:$0x1] }
 0x97a   : > { %6531 = vmatprep.subr.bf16.mxu1 %v6924_v13  ;;  %v4688_v30 = vsel %vm7645_vm15, %v5885_v39, %v4687_v33  ;;  %v5003_v26 = vrot.slane %v5001_v7, 4  ;;  %v5085_v22 = vshrl.u32 %v4984_v14, 16  ;;  %v5071_v15 = vshrl.u32 %v4982_v20, 16  ;;  %v8478_v50 = vld [vmem:[#allocation3 + $0x4c] sm:$0x1] }
 0x97b   : > { %v4491_v35 = vrot.slane %v4489_v40, 5  ;;  %v5898_v9 = vcombine.low %v4688_v30, %v4692_v57  ;;  %v5006_v63 = vrot.slane %v5004_v37, 5 }
 0x97c   : > { %6524 = vmatmul.mubr.msk.bf16.gmra.mrb[12].mxu1 %vm503_vm1, %v6925_v59  ;;  %v5884_v59 = vrot.slane %v4642_v29, 9  ;;  %v4996_v29 = vshll.u32 %v8443_v49, 16  ;;  %v5087_v7 = vrot.slane %v5085_v22, 4 }
 0x97d   : > { %6532 = vmatpush3.bf16.msra.mxu1 %v6924_v13  ;;  %6535 = vmatprep.mubr.msk.bf16.mxu1 %vm503_vm1, %v5867_v5  ;;  %v4492_v11 = vsel %vm7549_vm12, %v4487_v48, %v4491_v35  ;;  %v4506_v13 = vsel %vm7549_vm12, %v4501_v19, %v4505_v58  ;;  %v4683_v5 = vrot.slane %v8355_v6, 5  ;;  %v6936_v48 = vld [vmem:[%s8635_s12 + $0xe0] sm:$0xff]   ;;  %v5015_v19 = vshrl.u32 %v4974_v1, 16 }
 0x97e   : > { %6533 = vmatprep.subr.bf16.mxu1 %v6926_v21  ;;  %v5870_v54 = vcombine.low %v4492_v11, %v4506_v13  ;;  %v5007_v35 = vor.u32 %v5006_v63, %v5003_v26  ;;  %v5073_v1 = vrot.slane %v5071_v15, 4 }
 0x97f   : > { %v4684_v6 = vsel %vm7645_vm15, %v5884_v59, %v4683_v5 }
 0x980   : > { %v5897_v32 = vcombine.low %v4680_v3, %v4684_v6  ;;  %v5008_v45 = vrot.slane %v5007_v35, 4  ;;  %v5088_v3 = vshll.u32 %v4984_v14, 16  ;;  %v4998_v6 = vrot.slane %v4996_v29, 5 }
 0x981   : > { %6534 = vmatpush3.bf16.msra.mxu1 %v6926_v21  ;;  %v6931_v21 = vld [vmem:[%s8635_s12 + $0xc0] sm:$0xff]  }
 0x982   : > { %6543 = vmatprep.subr.bf16.mxu1 %v6927_v47  ;;  %v5090_v37 = vrot.slane %v5088_v3, 5 }
 0x984   : > { %6536 = vmatmul.mubr.msk.bf16.vlgmr.msra.gmra.mrb[8].mxu1 %vm503_vm1, %v5868_v18  ;;  %v4976_v18 = vld [vmem:[#allocation3 + $0x28] sm:$0xf] }
 0x985   : > { %6544 = vmatpush3.bf16.msra.mxu1 %v6927_v47  ;;  %6539 = vmatprep.mubr.msk.bf16.mxu1 %vm503_vm1, %v5869_v23  ;;  %v4970_v47 = vld [vmem:[#allocation3 + $0x10] sm:$0xf]  ;;  %v4980_v23 = vld [vmem:[#allocation3 + $0x38] sm:$0xf]  ;;  %v5029_v58 = vshrl.u32 %v4976_v18, 16 }
 0x986   : > { %6545 = vmatprep.subr.bf16.mxu1 %v6928_v8  ;;  %v4987_v61 = vshrl.u32 %v4970_v47, 16  ;;  %v4990_v52 = vshll.u32 %v4970_v47, 16  ;;  %v5057_v60 = vshrl.u32 %v4980_v23, 16  ;;  %v5060_v12 = vshll.u32 %v4980_v23, 16 }
 0x987   : > { %v5031_v41 = vrot.slane %v5029_v58, 4  ;;  %v5074_v47 = vshll.u32 %v4982_v20, 16 }
 0x988   : > { %v4989_v17 = vrot.slane %v4987_v61, 4  ;;  %v4992_v40 = vrot.slane %v4990_v52, 5  ;;  %v5059_v5 = vrot.slane %v5057_v60, 4 }
 0x989   : > { %6546 = vmatpush3.bf16.msra.mxu1 %v6928_v8  ;;  %v4978_v8 = vld [vmem:[#allocation3 + $0x30] sm:$0xf] }
 0x98a   : > { %6547 = vmatprep.subr.bf16.mxu1 %v6929_v10  ;;  %v4993_v4 = vor.u32 %v4992_v40, %v4989_v17  ;;  %v5043_v11 = vshrl.u32 %v4978_v8, 16  ;;  %v5046_v13 = vshll.u32 %v4978_v8, 16  ;;  %v5066_v40 = vshll.u32 %v8463_v55, 16 }
 0x98c   : > { %6540 = vmatmul.mubr.msk.bf16.gmra.mrb[12].mxu1 %vm503_vm1, %v5870_v54  ;;  %v5010_v54 = vshll.u32 %v8445_v2, 16  ;;  %v4994_v28 = vrot.slane %v4993_v4, 4  ;;  %v5045_v36 = vrot.slane %v5043_v11, 4  ;;  %v5048_v59 = vrot.slane %v5046_v13, 5  ;;  %v6943_v4 = vld [vmem:[%s8635_s12 + $0x100] sm:$0xff]  }
 0x98d   : > { %6548 = vmatpush3.bf16.msra.mxu1 %v6929_v10  ;;  %6551 = vmatprep.mubr.msk.bf16.mxu1 %vm503_vm1, %v5895_v53  ;;  %v5032_v10 = vshll.u32 %v4976_v18, 16  ;;  %v6938_v53 = vld [vmem:[#allocation3 + $0x30] ss:$8 sps:$4 sm:$0xff]   ;;  %v5076_v18 = vrot.slane %v5074_v47, 5  ;;  %v5068_v58 = vrot.slane %v5066_v40, 5  ;;  %v5091_v11 = vor.u32 %v5090_v37, %v5087_v7  ;;  %v6946_v47 = vld [vmem:[%s8635_s12 + $0x118] sm:$0xff]  }
 0x98e   : > { %6549 = vmatprep.subr.bf16.mxu1 %v6930_v31  ;;  %v5012_v34 = vrot.slane %v5010_v54, 5  ;;  %v4999_v51 = vsel %vm7549_vm12, %v4994_v28, %v4998_v6  ;;  %v5049_v30 = vor.u32 %v5048_v59, %v5045_v36  ;;  %v5228_v54 = vld [vmem:[#allocation3 + $0x10] sm:$0xe]  ;;  %v5254_v59 = vrot.slane %v8443_v49, 5  ;;  %v5230_v6 = vld [vmem:[#allocation3 + $0x20] sm:$0xe] }
 0x98f   : > { %v5034_v46 = vrot.slane %v5032_v10, 5  ;;  %v8483_v10 = vld [vmem:[#allocation3 + $0x44] sm:$0x1]  ;;  %v5947_v36 = vrot.slane %v5228_v54, 9  ;;  %v5274_v37 = vrot.slane %v8463_v55, 5 }
 0x990   : > { %v5050_v8 = vrot.slane %v5049_v30, 4  ;;  %v5080_v29 = vshll.u32 %v8483_v10, 16 }
 0x991   : > { %6550 = vmatpush3.bf16.msra.mxu1 %v6930_v31  ;;  %v5017_v31 = vrot.slane %v5015_v19, 4  ;;  %v5035_v33 = vor.u32 %v5034_v46, %v5031_v41  ;;  %v5092_v41 = vrot.slane %v5091_v11, 4  ;;  %v5255_v49 = vsel %vm7645_vm15, %v5947_v36, %v5254_v59 }
 0x992   : > { %6559 = vmatprep.subr.bf16.mxu1 %v6931_v21  ;;  %v5082_v20 = vrot.slane %v5080_v29, 5  ;;  %v7018_v29 = vld [vmem:[%s7264_s21 + $0x8] sm:$0xff] }
 0x993   : > { %v5021_v39 = vor.u32 %v5020_v38, %v5017_v31  ;;  %v5036_v63 = vrot.slane %v5035_v33, 4  ;;  %v5229_v31 = vld [vmem:[#allocation3 + $0x18] sm:$0xe] }
 0x994   : > { %6552 = vmatmul.mubr.msk.bf16.vlgmr.msra.gmra.mrb[8].mxu1 %vm503_vm1, %v5896_v56  ;;  %v8457_v56 = vld [vmem:[#allocation3 + $0x24] sm:$0x1]  ;;  %v5233_v33 = vld [vmem:[#allocation3 + $0x38] sm:$0xe] }
 0x995   : > { %6560 = vmatpush3.bf16.msra.mxu1 %v6931_v21  ;;  %6555 = vmatprep.mubr.msk.bf16.mxu1 %vm503_vm1, %v5897_v32  ;;  %v5062_v21 = vrot.slane %v5060_v12, 5  ;;  %v8461_v32 = vld [vmem:[#allocation3 + $0x34] sm:$0x1]  ;;  %v5024_v57 = vshll.u32 %v8457_v56, 16  ;;  %v5077_v12 = vor.u32 %v5076_v18, %v5073_v1  ;;  %v5952_v7 = vrot.slane %v5233_v33, 9 }
 0x996   : > { %6561 = vmatprep.subr.bf16.mxu1 %v6932_v62  ;;  %v5052_v17 = vshll.u32 %v8461_v32, 16  ;;  %v5282_v1 = vrot.slane %v8478_v50, 5 }
 0x997   : > { %v5063_v61 = vor.u32 %v5062_v21, %v5059_v5  ;;  %v5948_v5 = vrot.slane %v5229_v31, 9  ;;  %v5258_v21 = vrot.slane %v8445_v2, 5 }
 0x998   : > { %v5054_v35 = vrot.slane %v5052_v17, 5 }
 0x999   : > { %6562 = vmatpush3.bf16.msra.mxu1 %v6932_v62  ;;  %v8459_v62 = vld [vmem:[#allocation3 + $0x2c] sm:$0x1]  ;;  %v5064_v23 = vrot.slane %v5063_v61, 4  ;;  %v5259_v2 = vsel %vm7645_vm15, %v5948_v5, %v5258_v21  ;;  %v7020_v5 = vld [vmem:[%s7264_s21 + $0x20] sm:$0xff] }
 0x99a   : > { %6563 = vmatprep.subr.bf16.mxu1 %v6933_v44  ;;  %v5038_v52 = vshll.u32 %v8459_v62, 16  ;;  %v5055_v14 = vsel %vm7549_vm12, %v5050_v8, %v5054_v35  ;;  %v5963_v27 = vcombine.low %v5255_v49, %v5259_v2  ;;  %v5266_v61 = vrot.slane %v8459_v62, 5 }
 0x99c   : > { %6556 = vmatmul.mubr.msk.bf16.gmra.mrb[12].mxu1 %vm503_vm1, %v5898_v9  ;;  %v6941_v9 = vld [vmem:[#allocation3 + $0x40] ss:$8 sps:$4 sm:$0xff]   ;;  %v5040_v19 = vrot.slane %v5038_v52, 5  ;;  %v5270_v52 = vrot.slane %v8461_v32, 5  ;;  %v5275_v32 = vsel %vm7645_vm15, %v5952_v7, %v5274_v37 }
 0x99d   : > { %6564 = vmatpush3.bf16.msra.mxu1 %v6933_v44  ;;  %6567 = vmatprep.mubr.msk.bf16.mxu1 %vm503_vm1, %v6934_v0  ;;  %v5013_v44 = vsel %vm7549_vm12, %v5008_v45, %v5012_v34  ;;  %v6942_v0 = vld [vmem:[%s8635_s12 + $0xf8] sm:$0xff]   ;;  %v5078_v45 = vrot.slane %v5077_v12, 4 }
 0x99e   : > { %6565 = vmatprep.subr.bf16.mxu1 %v6935_v42  ;;  %v5935_v26 = vcombine.low %v4999_v51, %v5013_v44  ;;  %v5041_v60 = vsel %vm7549_vm12, %v5036_v63, %v5040_v19  ;;  %v5231_v34 = vld [vmem:[#allocation3 + $0x28] sm:$0xe]  ;;  %v5949_v51 = vrot.slane %v5230_v6, 9  ;;  %v5262_v44 = vrot.slane %v8457_v56, 5 }
 0x99f   : > { %v5083_v22 = vsel %vm7549_vm12, %v5078_v45, %v5082_v20  ;;  %v5950_v30 = vrot.slane %v5231_v34, 9  ;;  %v5278_v63 = vrot.slane %v8483_v10, 5 }
 0x9a1   : > { %6566 = vmatpush3.bf16.msra.mxu1 %v6935_v42  ;;  %v5022_v42 = vrot.slane %v5021_v39, 4  ;;  %v5232_v39 = vld [vmem:[#allocation3 + $0x30] sm:$0xe]  ;;  %v5267_v56 = vsel %vm7645_vm15, %v5950_v30, %v5266_v61 }
 0x9a2   : > { %6575 = vmatprep.subr.bf16.mxu1 %v6936_v48 }
 0x9a4   : > { %6568 = vmatmul.mubr.msk.bf16.vlgmr.msra.gmra.mrb[8].mxu1 %vm503_vm1, %v6937_v16  ;;  %v5069_v16 = vsel %vm7549_vm12, %v5064_v23, %v5068_v58 }
 0x9a5   : > { %6576 = vmatpush3.bf16.msra.mxu1 %v6936_v48  ;;  %6571 = vmatprep.mubr.msk.bf16.mxu1 %vm503_vm1, %v6938_v53  ;;  %v5026_v48 = vrot.slane %v5024_v57, 5  ;;  %v6944_v53 = vld [vmem:[%s8635_s12 + $0x108] sm:$0xff]   ;;  %v5937_v28 = vcombine.low %v5055_v14, %v5069_v16  ;;  %v5951_v57 = vrot.slane %v5232_v39, 9  ;;  %v7017_v14 = vld [vmem:[%s7264_s21 + $0x18] sm:$0xff] }
 0x9a6   : > { %6577 = vmatprep.subr.bf16.mxu1 %v6939_v24 }
 0x9a7   : > { %v5027_v13 = vsel %vm7549_vm12, %v5022_v42, %v5026_v48  ;;  %v5271_v62 = vsel %vm7645_vm15, %v5951_v57, %v5270_v52  ;;  %v5234_v42 = vld [vmem:[#allocation3 + $0x40] sm:$0xe]  ;;  %v5975_v48 = vld [vmem:[%s8636_s13] ss:$0 sm:$0xff] }
 0x9a8   : > { %v5936_v38 = vcombine.low %v5027_v13, %v5041_v60  ;;  %v5965_v40 = vcombine.low %v5271_v62, %v5275_v32  ;;  %v7016_v60 = vld [vmem:[%s7264_s21] sm:$0xff] }
 0x9a9   : > { %6578 = vmatpush3.bf16.msra.mxu1 %v6939_v24  ;;  %v5094_v24 = vshll.u32 %v8478_v50, 16 }
 0x9aa   : > { %6579 = vmatprep.subr.bf16.mxu1 %v6940_v43 }
 0x9ab   : > { %v5096_v46 = vrot.slane %v5094_v24, 5 }
 0x9ac   : > { %6572 = vmatmul.mubr.msk.bf16.gmra.mrb[12].mxu1 %vm503_vm1, %v6941_v9  ;;  %v5263_v9 = vsel %vm7645_vm15, %v5949_v51, %v5262_v44 }
 0x9ad   : > { %6580 = vmatpush3.bf16.msra.mxu1 %v6940_v43  ;;  %6583 = vmatprep.mubr.msk.bf16.mxu1 %vm503_vm1, %v5935_v26  ;;  %v6945_v43 = vld [vmem:[%s8635_s12 + $0x110] sm:$0xff]   ;;  %v5097_v3 = vsel %vm7549_vm12, %v5092_v41, %v5096_v46  ;;  %v5964_v55 = vcombine.low %v5263_v9, %v5267_v56  ;;  %v5953_v26 = vrot.slane %v5234_v42, 9 }
 0x9ae   : > { %6581 = vmatprep.subr.bf16.mxu1 %v6942_v0  ;;  %v5938_v15 = vcombine.low %v5083_v22, %v5097_v3  ;;  %v7019_v41 = vld [vmem:[%s7264_s21 + $0x30] sm:$0xff]  ;;  %v7022_v3 = vld [vmem:[%s7264_s21 + $0x28] sm:$0xff] }
 0x9af   : > { %v5279_v18 = vsel %vm7645_vm15, %v5953_v26, %v5278_v63 }
 0x9b1   : > { %6582 = vmatpush3.bf16.msra.mxu1 %v6942_v0  ;;  %v5235_v0 = vld [vmem:[#allocation3 + $0x48] sm:$0xe] }
 0x9b2   : > { %6591 = vmatprep.subr.bf16.mxu1 %v6943_v4  ;;  %v5954_v17 = vrot.slane %v5235_v0, 9 }
 0x9b4   : > { %6584 = vmatmul.mubr.msk.bf16.vlgmr.msra.gmra.mrb[8].mxu1 %vm503_vm1, %v5936_v38  ;;  %v5283_v8 = vsel %vm7645_vm15, %v5954_v17, %v5282_v1 }
 0x9b5   : > { %6592 = vmatpush3.bf16.msra.mxu1 %v6943_v4  ;;  %6587 = vmatprep.mubr.msk.bf16.mxu1 %vm503_vm1, %v5937_v28  ;;  %v5966_v23 = vcombine.low %v5279_v18, %v5283_v8 }
 0x9b6   : > { %6593 = vmatprep.subr.bf16.mxu1 %v6944_v53 }
 0x9b9   : > { %6594 = vmatpush3.bf16.msra.mxu1 %v6944_v53 }
 0x9ba   : > { %6595 = vmatprep.subr.bf16.mxu1 %v6945_v43 }
 0x9bc   : > { %6588 = vmatmul.mubr.msk.bf16.gmra.mrb[12].mxu1 %vm503_vm1, %v5938_v15 }
 0x9bd   : > { %6596 = vmatpush3.bf16.msra.mxu1 %v6945_v43  ;;  %6599 = vmatprep.mubr.msk.bf16.mxu1 %vm503_vm1, %v5963_v27  ;;  %v7021_v43 = vld [vmem:[%s7264_s21 + $0x38] sm:$0xff] }
 0x9be   : > { %6597 = vmatprep.subr.bf16.mxu1 %v6946_v47 }
 0x9c1   : > { %6598 = vmatpush3.bf16.msra.mxu1 %v6946_v47 }
 0x9c4   : > { %6600 = vmatmul.mubr.msk.bf16.vlgmr.msra.gmra.mrb[8].mxu1 %vm503_vm1, %v5964_v55 }
 0x9c5   : > { %6603 = vmatprep.mubr.msk.bf16.mxu1 %vm503_vm1, %v5965_v40 }
 0x9cc   : > { %6604 = vmatmul.mubr.msk.bf16.gmra.mrb[12].mxu1 %vm503_vm1, %v5966_v23 }
 0xa97   : > { %v6601_v19 = vpop.f32.mrb[8].mxu1 }
 0xa98   : > { %v5423_v50 = vadd.f32 %v6601_v19, %v5975_v48  ;;  %v5375_v4 = vpop.f32.mrb[9].mxu1 }
 0xa99   : > { %v5421_v35 = vadd.f32 %v5975_v48, %v5375_v4  ;;  %v6602_v58 = vpop.f32.mrb[10].mxu1 }
 0xa9a   : > { %v5431_v10 = vadd.f32 %v7015_v25, %v5423_v50  ;;  %v5424_v11 = vadd.f32 %v6602_v58, %v5975_v48  ;;  %v5378_v13 = vpop.f32.mrb[11].mxu1 }
 0xa9b   : > { %v5429_v12 = vadd.f32 %v7016_v60, %v5421_v35  ;;  %v5422_v24 = vadd.f32 %v5975_v48, %v5378_v13 }
 0xa9c   : > { %5439 = vst.msk [vmem:[%s8547_s19 + $0x10] sm:$0xff] %vm503_vm1, %v5431_v10  ;;  %v5432_v16 = vadd.f32 %v7017_v14, %v5424_v11 }
 0xa9d   : > { %5437 = vst.msk [vmem:[%s8547_s19] sm:$0xff] %vm503_vm1, %v5429_v12  ;;  %v5430_v54 = vadd.f32 %v7018_v29, %v5422_v24 }
 0xa9e   : > { %5440 = vst.msk [vmem:[%s8547_s19 + $0x18] sm:$0xff] %vm503_vm1, %v5432_v16 }
 0xa9f   : > { %5438 = vst.msk [vmem:[%s8547_s19 + $0x8] sm:$0xff] %vm503_vm1, %v5430_v54  ;;  %v6605_v31 = vpop.f32.mrb[12].mxu1 }
 0xaa0   : > { %v5427_v38 = vadd.f32 %v6605_v31, %v5975_v48  ;;  %v5391_v53 = vpop.f32.mrb[13].mxu1 }
 0xaa1   : > { %v5425_v28 = vadd.f32 %v5975_v48, %v5391_v53  ;;  %v6606_v45 = vpop.f32.mrb[14].mxu1 }
 0xaa2   : > { %v5435_v46 = vadd.f32 %v7019_v41, %v5427_v38  ;;  %v5428_v36 = vadd.f32 %v6606_v45, %v5975_v48  ;;  %v5394_v59 = vpop.f32.mrb[15].mxu1 }
 0xaa3   : > { %v5433_v21 = vadd.f32 %v7020_v5, %v5425_v28  ;;  %v5426_v20 = vadd.f32 %v5975_v48, %v5394_v59 }
 0xaa4   : > { %5443 = vst.msk [vmem:[%s8547_s19 + $0x30] sm:$0xff] %vm503_vm1, %v5435_v46  ;;  %v5436_v22 = vadd.f32 %v7021_v43, %v5428_v36 }
 0xaa5   : > { %5441 = vst.msk [vmem:[%s8547_s19 + $0x20] sm:$0xff] %vm503_vm1, %v5433_v21  ;;  %v5434_v6 = vadd.f32 %v7022_v3, %v5426_v20 }
 0xaa6   : > { %5444 = vst.msk [vmem:[%s8547_s19 + $0x38] sm:$0xff] %vm503_vm1, %v5436_v22 }
 0xaa7   : > { %5442 = vst.msk [vmem:[%s8547_s19 + $0x28] sm:$0xff] %vm503_vm1, %v5434_v6 }
 0xaa8   : > { %7036 = shalt.err (!%p7033_p3)
}
 0xaa9   : > { %s7037_s21 = scalar_lea.hbm %s8569_s17, 1024  ;;  %s7041_s25 = scalar_lea.hbm %s8637_s14, 2048 }
 0xaaa   : > { %p7038_p4 = scmp.ne.s32.totalorder %s8569_s17, %s7037_s21  ;;  %p7042_p9 = scmp.lt.u32.totalorder %s8569_s17, %s8637_s14 }
 0xaab   : > { %p7043_p10 = scmp.lt.u32.totalorder %s7041_s25, %s7037_s21  ;;  %p7045_p12 = scmp.lt.u32.totalorder %s7037_s21, %s8569_s17 }
 0xaac   : > { %p7039_p7 = pnand %p7038_p4, %p7207_p5 }
 0xaad   : > { %p7044_p11 = por %p7043_p10, %p7042_p9 }
 0xaae   : > { %p7040_p8 = pneg %p7039_p7 }
 0xaaf   : > { %p7046_p13 = por %p7045_p12, %p7044_p11 }
 0xab1   : > { %p7047_p0 = pnand %p7046_p13, %p7040_p8 }
 0xab3   : > { %7050 = shalt.err (!%p7047_p0)
}
 0xab4   : > { %s7092_s0 = smov 128   ;;  %s7093_s18 = smov 8  }
 0xab5   : > { %6807 = dma.vmem_to_hbm [thread:$0]  (%p7207_p5), %s8571_s26, 1024, %s8569_s17, %s8582_s28, %s7092_s0, %s7092_s0, %s7093_s18  }
 0xab6 PF: > { %p6813_p1 = scmp.ge.s32.totalorder %s7085_s16, 2  ;;  %s5474_s20 = sand.u32 1, %s7073_s29  }
 0xab7   : > { %s5475_s15 = scalar_lea.sflag [#allocation5], %s5474_s20 }
 0xab8   : > { %p6810_p2 = pnand %p6813_p1, %p7211_p6 }
 0xaba   : > { %7068 = dma.done.wait (!%p6810_p2), %s5475_s15, 1024  }
 0xabb   : > { %7070 = vsyncadd (!%p6810_p2), %s5475_s15, 4294966272  ;;  %s8660_s16 = sld [smem:[#allocation8_spill]]  ;;  %s8661_s21 = sld [smem:[#allocation7_spill]] }
 0xabc   : > { %s8662_s15 = sld [smem:[#allocation9_spill]]  ;;  %s8663_s29 = smov %s7077_s30 }
 0xac1   : > { %p24_p3 = scmp.ge.s32.totalorder %s8660_s16, 4   ;;  %s8664_s30 = smov %s8661_s21 }
 0xac3   :  { %26 = sbr.rel (!%p24_p3) target bundleno = 6 (0x6), region = 136 }
 0xaca   :  { %5480 = vsyncpa [#allocation5], 1 }
 0xacb   :  { %5482 = vsyncpa [#allocation5 + $0x1], 1 }

</bundles_post_ra>
